<compile_context>
chip_gen: v7x
topology: tpu7x:2x2x1
jax: 0.10.0
libtpu: 0.0.40
codegen_flags: <defaults>
</compile_context>

<pallas_src>
import functools

import jax
import jax.numpy as jnp
from jax.experimental import pallas as pl
from jax.experimental.pallas import tpu as pltpu


# ---------------------------------------------------------------------------
# Small helpers
# ---------------------------------------------------------------------------

def _cdiv(a, b):
    return -(-a // b)


def _round_up(v, m):
    return _cdiv(v, m) * m


def _pick_tm(M):
    """Row-tile size.

    Small M: one full-extent block (splitting 16-200 row matmuls only adds
    pipeline steps).  M >= 512: >=256-row tiles so each v7x TensorCore gets at
    least a full 256-row MXU pass per grid step."""
    if M < 512:
        return M
    Mr = _round_up(M, 16)
    return 256 if Mr < 1024 else 512


# ---------------------------------------------------------------------------
# Capability probe: single-buffered constant blocks (pipeline_mode=Buffered(1))
# ---------------------------------------------------------------------------

def _copy_probe_kernel(x_ref, o_ref):
    o_ref[...] = x_ref[...]


def _supports_buffered():
    try:
        spec = pl.BlockSpec((8, 128), lambda i: (0, 0),
                            pipeline_mode=pl.Buffered(1))
        fn = pl.pallas_call(
            _copy_probe_kernel,
            out_shape=jax.ShapeDtypeStruct((8, 128), jnp.float32),
            grid=(1,),
            in_specs=[spec],
            out_specs=pl.BlockSpec((8, 128), lambda i: (0, 0)),
        )
        jax.block_until_ready(fn(jnp.zeros((8, 128), jnp.float32)))
        return True
    except Exception:
        return False


_HAS_BUFFERED = _supports_buffered()


def _const_spec(shape):
    """BlockSpec for blocks that are identical every grid step (weights,
    scale/shift vectors): single-buffer them when the API supports it."""
    idx = lambda i: (0,) * len(shape)
    if _HAS_BUFFERED:
        return pl.BlockSpec(shape, idx, pipeline_mode=pl.Buffered(1))
    return pl.BlockSpec(shape, idx)


# ---------------------------------------------------------------------------
# Pallas kernels
# ---------------------------------------------------------------------------

def _mm_bn_act_kernel(a_ref, w_ref, s_ref, t_ref, o_ref, *, act):
    """out = act((A @ W) * scale + shift); A/W bf16, f32 MXU accumulation."""
    y = jnp.dot(a_ref[...], w_ref[...], preferred_element_type=jnp.float32)
    y = y * s_ref[...] + t_ref[...]
    if act == "relu":
        y = jnp.maximum(y, 0.0)
    o_ref[...] = y.astype(o_ref.dtype)


def _mm_bn_head_kernel(a_ref, w_ref, s_ref, t_ref, m_ref, o_ref):
    """Fused grasp/confidence head: tanh where mask==1, sigmoid where mask==0.

    A single tanh serves both activations (sigmoid(y) = 0.5*(tanh(y/2)+1)),
    halving EUP transcendental pushes."""
    y = jnp.dot(a_ref[...], w_ref[...], preferred_element_type=jnp.float32)
    y = y * s_ref[...] + t_ref[...]
    m = m_ref[...]
    z = jnp.where(m > 0.5, y, 0.5 * y)
    th = jnp.tanh(z)
    o_ref[...] = jnp.where(m > 0.5, th, 0.5 * (th + 1.0)).astype(o_ref.dtype)


def _maxpool_kernel(p_ref, o_ref):
    """p: (K*K, TR, 128) window taps -> elementwise max over the leading axis."""
    m = p_ref[0]
    for i in range(1, p_ref.shape[0]):
        m = jnp.maximum(m, p_ref[i])
    o_ref[...] = m


# ---------------------------------------------------------------------------
# Fused matmul wrapper (M-tiled; weights arrive pre-packed from prepare_params)
# ---------------------------------------------------------------------------

def matmul_bn_act(a, w, scale, shift, act, mask=None, out_dtype=jnp.bfloat16):
    M, K = a.shape
    Kw, N = w.shape
    assert K == Kw, (K, Kw)

    TM = _pick_tm(M)
    grid_m = _cdiv(M, TM)

    in_specs = [
        pl.BlockSpec((TM, K), lambda i: (i, 0)),
        _const_spec((K, N)),
        _const_spec((1, N)),
        _const_spec((1, N)),
    ]
    inputs = [a, w, scale, shift]
    if act == "head":
        in_specs.append(_const_spec((1, N)))
        inputs.append(mask)
        kernel = _mm_bn_head_kernel
    else:
        kernel = functools.partial(_mm_bn_act_kernel, act=act)

    # VMEM limit: actual footprint (+ margin), not a hard-coded 48 MiB clamp.
    out_bytes = jnp.dtype(out_dtype).itemsize
    n_lane = _round_up(N, 128)
    k_lane = _round_up(K, 128)
    footprint = (2 * TM * k_lane * 2                    # A tiles (double-buffered)
                 + 2 * _round_up(K, 16) * n_lane * 2    # W (worst case 2 bufs)
                 + 4 * 8 * n_lane * 4                   # scale/shift/mask vectors
                 + 2 * TM * n_lane * out_bytes)         # output tiles
    vmem_limit = int(max(int(footprint * 1.25), 8 << 20))

    return pl.pallas_call(
        kernel,
        out_shape=jax.ShapeDtypeStruct((M, N), out_dtype),
        grid=(grid_m,),
        in_specs=in_specs,
        out_specs=pl.BlockSpec((TM, N), lambda i: (i, 0)),
        compiler_params=pltpu.CompilerParams(
            dimension_semantics=("parallel",),
            vmem_limit_bytes=vmem_limit),
    )(*inputs)


# ---------------------------------------------------------------------------
# Layer glue (im2col / phase decomposition = data movement in JAX)
# ---------------------------------------------------------------------------

def _im2col(x, KH, KW, stride, pad):
    # x: (N, H, W, C) -> patches (N*OH*OW, KH*KW*C)
    N, H, W, C = x.shape
    xp = jnp.pad(x, ((0, 0), (pad, pad), (pad, pad), (0, 0)))
    OH = (H + 2 * pad - KH) // stride + 1
    OW = (W + 2 * pad - KW) // stride + 1
    cols = []
    for kh in range(KH):
        for kw in range(KW):
            cols.append(xp[:, kh:kh + (OH - 1) * stride + 1:stride,
                           kw:kw + (OW - 1) * stride + 1:stride, :])
    patches = jnp.stack(cols, axis=3)                   # (N, OH, OW, KH*KW, C)
    return patches.reshape(N * OH * OW, KH * KW * C), N, OH, OW


def conv2d(x, layer, KH, KW, stride=1, pad=0, act="relu",
           out_dtype=jnp.bfloat16):
    patches, N, OH, OW = _im2col(x, KH, KW, stride, pad)
    y = matmul_bn_act(patches, layer["w"], layer["s"], layer["t"], act,
                      out_dtype=out_dtype)
    Cout = layer["w"].shape[1]
    return y.reshape(N, OH, OW, Cout)


def _phase_info(K, s, p):
    """Sub-pixel decomposition geometry for one spatial dim of a ConvTranspose."""
    lo = K - 1 - p
    phases = []
    for r in range(s):
        c = (lo - r) % s                 # first kernel tap for this phase
        ntap = len(range(c, K, s))       # taps: c, c+s, ...
        d = (r + c - lo) // s            # input offset (exact division)
        phases.append((c, ntap, d))
    d_min = min(d for _, _, d in phases)
    L = max(d - d_min + n for _, n, d in phases)   # common window length
    return phases, d_min, L


def conv_transpose2d(x, layer, K, stride, pad=0, out_pad=0, act="relu",
                     out_dtype=jnp.bfloat16):
    """ConvTranspose2d via sub-pixel decomposition: one shared im2col + one matmul."""
    Nb, H, W, Cin = x.shape
    s = stride
    OH = (H - 1) * s - 2 * pad + K + out_pad
    OW = (W - 1) * s - 2 * pad + K + out_pad

    phases, d_min, L = _phase_info(K, s, pad)
    Qh, Qw = _cdiv(OH, s), _cdiv(OW, s)
    pad_lo = max(0, -d_min)
    pad_hi_h = max(0, (Qh - 1) + d_min + L - H)
    pad_hi_w = max(0, (Qw - 1) + d_min + L - W)
    xp = jnp.pad(x, ((0, 0), (pad_lo, pad_hi_h), (pad_lo, pad_hi_w), (0, 0)))
    s0 = d_min + pad_lo                             # window start offset (>=0)

    # One im2col shared by all s*s output phases (window L x L, stride 1).
    cols = []
    for th in range(L):
        for tw in range(L):
            cols.append(xp[:, s0 + th:s0 + th + Qh, s0 + tw:s0 + tw + Qw, :])
    patches = jnp.stack(cols, axis=3).reshape(Nb * Qh * Qw, L * L * Cin)

    Cout = layer["w"].shape[1] // (s * s)
    y = matmul_bn_act(patches, layer["w"], layer["s"], layer["t"], act,
                      mask=layer.get("m"), out_dtype=out_dtype)
    y = y.reshape(Nb, Qh, Qw, s, s, Cout)
    y = jnp.transpose(y, (0, 1, 3, 2, 4, 5)).reshape(Nb, Qh * s, Qw * s, Cout)
    return y[:, :OH, :OW, :]


def maxpool2d(x, ksize=3, stride=2):
    """3x3/2 max pool on lane-dense (R, 128) slabs, tiled with a grid."""
    N, H, W, C = x.shape
    OH = (H - ksize) // stride + 1
    OW = (W - ksize) // stride + 1
    M = N * OH * OW
    taps = []
    for kh in range(ksize):
        for kw in range(ksize):
            taps.append(x[:, kh:kh + (OH - 1) * stride + 1:stride,
                          kw:kw + (OW - 1) * stride + 1:stride, :].reshape(M * C))
    p = jnp.stack(taps, axis=0)                     # (K*K, M*C)
    Ltot = M * C
    Lp = _round_up(Ltot, 16 * 128)                  # lane-dense (sublane,lane) tiles
    if Lp != Ltot:
        p = jnp.pad(p, ((0, 0), (0, Lp - Ltot)))
    R = Lp // 128
    p = p.reshape(ksize * ksize, R, 128)
    TR = min(R, 1024)
    grid = _cdiv(R, TR)

    out = pl.pallas_call(
        _maxpool_kernel,
        out_shape=jax.ShapeDtypeStruct((R, 128), x.dtype),
        grid=(grid,),
        in_specs=[pl.BlockSpec((ksize * ksize, TR, 128), lambda i: (0, i, 0))],
        out_specs=pl.BlockSpec((TR, 128), lambda i: (i, 0)),
        compiler_params=pltpu.CompilerParams(
            dimension_semantics=("parallel",)),
    )(p)
    return out.reshape(Lp)[:Ltot].reshape(N, OH, OW, C)


# ---------------------------------------------------------------------------
# Parameters (deterministic synthetic init) + one-time weight preprocessing
# ---------------------------------------------------------------------------

def init_params(key):
    keys = jax.random.split(key, 32)
    it = iter(keys)

    def wconv(shape):
        fan_in = shape[1] * shape[2] * shape[3]
        return jax.random.normal(next(it), shape, jnp.float32) / jnp.sqrt(fan_in)

    def wconvt(shape):
        fan_in = shape[0] * shape[2] * shape[3]
        return jax.random.normal(next(it), shape, jnp.float32) / jnp.sqrt(fan_in)

    def vec(n, s=0.1):
        return s * jax.random.normal(next(it), (n,), jnp.float32)

    p = {}
    # shared AlexNet backbone (rgb_features aliases d_features in PyTorch)
    p["a_c1_w"] = wconv((64, 3, 11, 11));   p["a_c1_b"] = vec(64)
    p["a_c2_w"] = wconv((192, 64, 5, 5));   p["a_c2_b"] = vec(192)
    # features
    p["f_c1_w"] = wconv((128, 384, 3, 3));  p["f_c1_b"] = vec(128)
    p["bn1_g"] = 1.0 + vec(128);            p["bn1_b"] = vec(128)
    p["f_c2_w"] = wconv((128, 128, 3, 3));  p["f_c2_b"] = vec(128)
    p["bn2_g"] = 1.0 + vec(128);            p["bn2_b"] = vec(128)
    p["bn1_rm"] = jnp.zeros((128,), jnp.float32)
    p["bn1_rv"] = jnp.ones((128,), jnp.float32)
    p["bn2_rm"] = jnp.zeros((128,), jnp.float32)
    p["bn2_rv"] = jnp.ones((128,), jnp.float32)
    p["f_t1_w"] = wconvt((128, 64, 3, 3));  p["f_t1_b"] = vec(64)
    p["f_c3_w"] = wconv((64, 64, 5, 5));    p["f_c3_b"] = vec(64)
    p["f_t2_w"] = wconvt((64, 32, 3, 3));   p["f_t2_b"] = vec(32)
    # heads
    p["g_w"] = wconvt((32, 5, 11, 11));     p["g_b"] = vec(5)
    p["c_w"] = wconvt((32, 1, 11, 11));     p["c_b"] = vec(1)
    return p


def _prep_conv(w, b, bn=None, eps=1e-5):
    """Conv2d weight (Cout,Cin,KH,KW) -> matmul layout (KH*KW*Cin, Cout) bf16,
    with conv bias (and optional inference-mode BN) folded into scale/shift."""
    Cout, Cin, KH, KW = w.shape
    wm = jnp.transpose(w, (2, 3, 1, 0)).reshape(KH * KW * Cin, Cout)
    if bn is None:
        sc = jnp.ones((Cout,), jnp.float32)
        sh = b.astype(jnp.float32)
    else:
        g, beta, rm, rv = bn
        sc = g / jnp.sqrt(rv + eps)
        sh = (b - rm) * sc + beta
    return {"w": wm.astype(jnp.bfloat16),
            "s": sc.reshape(1, -1).astype(jnp.float32),
            "t": sh.reshape(1, -1).astype(jnp.float32)}


def _prep_convt(w, b, stride, pad):
    """ConvTranspose2d weight (Cin,Cout,KH,KW) -> phase-decomposed matmul
    layout (L*L*Cin, s*s*Cout) bf16, bias tiled per phase."""
    Cin, Cout, KH, KW = w.shape
    assert KH == KW
    s = stride
    phases, d_min, L = _phase_info(KH, s, pad)
    w_f = jnp.flip(w, axis=(2, 3))
    blocks = []
    for rh in range(s):
        ch, _, dh = phases[rh]
        for rw in range(s):
            cw, _, dw = phases[rw]
            wk = w_f[:, :, ch::s, cw::s]            # (Cin, Cout, Th, Tw)
            wc = jnp.zeros((Cin, Cout, L, L), w.dtype)
            oh0, ow0 = dh - d_min, dw - d_min
            wc = wc.at[:, :, oh0:oh0 + wk.shape[2],
                       ow0:ow0 + wk.shape[3]].set(wk)
            blocks.append(jnp.transpose(wc, (2, 3, 0, 1)).reshape(L * L * Cin, Cout))
    w_big = jnp.concatenate(blocks, axis=1)         # (L*L*Cin, s*s*Cout)
    return {"w": w_big.astype(jnp.bfloat16),
            "s": jnp.ones((1, s * s * Cout), jnp.float32),
            "t": jnp.tile(b.astype(jnp.float32), s * s).reshape(1, -1)}


def prepare_params(p):
    """One-time weight preprocessing, hoisted OUT of the jitted forward."""
    q = {}
    q["a_c1"] = _prep_conv(p["a_c1_w"], p["a_c1_b"])
    q["a_c2"] = _prep_conv(p["a_c2_w"], p["a_c2_b"])
    q["f_c1"] = _prep_conv(p["f_c1_w"], p["f_c1_b"],
                           bn=(p["bn1_g"], p["bn1_b"], p["bn1_rm"], p["bn1_rv"]))
    q["f_c2"] = _prep_conv(p["f_c2_w"], p["f_c2_b"],
                           bn=(p["bn2_g"], p["bn2_b"], p["bn2_rm"], p["bn2_rv"]))
    q["f_t1"] = _prep_convt(p["f_t1_w"], p["f_t1_b"], stride=2, pad=0)
    q["f_c3"] = _prep_conv(p["f_c3_w"], p["f_c3_b"])
    q["f_t2"] = _prep_convt(p["f_t2_w"], p["f_t2_b"], stride=2, pad=1)
    # fused grasp (tanh, ch 0-4) + confidence (sigmoid, ch 5) head
    head_w = jnp.concatenate([p["g_w"], p["c_w"]], axis=1)   # (32, 6, 11, 11)
    head_b = jnp.concatenate([p["g_b"], p["c_b"]], axis=0)   # (6,)
    head = _prep_convt(head_w, head_b, stride=4, pad=0)
    head["m"] = jnp.tile((jnp.arange(6) < 5).astype(jnp.float32),
                         16).reshape(1, -1)                  # 4*4 phases * 6 ch
    q["head"] = head
    return jax.tree_util.tree_map(jax.block_until_ready, q)


# ---------------------------------------------------------------------------
# Forward pass (jitted; takes pre-packed params)
# ---------------------------------------------------------------------------

def alexnet_map_forward(x, q):
    # x: (N, 4, H, W) NCHW float32
    x = x.astype(jnp.bfloat16)
    Nb = x.shape[0]
    rgb = x[:, :3, :, :]
    d = x[:, 3:4, :, :]
    d = jnp.concatenate([d, d, d], axis=1)

    # Shared-weight backbone run ONCE on the batched [rgb; d] stack (alexnet.features[:6]).
    t = jnp.concatenate([rgb, d], axis=0)            # (2N, 3, H, W)
    t = jnp.transpose(t, (0, 2, 3, 1))               # NHWC
    t = conv2d(t, q["a_c1"], 11, 11, stride=4, pad=2, act="relu")
    t = maxpool2d(t, 3, 2)
    t = conv2d(t, q["a_c2"], 5, 5, stride=1, pad=2, act="relu")
    t = maxpool2d(t, 3, 2)
    h = jnp.concatenate([t[:Nb], t[Nb:]], axis=-1)   # (N, h, w, 384): [rgb | d]

    # features (BN folded into conv scale/shift at prepare_params time)
    # TODO(synk): f_c1 -> f_c2 -> f_t1 could be fused into one pallas_call with
    # VMEM-resident activations; kept as separate calls for clarity.
    h = conv2d(h, q["f_c1"], 3, 3, stride=1, pad=1, act="relu")
    h = conv2d(h, q["f_c2"], 3, 3, stride=1, pad=1, act="relu")
    h = conv_transpose2d(h, q["f_t1"], 3, stride=2, pad=0, out_pad=0, act="relu")
    h = conv2d(h, q["f_c3"], 5, 5, stride=1, pad=2, act="relu")
    h = conv_transpose2d(h, q["f_t2"], 3, stride=2, pad=1, out_pad=1, act="relu")

    # fused grasp/confidence head (tanh ch 0-4, sigmoid ch 5), f32 output
    out = conv_transpose2d(h, q["head"], 11, stride=4, pad=0, out_pad=1,
                           act="head", out_dtype=jnp.float32)
    return jnp.transpose(out, (0, 3, 1, 2))          # back to NCHW


if __name__ == "__main__":
    key = jax.random.PRNGKey(0)
    pkey, xkey = jax.random.split(key)
    params = init_params(pkey)
    prepped = prepare_params(params)     # one-time weight prep, outside jit
    # 64x64 input -> 64x64 output (same spatial contract as 224 in PyTorch;
    # smaller inputs do not survive the stride-4 conv + two 3x3/2 maxpools).
    x = jax.random.normal(xkey, (2, 4, 64, 64), jnp.float32)
    fwd = jax.jit(alexnet_map_forward)
    out = jax.block_until_ready(fwd(x, prepped))
    assert out.shape == (2, 6, 64, 64), out.shape
    assert bool(jnp.all(jnp.isfinite(out)))
    print("KERNEL_OK")
</pallas_src>

<mosaic_0001>
module attributes {stable_mosaic.version = 11 : i64} {
  func.func @_copy_probe_kernel(%arg0: i32, %arg1: memref<8x128xf32, #tpu.memory_space<vmem>>, %arg2: memref<8x128xf32, #tpu.memory_space<vmem>>) attributes {dimension_semantics = [#tpu.dimension_semantics<arbitrary>], iteration_bounds = array<i64: 1>, scalar_prefetch = 0 : i64, scratch_operands = 0 : i64, tpu.core_type = #tpu.core_type<tc>, window_params = [{pipeline_mode = #tpu.pipeline_mode<synchronous>, transform_indices = @transform_0, window_bounds = array<i64: 8, 128>}, {pipeline_mode = #tpu.pipeline_mode<synchronous>, transform_indices = @transform_1, window_bounds = array<i64: 8, 128>}]} {
    %c0 = arith.constant 0 : index
    %c0_0 = arith.constant 0 : index
    %0 = vector.load %arg1[%c0, %c0_0] : memref<8x128xf32, #tpu.memory_space<vmem>>, vector<8x128xf32>
    %c0_1 = arith.constant 0 : index
    %c0_2 = arith.constant 0 : index
    %1 = vector.load %arg2[%c0_1, %c0_2] : memref<8x128xf32, #tpu.memory_space<vmem>>, vector<8x128xf32>
    tpu.vector_store %arg2[%c0_1, %c0_2], %0 {strides = array<i32>} : memref<8x128xf32, #tpu.memory_space<vmem>>, vector<8x128xf32>,
    return
  }
  func.func @transform_0(%arg0: i32) -> (i32, i32) {
    %c0_i32 = arith.constant 0 : i32
    %c0_i32_0 = arith.constant 0 : i32
    %c0_i32_1 = arith.constant 0 : i32
    return %c0_i32, %c0_i32_0 : i32, i32
  }
  func.func @transform_1(%arg0: i32) -> (i32, i32) {
    %c0_i32 = arith.constant 0 : i32
    %c0_i32_0 = arith.constant 0 : i32
    %c0_i32_1 = arith.constant 0 : i32
    return %c0_i32, %c0_i32_0 : i32, i32
  }
}

module attributes {stable_mosaic.version = 11 : i64} {
  func.func @_mm_bn_act_kernel(%arg0: i32, %arg1: memref<256x363xbf16, #tpu.memory_space<vmem>>, %arg2: memref<363x64xbf16, #tpu.memory_space<vmem>>, %arg3: memref<1x64xf32, #tpu.memory_space<vmem>>, %arg4: memref<1x64xf32, #tpu.memory_space<vmem>>, %arg5: memref<256x64xbf16, #tpu.memory_space<vmem>>) attributes {dimension_semantics = [#tpu.dimension_semantics<parallel>], iteration_bounds = array<i64: 4>, scalar_prefetch = 0 : i64, scratch_operands = 0 : i64, tpu.core_type = #tpu.core_type<tc>, window_params = [{transform_indices = @transform_0, window_bounds = array<i64: 256, 363>}, {pipeline_mode = #tpu.pipeline_mode<synchronous>, transform_indices = @transform_1, window_bounds = array<i64: 363, 64>}, {pipeline_mode = #tpu.pipeline_mode<synchronous>, transform_indices = @transform_2, window_bounds = array<i64: 1, 64>}, {pipeline_mode = #tpu.pipeline_mode<synchronous>, transform_indices = @transform_3, window_bounds = array<i64: 1, 64>}, {transform_indices = @transform_4, window_bounds = array<i64: 256, 64>}]} {
    %c0 = arith.constant 0 : index
    %c0_0 = arith.constant 0 : index
    %0 = vector.load %arg1[%c0, %c0_0] : memref<256x363xbf16, #tpu.memory_space<vmem>>, vector<256x363xbf16>
    %c0_1 = arith.constant 0 : index
    %c0_2 = arith.constant 0 : index
    %1 = vector.load %arg2[%c0_1, %c0_2] : memref<363x64xbf16, #tpu.memory_space<vmem>>, vector<363x64xbf16>
    %cst = arith.constant dense<0.000000e+00> : vector<256x64xf32>
    %2 = tpu.matmul %0, %1, %cst {dimension_numbers = #tpu.dot_dimension_numbers<[1], [0], [0], [1], [0, 0, 1, 1], [], []>} : vector<256x363xbf16>, vector<363x64xbf16>, vector<256x64xf32> -> vector<256x64xf32>
    %c0_3 = arith.constant 0 : index
    %c0_4 = arith.constant 0 : index
    %3 = vector.load %arg3[%c0_3, %c0_4] : memref<1x64xf32, #tpu.memory_space<vmem>>, vector<1x64xf32>
    %4 = vector.broadcast %3 : vector<1x64xf32> to vector<256x64xf32>
    %5 = arith.mulf %2, %4 : vector<256x64xf32>
    %c0_5 = arith.constant 0 : index
    %c0_6 = arith.constant 0 : index
    %6 = vector.load %arg4[%c0_5, %c0_6] : memref<1x64xf32, #tpu.memory_space<vmem>>, vector<1x64xf32>
    %7 = vector.broadcast %6 : vector<1x64xf32> to vector<256x64xf32>
    %8 = arith.addf %5, %7 : vector<256x64xf32>
    %cst_7 = arith.constant 0.000000e+00 : f32
    %9 = vector.broadcast %cst_7 : f32 to vector<256x64xf32>
    %10 = arith.maximumf %8, %9 : vector<256x64xf32>
    %11 = arith.truncf %10 : vector<256x64xf32> to vector<256x64xbf16>
    %c0_8 = arith.constant 0 : index
    %c0_9 = arith.constant 0 : index
    %12 = vector.load %arg5[%c0_8, %c0_9] : memref<256x64xbf16, #tpu.memory_space<vmem>>, vector<256x64xbf16>
    tpu.vector_store %arg5[%c0_8, %c0_9], %11 {strides = array<i32>} : memref<256x64xbf16, #tpu.memory_space<vmem>>, vector<256x64xbf16>,
    return
  }
  func.func @transform_0(%arg0: i32) -> (i32, i32) {
    %c0_i32 = arith.constant 0 : i32
    %c0_i32_0 = arith.constant 0 : i32
    return %arg0, %c0_i32 : i32, i32
  }
  func.func @transform_1(%arg0: i32) -> (i32, i32) {
    %c0_i32 = arith.constant 0 : i32
    %c0_i32_0 = arith.constant 0 : i32
    %c0_i32_1 = arith.constant 0 : i32
    return %c0_i32, %c0_i32_0 : i32, i32
  }
  func.func @transform_2(%arg0: i32) -> (i32, i32) {
    %c0_i32 = arith.constant 0 : i32
    %c0_i32_0 = arith.constant 0 : i32
    %c0_i32_1 = arith.constant 0 : i32
    return %c0_i32, %c0_i32_0 : i32, i32
  }
  func.func @transform_3(%arg0: i32) -> (i32, i32) {
    %c0_i32 = arith.constant 0 : i32
    %c0_i32_0 = arith.constant 0 : i32
    %c0_i32_1 = arith.constant 0 : i32
    return %c0_i32, %c0_i32_0 : i32, i32
  }
  func.func @transform_4(%arg0: i32) -> (i32, i32) {
    %c0_i32 = arith.constant 0 : i32
    %c0_i32_0 = arith.constant 0 : i32
    return %arg0, %c0_i32 : i32, i32
  }
}

module attributes {stable_mosaic.version = 11 : i64} {
  func.func @_maxpool_kernel(%arg0: i32, %arg1: memref<9x112x128xbf16, #tpu.memory_space<vmem>>, %arg2: memref<112x128xbf16, #tpu.memory_space<vmem>>) attributes {dimension_semantics = [#tpu.dimension_semantics<parallel>], iteration_bounds = array<i64: 1>, scalar_prefetch = 0 : i64, scratch_operands = 0 : i64, tpu.core_type = #tpu.core_type<tc>, window_params = [{transform_indices = @transform_0, window_bounds = array<i64: 9, 112, 128>}, {transform_indices = @transform_1, window_bounds = array<i64: 112, 128>}]} {
    %c0 = arith.constant 0 : index
    %c0_0 = arith.constant 0 : index
    %c0_1 = arith.constant 0 : index
    %0 = vector.load %arg1[%c0, %c0_0, %c0_1] : memref<9x112x128xbf16, #tpu.memory_space<vmem>>, vector<1x112x128xbf16>
    %1 = vector.shape_cast %0 : vector<1x112x128xbf16> to vector<112x128xbf16>
    %c1 = arith.constant 1 : index
    %c0_2 = arith.constant 0 : index
    %c0_3 = arith.constant 0 : index
    %2 = vector.load %arg1[%c1, %c0_2, %c0_3] : memref<9x112x128xbf16, #tpu.memory_space<vmem>>, vector<1x112x128xbf16>
    %3 = vector.shape_cast %2 : vector<1x112x128xbf16> to vector<112x128xbf16>
    %4 = arith.maximumf %1, %3 : vector<112x128xbf16>
    %c2 = arith.constant 2 : index
    %c0_4 = arith.constant 0 : index
    %c0_5 = arith.constant 0 : index
    %5 = vector.load %arg1[%c2, %c0_4, %c0_5] : memref<9x112x128xbf16, #tpu.memory_space<vmem>>, vector<1x112x128xbf16>
    %6 = vector.shape_cast %5 : vector<1x112x128xbf16> to vector<112x128xbf16>
    %7 = arith.maximumf %4, %6 : vector<112x128xbf16>
    %c3 = arith.constant 3 : index
    %c0_6 = arith.constant 0 : index
    %c0_7 = arith.constant 0 : index
    %8 = vector.load %arg1[%c3, %c0_6, %c0_7] : memref<9x112x128xbf16, #tpu.memory_space<vmem>>, vector<1x112x128xbf16>
    %9 = vector.shape_cast %8 : vector<1x112x128xbf16> to vector<112x128xbf16>
    %10 = arith.maximumf %7, %9 : vector<112x128xbf16>
    %c4 = arith.constant 4 : index
    %c0_8 = arith.constant 0 : index
    %c0_9 = arith.constant 0 : index
    %11 = vector.load %arg1[%c4, %c0_8, %c0_9] : memref<9x112x128xbf16, #tpu.memory_space<vmem>>, vector<1x112x128xbf16>
    %12 = vector.shape_cast %11 : vector<1x112x128xbf16> to vector<112x128xbf16>
    %13 = arith.maximumf %10, %12 : vector<112x128xbf16>
    %c5 = arith.constant 5 : index
    %c0_10 = arith.constant 0 : index
    %c0_11 = arith.constant 0 : index
    %14 = vector.load %arg1[%c5, %c0_10, %c0_11] : memref<9x112x128xbf16, #tpu.memory_space<vmem>>, vector<1x112x128xbf16>
    %15 = vector.shape_cast %14 : vector<1x112x128xbf16> to vector<112x128xbf16>
    %16 = arith.maximumf %13, %15 : vector<112x128xbf16>
    %c6 = arith.constant 6 : index
    %c0_12 = arith.constant 0 : index
    %c0_13 = arith.constant 0 : index
    %17 = vector.load %arg1[%c6, %c0_12, %c0_13] : memref<9x112x128xbf16, #tpu.memory_space<vmem>>, vector<1x112x128xbf16>
    %18 = vector.shape_cast %17 : vector<1x112x128xbf16> to vector<112x128xbf16>
    %19 = arith.maximumf %16, %18 : vector<112x128xbf16>
    %c7 = arith.constant 7 : index
    %c0_14 = arith.constant 0 : index
    %c0_15 = arith.constant 0 : index
    %20 = vector.load %arg1[%c7, %c0_14, %c0_15] : memref<9x112x128xbf16, #tpu.memory_space<vmem>>, vector<1x112x128xbf16>
    %21 = vector.shape_cast %20 : vector<1x112x128xbf16> to vector<112x128xbf16>
    %22 = arith.maximumf %19, %21 : vector<112x128xbf16>
    %c8 = arith.constant 8 : index
    %c0_16 = arith.constant 0 : index
    %c0_17 = arith.constant 0 : index
    %23 = vector.load %arg1[%c8, %c0_16, %c0_17] : memref<9x112x128xbf16, #tpu.memory_space<vmem>>, vector<1x112x128xbf16>
    %24 = vector.shape_cast %23 : vector<1x112x128xbf16> to vector<112x128xbf16>
    %25 = arith.maximumf %22, %24 : vector<112x128xbf16>
    %c0_18 = arith.constant 0 : index
    %c0_19 = arith.constant 0 : index
    %26 = vector.load %arg2[%c0_18, %c0_19] : memref<112x128xbf16, #tpu.memory_space<vmem>>, vector<112x128xbf16>
    tpu.vector_store %arg2[%c0_18, %c0_19], %25 {strides = array<i32>} : memref<112x128xbf16, #tpu.memory_space<vmem>>, vector<112x128xbf16>,
    return
  }
  func.func @transform_0(%arg0: i32) -> (i32, i32, i32) {
    %c0_i32 = arith.constant 0 : i32
    %c0_i32_0 = arith.constant 0 : i32
    %c0_i32_1 = arith.constant 0 : i32
    return %c0_i32, %arg0, %c0_i32_0 : i32, i32, i32
  }
  func.func @transform_1(%arg0: i32) -> (i32, i32) {
    %c0_i32 = arith.constant 0 : i32
    %c0_i32_0 = arith.constant 0 : i32
    return %arg0, %c0_i32 : i32, i32
  }
}

module attributes {stable_mosaic.version = 11 : i64} {
  func.func @_mm_bn_act_kernel(%arg0: i32, %arg1: memref<196x1600xbf16, #tpu.memory_space<vmem>>, %arg2: memref<1600x192xbf16, #tpu.memory_space<vmem>>, %arg3: memref<1x192xf32, #tpu.memory_space<vmem>>, %arg4: memref<1x192xf32, #tpu.memory_space<vmem>>, %arg5: memref<196x192xbf16, #tpu.memory_space<vmem>>) attributes {dimension_semantics = [#tpu.dimension_semantics<parallel>], iteration_bounds = array<i64: 1>, scalar_prefetch = 0 : i64, scratch_operands = 0 : i64, tpu.core_type = #tpu.core_type<tc>, window_params = [{transform_indices = @transform_0, window_bounds = array<i64: 196, 1600>}, {pipeline_mode = #tpu.pipeline_mode<synchronous>, transform_indices = @transform_1, window_bounds = array<i64: 1600, 192>}, {pipeline_mode = #tpu.pipeline_mode<synchronous>, transform_indices = @transform_2, window_bounds = array<i64: 1, 192>}, {pipeline_mode = #tpu.pipeline_mode<synchronous>, transform_indices = @transform_3, window_bounds = array<i64: 1, 192>}, {transform_indices = @transform_4, window_bounds = array<i64: 196, 192>}]} {
    %c0 = arith.constant 0 : index
    %c0_0 = arith.constant 0 : index
    %0 = vector.load %arg1[%c0, %c0_0] : memref<196x1600xbf16, #tpu.memory_space<vmem>>, vector<196x1600xbf16>
    %c0_1 = arith.constant 0 : index
    %c0_2 = arith.constant 0 : index
    %1 = vector.load %arg2[%c0_1, %c0_2] : memref<1600x192xbf16, #tpu.memory_space<vmem>>, vector<1600x192xbf16>
    %cst = arith.constant dense<0.000000e+00> : vector<196x192xf32>
    %2 = tpu.matmul %0, %1, %cst {dimension_numbers = #tpu.dot_dimension_numbers<[1], [0], [0], [1], [0, 0, 1, 1], [], []>} : vector<196x1600xbf16>, vector<1600x192xbf16>, vector<196x192xf32> -> vector<196x192xf32>
    %c0_3 = arith.constant 0 : index
    %c0_4 = arith.constant 0 : index
    %3 = vector.load %arg3[%c0_3, %c0_4] : memref<1x192xf32, #tpu.memory_space<vmem>>, vector<1x192xf32>
    %4 = vector.broadcast %3 : vector<1x192xf32> to vector<196x192xf32>
    %5 = arith.mulf %2, %4 : vector<196x192xf32>
    %c0_5 = arith.constant 0 : index
    %c0_6 = arith.constant 0 : index
    %6 = vector.load %arg4[%c0_5, %c0_6] : memref<1x192xf32, #tpu.memory_space<vmem>>, vector<1x192xf32>
    %7 = vector.broadcast %6 : vector<1x192xf32> to vector<196x192xf32>
    %8 = arith.addf %5, %7 : vector<196x192xf32>
    %cst_7 = arith.constant 0.000000e+00 : f32
    %9 = vector.broadcast %cst_7 : f32 to vector<196x192xf32>
    %10 = arith.maximumf %8, %9 : vector<196x192xf32>
    %11 = arith.truncf %10 : vector<196x192xf32> to vector<196x192xbf16>
    %c0_8 = arith.constant 0 : index
    %c0_9 = arith.constant 0 : index
    %12 = vector.load %arg5[%c0_8, %c0_9] : memref<196x192xbf16, #tpu.memory_space<vmem>>, vector<196x192xbf16>
    tpu.vector_store %arg5[%c0_8, %c0_9], %11 {strides = array<i32>} : memref<196x192xbf16, #tpu.memory_space<vmem>>, vector<196x192xbf16>,
    return
  }
  func.func @transform_0(%arg0: i32) -> (i32, i32) {
    %c0_i32 = arith.constant 0 : i32
    %c0_i32_0 = arith.constant 0 : i32
    return %arg0, %c0_i32 : i32, i32
  }
  func.func @transform_1(%arg0: i32) -> (i32, i32) {
    %c0_i32 = arith.constant 0 : i32
    %c0_i32_0 = arith.constant 0 : i32
    %c0_i32_1 = arith.constant 0 : i32
    return %c0_i32, %c0_i32_0 : i32, i32
  }
  func.func @transform_2(%arg0: i32) -> (i32, i32) {
    %c0_i32 = arith.constant 0 : i32
    %c0_i32_0 = arith.constant 0 : i32
    %c0_i32_1 = arith.constant 0 : i32
    return %c0_i32, %c0_i32_0 : i32, i32
  }
  func.func @transform_3(%arg0: i32) -> (i32, i32) {
    %c0_i32 = arith.constant 0 : i32
    %c0_i32_0 = arith.constant 0 : i32
    %c0_i32_1 = arith.constant 0 : i32
    return %c0_i32, %c0_i32_0 : i32, i32
  }
  func.func @transform_4(%arg0: i32) -> (i32, i32) {
    %c0_i32 = arith.constant 0 : i32
    %c0_i32_0 = arith.constant 0 : i32
    return %arg0, %c0_i32 : i32, i32
  }
}

module attributes {stable_mosaic.version = 11 : i64} {
  func.func @_maxpool_kernel(%arg0: i32, %arg1: memref<9x64x128xbf16, #tpu.memory_space<vmem>>, %arg2: memref<64x128xbf16, #tpu.memory_space<vmem>>) attributes {dimension_semantics = [#tpu.dimension_semantics<parallel>], iteration_bounds = array<i64: 1>, scalar_prefetch = 0 : i64, scratch_operands = 0 : i64, tpu.core_type = #tpu.core_type<tc>, window_params = [{transform_indices = @transform_0, window_bounds = array<i64: 9, 64, 128>}, {transform_indices = @transform_1, window_bounds = array<i64: 64, 128>}]} {
    %c0 = arith.constant 0 : index
    %c0_0 = arith.constant 0 : index
    %c0_1 = arith.constant 0 : index
    %0 = vector.load %arg1[%c0, %c0_0, %c0_1] : memref<9x64x128xbf16, #tpu.memory_space<vmem>>, vector<1x64x128xbf16>
    %1 = vector.shape_cast %0 : vector<1x64x128xbf16> to vector<64x128xbf16>
    %c1 = arith.constant 1 : index
    %c0_2 = arith.constant 0 : index
    %c0_3 = arith.constant 0 : index
    %2 = vector.load %arg1[%c1, %c0_2, %c0_3] : memref<9x64x128xbf16, #tpu.memory_space<vmem>>, vector<1x64x128xbf16>
    %3 = vector.shape_cast %2 : vector<1x64x128xbf16> to vector<64x128xbf16>
    %4 = arith.maximumf %1, %3 : vector<64x128xbf16>
    %c2 = arith.constant 2 : index
    %c0_4 = arith.constant 0 : index
    %c0_5 = arith.constant 0 : index
    %5 = vector.load %arg1[%c2, %c0_4, %c0_5] : memref<9x64x128xbf16, #tpu.memory_space<vmem>>, vector<1x64x128xbf16>
    %6 = vector.shape_cast %5 : vector<1x64x128xbf16> to vector<64x128xbf16>
    %7 = arith.maximumf %4, %6 : vector<64x128xbf16>
    %c3 = arith.constant 3 : index
    %c0_6 = arith.constant 0 : index
    %c0_7 = arith.constant 0 : index
    %8 = vector.load %arg1[%c3, %c0_6, %c0_7] : memref<9x64x128xbf16, #tpu.memory_space<vmem>>, vector<1x64x128xbf16>
    %9 = vector.shape_cast %8 : vector<1x64x128xbf16> to vector<64x128xbf16>
    %10 = arith.maximumf %7, %9 : vector<64x128xbf16>
    %c4 = arith.constant 4 : index
    %c0_8 = arith.constant 0 : index
    %c0_9 = arith.constant 0 : index
    %11 = vector.load %arg1[%c4, %c0_8, %c0_9] : memref<9x64x128xbf16, #tpu.memory_space<vmem>>, vector<1x64x128xbf16>
    %12 = vector.shape_cast %11 : vector<1x64x128xbf16> to vector<64x128xbf16>
    %13 = arith.maximumf %10, %12 : vector<64x128xbf16>
    %c5 = arith.constant 5 : index
    %c0_10 = arith.constant 0 : index
    %c0_11 = arith.constant 0 : index
    %14 = vector.load %arg1[%c5, %c0_10, %c0_11] : memref<9x64x128xbf16, #tpu.memory_space<vmem>>, vector<1x64x128xbf16>
    %15 = vector.shape_cast %14 : vector<1x64x128xbf16> to vector<64x128xbf16>
    %16 = arith.maximumf %13, %15 : vector<64x128xbf16>
    %c6 = arith.constant 6 : index
    %c0_12 = arith.constant 0 : index
    %c0_13 = arith.constant 0 : index
    %17 = vector.load %arg1[%c6, %c0_12, %c0_13] : memref<9x64x128xbf16, #tpu.memory_space<vmem>>, vector<1x64x128xbf16>
    %18 = vector.shape_cast %17 : vector<1x64x128xbf16> to vector<64x128xbf16>
    %19 = arith.maximumf %16, %18 : vector<64x128xbf16>
    %c7 = arith.constant 7 : index
    %c0_14 = arith.constant 0 : index
    %c0_15 = arith.constant 0 : index
    %20 = vector.load %arg1[%c7, %c0_14, %c0_15] : memref<9x64x128xbf16, #tpu.memory_space<vmem>>, vector<1x64x128xbf16>
    %21 = vector.shape_cast %20 : vector<1x64x128xbf16> to vector<64x128xbf16>
    %22 = arith.maximumf %19, %21 : vector<64x128xbf16>
    %c8 = arith.constant 8 : index
    %c0_16 = arith.constant 0 : index
    %c0_17 = arith.constant 0 : index
    %23 = vector.load %arg1[%c8, %c0_16, %c0_17] : memref<9x64x128xbf16, #tpu.memory_space<vmem>>, vector<1x64x128xbf16>
    %24 = vector.shape_cast %23 : vector<1x64x128xbf16> to vector<64x128xbf16>
    %25 = arith.maximumf %22, %24 : vector<64x128xbf16>
    %c0_18 = arith.constant 0 : index
    %c0_19 = arith.constant 0 : index
    %26 = vector.load %arg2[%c0_18, %c0_19] : memref<64x128xbf16, #tpu.memory_space<vmem>>, vector<64x128xbf16>
    tpu.vector_store %arg2[%c0_18, %c0_19], %25 {strides = array<i32>} : memref<64x128xbf16, #tpu.memory_space<vmem>>, vector<64x128xbf16>,
    return
  }
  func.func @transform_0(%arg0: i32) -> (i32, i32, i32) {
    %c0_i32 = arith.constant 0 : i32
    %c0_i32_0 = arith.constant 0 : i32
    %c0_i32_1 = arith.constant 0 : i32
    return %c0_i32, %arg0, %c0_i32_0 : i32, i32, i32
  }
  func.func @transform_1(%arg0: i32) -> (i32, i32) {
    %c0_i32 = arith.constant 0 : i32
    %c0_i32_0 = arith.constant 0 : i32
    return %arg0, %c0_i32 : i32, i32
  }
}

module attributes {stable_mosaic.version = 11 : i64} {
  func.func @_mm_bn_act_kernel(%arg0: i32, %arg1: memref<18x3456xbf16, #tpu.memory_space<vmem>>, %arg2: memref<3456x128xbf16, #tpu.memory_space<vmem>>, %arg3: memref<1x128xf32, #tpu.memory_space<vmem>>, %arg4: memref<1x128xf32, #tpu.memory_space<vmem>>, %arg5: memref<18x128xbf16, #tpu.memory_space<vmem>>) attributes {dimension_semantics = [#tpu.dimension_semantics<parallel>], iteration_bounds = array<i64: 1>, scalar_prefetch = 0 : i64, scratch_operands = 0 : i64, tpu.core_type = #tpu.core_type<tc>, window_params = [{transform_indices = @transform_0, window_bounds = array<i64: 18, 3456>}, {pipeline_mode = #tpu.pipeline_mode<synchronous>, transform_indices = @transform_1, window_bounds = array<i64: 3456, 128>}, {pipeline_mode = #tpu.pipeline_mode<synchronous>, transform_indices = @transform_2, window_bounds = array<i64: 1, 128>}, {pipeline_mode = #tpu.pipeline_mode<synchronous>, transform_indices = @transform_3, window_bounds = array<i64: 1, 128>}, {transform_indices = @transform_4, window_bounds = array<i64: 18, 128>}]} {
    %c0 = arith.constant 0 : index
    %c0_0 = arith.constant 0 : index
    %0 = vector.load %arg1[%c0, %c0_0] : memref<18x3456xbf16, #tpu.memory_space<vmem>>, vector<18x3456xbf16>
    %c0_1 = arith.constant 0 : index
    %c0_2 = arith.constant 0 : index
    %1 = vector.load %arg2[%c0_1, %c0_2] : memref<3456x128xbf16, #tpu.memory_space<vmem>>, vector<3456x128xbf16>
    %cst = arith.constant dense<0.000000e+00> : vector<18x128xf32>
    %2 = tpu.matmul %0, %1, %cst {dimension_numbers = #tpu.dot_dimension_numbers<[1], [0], [0], [1], [0, 0, 1, 1], [], []>} : vector<18x3456xbf16>, vector<3456x128xbf16>, vector<18x128xf32> -> vector<18x128xf32>
    %c0_3 = arith.constant 0 : index
    %c0_4 = arith.constant 0 : index
    %3 = vector.load %arg3[%c0_3, %c0_4] : memref<1x128xf32, #tpu.memory_space<vmem>>, vector<1x128xf32>
    %4 = vector.broadcast %3 : vector<1x128xf32> to vector<18x128xf32>
    %5 = arith.mulf %2, %4 : vector<18x128xf32>
    %c0_5 = arith.constant 0 : index
    %c0_6 = arith.constant 0 : index
    %6 = vector.load %arg4[%c0_5, %c0_6] : memref<1x128xf32, #tpu.memory_space<vmem>>, vector<1x128xf32>
    %7 = vector.broadcast %6 : vector<1x128xf32> to vector<18x128xf32>
    %8 = arith.addf %5, %7 : vector<18x128xf32>
    %cst_7 = arith.constant 0.000000e+00 : f32
    %9 = vector.broadcast %cst_7 : f32 to vector<18x128xf32>
    %10 = arith.maximumf %8, %9 : vector<18x128xf32>
    %11 = arith.truncf %10 : vector<18x128xf32> to vector<18x128xbf16>
    %c0_8 = arith.constant 0 : index
    %c0_9 = arith.constant 0 : index
    %12 = vector.load %arg5[%c0_8, %c0_9] : memref<18x128xbf16, #tpu.memory_space<vmem>>, vector<18x128xbf16>
    tpu.vector_store %arg5[%c0_8, %c0_9], %11 {strides = array<i32>} : memref<18x128xbf16, #tpu.memory_space<vmem>>, vector<18x128xbf16>,
    return
  }
  func.func @transform_0(%arg0: i32) -> (i32, i32) {
    %c0_i32 = arith.constant 0 : i32
    %c0_i32_0 = arith.constant 0 : i32
    return %arg0, %c0_i32 : i32, i32
  }
  func.func @transform_1(%arg0: i32) -> (i32, i32) {
    %c0_i32 = arith.constant 0 : i32
    %c0_i32_0 = arith.constant 0 : i32
    %c0_i32_1 = arith.constant 0 : i32
    return %c0_i32, %c0_i32_0 : i32, i32
  }
  func.func @transform_2(%arg0: i32) -> (i32, i32) {
    %c0_i32 = arith.constant 0 : i32
    %c0_i32_0 = arith.constant 0 : i32
    %c0_i32_1 = arith.constant 0 : i32
    return %c0_i32, %c0_i32_0 : i32, i32
  }
  func.func @transform_3(%arg0: i32) -> (i32, i32) {
    %c0_i32 = arith.constant 0 : i32
    %c0_i32_0 = arith.constant 0 : i32
    %c0_i32_1 = arith.constant 0 : i32
    return %c0_i32, %c0_i32_0 : i32, i32
  }
  func.func @transform_4(%arg0: i32) -> (i32, i32) {
    %c0_i32 = arith.constant 0 : i32
    %c0_i32_0 = arith.constant 0 : i32
    return %arg0, %c0_i32 : i32, i32
  }
}

module attributes {stable_mosaic.version = 11 : i64} {
  func.func @_mm_bn_act_kernel(%arg0: i32, %arg1: memref<18x1152xbf16, #tpu.memory_space<vmem>>, %arg2: memref<1152x128xbf16, #tpu.memory_space<vmem>>, %arg3: memref<1x128xf32, #tpu.memory_space<vmem>>, %arg4: memref<1x128xf32, #tpu.memory_space<vmem>>, %arg5: memref<18x128xbf16, #tpu.memory_space<vmem>>) attributes {dimension_semantics = [#tpu.dimension_semantics<parallel>], iteration_bounds = array<i64: 1>, scalar_prefetch = 0 : i64, scratch_operands = 0 : i64, tpu.core_type = #tpu.core_type<tc>, window_params = [{transform_indices = @transform_0, window_bounds = array<i64: 18, 1152>}, {pipeline_mode = #tpu.pipeline_mode<synchronous>, transform_indices = @transform_1, window_bounds = array<i64: 1152, 128>}, {pipeline_mode = #tpu.pipeline_mode<synchronous>, transform_indices = @transform_2, window_bounds = array<i64: 1, 128>}, {pipeline_mode = #tpu.pipeline_mode<synchronous>, transform_indices = @transform_3, window_bounds = array<i64: 1, 128>}, {transform_indices = @transform_4, window_bounds = array<i64: 18, 128>}]} {
    %c0 = arith.constant 0 : index
    %c0_0 = arith.constant 0 : index
    %0 = vector.load %arg1[%c0, %c0_0] : memref<18x1152xbf16, #tpu.memory_space<vmem>>, vector<18x1152xbf16>
    %c0_1 = arith.constant 0 : index
    %c0_2 = arith.constant 0 : index
    %1 = vector.load %arg2[%c0_1, %c0_2] : memref<1152x128xbf16, #tpu.memory_space<vmem>>, vector<1152x128xbf16>
    %cst = arith.constant dense<0.000000e+00> : vector<18x128xf32>
    %2 = tpu.matmul %0, %1, %cst {dimension_numbers = #tpu.dot_dimension_numbers<[1], [0], [0], [1], [0, 0, 1, 1], [], []>} : vector<18x1152xbf16>, vector<1152x128xbf16>, vector<18x128xf32> -> vector<18x128xf32>
    %c0_3 = arith.constant 0 : index
    %c0_4 = arith.constant 0 : index
    %3 = vector.load %arg3[%c0_3, %c0_4] : memref<1x128xf32, #tpu.memory_space<vmem>>, vector<1x128xf32>
    %4 = vector.broadcast %3 : vector<1x128xf32> to vector<18x128xf32>
    %5 = arith.mulf %2, %4 : vector<18x128xf32>
    %c0_5 = arith.constant 0 : index
    %c0_6 = arith.constant 0 : index
    %6 = vector.load %arg4[%c0_5, %c0_6] : memref<1x128xf32, #tpu.memory_space<vmem>>, vector<1x128xf32>
    %7 = vector.broadcast %6 : vector<1x128xf32> to vector<18x128xf32>
    %8 = arith.addf %5, %7 : vector<18x128xf32>
    %cst_7 = arith.constant 0.000000e+00 : f32
    %9 = vector.broadcast %cst_7 : f32 to vector<18x128xf32>
    %10 = arith.maximumf %8, %9 : vector<18x128xf32>
    %11 = arith.truncf %10 : vector<18x128xf32> to vector<18x128xbf16>
    %c0_8 = arith.constant 0 : index
    %c0_9 = arith.constant 0 : index
    %12 = vector.load %arg5[%c0_8, %c0_9] : memref<18x128xbf16, #tpu.memory_space<vmem>>, vector<18x128xbf16>
    tpu.vector_store %arg5[%c0_8, %c0_9], %11 {strides = array<i32>} : memref<18x128xbf16, #tpu.memory_space<vmem>>, vector<18x128xbf16>,
    return
  }
  func.func @transform_0(%arg0: i32) -> (i32, i32) {
    %c0_i32 = arith.constant 0 : i32
    %c0_i32_0 = arith.constant 0 : i32
    return %arg0, %c0_i32 : i32, i32
  }
  func.func @transform_1(%arg0: i32) -> (i32, i32) {
    %c0_i32 = arith.constant 0 : i32
    %c0_i32_0 = arith.constant 0 : i32
    %c0_i32_1 = arith.constant 0 : i32
    return %c0_i32, %c0_i32_0 : i32, i32
  }
  func.func @transform_2(%arg0: i32) -> (i32, i32) {
    %c0_i32 = arith.constant 0 : i32
    %c0_i32_0 = arith.constant 0 : i32
    %c0_i32_1 = arith.constant 0 : i32
    return %c0_i32, %c0_i32_0 : i32, i32
  }
  func.func @transform_3(%arg0: i32) -> (i32, i32) {
    %c0_i32 = arith.constant 0 : i32
    %c0_i32_0 = arith.constant 0 : i32
    %c0_i32_1 = arith.constant 0 : i32
    return %c0_i32, %c0_i32_0 : i32, i32
  }
  func.func @transform_4(%arg0: i32) -> (i32, i32) {
    %c0_i32 = arith.constant 0 : i32
    %c0_i32_0 = arith.constant 0 : i32
    return %arg0, %c0_i32 : i32, i32
  }
}

module attributes {stable_mosaic.version = 11 : i64} {
  func.func @_mm_bn_act_kernel(%arg0: i32, %arg1: memref<32x512xbf16, #tpu.memory_space<vmem>>, %arg2: memref<512x256xbf16, #tpu.memory_space<vmem>>, %arg3: memref<1x256xf32, #tpu.memory_space<vmem>>, %arg4: memref<1x256xf32, #tpu.memory_space<vmem>>, %arg5: memref<32x256xbf16, #tpu.memory_space<vmem>>) attributes {dimension_semantics = [#tpu.dimension_semantics<parallel>], iteration_bounds = array<i64: 1>, scalar_prefetch = 0 : i64, scratch_operands = 0 : i64, tpu.core_type = #tpu.core_type<tc>, window_params = [{transform_indices = @transform_0, window_bounds = array<i64: 32, 512>}, {pipeline_mode = #tpu.pipeline_mode<synchronous>, transform_indices = @transform_1, window_bounds = array<i64: 512, 256>}, {pipeline_mode = #tpu.pipeline_mode<synchronous>, transform_indices = @transform_2, window_bounds = array<i64: 1, 256>}, {pipeline_mode = #tpu.pipeline_mode<synchronous>, transform_indices = @transform_3, window_bounds = array<i64: 1, 256>}, {transform_indices = @transform_4, window_bounds = array<i64: 32, 256>}]} {
    %c0 = arith.constant 0 : index
    %c0_0 = arith.constant 0 : index
    %0 = vector.load %arg1[%c0, %c0_0] : memref<32x512xbf16, #tpu.memory_space<vmem>>, vector<32x512xbf16>
    %c0_1 = arith.constant 0 : index
    %c0_2 = arith.constant 0 : index
    %1 = vector.load %arg2[%c0_1, %c0_2] : memref<512x256xbf16, #tpu.memory_space<vmem>>, vector<512x256xbf16>
    %cst = arith.constant dense<0.000000e+00> : vector<32x256xf32>
    %2 = tpu.matmul %0, %1, %cst {dimension_numbers = #tpu.dot_dimension_numbers<[1], [0], [0], [1], [0, 0, 1, 1], [], []>} : vector<32x512xbf16>, vector<512x256xbf16>, vector<32x256xf32> -> vector<32x256xf32>
    %c0_3 = arith.constant 0 : index
    %c0_4 = arith.constant 0 : index
    %3 = vector.load %arg3[%c0_3, %c0_4] : memref<1x256xf32, #tpu.memory_space<vmem>>, vector<1x256xf32>
    %4 = vector.broadcast %3 : vector<1x256xf32> to vector<32x256xf32>
    %5 = arith.mulf %2, %4 : vector<32x256xf32>
    %c0_5 = arith.constant 0 : index
    %c0_6 = arith.constant 0 : index
    %6 = vector.load %arg4[%c0_5, %c0_6] : memref<1x256xf32, #tpu.memory_space<vmem>>, vector<1x256xf32>
    %7 = vector.broadcast %6 : vector<1x256xf32> to vector<32x256xf32>
    %8 = arith.addf %5, %7 : vector<32x256xf32>
    %cst_7 = arith.constant 0.000000e+00 : f32
    %9 = vector.broadcast %cst_7 : f32 to vector<32x256xf32>
    %10 = arith.maximumf %8, %9 : vector<32x256xf32>
    %11 = arith.truncf %10 : vector<32x256xf32> to vector<32x256xbf16>
    %c0_8 = arith.constant 0 : index
    %c0_9 = arith.constant 0 : index
    %12 = vector.load %arg5[%c0_8, %c0_9] : memref<32x256xbf16, #tpu.memory_space<vmem>>, vector<32x256xbf16>
    tpu.vector_store %arg5[%c0_8, %c0_9], %11 {strides = array<i32>} : memref<32x256xbf16, #tpu.memory_space<vmem>>, vector<32x256xbf16>,
    return
  }
  func.func @transform_0(%arg0: i32) -> (i32, i32) {
    %c0_i32 = arith.constant 0 : i32
    %c0_i32_0 = arith.constant 0 : i32
    return %arg0, %c0_i32 : i32, i32
  }
  func.func @transform_1(%arg0: i32) -> (i32, i32) {
    %c0_i32 = arith.constant 0 : i32
    %c0_i32_0 = arith.constant 0 : i32
    %c0_i32_1 = arith.constant 0 : i32
    return %c0_i32, %c0_i32_0 : i32, i32
  }
  func.func @transform_2(%arg0: i32) -> (i32, i32) {
    %c0_i32 = arith.constant 0 : i32
    %c0_i32_0 = arith.constant 0 : i32
    %c0_i32_1 = arith.constant 0 : i32
    return %c0_i32, %c0_i32_0 : i32, i32
  }
  func.func @transform_3(%arg0: i32) -> (i32, i32) {
    %c0_i32 = arith.constant 0 : i32
    %c0_i32_0 = arith.constant 0 : i32
    %c0_i32_1 = arith.constant 0 : i32
    return %c0_i32, %c0_i32_0 : i32, i32
  }
  func.func @transform_4(%arg0: i32) -> (i32, i32) {
    %c0_i32 = arith.constant 0 : i32
    %c0_i32_0 = arith.constant 0 : i32
    return %arg0, %c0_i32 : i32, i32
  }
}

module attributes {stable_mosaic.version = 11 : i64} {
  func.func @_mm_bn_act_kernel(%arg0: i32, %arg1: memref<98x1600xbf16, #tpu.memory_space<vmem>>, %arg2: memref<1600x64xbf16, #tpu.memory_space<vmem>>, %arg3: memref<1x64xf32, #tpu.memory_space<vmem>>, %arg4: memref<1x64xf32, #tpu.memory_space<vmem>>, %arg5: memref<98x64xbf16, #tpu.memory_space<vmem>>) attributes {dimension_semantics = [#tpu.dimension_semantics<parallel>], iteration_bounds = array<i64: 1>, scalar_prefetch = 0 : i64, scratch_operands = 0 : i64, tpu.core_type = #tpu.core_type<tc>, window_params = [{transform_indices = @transform_0, window_bounds = array<i64: 98, 1600>}, {pipeline_mode = #tpu.pipeline_mode<synchronous>, transform_indices = @transform_1, window_bounds = array<i64: 1600, 64>}, {pipeline_mode = #tpu.pipeline_mode<synchronous>, transform_indices = @transform_2, window_bounds = array<i64: 1, 64>}, {pipeline_mode = #tpu.pipeline_mode<synchronous>, transform_indices = @transform_3, window_bounds = array<i64: 1, 64>}, {transform_indices = @transform_4, window_bounds = array<i64: 98, 64>}]} {
    %c0 = arith.constant 0 : index
    %c0_0 = arith.constant 0 : index
    %0 = vector.load %arg1[%c0, %c0_0] : memref<98x1600xbf16, #tpu.memory_space<vmem>>, vector<98x1600xbf16>
    %c0_1 = arith.constant 0 : index
    %c0_2 = arith.constant 0 : index
    %1 = vector.load %arg2[%c0_1, %c0_2] : memref<1600x64xbf16, #tpu.memory_space<vmem>>, vector<1600x64xbf16>
    %cst = arith.constant dense<0.000000e+00> : vector<98x64xf32>
    %2 = tpu.matmul %0, %1, %cst {dimension_numbers = #tpu.dot_dimension_numbers<[1], [0], [0], [1], [0, 0, 1, 1], [], []>} : vector<98x1600xbf16>, vector<1600x64xbf16>, vector<98x64xf32> -> vector<98x64xf32>
    %c0_3 = arith.constant 0 : index
    %c0_4 = arith.constant 0 : index
    %3 = vector.load %arg3[%c0_3, %c0_4] : memref<1x64xf32, #tpu.memory_space<vmem>>, vector<1x64xf32>
    %4 = vector.broadcast %3 : vector<1x64xf32> to vector<98x64xf32>
    %5 = arith.mulf %2, %4 : vector<98x64xf32>
    %c0_5 = arith.constant 0 : index
    %c0_6 = arith.constant 0 : index
    %6 = vector.load %arg4[%c0_5, %c0_6] : memref<1x64xf32, #tpu.memory_space<vmem>>, vector<1x64xf32>
    %7 = vector.broadcast %6 : vector<1x64xf32> to vector<98x64xf32>
    %8 = arith.addf %5, %7 : vector<98x64xf32>
    %cst_7 = arith.constant 0.000000e+00 : f32
    %9 = vector.broadcast %cst_7 : f32 to vector<98x64xf32>
    %10 = arith.maximumf %8, %9 : vector<98x64xf32>
    %11 = arith.truncf %10 : vector<98x64xf32> to vector<98x64xbf16>
    %c0_8 = arith.constant 0 : index
    %c0_9 = arith.constant 0 : index
    %12 = vector.load %arg5[%c0_8, %c0_9] : memref<98x64xbf16, #tpu.memory_space<vmem>>, vector<98x64xbf16>
    tpu.vector_store %arg5[%c0_8, %c0_9], %11 {strides = array<i32>} : memref<98x64xbf16, #tpu.memory_space<vmem>>, vector<98x64xbf16>,
    return
  }
  func.func @transform_0(%arg0: i32) -> (i32, i32) {
    %c0_i32 = arith.constant 0 : i32
    %c0_i32_0 = arith.constant 0 : i32
    return %arg0, %c0_i32 : i32, i32
  }
  func.func @transform_1(%arg0: i32) -> (i32, i32) {
    %c0_i32 = arith.constant 0 : i32
    %c0_i32_0 = arith.constant 0 : i32
    %c0_i32_1 = arith.constant 0 : i32
    return %c0_i32, %c0_i32_0 : i32, i32
  }
  func.func @transform_2(%arg0: i32) -> (i32, i32) {
    %c0_i32 = arith.constant 0 : i32
    %c0_i32_0 = arith.constant 0 : i32
    %c0_i32_1 = arith.constant 0 : i32
    return %c0_i32, %c0_i32_0 : i32, i32
  }
  func.func @transform_3(%arg0: i32) -> (i32, i32) {
    %c0_i32 = arith.constant 0 : i32
    %c0_i32_0 = arith.constant 0 : i32
    %c0_i32_1 = arith.constant 0 : i32
    return %c0_i32, %c0_i32_0 : i32, i32
  }
  func.func @transform_4(%arg0: i32) -> (i32, i32) {
    %c0_i32 = arith.constant 0 : i32
    %c0_i32_0 = arith.constant 0 : i32
    return %arg0, %c0_i32 : i32, i32
  }
}

module attributes {stable_mosaic.version = 11 : i64} {
  func.func @_mm_bn_act_kernel(%arg0: i32, %arg1: memref<98x256xbf16, #tpu.memory_space<vmem>>, %arg2: memref<256x128xbf16, #tpu.memory_space<vmem>>, %arg3: memref<1x128xf32, #tpu.memory_space<vmem>>, %arg4: memref<1x128xf32, #tpu.memory_space<vmem>>, %arg5: memref<98x128xbf16, #tpu.memory_space<vmem>>) attributes {dimension_semantics = [#tpu.dimension_semantics<parallel>], iteration_bounds = array<i64: 1>, scalar_prefetch = 0 : i64, scratch_operands = 0 : i64, tpu.core_type = #tpu.core_type<tc>, window_params = [{transform_indices = @transform_0, window_bounds = array<i64: 98, 256>}, {pipeline_mode = #tpu.pipeline_mode<synchronous>, transform_indices = @transform_1, window_bounds = array<i64: 256, 128>}, {pipeline_mode = #tpu.pipeline_mode<synchronous>, transform_indices = @transform_2, window_bounds = array<i64: 1, 128>}, {pipeline_mode = #tpu.pipeline_mode<synchronous>, transform_indices = @transform_3, window_bounds = array<i64: 1, 128>}, {transform_indices = @transform_4, window_bounds = array<i64: 98, 128>}]} {
    %c0 = arith.constant 0 : index
    %c0_0 = arith.constant 0 : index
    %0 = vector.load %arg1[%c0, %c0_0] : memref<98x256xbf16, #tpu.memory_space<vmem>>, vector<98x256xbf16>
    %c0_1 = arith.constant 0 : index
    %c0_2 = arith.constant 0 : index
    %1 = vector.load %arg2[%c0_1, %c0_2] : memref<256x128xbf16, #tpu.memory_space<vmem>>, vector<256x128xbf16>
    %cst = arith.constant dense<0.000000e+00> : vector<98x128xf32>
    %2 = tpu.matmul %0, %1, %cst {dimension_numbers = #tpu.dot_dimension_numbers<[1], [0], [0], [1], [0, 0, 1, 1], [], []>} : vector<98x256xbf16>, vector<256x128xbf16>, vector<98x128xf32> -> vector<98x128xf32>
    %c0_3 = arith.constant 0 : index
    %c0_4 = arith.constant 0 : index
    %3 = vector.load %arg3[%c0_3, %c0_4] : memref<1x128xf32, #tpu.memory_space<vmem>>, vector<1x128xf32>
    %4 = vector.broadcast %3 : vector<1x128xf32> to vector<98x128xf32>
    %5 = arith.mulf %2, %4 : vector<98x128xf32>
    %c0_5 = arith.constant 0 : index
    %c0_6 = arith.constant 0 : index
    %6 = vector.load %arg4[%c0_5, %c0_6] : memref<1x128xf32, #tpu.memory_space<vmem>>, vector<1x128xf32>
    %7 = vector.broadcast %6 : vector<1x128xf32> to vector<98x128xf32>
    %8 = arith.addf %5, %7 : vector<98x128xf32>
    %cst_7 = arith.constant 0.000000e+00 : f32
    %9 = vector.broadcast %cst_7 : f32 to vector<98x128xf32>
    %10 = arith.maximumf %8, %9 : vector<98x128xf32>
    %11 = arith.truncf %10 : vector<98x128xf32> to vector<98x128xbf16>
    %c0_8 = arith.constant 0 : index
    %c0_9 = arith.constant 0 : index
    %12 = vector.load %arg5[%c0_8, %c0_9] : memref<98x128xbf16, #tpu.memory_space<vmem>>, vector<98x128xbf16>
    tpu.vector_store %arg5[%c0_8, %c0_9], %11 {strides = array<i32>} : memref<98x128xbf16, #tpu.memory_space<vmem>>, vector<98x128xbf16>,
    return
  }
  func.func @transform_0(%arg0: i32) -> (i32, i32) {
    %c0_i32 = arith.constant 0 : i32
    %c0_i32_0 = arith.constant 0 : i32
    return %arg0, %c0_i32 : i32, i32
  }
  func.func @transform_1(%arg0: i32) -> (i32, i32) {
    %c0_i32 = arith.constant 0 : i32
    %c0_i32_0 = arith.constant 0 : i32
    %c0_i32_1 = arith.constant 0 : i32
    return %c0_i32, %c0_i32_0 : i32, i32
  }
  func.func @transform_2(%arg0: i32) -> (i32, i32) {
    %c0_i32 = arith.constant 0 : i32
    %c0_i32_0 = arith.constant 0 : i32
    %c0_i32_1 = arith.constant 0 : i32
    return %c0_i32, %c0_i32_0 : i32, i32
  }
  func.func @transform_3(%arg0: i32) -> (i32, i32) {
    %c0_i32 = arith.constant 0 : i32
    %c0_i32_0 = arith.constant 0 : i32
    %c0_i32_1 = arith.constant 0 : i32
    return %c0_i32, %c0_i32_0 : i32, i32
  }
  func.func @transform_4(%arg0: i32) -> (i32, i32) {
    %c0_i32 = arith.constant 0 : i32
    %c0_i32_0 = arith.constant 0 : i32
    return %arg0, %c0_i32 : i32, i32
  }
}

module attributes {stable_mosaic.version = 11 : i64} {
  func.func @_mm_bn_head_kernel(%arg0: i32, %arg1: memref<256x288xbf16, #tpu.memory_space<vmem>>, %arg2: memref<288x96xbf16, #tpu.memory_space<vmem>>, %arg3: memref<1x96xf32, #tpu.memory_space<vmem>>, %arg4: memref<1x96xf32, #tpu.memory_space<vmem>>, %arg5: memref<1x96xf32, #tpu.memory_space<vmem>>, %arg6: memref<256x96xf32, #tpu.memory_space<vmem>>) attributes {dimension_semantics = [#tpu.dimension_semantics<parallel>], iteration_bounds = array<i64: 2>, scalar_prefetch = 0 : i64, scratch_operands = 0 : i64, tpu.core_type = #tpu.core_type<tc>, window_params = [{transform_indices = @transform_0, window_bounds = array<i64: 256, 288>}, {pipeline_mode = #tpu.pipeline_mode<synchronous>, transform_indices = @transform_1, window_bounds = array<i64: 288, 96>}, {pipeline_mode = #tpu.pipeline_mode<synchronous>, transform_indices = @transform_2, window_bounds = array<i64: 1, 96>}, {pipeline_mode = #tpu.pipeline_mode<synchronous>, transform_indices = @transform_3, window_bounds = array<i64: 1, 96>}, {pipeline_mode = #tpu.pipeline_mode<synchronous>, transform_indices = @transform_4, window_bounds = array<i64: 1, 96>}, {transform_indices = @transform_5, window_bounds = array<i64: 256, 96>}]} {
    %c0 = arith.constant 0 : index
    %c0_0 = arith.constant 0 : index
    %0 = vector.load %arg1[%c0, %c0_0] : memref<256x288xbf16, #tpu.memory_space<vmem>>, vector<256x288xbf16>
    %c0_1 = arith.constant 0 : index
    %c0_2 = arith.constant 0 : index
    %1 = vector.load %arg2[%c0_1, %c0_2] : memref<288x96xbf16, #tpu.memory_space<vmem>>, vector<288x96xbf16>
    %cst = arith.constant dense<0.000000e+00> : vector<256x96xf32>
    %2 = tpu.matmul %0, %1, %cst {dimension_numbers = #tpu.dot_dimension_numbers<[1], [0], [0], [1], [0, 0, 1, 1], [], []>} : vector<256x288xbf16>, vector<288x96xbf16>, vector<256x96xf32> -> vector<256x96xf32>
    %c0_3 = arith.constant 0 : index
    %c0_4 = arith.constant 0 : index
    %3 = vector.load %arg3[%c0_3, %c0_4] : memref<1x96xf32, #tpu.memory_space<vmem>>, vector<1x96xf32>
    %4 = vector.broadcast %3 : vector<1x96xf32> to vector<256x96xf32>
    %5 = arith.mulf %2, %4 : vector<256x96xf32>
    %c0_5 = arith.constant 0 : index
    %c0_6 = arith.constant 0 : index
    %6 = vector.load %arg4[%c0_5, %c0_6] : memref<1x96xf32, #tpu.memory_space<vmem>>, vector<1x96xf32>
    %7 = vector.broadcast %6 : vector<1x96xf32> to vector<256x96xf32>
    %8 = arith.addf %5, %7 : vector<256x96xf32>
    %c0_7 = arith.constant 0 : index
    %c0_8 = arith.constant 0 : index
    %9 = vector.load %arg5[%c0_7, %c0_8] : memref<1x96xf32, #tpu.memory_space<vmem>>, vector<1x96xf32>
    %cst_9 = arith.constant 5.000000e-01 : f32
    %10 = vector.broadcast %cst_9 : f32 to vector<1x96xf32>
    %11 = arith.cmpf ogt, %9, %10 : vector<1x96xf32>
    %cst_10 = arith.constant 5.000000e-01 : f32
    %12 = vector.broadcast %cst_10 : f32 to vector<256x96xf32>
    %13 = arith.mulf %12, %8 : vector<256x96xf32>
    %14 = vector.shape_cast %11 : vector<1x96xi1> to vector<1x96xi1>
    %15 = vector.broadcast %14 : vector<1x96xi1> to vector<256x96xi1>
    %16 = arith.select %15, %8, %13 : vector<256x96xi1>, vector<256x96xf32>
    %17 = math.tanh %16 : vector<256x96xf32>
    %cst_11 = arith.constant 5.000000e-01 : f32
    %18 = vector.broadcast %cst_11 : f32 to vector<1x96xf32>
    %19 = arith.cmpf ogt, %9, %18 : vector<1x96xf32>
    %cst_12 = arith.constant 1.000000e+00 : f32
    %20 = vector.broadcast %cst_12 : f32 to vector<256x96xf32>
    %21 = arith.addf %17, %20 : vector<256x96xf32>
    %cst_13 = arith.constant 5.000000e-01 : f32
    %22 = vector.broadcast %cst_13 : f32 to vector<256x96xf32>
    %23 = arith.mulf %22, %21 : vector<256x96xf32>
    %24 = vector.shape_cast %19 : vector<1x96xi1> to vector<1x96xi1>
    %25 = vector.broadcast %24 : vector<1x96xi1> to vector<256x96xi1>
    %26 = arith.select %25, %17, %23 : vector<256x96xi1>, vector<256x96xf32>
    %c0_14 = arith.constant 0 : index
    %c0_15 = arith.constant 0 : index
    %27 = vector.load %arg6[%c0_14, %c0_15] : memref<256x96xf32, #tpu.memory_space<vmem>>, vector<256x96xf32>
    tpu.vector_store %arg6[%c0_14, %c0_15], %26 {strides = array<i32>} : memref<256x96xf32, #tpu.memory_space<vmem>>, vector<256x96xf32>,
    return
  }
  func.func @transform_0(%arg0: i32) -> (i32, i32) {
    %c0_i32 = arith.constant 0 : i32
    %c0_i32_0 = arith.constant 0 : i32
    return %arg0, %c0_i32 : i32, i32
  }
  func.func @transform_1(%arg0: i32) -> (i32, i32) {
    %c0_i32 = arith.constant 0 : i32
    %c0_i32_0 = arith.constant 0 : i32
    %c0_i32_1 = arith.constant 0 : i32
    return %c0_i32, %c0_i32_0 : i32, i32
  }
  func.func @transform_2(%arg0: i32) -> (i32, i32) {
    %c0_i32 = arith.constant 0 : i32
    %c0_i32_0 = arith.constant 0 : i32
    %c0_i32_1 = arith.constant 0 : i32
    return %c0_i32, %c0_i32_0 : i32, i32
  }
  func.func @transform_3(%arg0: i32) -> (i32, i32) {
    %c0_i32 = arith.constant 0 : i32
    %c0_i32_0 = arith.constant 0 : i32
    %c0_i32_1 = arith.constant 0 : i32
    return %c0_i32, %c0_i32_0 : i32, i32
  }
  func.func @transform_4(%arg0: i32) -> (i32, i32) {
    %c0_i32 = arith.constant 0 : i32
    %c0_i32_0 = arith.constant 0 : i32
    %c0_i32_1 = arith.constant 0 : i32
    return %c0_i32, %c0_i32_0 : i32, i32
  }
  func.func @transform_5(%arg0: i32) -> (i32, i32) {
    %c0_i32 = arith.constant 0 : i32
    %c0_i32_0 = arith.constant 0 : i32
    return %arg0, %c0_i32 : i32, i32
  }
}

</mosaic_0001>

<bundles_post_ra>
// kernel: tpu_custom_call.1
= control target key start
LH: loop header
LB: loop body
LE: loop exit
PB: predicated region body
PF: predicated region fallthrough
CT: control target
= control target key end

     0   :  { %6 = vsyncpa [#allocation3], 0  ;;  %s124_s0 = inlined_call_operand.hbm [shape: f32[8,128], index: 0, kind: input, shape index: {}]   ;;  %s125_s1 = inlined_call_operand.hbm [shape: f32[8,128], index: 1, kind: output, shape index: {}]  }
   0x1   :  { %7 = vsyncpa [#allocation4], 0  ;;  %s88_s6 = smov [#allocation2]   ;;  %s40_s10 = scalar_lea.hbm %s124_s0, 128 }
   0x2   :  { %s14_s7 = sshll.u32 %s88_s6, 4  ;;  %p41_p0 = scmp.ne.s32.totalorder %s124_s0, %s40_s10  ;;  %s15_s7 = int_to_ptr.vmem [resolvable:$true] %s14_s7 }
   0x3   :  { %p44_p1 = scmp.lt.u32.totalorder %s40_s10, %s124_s0 }
   0x5   :  { %p46_p2 = pnand %p44_p1, %p41_p0 }
   0x7   :  { %49 = shalt.err (!%p46_p2)
}
   0x8   :  { %s50_s15 = scalar_lea.vmem %s15_s7, 128  ;;  %p55_p4 = scmp.lt.s32.totalorder %s15_s7, %s15_s7 }
   0x9   :  { %p51_p3 = scmp.ne.s32.totalorder %s15_s7, %s50_s15  ;;  %p56_p5 = scmp.lt.s32.totalorder %s50_s15, %s50_s15 }
   0xb   :  { %p57_p6 = por %p56_p5, %p55_p4 }
   0xd   :  { %p58_p7 = pnand %p57_p6, %p51_p3 }
   0xf   :  { %61 = shalt.err (!%p58_p7)
}
  0x10   :  { %17 = dma.hbm_to_vmem [thread:$0]  %s124_s0, 128, %s15_s7, [#allocation3]  }
  0x11   :  { %84 = dma.done.wait [#allocation3], 128  }
  0x12   :  { %85 = vsyncadd [#allocation3], 4294967168  ;;  %s89_s18 = smov [#allocation5]   ;;  %v21_v0 = vld [vmem:[#allocation2] sm:$0xff] }
  0x13   :  { %s29_s19 = sshll.u32 %s89_s18, 4  ;;  %22 = vst [vmem:[#allocation5] sm:$0xff] %v21_v0  ;;  %s30_s19 = int_to_ptr.vmem [resolvable:$true] %s29_s19 }
  0x14   :  { %s62_s20 = scalar_lea.vmem %s30_s19, 128  ;;  %p67_p9 = scmp.lt.s32.totalorder %s30_s19, %s30_s19 }
  0x15   :  { %p63_p8 = scmp.ne.s32.totalorder %s30_s19, %s62_s20  ;;  %p68_p10 = scmp.lt.s32.totalorder %s62_s20, %s62_s20 }
  0x17   :  { %p69_p11 = por %p68_p10, %p67_p9 }
  0x19   :  { %p70_p12 = pnand %p69_p11, %p63_p8 }
  0x1b   :  { %73 = shalt.err (!%p70_p12)
}
  0x1c   :  { %s74_s23 = scalar_lea.hbm %s125_s1, 128 }
  0x1d   :  { %p75_p13 = scmp.ne.s32.totalorder %s125_s1, %s74_s23  ;;  %p78_p0 = scmp.lt.u32.totalorder %s74_s23, %s125_s1 }
  0x1f   :  { %p80_p1 = pnand %p78_p0, %p75_p13 }
  0x21   :  { %83 = shalt.err (!%p80_p1)
}
  0x22   :  { %32 = dma.vmem_to_hbm [thread:$0]  %s30_s19, 128, %s125_s1, [#allocation4]  }
  0x23   :  { %86 = dma.done.wait [#allocation4], 128  }
  0x24   :  { %87 = vsyncadd [#allocation4], 4294967168 }
  0x25   :  { %36 = vsyncpa [#allocation3], 1 }
  0x26   :  { %37 = vsyncpa [#allocation4], 1 }

// kernel: alexnet_map_forward.10
= control target key start
LH: loop header
LB: loop body
LE: loop exit
PB: predicated region body
PF: predicated region fallthrough
CT: control target
= control target key end

     0   :  { %s2370_s15 = smov 0   ;;  %s2372_s16 = smov 0   ;;  %s2857_s0 = inlined_call_operand.vmem [shape: bf16[900,363], index: 0, kind: input, shape index: {}]   ;;  %s2858_s1 = inlined_call_operand.vmem [shape: bf16[363,64], index: 1, kind: input, shape index: {}]   ;;  %s2859_s2 = inlined_call_operand.vmem [shape: f32[1,64], index: 2, kind: input, shape index: {}]   ;;  %s2860_s3 = inlined_call_operand.vmem [shape: f32[1,64], index: 3, kind: input, shape index: {}]   ;;  %s2861_s4 = inlined_call_operand.vmem [shape: bf16[900,64], index: 4, kind: output, shape index: {}]  }
   0x1   :  { %s2374_s17 = smov 0  }
   0x2 LB: > { %s2383_s18 = sadd.s32 4294967295, %s2310_s17   ;;  %s2385_s19 = sadd.s32 1, %s2310_s17   ;;  %s2310_s17 = sphi %s2374_s17, %s2868_s17   ;;  %s2306_s16 = sphi %s2372_s16, %s2867_s16   ;;  %s2302_s15 = sphi %s2370_s15, %s2866_s15  }
   0x3   : > { %s107_s20 = ssub.s32 %s2310_s17, %s2385_s19  ;;  %s110_s21 = sadd.s32 1, %s2306_s16 }
   0x4   : > { %p108_p0 = scmp.eq.s32.totalorder %s107_s20, 0  ;;  %p120_p1 = scmp.ne.s32.totalorder %s2306_s16, %s2302_s15 }
   0x5   : > { %p121_p2 = scmp.eq.s32.totalorder %s2383_s18, 3  ;;  %p1705_p3 = scmp.ge.s32.totalorder %s2310_s17, 1 }
   0x6   : > { %s2393_s22 = scalar_select %p108_p0, %s2306_s16, %s110_s21  }
   0x7   : > { %p2395_p4 = por %p121_p2, %p120_p1  ;;  %p174_p5 = scmp.lt.s32.totalorder %s2310_s17, 5 }
   0x9   : > { %p175_p6 = pnand %p1705_p3, %p174_p5 }
   0xa   : > { %v2169_v0 = vld [vmem:[%s2858_s1 + $0x40] sm:$0xff] (!%p175_p6)   ;;  %s2403_s26 = sshll.u32 (!%p175_p6), %s2383_s18, 5  ;;  %v2171_v2 = vld [vmem:[%s2858_s1 + $0x48] sm:$0xff] (!%p175_p6)   ;;  %v2173_v4 = vld [vmem:[%s2858_s1 + $0x50] sm:$0xff] (!%p175_p6)   ;;  %vm764_vm0 = vcmask (!%p175_p6), 1044480   ;;  %vm765_vm1 = vcmask (!%p175_p6), 1045504  }
   0xb   : > { %178 = sbr.rel (%p175_p6) target bundleno = 430 (0x1ae), region = 36  ;;  %v2170_v1 = vld [vmem:[%s2858_s1] sm:$0xff] (!%p175_p6)   ;;  %1882 = vmatprep.subr.bf16.mxu0 (!%p175_p6), %v2169_v0  ;;  %2063 = vmatprep.subr.bf16.mxu1 (!%p175_p6), %v2169_v0  ;;  %p211_p7 = scmp.lt.s32.totalorder (!%p175_p6), %s2403_s26, 112  ;;  %v2172_v3 = vld [vmem:[%s2858_s1 + $0x8] sm:$0xff] (!%p175_p6)   ;;  %v2174_v5 = vld [vmem:[%s2858_s1 + $0x10] sm:$0xff] (!%p175_p6)   ;;  %v2344_v32 = vmov (!%p175_p6), 65535  }
   0xc   : > { %1883 = vmatpush3.bf16.msra.mxu0 (!%p175_p6), %v2170_v1  ;;  %2071 = vmatpush3.bf16.msra.mxu1 (!%p175_p6), %v2170_v1  ;;  %v2175_v6 = vld [vmem:[%s2858_s1 + $0x58] sm:$0xff] (!%p175_p6)   ;;  %v2177_v8 = vld [vmem:[%s2858_s1 + $0x60] sm:$0xff] (!%p175_p6)   ;;  %v2179_v10 = vld [vmem:[%s2858_s1 + $0x68] sm:$0xff] (!%p175_p6)   ;;  %v766_v33 = vsel (!%p175_p6), %vm764_vm0, 4294967295, %v2344_v32  ;;  %vm715_vm2 = vcmask (!%p175_p6), 875520   ;;  %vm1331_vm3 = vcmask (!%p175_p6), 519168  }
   0xd   : > { %1884 = vmatprep.subr.bf16.mxu0 (!%p175_p6), %v2171_v2  ;;  %2064 = vmatprep.subr.bf16.mxu1 (!%p175_p6), %v2171_v2  ;;  %v2176_v7 = vld [vmem:[%s2858_s1 + $0x18] sm:$0xff] (!%p175_p6)   ;;  %v2178_v9 = vld [vmem:[%s2858_s1 + $0x20] sm:$0xff] (!%p175_p6)   ;;  %v2180_v13 = vld [vmem:[%s2858_s1 + $0x28] sm:$0xff] (!%p175_p6)   ;;  %v767_v39 = vsel (!%p175_p6), %vm765_vm1, %v766_v33, 0 }
   0xe   : > { %v2181_v14 = vld [vmem:[%s2858_s1 + $0x70] sm:$0xff] (!%p175_p6)   ;;  %v2183_v16 = vld [vmem:[%s2858_s1 + $0x78] sm:$0xff] (!%p175_p6)   ;;  %v2191_v18 = vld [vmem:[%s2858_s1 + $0x80] sm:$0xff] (!%p175_p6)  }
   0xf   : > { %v2182_v15 = vld [vmem:[%s2858_s1 + $0x30] sm:$0xff] (!%p175_p6)   ;;  %v2184_v17 = vld [vmem:[%s2858_s1 + $0x38] sm:$0xff] (!%p175_p6)   ;;  %v2192_v21 = vld [vmem:[%s2858_s1 + $0x88] sm:$0xff] (!%p175_p6)  }
  0x10   : > { %1885 = vmatpush3.bf16.msra.mxu0 (!%p175_p6), %v2172_v3  ;;  %2072 = vmatpush3.bf16.msra.mxu1 (!%p175_p6), %v2172_v3  ;;  %v2199_v25 = vld [vmem:[%s2858_s1 + $0x90] sm:$0xff] (!%p175_p6)   ;;  %v2204_v29 = vld [vmem:[%s2858_s1 + $0x98] sm:$0xff] (!%p175_p6)   ;;  %v2207_v31 = vld [vmem:[%s2858_s1 + $0xa0] sm:$0xff] (!%p175_p6)  }
  0x11   : > { %1886 = vmatprep.subr.bf16.mxu0 (!%p175_p6), %v2173_v4  ;;  %2065 = vmatprep.subr.bf16.mxu1 (!%p175_p6), %v2173_v4  ;;  %v2214_v37 = vld [vmem:[%s2858_s1 + $0xa8] sm:$0xff] (!%p175_p6)   ;;  %v2215_v38 = vld [vmem:[%s2858_s1 + $0xb0] sm:$0x3f] (!%p175_p6)  }
  0x12   : > { %s212_s9 = scalar_select %p211_p7, %s2403_s26, 112  ;;  %v769_v40 = vand.u32 %v2215_v38, %v767_v39 }
  0x13   : > { %s1372_s24 = ssub.s32 (%p2395_p4), 113, %s2403_s26  ;;  %s1879_s25 = sshll.u32 (%p2395_p4), %s2383_s18, 7 }
  0x14   : > { %s2079_s14 = smul.u32 12, %s212_s9  ;;  %1887 = vmatpush3.bf16.msra.mxu0 %v2174_v5  ;;  %2073 = vmatpush3.bf16.msra.mxu1 %v2174_v5  ;;  %p1373_p8 = scmp.lt.s32.totalorder (%p2395_p4), %s1372_s24, 32 }
  0x15   : > { %1888 = vmatprep.subr.bf16.mxu0 %v2175_v6  ;;  %2066 = vmatprep.subr.bf16.mxu1 %v2175_v6  ;;  %s2729_s30 = scalar_lea.vmem (%p2395_p4), %s2861_s4, %s1879_s25  }
  0x16   : > { %s2434_s28 = scalar_lea.vmem %s2857_s0, %s2079_s14  ;;  %s202_s14 = sand.u32 1, %s2302_s15  }
  0x17   : > { %v2187_v11 = vld [vmem:[%s2434_s28 + $0x4] ss:$12 sps:$4 sm:$0xff]   ;;  %v2185_v19 = vld [vmem:[%s2434_s28] ss:$12 sps:$4 sm:$0xff]   ;;  %v2193_v22 = vld [vmem:[%s2434_s28 + $0x1c] ss:$12 sps:$4 sm:$0xff]  }
  0x18   : > { %1889 = vmatpush3.bf16.msra.mxu0 %v2176_v7  ;;  %2074 = vmatpush3.bf16.msra.mxu1 %v2176_v7  ;;  %v2190_v12 = vld [vmem:[%s2434_s28 + $0x124] ss:$12 sps:$4 sm:$0xff]   ;;  %v2188_v20 = vld [vmem:[%s2434_s28 + $0x120] ss:$12 sps:$4 sm:$0xff]   ;;  %v2195_v23 = vld [vmem:[%s2434_s28 + $0x13c] ss:$12 sps:$4 sm:$0xff]  }
  0x19   : > { %1890 = vmatprep.subr.bf16.mxu0 %v2177_v8  ;;  %2067 = vmatprep.subr.bf16.mxu1 %v2177_v8  ;;  %v2197_v24 = vld [vmem:[%s2434_s28 + $0x18] ss:$12 sps:$4 sm:$0xff]   ;;  %v2200_v27 = vld [vmem:[%s2434_s28 + $0x34] ss:$12 sps:$4 sm:$0xff]   ;;  %v2205_v30 = vld [vmem:[%s2434_s28 + $0x30] ss:$12 sps:$4 sm:$0xff]  }
  0x1a   : > { %803 = vmatprep.mubr.bf16.mxu0 %v2187_v11  ;;  %899 = vmatprep.mubr.bf16.mxu1 %v2190_v12  ;;  %v2198_v26 = vld [vmem:[%s2434_s28 + $0x138] ss:$12 sps:$4 sm:$0xff]   ;;  %v2202_v28 = vld [vmem:[%s2434_s28 + $0x154] ss:$12 sps:$4 sm:$0xff]   ;;  %v2206_v34 = vld [vmem:[%s2434_s28 + $0x150] ss:$12 sps:$4 sm:$0xff]  }
  0x1b   : > { %v2208_v35 = vld [vmem:[%s2434_s28 + $0x4c] ss:$12 sps:$4 sm:$0xff]   ;;  %v2212_v41 = vld [vmem:[%s2434_s28 + $0x48] ss:$12 sps:$4 sm:$0xff]   ;;  %v2216_v43 = vld [vmem:[%s2434_s28 + $0x64] ss:$12 sps:$4 sm:$0xff]  }
  0x1c   : > { %1891 = vmatpush3.bf16.msra.mxu0 %v2178_v9  ;;  %2075 = vmatpush3.bf16.msra.mxu1 %v2178_v9  ;;  %v2210_v36 = vld [vmem:[%s2434_s28 + $0x16c] ss:$12 sps:$4 sm:$0xff]   ;;  %v2213_v42 = vld [vmem:[%s2434_s28 + $0x168] ss:$12 sps:$4 sm:$0xff]   ;;  %v2225_v50 = vld [vmem:[%s2434_s28 + $0x50] ss:$12 sps:$4 sm:$0xff]  }
  0x1d   : > { %1892 = vmatprep.subr.bf16.mxu0 %v2179_v10  ;;  %2068 = vmatprep.subr.bf16.mxu1 %v2179_v10  ;;  %v2218_v44 = vld [vmem:[%s2434_s28 + $0x8] ss:$12 sps:$4 sm:$0xff]   ;;  %v2219_v45 = vld [vmem:[%s2434_s28 + $0x60] ss:$12 sps:$4 sm:$0xff]   ;;  %v2223_v48 = vld [vmem:[%s2434_s28 + $0x38] ss:$12 sps:$4 sm:$0xff]  }
  0x1e   : > { %v2220_v46 = vld [vmem:[%s2434_s28 + $0x20] ss:$12 sps:$4 sm:$0xff]   ;;  %v2221_v47 = vld [vmem:[%s2434_s28 + $0x7c] ss:$12 sps:$4 sm:$0xff]   ;;  %v2224_v49 = vld [vmem:[%s2434_s28 + $0x78] ss:$12 sps:$4 sm:$0xff]  }
  0x1f   : > { %v2226_v51 = vld [vmem:[%s2434_s28 + $0x94] ss:$12 sps:$4 sm:$0xff]   ;;  %v2229_v53 = vld [vmem:[%s2434_s28 + $0x90] ss:$12 sps:$4 sm:$0xff]   ;;  %v2231_v55 = vld [vmem:[%s2434_s28 + $0xac] ss:$12 sps:$4 sm:$0xff]  }
  0x20   : > { %1893 = vmatpush3.bf16.msra.mxu0 %v2180_v13  ;;  %2076 = vmatpush3.bf16.msra.mxu1 %v2180_v13  ;;  %v2228_v52 = vld [vmem:[%s2434_s28 + $0x68] ss:$12 sps:$4 sm:$0xff]   ;;  %v2230_v54 = vld [vmem:[%s2434_s28 + $0x80] ss:$12 sps:$4 sm:$0xff]   ;;  %v2233_v56 = vld [vmem:[%s2434_s28 + $0x98] ss:$12 sps:$4 sm:$0xff]  }
  0x21   : > { %1894 = vmatprep.subr.bf16.mxu0 %v2181_v14  ;;  %2069 = vmatprep.subr.bf16.mxu1 %v2181_v14  ;;  %v2234_v57 = vld [vmem:[%s2434_s28 + $0xa8] ss:$12 sps:$4 sm:$0xff]   ;;  %v2235_v58 = vld [vmem:[%s2434_s28 + $0xb0] ss:$12 sps:$4 sm:$0xff]   ;;  %v2239_v61 = vld [vmem:[%s2434_s28 + $0xc0] ss:$12 sps:$4 sm:$0xff]  }
  0x22   : > { %v2236_v59 = vld [vmem:[%s2434_s28 + $0xc4] ss:$12 sps:$4 sm:$0xff]   ;;  %v2238_v60 = vld [vmem:[%s2434_s28 + $0xc8] ss:$12 sps:$4 sm:$0xff]   ;;  %v2240_v62 = vld [vmem:[%s2434_s28 + $0xe0] ss:$12 sps:$4 sm:$0xff]  }
  0x23   : > { %v2241_v63 = vld [vmem:[%s2434_s28 + $0xdc] ss:$12 sps:$4 sm:$0xff]   ;;  %v2243_v0 = vld [vmem:[%s2434_s28 + $0xf8] ss:$12 sps:$4 sm:$0xff]   ;;  %v2246_v3 = vld [vmem:[%s2434_s28 + $0xf4] ss:$12 sps:$4 sm:$0xff]  }
  0x24   : > { %1895 = vmatpush3.bf16.msra.mxu0 %v2182_v15  ;;  %2077 = vmatpush3.bf16.msra.mxu1 %v2182_v15  ;;  %v2244_v1 = vld [vmem:[%s2434_s28 + $0xd8] ss:$12 sps:$4 sm:$0xff]   ;;  %v2245_v2 = vld [vmem:[%s2434_s28 + $0x110] ss:$12 sps:$4 sm:$0xff]   ;;  %v2248_v4 = vld [vmem:[%s2434_s28 + $0x128] ss:$12 sps:$4 sm:$0xff]  }
  0x25   : > { %1896 = vmatprep.subr.bf16.mxu0 %v2183_v16  ;;  %2070 = vmatprep.subr.bf16.mxu1 %v2183_v16  ;;  %v2249_v5 = vld [vmem:[%s2434_s28 + $0xf0] ss:$12 sps:$4 sm:$0xff]   ;;  %v2250_v6 = vld [vmem:[%s2434_s28 + $0x140] ss:$12 sps:$4 sm:$0xff]   ;;  %v2253_v8 = vld [vmem:[%s2434_s28 + $0x158] ss:$12 sps:$4 sm:$0xff]  }
  0x26   : > { %v2251_v7 = vld [vmem:[%s2434_s28 + $0x10c] ss:$12 sps:$4 sm:$0xff]   ;;  %v2254_v9 = vld [vmem:[%s2434_s28 + $0x108] ss:$12 sps:$4 sm:$0xff]   ;;  %v2255_v10 = vld [vmem:[%s2434_s28 + $0x170] ss:$12 sps:$4 sm:$0xff]  }
  0x27   : > { %s1706_s15 = sshll.u32 %s202_s14, 7 }
  0x28   : > { %1897 = vmatpush3.bf16.msra.mxu0 %v2184_v17  ;;  %2078 = vmatpush3.bf16.msra.mxu1 %v2184_v17  ;;  %s2583_s21 = scalar_lea.vmem [#allocation2], %s1706_s15  }
  0x29   : > { %2017 = vmatprep.subr.bf16.mxu1 %v2191_v18 }
  0x2b   : > { %804 = vmatmul.mubr.bf16.vlgmr.msra.gmra.mrb[0].mxu0 %v2185_v19  ;;  %900 = vmatmul.mubr.bf16.vlgmr.msra.gmra.mrb[0].mxu1 %v2188_v20 }
  0x2c   : > { %2018 = vmatpush3.bf16.msra.mxu1 %v2191_v18  ;;  %811 = vmatprep.mubr.bf16.mxu0 %v2193_v22 }
  0x2d   : > { %2019 = vmatprep.subr.bf16.mxu1 %v2192_v21  ;;  %907 = vmatprep.mubr.bf16.mxu1 %v2195_v23 }
  0x30   : > { %2020 = vmatpush3.bf16.msra.mxu1 %v2192_v21 }
  0x31   : > { %2021 = vmatprep.subr.bf16.mxu1 %v2199_v25 }
  0x33   : > { %812 = vmatmul.mubr.bf16.gmra.mrb[4].mxu0 %v2197_v24  ;;  %908 = vmatmul.mubr.bf16.gmra.mrb[4].mxu1 %v2198_v26 }
  0x34   : > { %2022 = vmatpush3.bf16.msra.mxu1 %v2199_v25  ;;  %819 = vmatprep.mubr.bf16.mxu0 %v2200_v27 }
  0x35   : > { %915 = vmatprep.mubr.bf16.mxu1 %v2202_v28  ;;  %2023 = vmatprep.subr.bf16.mxu1 %v2204_v29 }
  0x38   : > { %2024 = vmatpush3.bf16.msra.mxu1 %v2204_v29 }
  0x39   : > { %2025 = vmatprep.subr.bf16.mxu1 %v2207_v31 }
  0x3b   : > { %820 = vmatmul.mubr.bf16.gmra.mrb[8].mxu0 %v2205_v30  ;;  %916 = vmatmul.mubr.bf16.gmra.mrb[8].mxu1 %v2206_v34 }
  0x3c   : > { %2026 = vmatpush3.bf16.msra.mxu1 %v2207_v31  ;;  %827 = vmatprep.mubr.bf16.mxu0 %v2208_v35 }
  0x3d   : > { %923 = vmatprep.mubr.bf16.mxu1 %v2210_v36  ;;  %2027 = vmatprep.subr.bf16.mxu1 %v2214_v37 }
  0x40   : > { %2028 = vmatpush3.bf16.msra.mxu1 %v2214_v37 }
  0x41   : > { %2029 = vmatprep.subr.bf16.mxu1 %v769_v40 }
  0x43   : > { %828 = vmatmul.mubr.bf16.gmra.mrb[12].mxu0 %v2212_v41  ;;  %924 = vmatmul.mubr.bf16.gmra.mrb[12].mxu1 %v2213_v42 }
  0x44   : > { %2030 = vmatpush3.bf16.msra.mxu1 %v769_v40  ;;  %835 = vmatprep.mubr.bf16.mxu0 %v2216_v43 }
  0x45   : > { %2031 = vmatprep.mubr.msk.bf16.mxu1 %vm715_vm2, %v2218_v44 }
  0x4b   : > { %836 = vmatmul.mubr.bf16.gmra.mrb[16].mxu0 %v2219_v45  ;;  %2032 = vmatmul.mubr.msk.bf16.vlgmr.msra.gmra.mrb[16].mxu1 %vm715_vm2, %v2220_v46 }
  0x4c   : > { %843 = vmatprep.mubr.bf16.mxu0 %v2221_v47  ;;  %2035 = vmatprep.mubr.msk.bf16.mxu1 %vm715_vm2, %v2223_v48 }
  0x53   : > { %844 = vmatmul.mubr.bf16.gmra.mrb[20].mxu0 %v2224_v49  ;;  %2036 = vmatmul.mubr.msk.bf16.gmra.mrb[20].mxu1 %vm715_vm2, %v2225_v50 }
  0x54   : > { %851 = vmatprep.mubr.bf16.mxu0 %v2226_v51  ;;  %2039 = vmatprep.mubr.msk.bf16.mxu1 %vm715_vm2, %v2228_v52 }
  0x5b   : > { %852 = vmatmul.mubr.bf16.gmra.mrb[24].mxu0 %v2229_v53  ;;  %2040 = vmatmul.mubr.msk.bf16.gmra.mrb[24].mxu1 %vm715_vm2, %v2230_v54 }
  0x5c   : > { %859 = vmatprep.mubr.bf16.mxu0 %v2231_v55  ;;  %2043 = vmatprep.mubr.msk.bf16.mxu1 %vm715_vm2, %v2233_v56 }
  0x63   : > { %860 = vmatmul.mubr.bf16.gmra.mrb[28].mxu0 %v2234_v57  ;;  %2044 = vmatmul.mubr.msk.bf16.gmra.mrb[28].mxu1 %vm715_vm2, %v2235_v58 }
  0x64   : > { %867 = vmatprep.mubr.bf16.mxu0 %v2236_v59  ;;  %2047 = vmatprep.mubr.msk.bf16.mxu1 %vm715_vm2, %v2238_v60 }
  0x6b   : > { %868 = vmatmul.mubr.bf16.gmra.mrb[32].mxu0 %v2239_v61  ;;  %2048 = vmatmul.mubr.msk.bf16.gmra.mrb[32].mxu1 %vm715_vm2, %v2240_v62  ;;  %v2563_v61 = vld [vmem:[%s2859_s2] ss:$0 sm:$0xff] }
  0x6c   : > { %875 = vmatprep.mubr.bf16.mxu0 %v2241_v63  ;;  %2051 = vmatprep.mubr.msk.bf16.mxu1 %vm715_vm2, %v2243_v0 }
  0x73   : > { %876 = vmatmul.mubr.bf16.gmra.mrb[36].mxu0 %v2244_v1  ;;  %2052 = vmatmul.mubr.msk.bf16.gmra.mrb[36].mxu1 %vm715_vm2, %v2245_v2  ;;  %v2569_v1 = vld [vmem:[%s2860_s3] ss:$0 sm:$0xff] }
  0x74   : > { %883 = vmatprep.mubr.bf16.mxu0 %v2246_v3  ;;  %2055 = vmatprep.mubr.msk.bf16.mxu1 %vm715_vm2, %v2248_v4 }
  0x7b   : > { %884 = vmatmul.mubr.bf16.gmra.mrb[40].mxu0 %v2249_v5  ;;  %2056 = vmatmul.mubr.msk.bf16.gmra.mrb[40].mxu1 %vm715_vm2, %v2250_v6 }
  0x7c   : > { %891 = vmatprep.mubr.bf16.mxu0 %v2251_v7  ;;  %2059 = vmatprep.mubr.msk.bf16.mxu1 %vm715_vm2, %v2253_v8 }
  0x83   : > { %892 = vmatmul.mubr.bf16.gmra.mrb[44].mxu0 %v2254_v9  ;;  %2060 = vmatmul.mubr.msk.bf16.gmra.mrb[44].mxu1 %vm715_vm2, %v2255_v10 }
  0xfe   : > { %v1898_v11 = vpop.f32.mrb[0].mxu0  ;;  %v1970_v12 = vpop.f32.mrb[0].mxu1 }
  0xff   : > { %v1899_v13 = vpop.f32.mrb[1].mxu0  ;;  %v1971_v14 = vpop.f32.mrb[1].mxu1 }
 0x100   : > { %v1900_v15 = vadd.f32 %v1899_v13, %v1898_v11  ;;  %v2542_v16 = vadd.f32 %v1971_v14, %v1970_v12  ;;  %v1901_v17 = vpop.f32.mrb[2].mxu0  ;;  %v1973_v18 = vpop.f32.mrb[2].mxu1 }
 0x101   : > { %v1902_v19 = vpop.f32.mrb[3].mxu0  ;;  %v1974_v20 = vpop.f32.mrb[3].mxu1 }
 0x102   : > { %v1903_v21 = vadd.f32 %v1902_v19, %v1901_v17  ;;  %v2544_v22 = vadd.f32 %v1974_v20, %v1973_v18 }
 0x106   : > { %v1904_v23 = vpop.f32.mrb[4].mxu0  ;;  %v1976_v24 = vpop.f32.mrb[4].mxu1 }
 0x107   : > { %v1905_v25 = vpop.f32.mrb[5].mxu0  ;;  %v1977_v26 = vpop.f32.mrb[5].mxu1 }
 0x108   : > { %v1906_v27 = vadd.f32 %v1905_v25, %v1904_v23  ;;  %v2546_v28 = vadd.f32 %v1977_v26, %v1976_v24  ;;  %v1907_v29 = vpop.f32.mrb[6].mxu0  ;;  %v1979_v30 = vpop.f32.mrb[6].mxu1 }
 0x109   : > { %v1908_v31 = vpop.f32.mrb[7].mxu0  ;;  %v1980_v32 = vpop.f32.mrb[7].mxu1 }
 0x10a   : > { %v1909_v33 = vadd.f32 %v1908_v31, %v1907_v29  ;;  %v2548_v34 = vadd.f32 %v1980_v32, %v1979_v30 }
 0x10e   : > { %v1910_v35 = vpop.f32.mrb[8].mxu0  ;;  %v1982_v36 = vpop.f32.mrb[8].mxu1 }
 0x10f   : > { %v1911_v37 = vpop.f32.mrb[9].mxu0  ;;  %v1983_v38 = vpop.f32.mrb[9].mxu1 }
 0x110   : > { %v1912_v39 = vadd.f32 %v1911_v37, %v1910_v35  ;;  %v2550_v40 = vadd.f32 %v1983_v38, %v1982_v36  ;;  %v1913_v41 = vpop.f32.mrb[10].mxu0  ;;  %v1985_v42 = vpop.f32.mrb[10].mxu1 }
 0x111   : > { %v1914_v43 = vpop.f32.mrb[11].mxu0  ;;  %v1986_v44 = vpop.f32.mrb[11].mxu1 }
 0x112   : > { %v2552_v45 = vadd.f32 %v1914_v43, %v1913_v41  ;;  %v2554_v46 = vadd.f32 %v1986_v44, %v1985_v42 }
 0x116   : > { %v1916_v47 = vpop.f32.mrb[12].mxu0  ;;  %v1988_v48 = vpop.f32.mrb[12].mxu1 }
 0x117   : > { %v1917_v49 = vpop.f32.mrb[13].mxu0  ;;  %v1989_v50 = vpop.f32.mrb[13].mxu1 }
 0x118   : > { %v1918_v51 = vadd.f32 %v1917_v49, %v1916_v47  ;;  %v2556_v52 = vadd.f32 %v1989_v50, %v1988_v48  ;;  %v1919_v53 = vpop.f32.mrb[14].mxu0  ;;  %v1991_v54 = vpop.f32.mrb[14].mxu1 }
 0x119   : > { %v1920_v55 = vpop.f32.mrb[15].mxu0  ;;  %v1992_v56 = vpop.f32.mrb[15].mxu1 }
 0x11a   : > { %v1921_v57 = vadd.f32 %v1920_v55, %v1919_v53  ;;  %v2558_v58 = vadd.f32 %v1992_v56, %v1991_v54 }
 0x11e   : > { %v1922_v59 = vpop.f32.mrb[16].mxu0  ;;  %v2033_v60 = vpop.f32.mrb[16].mxu1 }
 0x11f   : > { %v975_v62 = vadd.f32 %v2033_v60, %v1906_v27  ;;  %v1923_v63 = vpop.f32.mrb[17].mxu0  ;;  %v966_v0 = vpop.f32.mrb[17].mxu1 }
 0x120   : > { %v2571_v2 = vadd.f32 %v1923_v63, %v1922_v59  ;;  %v967_v3 = vadd.f32 %v1900_v15, %v966_v0  ;;  %v1925_v4 = vpop.f32.mrb[18].mxu0  ;;  %v2034_v5 = vpop.f32.mrb[18].mxu1 }
 0x121   : > { %v1102_v6 = vmul.f32 %v2563_v61, %v975_v62  ;;  %v978_v7 = vadd.f32 %v2034_v5, %v1909_v33  ;;  %v1926_v8 = vpop.f32.mrb[19].mxu0  ;;  %v969_v9 = vpop.f32.mrb[19].mxu1 }
 0x122   : > { %v1100_v10 = vmul.f32 %v2563_v61, %v967_v3  ;;  %v2575_v11 = vadd.f32 %v1926_v8, %v1925_v4  ;;  %v970_v12 = vadd.f32 %v1903_v21, %v969_v9 }
 0x123   : > { %v1141_v13 = vadd.f32 %v2569_v1, %v1102_v6  ;;  %v1103_v14 = vmul.f32 %v2563_v61, %v978_v7 }
 0x124   : > { %v1139_v17 = vadd.f32 %v2569_v1, %v1100_v10  ;;  %v1101_v15 = vmul.f32 %v2563_v61, %v970_v12 }
 0x125   : > { %v1173_v18 = vmax.f32 %v1141_v13, 0.0  ;;  %v1142_v19 = vadd.f32 %v2569_v1, %v1103_v14 }
 0x126   : > { %v1171_v20 = vmax.f32 %v1139_v17, 0.0  ;;  %v1140_v23 = vadd.f32 %v2569_v1, %v1101_v15  ;;  %v1928_v24 = vpop.f32.mrb[20].mxu0  ;;  %v2037_v25 = vpop.f32.mrb[20].mxu1 }
 0x127   : > { %v1849_v26 = vpack.c.bf16 %v1173_v18, %v1173_v18  ;;  %v1174_v21 = vmax.f32 %v1142_v19, 0.0  ;;  %v991_v27 = vadd.f32 %v2037_v25, %v1918_v51  ;;  %v1929_v29 = vpop.f32.mrb[21].mxu0  ;;  %v982_v30 = vpop.f32.mrb[21].mxu1 }
 0x128   : > { %v1847_v31 = vpack.c.bf16 %v1171_v20, %v1171_v20  ;;  %v1172_v32 = vmax.f32 %v1140_v23, 0.0  ;;  %v1930_v33 = vadd.f32 %v1929_v29, %v1928_v24  ;;  %v983_v35 = vadd.f32 %v1912_v39, %v982_v30  ;;  %v1931_v36 = vpop.f32.mrb[22].mxu0  ;;  %v2038_v37 = vpop.f32.mrb[22].mxu1 }
 0x129   : > { %1334 = vst.msk [vmem:[%s2583_s21 + $0x8] sm:$0xf] %vm1331_vm3, %v1849_v26  ;;  %v1850_v38 = vpack.c.bf16 %v1174_v21, %v1174_v21  ;;  %v1106_v41 = vmul.f32 %v2563_v61, %v991_v27  ;;  %v994_v42 = vadd.f32 %v2038_v37, %v1921_v57  ;;  %v1932_v43 = vpop.f32.mrb[23].mxu0  ;;  %v985_v44 = vpop.f32.mrb[23].mxu1 }
 0x12a   : > { %1332 = vst.msk [vmem:[%s2583_s21] sm:$0xf] %vm1331_vm3, %v1847_v31  ;;  %v1848_v47 = vpack.c.bf16 %v1172_v32, %v1172_v32  ;;  %v1104_v39 = vmul.f32 %v2563_v61, %v983_v35  ;;  %v1933_v48 = vadd.f32 %v1932_v43, %v1931_v36  ;;  %v986_v49 = vadd.f32 %v2552_v45, %v985_v44 }
 0x12b   : > { %1335 = vst.msk [vmem:[%s2583_s21 + $0xc] sm:$0xf] %vm1331_vm3, %v1850_v38  ;;  %v1145_v50 = vadd.f32 %v2569_v1, %v1106_v41  ;;  %v1107_v51 = vmul.f32 %v2563_v61, %v994_v42 }
 0x12c   : > { %1333 = vst.msk [vmem:[%s2583_s21 + $0x4] sm:$0xf] %vm1331_vm3, %v1848_v47  ;;  %v1143_v53 = vadd.f32 %v2569_v1, %v1104_v39  ;;  %v1105_v54 = vmul.f32 %v2563_v61, %v986_v49 }
 0x12d   : > { %v1177_v55 = vmax.f32 %v1145_v50, 0.0  ;;  %v1146_v56 = vadd.f32 %v2569_v1, %v1107_v51 }
 0x12e   : > { %v1175_v57 = vmax.f32 %v1143_v53, 0.0  ;;  %v1144_v59 = vadd.f32 %v2569_v1, %v1105_v54  ;;  %v1934_v45 = vpop.f32.mrb[24].mxu0  ;;  %v2041_v60 = vpop.f32.mrb[24].mxu1 }
 0x12f   : > { %v1853_v62 = vpack.c.bf16 %v1177_v55, %v1177_v55  ;;  %v1178_v63 = vmax.f32 %v1146_v56, 0.0  ;;  %v1007_v0 = vadd.f32 %v2041_v60, %v1930_v33  ;;  %v1935_v3 = vpop.f32.mrb[25].mxu0  ;;  %v998_v4 = vpop.f32.mrb[25].mxu1 }
 0x130   : > { %v1851_v5 = vpack.c.bf16 %v1175_v57, %v1175_v57  ;;  %v1176_v6 = vmax.f32 %v1144_v59, 0.0  ;;  %v1936_v7 = vadd.f32 %v1935_v3, %v1934_v45  ;;  %v999_v8 = vadd.f32 %v2571_v2, %v998_v4  ;;  %v1937_v9 = vpop.f32.mrb[26].mxu0  ;;  %v2042_v10 = vpop.f32.mrb[26].mxu1 }
 0x131   : > { %1338 = vst.msk [vmem:[%s2583_s21 + $0x18] sm:$0xf] %vm1331_vm3, %v1853_v62  ;;  %v1854_v12 = vpack.c.bf16 %v1178_v63, %v1178_v63  ;;  %v1110_v13 = vmul.f32 %v2563_v61, %v1007_v0  ;;  %v1010_v14 = vadd.f32 %v2042_v10, %v1933_v48  ;;  %v1938_v17 = vpop.f32.mrb[27].mxu0  ;;  %v1001_v15 = vpop.f32.mrb[27].mxu1 }
 0x132   : > { %1336 = vst.msk [vmem:[%s2583_s21 + $0x10] sm:$0xf] %vm1331_vm3, %v1851_v5  ;;  %v1852_v18 = vpack.c.bf16 %v1176_v6, %v1176_v6  ;;  %v1108_v19 = vmul.f32 %v2563_v61, %v999_v8  ;;  %v1939_v20 = vadd.f32 %v1938_v17, %v1937_v9  ;;  %v1002_v23 = vadd.f32 %v2575_v11, %v1001_v15 }
 0x133   : > { %1339 = vst.msk [vmem:[%s2583_s21 + $0x1c] sm:$0xf] %vm1331_vm3, %v1854_v12  ;;  %v1149_v2 = vadd.f32 %v2569_v1, %v1110_v13  ;;  %v1111_v24 = vmul.f32 %v2563_v61, %v1010_v14 }
 0x134   : > { %1337 = vst.msk [vmem:[%s2583_s21 + $0x14] sm:$0xf] %vm1331_vm3, %v1852_v18  ;;  %v1147_v25 = vadd.f32 %v2569_v1, %v1108_v19  ;;  %v1109_v26 = vmul.f32 %v2563_v61, %v1002_v23 }
 0x135   : > { %v1181_v21 = vmax.f32 %v1149_v2, 0.0  ;;  %v1150_v27 = vadd.f32 %v2569_v1, %v1111_v24 }
 0x136   : > { %v1179_v29 = vmax.f32 %v1147_v25, 0.0  ;;  %v1148_v30 = vadd.f32 %v2569_v1, %v1109_v26  ;;  %v1940_v11 = vpop.f32.mrb[28].mxu0  ;;  %v2045_v31 = vpop.f32.mrb[28].mxu1 }
 0x137   : > { %v1857_v32 = vpack.c.bf16 %v1181_v21, %v1181_v21  ;;  %v1182_v33 = vmax.f32 %v1150_v27, 0.0  ;;  %v1941_v35 = vpop.f32.mrb[29].mxu0  ;;  %v1014_v36 = vpop.f32.mrb[29].mxu1 }
 0x138   : > { %v1855_v37 = vpack.c.bf16 %v1179_v29, %v1179_v29  ;;  %v1180_v38 = vmax.f32 %v1148_v30, 0.0  ;;  %v1942_v41 = vadd.f32 %v1941_v35, %v1940_v11  ;;  %v1015_v42 = vadd.f32 %v1936_v7, %v1014_v36  ;;  %v1943_v43 = vpop.f32.mrb[30].mxu0  ;;  %v2046_v44 = vpop.f32.mrb[30].mxu1 }
 0x139   : > { %1342 = vst.msk [vmem:[%s2583_s21 + $0x28] sm:$0xf] %vm1331_vm3, %v1857_v32  ;;  %v1858_v47 = vpack.c.bf16 %v1182_v33, %v1182_v33  ;;  %v1944_v39 = vpop.f32.mrb[31].mxu0  ;;  %v1017_v48 = vpop.f32.mrb[31].mxu1 }
 0x13a   : > { %1340 = vst.msk [vmem:[%s2583_s21 + $0x20] sm:$0xf] %vm1331_vm3, %v1855_v37  ;;  %v1856_v49 = vpack.c.bf16 %v1180_v38, %v1180_v38  ;;  %v1023_v50 = vadd.f32 %v2045_v31, %v1942_v41  ;;  %v1112_v51 = vmul.f32 %v2563_v61, %v1015_v42  ;;  %v1945_v53 = vadd.f32 %v1944_v39, %v1943_v43 }
 0x13b   : > { %1343 = vst.msk [vmem:[%s2583_s21 + $0x2c] sm:$0xf] %vm1331_vm3, %v1858_v47  ;;  %v1018_v54 = vadd.f32 %v1939_v20, %v1017_v48 }
 0x13c   : > { %1341 = vst.msk [vmem:[%s2583_s21 + $0x24] sm:$0xf] %vm1331_vm3, %v1856_v49  ;;  %v1114_v55 = vmul.f32 %v2563_v61, %v1023_v50  ;;  %v1151_v56 = vadd.f32 %v2569_v1, %v1112_v51  ;;  %v1026_v57 = vadd.f32 %v2046_v44, %v1945_v53 }
 0x13d   : > { %v1113_v59 = vmul.f32 %v2563_v61, %v1018_v54 }
 0x13e   : > { %v1153_v45 = vadd.f32 %v2569_v1, %v1114_v55  ;;  %v1183_v60 = vmax.f32 %v1151_v56, 0.0  ;;  %v1115_v62 = vmul.f32 %v2563_v61, %v1026_v57  ;;  %v1946_v63 = vpop.f32.mrb[32].mxu0  ;;  %v2049_v0 = vpop.f32.mrb[32].mxu1 }
 0x13f   : > { %v1152_v3 = vadd.f32 %v2569_v1, %v1113_v59  ;;  %v1947_v4 = vpop.f32.mrb[33].mxu0  ;;  %v1030_v5 = vpop.f32.mrb[33].mxu1 }
 0x140   : > { %v1185_v6 = vmax.f32 %v1153_v45, 0.0  ;;  %v1859_v7 = vpack.c.bf16 %v1183_v60, %v1183_v60  ;;  %v1154_v8 = vadd.f32 %v2569_v1, %v1115_v62  ;;  %v1948_v9 = vadd.f32 %v1947_v4, %v1946_v63  ;;  %v1949_v10 = vpop.f32.mrb[34].mxu0  ;;  %v2050_v12 = vpop.f32.mrb[34].mxu1 }
 0x141   : > { %v1184_v13 = vmax.f32 %v1152_v3, 0.0  ;;  %v1950_v14 = vpop.f32.mrb[35].mxu0  ;;  %v1033_v17 = vpop.f32.mrb[35].mxu1 }
 0x142   : > { %v1861_v15 = vpack.c.bf16 %v1185_v6, %v1185_v6  ;;  %1344 = vst.msk [vmem:[%s2583_s21 + $0x30] sm:$0xf] %vm1331_vm3, %v1859_v7  ;;  %v1186_v18 = vmax.f32 %v1154_v8, 0.0  ;;  %v1031_v19 = vadd.f32 %v1948_v9, %v1030_v5  ;;  %v1951_v20 = vadd.f32 %v1950_v14, %v1949_v10 }
 0x143   : > { %v1860_v23 = vpack.c.bf16 %v1184_v13, %v1184_v13 }
 0x144   : > { %1346 = vst.msk [vmem:[%s2583_s21 + $0x38] sm:$0xf] %vm1331_vm3, %v1861_v15  ;;  %v1862_v2 = vpack.c.bf16 %v1186_v18, %v1186_v18  ;;  %v1116_v24 = vmul.f32 %v2563_v61, %v1031_v19  ;;  %v1034_v25 = vadd.f32 %v1951_v20, %v1033_v17 }
 0x145   : > { %1345 = vst.msk [vmem:[%s2583_s21 + $0x34] sm:$0xf] %vm1331_vm3, %v1860_v23 }
 0x146   : > { %1347 = vst.msk [vmem:[%s2583_s21 + $0x3c] sm:$0xf] %vm1331_vm3, %v1862_v2  ;;  %v1155_v26 = vadd.f32 %v2569_v1, %v1116_v24  ;;  %v1117_v21 = vmul.f32 %v2563_v61, %v1034_v25  ;;  %v1952_v27 = vpop.f32.mrb[36].mxu0  ;;  %v2647_v29 = vpop.f32.mrb[36].mxu1 }
 0x147   : > { %v1953_v30 = vpop.f32.mrb[37].mxu0  ;;  %v1046_v11 = vpop.f32.mrb[37].mxu1 }
 0x148   : > { %v1187_v31 = vmax.f32 %v1155_v26, 0.0  ;;  %v1156_v32 = vadd.f32 %v2569_v1, %v1117_v21  ;;  %v1954_v33 = vadd.f32 %v1953_v30, %v1952_v27  ;;  %v1955_v35 = vpop.f32.mrb[38].mxu0  ;;  %v2650_v36 = vpop.f32.mrb[38].mxu1 }
 0x149   : > { %v1956_v37 = vpop.f32.mrb[39].mxu0  ;;  %v1049_v38 = vpop.f32.mrb[39].mxu1 }
 0x14a   : > { %v1863_v41 = vpack.c.bf16 %v1187_v31, %v1187_v31  ;;  %v1188_v42 = vmax.f32 %v1156_v32, 0.0  ;;  %v1039_v43 = vadd.f32 %v2049_v0, %v1954_v33  ;;  %v1957_v44 = vadd.f32 %v1956_v37, %v1955_v35 }
 0x14c   : > { %1348 = vst.msk [vmem:[%s2583_s21 + $0x40] sm:$0xf] %vm1331_vm3, %v1863_v41  ;;  %v1864_v47 = vpack.c.bf16 %v1188_v42, %v1188_v42  ;;  %v1118_v39 = vmul.f32 %v2563_v61, %v1039_v43  ;;  %v1042_v48 = vadd.f32 %v2050_v12, %v1957_v44 }
 0x14e   : > { %1349 = vst.msk [vmem:[%s2583_s21 + $0x44] sm:$0xf] %vm1331_vm3, %v1864_v47  ;;  %v1157_v49 = vadd.f32 %v2569_v1, %v1118_v39  ;;  %v1119_v50 = vmul.f32 %v2563_v61, %v1042_v48  ;;  %v1958_v51 = vpop.f32.mrb[40].mxu0  ;;  %v2057_v53 = vpop.f32.mrb[40].mxu1 }
 0x14f   : > { %v1071_v54 = vadd.f32 %v2057_v53, %v2546_v28  ;;  %v1959_v55 = vpop.f32.mrb[41].mxu0  ;;  %v1062_v56 = vpop.f32.mrb[41].mxu1 }
 0x150   : > { %v1189_v57 = vmax.f32 %v1157_v49, 0.0  ;;  %v1158_v59 = vadd.f32 %v2569_v1, %v1119_v50  ;;  %v1960_v45 = vadd.f32 %v1959_v55, %v1958_v51  ;;  %v1063_v60 = vadd.f32 %v2542_v16, %v1062_v56  ;;  %v1961_v62 = vpop.f32.mrb[42].mxu0  ;;  %v2058_v63 = vpop.f32.mrb[42].mxu1 }
 0x151   : > { %v1126_v0 = vmul.f32 %v2563_v61, %v1071_v54  ;;  %v1074_v3 = vadd.f32 %v2058_v63, %v2548_v34  ;;  %v1962_v4 = vpop.f32.mrb[43].mxu0  ;;  %v1065_v5 = vpop.f32.mrb[43].mxu1 }
 0x152   : > { %v1865_v6 = vpack.c.bf16 %v1189_v57, %v1189_v57  ;;  %v1190_v28 = vmax.f32 %v1158_v59, 0.0  ;;  %v1047_v7 = vadd.f32 %v1960_v45, %v1046_v11  ;;  %v1124_v8 = vmul.f32 %v2563_v61, %v1063_v60 }
 0x153   : > { %v1165_v9 = vadd.f32 %v2569_v1, %v1126_v0  ;;  %v1127_v10 = vmul.f32 %v2563_v61, %v1074_v3  ;;  %v1963_v12 = vadd.f32 %v1962_v4, %v1961_v62  ;;  %v1066_v16 = vadd.f32 %v2544_v22, %v1065_v5 }
 0x154   : > { %1350 = vst.msk [vmem:[%s2583_s21 + $0x48] sm:$0xf] %vm1331_vm3, %v1865_v6  ;;  %v1866_v13 = vpack.c.bf16 %v1190_v28, %v1190_v28  ;;  %v1120_v34 = vmul.f32 %v2563_v61, %v1047_v7  ;;  %v1163_v14 = vadd.f32 %v2569_v1, %v1124_v8 }
 0x155   : > { %v1197_v17 = vmax.f32 %v1165_v9, 0.0  ;;  %v1166_v15 = vadd.f32 %v2569_v1, %v1127_v10  ;;  %v1050_v18 = vadd.f32 %v1963_v12, %v1049_v38  ;;  %v1125_v19 = vmul.f32 %v2563_v61, %v1066_v16 }
 0x156   : > { %1351 = vst.msk [vmem:[%s2583_s21 + $0x4c] sm:$0xf] %vm1331_vm3, %v1866_v13  ;;  %v1159_v20 = vadd.f32 %v2569_v1, %v1120_v34  ;;  %v1195_v23 = vmax.f32 %v1163_v14, 0.0  ;;  %v1964_v22 = vpop.f32.mrb[44].mxu0  ;;  %v2061_v2 = vpop.f32.mrb[44].mxu1 }
 0x157   : > { %v1873_v24 = vpack.c.bf16 %v1197_v17, %v1197_v17  ;;  %v1198_v25 = vmax.f32 %v1166_v15, 0.0  ;;  %v1121_v26 = vmul.f32 %v2563_v61, %v1050_v18  ;;  %v1164_v21 = vadd.f32 %v2569_v1, %v1125_v19  ;;  %v1965_v27 = vpop.f32.mrb[45].mxu0  ;;  %v1078_v30 = vpop.f32.mrb[45].mxu1 }
 0x158   : > { %v1191_v11 = vmax.f32 %v1159_v20, 0.0  ;;  %v1871_v31 = vpack.c.bf16 %v1195_v23, %v1195_v23  ;;  %v1087_v32 = vadd.f32 %v2061_v2, %v2556_v52  ;;  %v1966_v33 = vadd.f32 %v1965_v27, %v1964_v22  ;;  %v1967_v35 = vpop.f32.mrb[46].mxu0  ;;  %v2062_v37 = vpop.f32.mrb[46].mxu1 }
 0x159   : > { %1358 = vst.msk [vmem:[%s2583_s21 + $0x68] sm:$0xf] %vm1331_vm3, %v1873_v24  ;;  %v1874_v38 = vpack.c.bf16 %v1198_v25, %v1198_v25  ;;  %v1160_v41 = vadd.f32 %v2569_v1, %v1121_v26  ;;  %v1196_v42 = vmax.f32 %v1164_v21, 0.0  ;;  %v1079_v43 = vadd.f32 %v2550_v40, %v1078_v30  ;;  %v1968_v44 = vpop.f32.mrb[47].mxu0  ;;  %v1081_v47 = vpop.f32.mrb[47].mxu1 }
 0x15a   : > { %v1867_v39 = vpack.c.bf16 %v1191_v11, %v1191_v11  ;;  %1356 = vst.msk [vmem:[%s2583_s21 + $0x60] sm:$0xf] %vm1331_vm3, %v1871_v31  ;;  %v1130_v52 = vmul.f32 %v2563_v61, %v1087_v32  ;;  %v1055_v48 = vadd.f32 %v2647_v29, %v1966_v33  ;;  %v1090_v49 = vadd.f32 %v2062_v37, %v2558_v58 }
 0x15b   : > { %1359 = vst.msk [vmem:[%s2583_s21 + $0x6c] sm:$0xf] %vm1331_vm3, %v1874_v38  ;;  %v1192_v50 = vmax.f32 %v1160_v41, 0.0  ;;  %v1872_v51 = vpack.c.bf16 %v1196_v42, %v1196_v42  ;;  %v1128_v53 = vmul.f32 %v2563_v61, %v1079_v43  ;;  %v1969_v40 = vadd.f32 %v1968_v44, %v1967_v35 }
 0x15c   : > { %1352 = vst.msk [vmem:[%s2583_s21 + $0x50] sm:$0xf] %vm1331_vm3, %v1867_v39  ;;  %v1169_v54 = vadd.f32 %v2569_v1, %v1130_v52  ;;  %v1122_v55 = vmul.f32 %v2563_v61, %v1055_v48  ;;  %v1131_v56 = vmul.f32 %v2563_v61, %v1090_v49  ;;  %v1082_v29 = vadd.f32 %v2554_v46, %v1081_v47 }
 0x15d   : > { %v1868_v57 = vpack.c.bf16 %v1192_v50, %v1192_v50  ;;  %1357 = vst.msk [vmem:[%s2583_s21 + $0x64] sm:$0xf] %vm1331_vm3, %v1872_v51  ;;  %v1167_v58 = vadd.f32 %v2569_v1, %v1128_v53  ;;  %v1058_v59 = vadd.f32 %v2650_v36, %v1969_v40 }
 0x15e   : > { %v1201_v45 = vmax.f32 %v1169_v54, 0.0  ;;  %v1161_v60 = vadd.f32 %v2569_v1, %v1122_v55  ;;  %v1170_v62 = vadd.f32 %v2569_v1, %v1131_v56  ;;  %v1129_v63 = vmul.f32 %v2563_v61, %v1082_v29 }
 0x15f   : > { %1353 = vst.msk [vmem:[%s2583_s21 + $0x54] sm:$0xf] %vm1331_vm3, %v1868_v57  ;;  %v1199_v46 = vmax.f32 %v1167_v58, 0.0  ;;  %v1123_v0 = vmul.f32 %v2563_v61, %v1058_v59 }
 0x160   : > { %v1877_v3 = vpack.c.bf16 %v1201_v45, %v1201_v45  ;;  %v1193_v4 = vmax.f32 %v1161_v60, 0.0  ;;  %v1202_v36 = vmax.f32 %v1170_v62, 0.0  ;;  %v1168_v5 = vadd.f32 %v2569_v1, %v1129_v63 }
 0x161   : > { %v1875_v6 = vpack.c.bf16 %v1199_v46, %v1199_v46  ;;  %v1162_v28 = vadd.f32 %v2569_v1, %v1123_v0  ;;  %1370 = sbr.rel (!%p2395_p4) target bundleno = 430 (0x1ae), region = 40 }
 0x162   : > { %1362 = vst.msk [vmem:[%s2583_s21 + $0x78] sm:$0xf] %vm1331_vm3, %v1877_v3  ;;  %v1869_v7 = vpack.c.bf16 %v1193_v4, %v1193_v4  ;;  %v1878_v8 = vpack.c.bf16 %v1202_v36, %v1202_v36  ;;  %v1200_v9 = vmax.f32 %v1168_v5, 0.0 }
 0x163   : > { %1360 = vst.msk [vmem:[%s2583_s21 + $0x70] sm:$0xf] %vm1331_vm3, %v1875_v6  ;;  %v1194_v10 = vmax.f32 %v1162_v28, 0.0 }
 0x164   : > { %1354 = vst.msk [vmem:[%s2583_s21 + $0x58] sm:$0xf] %vm1331_vm3, %v1869_v7  ;;  %1363 = vst.msk [vmem:[%s2583_s21 + $0x7c] sm:$0xf] %vm1331_vm3, %v1878_v8  ;;  %v1876_v61 = vpack.c.bf16 %v1200_v9, %v1200_v9 }
 0x165   : > { %v1870_v12 = vpack.c.bf16 %v1194_v10, %v1194_v10 }
 0x166   : > { %1361 = vst.msk [vmem:[%s2583_s21 + $0x74] sm:$0xf] %vm1331_vm3, %v1876_v61 }
 0x167   : > { %1355 = vst.msk [vmem:[%s2583_s21 + $0x5c] sm:$0xf] %vm1331_vm3, %v1870_v12 }
 0x168   : > { %s2870_s24 = smov (!%p1373_p8, %s1372_s24), 32 }
 0x169   : > { %s1832_s5 = sshll.u32 %s2870_s24, 6 }
 0x16a   : > { %p1835_p9 = scmp.eq.s32.totalorder %s1832_s5, 0 }
 0x16b   : > { %s2735_s6 = sshrl.u32 (!%p1835_p9), %s2870_s24, 5 }
 0x16c   : > { %1381 = sbr.rel (%p1835_p9) target bundleno = 430 (0x1ae), region = 44  ;;  %p1836_p10 = scmp.le.s32.totalorder (!%p1835_p9), %s2735_s6, 0 }
 0x173   : > { %1658 = sbr.rel (%p1836_p10) target bundleno = 409 (0x199), region = 116  ;;  %s2863_s18 = smov (!%p1836_p10), %s2729_s30 }
 0x174   : > { %s2864_s23 = smov (!%p1836_p10), %s2583_s21  ;;  %s2744_s26 = smov (!%p1836_p10), 0  }
 0x175   : > { %s2746_s7 = smov (!%p1836_p10), 0  }
 0x17a LB: >> { %v1397_v1 = vld [vmem:[%s2318_s23] sm:$0xf]  ;;  %v1399_v16 = vld [vmem:[%s2318_s23 + $0x4] sm:$0xf]  ;;  %v1401_v13 = vld [vmem:[%s2318_s23 + $0x8] sm:$0xf]  ;;  %s2326_s7 = sphi %s2746_s7, %s1391_s7   ;;  %s2322_s26 = sphi %s2744_s26, %s2865_s26   ;;  %s2318_s23 = sphi %s2864_s23, %s1466_s23   ;;  %s2314_s18 = sphi %s2863_s18, %s1467_s18  }
 0x17b   : >> { %1398 = vst [vmem:[%s2314_s18] sm:$0xf] %v1397_v1  ;;  %1400 = vst [vmem:[%s2314_s18 + $0x4] sm:$0xf] %v1399_v16  ;;  %v1403_v34 = vld [vmem:[%s2318_s23 + $0xc] sm:$0xf]  ;;  %s1461_s8 = sadd.s32 1, %s2322_s26 }
 0x17c   : >> { %1402 = vst [vmem:[%s2314_s18 + $0x8] sm:$0xf] %v1401_v13  ;;  %v1405_v14 = vld [vmem:[%s2318_s23 + $0x10] sm:$0xf]  ;;  %v1407_v17 = vld [vmem:[%s2318_s23 + $0x14] sm:$0xf]  ;;  %p1462_p11 = scmp.ge.s32.totalorder %s1461_s8, %s2735_s6 }
 0x17d   : >> { %1404 = vst [vmem:[%s2314_s18 + $0xc] sm:$0xf] %v1403_v34  ;;  %1406 = vst [vmem:[%s2314_s18 + $0x10] sm:$0xf] %v1405_v14  ;;  %v1409_v15 = vld [vmem:[%s2318_s23 + $0x18] sm:$0xf] }
 0x17e   : >> { %1408 = vst [vmem:[%s2314_s18 + $0x14] sm:$0xf] %v1407_v17  ;;  %v1411_v18 = vld [vmem:[%s2318_s23 + $0x1c] sm:$0xf]  ;;  %v1413_v19 = vld [vmem:[%s2318_s23 + $0x20] sm:$0xf] }
 0x17f   : >> { %1410 = vst [vmem:[%s2314_s18 + $0x18] sm:$0xf] %v1409_v15  ;;  %1412 = vst [vmem:[%s2314_s18 + $0x1c] sm:$0xf] %v1411_v18  ;;  %v1415_v20 = vld [vmem:[%s2318_s23 + $0x24] sm:$0xf] }
 0x180   : >> { %1414 = vst [vmem:[%s2314_s18 + $0x20] sm:$0xf] %v1413_v19  ;;  %v1417_v23 = vld [vmem:[%s2318_s23 + $0x28] sm:$0xf]  ;;  %v1419_v22 = vld [vmem:[%s2318_s23 + $0x2c] sm:$0xf] }
 0x181   : >> { %1416 = vst [vmem:[%s2314_s18 + $0x24] sm:$0xf] %v1415_v20  ;;  %1418 = vst [vmem:[%s2314_s18 + $0x28] sm:$0xf] %v1417_v23  ;;  %v1421_v2 = vld [vmem:[%s2318_s23 + $0x30] sm:$0xf] }
 0x182   : >> { %1420 = vst [vmem:[%s2314_s18 + $0x2c] sm:$0xf] %v1419_v22  ;;  %v1423_v24 = vld [vmem:[%s2318_s23 + $0x34] sm:$0xf]  ;;  %v1425_v25 = vld [vmem:[%s2318_s23 + $0x38] sm:$0xf] }
 0x183   : >> { %1422 = vst [vmem:[%s2314_s18 + $0x30] sm:$0xf] %v1421_v2  ;;  %1424 = vst [vmem:[%s2314_s18 + $0x34] sm:$0xf] %v1423_v24  ;;  %v1427_v26 = vld [vmem:[%s2318_s23 + $0x3c] sm:$0xf] }
 0x184   : >> { %1426 = vst [vmem:[%s2314_s18 + $0x38] sm:$0xf] %v1425_v25  ;;  %v1429_v21 = vld [vmem:[%s2318_s23 + $0x40] sm:$0xf]  ;;  %v1431_v27 = vld [vmem:[%s2318_s23 + $0x44] sm:$0xf] }
 0x185   : >> { %1428 = vst [vmem:[%s2314_s18 + $0x3c] sm:$0xf] %v1427_v26  ;;  %1430 = vst [vmem:[%s2314_s18 + $0x40] sm:$0xf] %v1429_v21  ;;  %v1433_v30 = vld [vmem:[%s2318_s23 + $0x48] sm:$0xf] }
 0x186   : >> { %1432 = vst [vmem:[%s2314_s18 + $0x44] sm:$0xf] %v1431_v27  ;;  %v1435_v11 = vld [vmem:[%s2318_s23 + $0x4c] sm:$0xf]  ;;  %v1437_v31 = vld [vmem:[%s2318_s23 + $0x50] sm:$0xf] }
 0x187   : >> { %1434 = vst [vmem:[%s2314_s18 + $0x48] sm:$0xf] %v1433_v30  ;;  %1436 = vst [vmem:[%s2314_s18 + $0x4c] sm:$0xf] %v1435_v11  ;;  %v1439_v32 = vld [vmem:[%s2318_s23 + $0x54] sm:$0xf] }
 0x188   : >> { %1438 = vst [vmem:[%s2314_s18 + $0x50] sm:$0xf] %v1437_v31  ;;  %v1441_v33 = vld [vmem:[%s2318_s23 + $0x58] sm:$0xf]  ;;  %v1443_v35 = vld [vmem:[%s2318_s23 + $0x5c] sm:$0xf] }
 0x189   : >> { %1440 = vst [vmem:[%s2314_s18 + $0x54] sm:$0xf] %v1439_v32  ;;  %1442 = vst [vmem:[%s2314_s18 + $0x58] sm:$0xf] %v1441_v33  ;;  %v1445_v37 = vld [vmem:[%s2318_s23 + $0x60] sm:$0xf] }
 0x18a   : >> { %1444 = vst [vmem:[%s2314_s18 + $0x5c] sm:$0xf] %v1443_v35  ;;  %v1447_v38 = vld [vmem:[%s2318_s23 + $0x64] sm:$0xf]  ;;  %v1449_v41 = vld [vmem:[%s2318_s23 + $0x68] sm:$0xf] }
 0x18b   : >> { %1446 = vst [vmem:[%s2314_s18 + $0x60] sm:$0xf] %v1445_v37  ;;  %1448 = vst [vmem:[%s2314_s18 + $0x64] sm:$0xf] %v1447_v38  ;;  %v1451_v42 = vld [vmem:[%s2318_s23 + $0x6c] sm:$0xf] }
 0x18c   : >> { %1450 = vst [vmem:[%s2314_s18 + $0x68] sm:$0xf] %v1449_v41  ;;  %v1453_v43 = vld [vmem:[%s2318_s23 + $0x70] sm:$0xf]  ;;  %v1455_v44 = vld [vmem:[%s2318_s23 + $0x74] sm:$0xf] }
 0x18d   : >> { %1452 = vst [vmem:[%s2314_s18 + $0x6c] sm:$0xf] %v1451_v42  ;;  %1454 = vst [vmem:[%s2314_s18 + $0x70] sm:$0xf] %v1453_v43  ;;  %v1457_v47 = vld [vmem:[%s2318_s23 + $0x78] sm:$0xf] }
 0x18e   : >> { %1456 = vst [vmem:[%s2314_s18 + $0x74] sm:$0xf] %v1455_v44  ;;  %v1459_v39 = vld [vmem:[%s2318_s23 + $0x7c] sm:$0xf]  ;;  %1458 = vst [vmem:[%s2314_s18 + $0x78] sm:$0xf] %v1457_v47 }
 0x18f   : >> { %1460 = vst [vmem:[%s2314_s18 + $0x7c] sm:$0xf] %v1459_v39  ;;  %s2872_s8 = smov (%p1462_p11, %s1461_s8), 0  ;;  %s1391_s7 = sadd.s32 1, %s2326_s7  }
 0x190   : >> { %s1837_s9 = sshll.u32 %s2872_s8, 7  ;;  %p1390_p12 = scmp.ge.s32.totalorder %s1391_s7, %s2735_s6 }
 0x191   : >> { %s1466_s23 = scalar_lea.vmem %s2583_s21, %s1837_s9 [#allocation2]   ;;  %s1467_s18 = scalar_lea.vmem %s2729_s30, %s1837_s9  }
 0x192   : >> { %s2865_s26 = smov %s2872_s8  ;;  %1393 = sbr.rel (!%p1390_p12) target bundleno = 378 (0x17a), region = 122 }
 0x199 PF: > { %s2839_s10 = sand.u32 31, %s2870_s24   ;;  %s1880_s11 = sshll.u32 %s2735_s6, 7 }
 0x19a   : > { %s1472_s12 = scalar_lea.vmem %s2583_s21, %s1880_s11 [#allocation2]   ;;  %s1474_s28 = scalar_lea.vmem %s2729_s30, %s1880_s11  }
 0x19b   : > { %p1842_p13 = scmp.le.s32.totalorder %s2839_s10, 0 }
 0x19c   : > { %s2328_s13 = smov (!%p1842_p13), %s1474_s28   ;;  %s2332_s14 = smov (!%p1842_p13), %s1472_s12  }
 0x19d   : > { %1672 = sbr.rel (%p1842_p13) target bundleno = 430 (0x1ae), region = 127  ;;  %s2336_s17 = smov (!%p1842_p13), 0  }
 0x19e   : > { %s2340_s20 = smov (!%p1842_p13), 0  }
 0x1a4 LB: >> { %v1484_v52 = vld [vmem:[%s2334_s14] sm:$0xf]  ;;  %s1486_s15 = sadd.s32 1, %s2338_s17  ;;  %s1478_s20 = sadd.s32 1, %s2342_s20   ;;  %s2342_s20 = sphi %s2340_s20, %s1478_s20   ;;  %s2338_s17 = sphi %s2336_s17, %s2337_s17   ;;  %s2334_s14 = sphi %s2332_s14, %s1491_s14   ;;  %s2330_s13 = sphi %s2328_s13, %s1492_s13  }
 0x1a5   : >> { %1485 = vst [vmem:[%s2330_s13] sm:$0xf] %v1484_v52  ;;  %p1487_p0 = scmp.ge.s32.totalorder %s1486_s15, %s2839_s10  ;;  %p1477_p1 = scmp.ge.s32.totalorder %s1478_s20, %s2839_s10 }
 0x1a7   : >> { %s2874_s15 = smov (%p1487_p0, %s1486_s15), 0  ;;  %1480 = sbr.rel (!%p1477_p1) target bundleno = 420 (0x1a4), region = 133 }
 0x1a8   : >> { %s1843_s21 = sshll.u32 %s2874_s15, 2  ;;  %s2337_s17 = smov %s2874_s15  }
 0x1a9   : >> { %s1491_s14 = scalar_lea.vmem %s1472_s12, %s1843_s21 [#allocation2]   ;;  %s1492_s13 = scalar_lea.vmem %s1474_s28, %s1843_s21  }
 0x1ae PF: > { %p11_p2 = scmp.ge.s32.totalorder %s2385_s19, 6   ;;  %s2866_s15 = smov %s2306_s16 }
 0x1af   : > { %s2867_s16 = smov %s2393_s22  ;;  %s2868_s17 = smov %s2385_s19 }
 0x1b0   :  { %13 = sbr.rel (!%p11_p2) target bundleno = 2 (0x2), region = 144 }

// kernel: alexnet_map_forward.11
= control target key start
LH: loop header
LB: loop body
LE: loop exit
PB: predicated region body
PF: predicated region fallthrough
CT: control target
= control target key end

     0   :  { %s841_s0 = inlined_call_operand.vmem [shape: bf16[9,112,128], index: 0, kind: input, shape index: {}]   ;;  %s842_s1 = inlined_call_operand.vmem [shape: bf16[112,128], index: 1, kind: output, shape index: {}]  }
   0x1   :  { %v8_v0 = vld [vmem:[%s841_s0] sm:$0xf]  ;;  %v9_v1 = vld [vmem:[%s841_s0 + $0x4] sm:$0xf]  ;;  %v272_v2 = vld [vmem:[%s841_s0 + $0x38] sm:$0xf] }
   0x2   :  { %v273_v3 = vld [vmem:[%s841_s0 + $0x3c] sm:$0xf]  ;;  %v37_v4 = vmax.bf16 %v272_v2, %v8_v0  ;;  %v286_v5 = vld [vmem:[%s841_s0 + $0x70] sm:$0xf]  ;;  %v287_v6 = vld [vmem:[%s841_s0 + $0x74] sm:$0xf] }
   0x3   :  { %v38_v7 = vmax.bf16 %v273_v3, %v9_v1  ;;  %v300_v8 = vld [vmem:[%s841_s0 + $0xa8] sm:$0xf]  ;;  %v301_v10 = vld [vmem:[%s841_s0 + $0xac] sm:$0xf]  ;;  %v314_v12 = vld [vmem:[%s841_s0 + $0xe0] sm:$0xf] }
   0x4   :  { %v66_v9 = vmax.bf16 %v286_v5, %v37_v4  ;;  %v315_v14 = vld [vmem:[%s841_s0 + $0xe4] sm:$0xf]  ;;  %v328_v15 = vld [vmem:[%s841_s0 + $0x118] sm:$0xf]  ;;  %v329_v16 = vld [vmem:[%s841_s0 + $0x11c] sm:$0xf] }
   0x5   :  { %v67_v11 = vmax.bf16 %v287_v6, %v38_v7  ;;  %v10_v18 = vld [vmem:[%s841_s0 + $0x8] sm:$0xf]  ;;  %v11_v19 = vld [vmem:[%s841_s0 + $0xc] sm:$0xf]  ;;  %v274_v20 = vld [vmem:[%s841_s0 + $0x40] sm:$0xf] }
   0x6   :  { %v95_v13 = vmax.bf16 %v300_v8, %v66_v9  ;;  %v275_v22 = vld [vmem:[%s841_s0 + $0x44] sm:$0xf]  ;;  %v39_v23 = vmax.bf16 %v274_v20, %v10_v18  ;;  %v288_v24 = vld [vmem:[%s841_s0 + $0x78] sm:$0xf]  ;;  %v289_v25 = vld [vmem:[%s841_s0 + $0x7c] sm:$0xf] }
   0x7   :  { %v96_v17 = vmax.bf16 %v301_v10, %v67_v11  ;;  %v342_v27 = vld [vmem:[%s841_s0 + $0x150] sm:$0xf]  ;;  %v40_v28 = vmax.bf16 %v275_v22, %v11_v19  ;;  %v343_v31 = vld [vmem:[%s841_s0 + $0x154] sm:$0xf]  ;;  %v356_v32 = vld [vmem:[%s841_s0 + $0x188] sm:$0xf] }
   0x8   :  { %v124_v21 = vmax.bf16 %v314_v12, %v95_v13  ;;  %v302_v29 = vld [vmem:[%s841_s0 + $0xb0] sm:$0xf]  ;;  %v68_v33 = vmax.bf16 %v288_v24, %v39_v23  ;;  %v303_v34 = vld [vmem:[%s841_s0 + $0xb4] sm:$0xf]  ;;  %v357_v36 = vld [vmem:[%s841_s0 + $0x18c] sm:$0xf] }
   0x9   :  { %v125_v26 = vmax.bf16 %v315_v14, %v96_v17  ;;  %v370_v37 = vld [vmem:[%s841_s0 + $0x1c0] sm:$0xf]  ;;  %v69_v38 = vmax.bf16 %v289_v25, %v40_v28  ;;  %v316_v39 = vld [vmem:[%s841_s0 + $0xe8] sm:$0xf]  ;;  %v371_v41 = vld [vmem:[%s841_s0 + $0x1c4] sm:$0xf] }
   0xa   :  { %v153_v30 = vmax.bf16 %v328_v15, %v124_v21  ;;  %v97_v42 = vmax.bf16 %v302_v29, %v68_v33  ;;  %v317_v43 = vld [vmem:[%s841_s0 + $0xec] sm:$0xf]  ;;  %v330_v44 = vld [vmem:[%s841_s0 + $0x120] sm:$0xf]  ;;  %v331_v45 = vld [vmem:[%s841_s0 + $0x124] sm:$0xf] }
   0xb   :  { %v154_v35 = vmax.bf16 %v329_v16, %v125_v26  ;;  %v98_v47 = vmax.bf16 %v303_v34, %v69_v38  ;;  %v12_v48 = vld [vmem:[%s841_s0 + $0x10] sm:$0xf]  ;;  %v13_v49 = vld [vmem:[%s841_s0 + $0x14] sm:$0xf]  ;;  %v276_v50 = vld [vmem:[%s841_s0 + $0x48] sm:$0xf] }
   0xc   :  { %v182_v40 = vmax.bf16 %v342_v27, %v153_v30  ;;  %v126_v52 = vmax.bf16 %v316_v39, %v97_v42  ;;  %v277_v53 = vld [vmem:[%s841_s0 + $0x4c] sm:$0xf]  ;;  %v41_v54 = vmax.bf16 %v276_v50, %v12_v48  ;;  %v290_v55 = vld [vmem:[%s841_s0 + $0x80] sm:$0xf]  ;;  %v291_v56 = vld [vmem:[%s841_s0 + $0x84] sm:$0xf] }
   0xd   :  { %v183_v46 = vmax.bf16 %v343_v31, %v154_v35  ;;  %v127_v58 = vmax.bf16 %v317_v43, %v98_v47  ;;  %v344_v59 = vld [vmem:[%s841_s0 + $0x158] sm:$0xf]  ;;  %v42_v60 = vmax.bf16 %v277_v53, %v13_v49  ;;  %v345_v0 = vld [vmem:[%s841_s0 + $0x15c] sm:$0xf]  ;;  %v358_v1 = vld [vmem:[%s841_s0 + $0x190] sm:$0xf] }
   0xe   :  { %v211_v51 = vmax.bf16 %v356_v32, %v182_v40  ;;  %v304_v61 = vld [vmem:[%s841_s0 + $0xb8] sm:$0xf]  ;;  %v155_v63 = vmax.bf16 %v330_v44, %v126_v52  ;;  %v70_v2 = vmax.bf16 %v290_v55, %v41_v54  ;;  %v305_v3 = vld [vmem:[%s841_s0 + $0xbc] sm:$0xf]  ;;  %v359_v6 = vld [vmem:[%s841_s0 + $0x194] sm:$0xf] }
   0xf   :  { %v212_v57 = vmax.bf16 %v357_v36, %v183_v46  ;;  %v156_v5 = vmax.bf16 %v331_v45, %v127_v58  ;;  %v372_v7 = vld [vmem:[%s841_s0 + $0x1c8] sm:$0xf]  ;;  %v71_v8 = vmax.bf16 %v291_v56, %v42_v60  ;;  %v318_v9 = vld [vmem:[%s841_s0 + $0xf0] sm:$0xf]  ;;  %v373_v11 = vld [vmem:[%s841_s0 + $0x1cc] sm:$0xf] }
  0x10   :  { %v240_v62 = vmax.bf16 %v370_v37, %v211_v51  ;;  %v184_v10 = vmax.bf16 %v344_v59, %v155_v63  ;;  %v99_v12 = vmax.bf16 %v304_v61, %v70_v2  ;;  %v319_v13 = vld [vmem:[%s841_s0 + $0xf4] sm:$0xf]  ;;  %v332_v14 = vld [vmem:[%s841_s0 + $0x128] sm:$0xf]  ;;  %v333_v15 = vld [vmem:[%s841_s0 + $0x12c] sm:$0xf] }
  0x11   :  { %v241_v4 = vmax.bf16 %v371_v41, %v212_v57  ;;  %v185_v17 = vmax.bf16 %v345_v0, %v156_v5  ;;  %v100_v18 = vmax.bf16 %v305_v3, %v71_v8  ;;  %v14_v19 = vld [vmem:[%s841_s0 + $0x18] sm:$0xf]  ;;  %v15_v20 = vld [vmem:[%s841_s0 + $0x1c] sm:$0xf]  ;;  %v278_v21 = vld [vmem:[%s841_s0 + $0x50] sm:$0xf] }
  0x12   :  { %v213_v22 = vmax.bf16 %v358_v1, %v184_v10  ;;  %v128_v23 = vmax.bf16 %v318_v9, %v99_v12  ;;  %v279_v24 = vld [vmem:[%s841_s0 + $0x54] sm:$0xf]  ;;  %v43_v25 = vmax.bf16 %v278_v21, %v14_v19  ;;  %v292_v26 = vld [vmem:[%s841_s0 + $0x88] sm:$0xf]  ;;  %v293_v27 = vld [vmem:[%s841_s0 + $0x8c] sm:$0xf] }
  0x13   :  { %v419_v16 = vcombine.low %v240_v62, %v241_v4  ;;  %v214_v28 = vmax.bf16 %v359_v6, %v185_v17  ;;  %v129_v29 = vmax.bf16 %v319_v13, %v100_v18  ;;  %v346_v30 = vld [vmem:[%s841_s0 + $0x160] sm:$0xf]  ;;  %v44_v31 = vmax.bf16 %v279_v24, %v15_v20  ;;  %v347_v35 = vld [vmem:[%s841_s0 + $0x164] sm:$0xf]  ;;  %v360_v36 = vld [vmem:[%s841_s0 + $0x198] sm:$0xf] }
  0x14   :  { %v306_v32 = vld [vmem:[%s841_s0 + $0xc0] sm:$0xf]  ;;  %v242_v33 = vmax.bf16 %v372_v7, %v213_v22  ;;  %v157_v34 = vmax.bf16 %v332_v14, %v128_v23  ;;  %v72_v37 = vmax.bf16 %v292_v26, %v43_v25  ;;  %v307_v38 = vld [vmem:[%s841_s0 + $0xc4] sm:$0xf]  ;;  %v361_v41 = vld [vmem:[%s841_s0 + $0x19c] sm:$0xf] }
  0x15   :  { %388 = vst [vmem:[%s842_s1] sm:$0xff] %v419_v16   ;;  %v243_v39 = vmax.bf16 %v373_v11, %v214_v28  ;;  %v158_v40 = vmax.bf16 %v333_v15, %v129_v29  ;;  %v374_v42 = vld [vmem:[%s841_s0 + $0x1d0] sm:$0xf]  ;;  %v73_v43 = vmax.bf16 %v293_v27, %v44_v31  ;;  %v320_v44 = vld [vmem:[%s841_s0 + $0xf8] sm:$0xf]  ;;  %v375_v46 = vld [vmem:[%s841_s0 + $0x1d4] sm:$0xf] }
  0x16   :  { %v186_v45 = vmax.bf16 %v346_v30, %v157_v34  ;;  %v101_v47 = vmax.bf16 %v306_v32, %v72_v37  ;;  %v321_v48 = vld [vmem:[%s841_s0 + $0xfc] sm:$0xf]  ;;  %v334_v49 = vld [vmem:[%s841_s0 + $0x130] sm:$0xf]  ;;  %v335_v50 = vld [vmem:[%s841_s0 + $0x134] sm:$0xf] }
  0x17   :  { %v420_v51 = vcombine.low %v242_v33, %v243_v39  ;;  %v187_v52 = vmax.bf16 %v347_v35, %v158_v40  ;;  %v102_v53 = vmax.bf16 %v307_v38, %v73_v43  ;;  %v16_v54 = vld [vmem:[%s841_s0 + $0x20] sm:$0xf]  ;;  %v17_v55 = vld [vmem:[%s841_s0 + $0x24] sm:$0xf]  ;;  %v280_v56 = vld [vmem:[%s841_s0 + $0x58] sm:$0xf] }
  0x18   :  { %v215_v57 = vmax.bf16 %v360_v36, %v186_v45  ;;  %v130_v58 = vmax.bf16 %v320_v44, %v101_v47  ;;  %v281_v59 = vld [vmem:[%s841_s0 + $0x5c] sm:$0xf]  ;;  %v45_v60 = vmax.bf16 %v280_v56, %v16_v54  ;;  %v294_v61 = vld [vmem:[%s841_s0 + $0x90] sm:$0xf]  ;;  %v295_v62 = vld [vmem:[%s841_s0 + $0x94] sm:$0xf] }
  0x19   :  { %421 = vst [vmem:[%s842_s1 + $0x8] sm:$0xff] %v420_v51   ;;  %v216_v63 = vmax.bf16 %v361_v41, %v187_v52  ;;  %v131_v0 = vmax.bf16 %v321_v48, %v102_v53  ;;  %v348_v1 = vld [vmem:[%s841_s0 + $0x168] sm:$0xf]  ;;  %v46_v2 = vmax.bf16 %v281_v59, %v17_v55  ;;  %v349_v6 = vld [vmem:[%s841_s0 + $0x16c] sm:$0xf] }
  0x1a   :  { %v308_v3 = vld [vmem:[%s841_s0 + $0xc8] sm:$0xf]  ;;  %v244_v4 = vmax.bf16 %v374_v42, %v215_v57  ;;  %v159_v5 = vmax.bf16 %v334_v49, %v130_v58  ;;  %v362_v7 = vld [vmem:[%s841_s0 + $0x1a0] sm:$0xf]  ;;  %v74_v8 = vmax.bf16 %v294_v61, %v45_v60  ;;  %v309_v9 = vld [vmem:[%s841_s0 + $0xcc] sm:$0xf] }
  0x1b   :  { %v245_v10 = vmax.bf16 %v375_v46, %v216_v63  ;;  %v160_v11 = vmax.bf16 %v335_v50, %v131_v0  ;;  %v363_v12 = vld [vmem:[%s841_s0 + $0x1a4] sm:$0xf]  ;;  %v376_v13 = vld [vmem:[%s841_s0 + $0x1d8] sm:$0xf]  ;;  %v75_v14 = vmax.bf16 %v295_v62, %v46_v2  ;;  %v322_v15 = vld [vmem:[%s841_s0 + $0x100] sm:$0xf] }
  0x1c   :  { %v188_v16 = vmax.bf16 %v348_v1, %v159_v5  ;;  %v377_v17 = vld [vmem:[%s841_s0 + $0x1dc] sm:$0xf]  ;;  %v103_v18 = vmax.bf16 %v308_v3, %v74_v8  ;;  %v323_v19 = vld [vmem:[%s841_s0 + $0x104] sm:$0xf]  ;;  %v336_v20 = vld [vmem:[%s841_s0 + $0x138] sm:$0xf] }
  0x1d   :  { %v337_v21 = vld [vmem:[%s841_s0 + $0x13c] sm:$0xf]  ;;  %v422_v22 = vcombine.low %v244_v4, %v245_v10  ;;  %v189_v23 = vmax.bf16 %v349_v6, %v160_v11  ;;  %v104_v24 = vmax.bf16 %v309_v9, %v75_v14  ;;  %v18_v25 = vld [vmem:[%s841_s0 + $0x28] sm:$0xf]  ;;  %v19_v26 = vld [vmem:[%s841_s0 + $0x2c] sm:$0xf] }
  0x1e   :  { %v282_v27 = vld [vmem:[%s841_s0 + $0x60] sm:$0xf]  ;;  %v217_v28 = vmax.bf16 %v362_v7, %v188_v16  ;;  %v132_v29 = vmax.bf16 %v322_v15, %v103_v18  ;;  %v283_v30 = vld [vmem:[%s841_s0 + $0x64] sm:$0xf]  ;;  %v296_v32 = vld [vmem:[%s841_s0 + $0x98] sm:$0xf] }
  0x1f   :  { %v47_v31 = vmax.bf16 %v282_v27, %v18_v25  ;;  %v297_v33 = vld [vmem:[%s841_s0 + $0x9c] sm:$0xf]  ;;  %423 = vst [vmem:[%s842_s1 + $0x10] sm:$0xff] %v422_v22   ;;  %v218_v34 = vmax.bf16 %v363_v12, %v189_v23  ;;  %v133_v35 = vmax.bf16 %v323_v19, %v104_v24  ;;  %v350_v36 = vld [vmem:[%s841_s0 + $0x170] sm:$0xf]  ;;  %v48_v37 = vmax.bf16 %v283_v30, %v19_v26 }
  0x20   :  { %v310_v38 = vld [vmem:[%s841_s0 + $0xd0] sm:$0xf]  ;;  %v246_v39 = vmax.bf16 %v376_v13, %v217_v28  ;;  %v161_v40 = vmax.bf16 %v336_v20, %v132_v29  ;;  %v351_v41 = vld [vmem:[%s841_s0 + $0x174] sm:$0xf]  ;;  %v364_v42 = vld [vmem:[%s841_s0 + $0x1a8] sm:$0xf] }
  0x21   :  { %v76_v43 = vmax.bf16 %v296_v32, %v47_v31  ;;  %v311_v44 = vld [vmem:[%s841_s0 + $0xd4] sm:$0xf]  ;;  %v247_v45 = vmax.bf16 %v377_v17, %v218_v34  ;;  %v162_v46 = vmax.bf16 %v337_v21, %v133_v35  ;;  %v365_v47 = vld [vmem:[%s841_s0 + $0x1ac] sm:$0xf]  ;;  %v378_v48 = vld [vmem:[%s841_s0 + $0x1e0] sm:$0xf]  ;;  %v77_v49 = vmax.bf16 %v297_v33, %v48_v37 }
  0x22   :  { %v324_v50 = vld [vmem:[%s841_s0 + $0x108] sm:$0xf]  ;;  %v190_v51 = vmax.bf16 %v350_v36, %v161_v40  ;;  %v379_v52 = vld [vmem:[%s841_s0 + $0x1e4] sm:$0xf]  ;;  %v325_v54 = vld [vmem:[%s841_s0 + $0x10c] sm:$0xf] }
  0x23   :  { %v105_v53 = vmax.bf16 %v310_v38, %v76_v43  ;;  %v338_v55 = vld [vmem:[%s841_s0 + $0x140] sm:$0xf]  ;;  %v339_v56 = vld [vmem:[%s841_s0 + $0x144] sm:$0xf]  ;;  %v424_v57 = vcombine.low %v246_v39, %v247_v45  ;;  %v191_v58 = vmax.bf16 %v351_v41, %v162_v46  ;;  %v106_v59 = vmax.bf16 %v311_v44, %v77_v49  ;;  %v20_v60 = vld [vmem:[%s841_s0 + $0x30] sm:$0xf] }
  0x24   :  { %v21_v61 = vld [vmem:[%s841_s0 + $0x34] sm:$0xf]  ;;  %v284_v62 = vld [vmem:[%s841_s0 + $0x68] sm:$0xf]  ;;  %v219_v63 = vmax.bf16 %v364_v42, %v190_v51  ;;  %v285_v1 = vld [vmem:[%s841_s0 + $0x6c] sm:$0xf] }
  0x25   :  { %v134_v0 = vmax.bf16 %v324_v50, %v105_v53  ;;  %v49_v2 = vmax.bf16 %v284_v62, %v20_v60  ;;  %v298_v3 = vld [vmem:[%s841_s0 + $0xa0] sm:$0xf]  ;;  %v299_v4 = vld [vmem:[%s841_s0 + $0xa4] sm:$0xf]  ;;  %425 = vst [vmem:[%s842_s1 + $0x18] sm:$0xff] %v424_v57   ;;  %v220_v5 = vmax.bf16 %v365_v47, %v191_v58  ;;  %v135_v6 = vmax.bf16 %v325_v54, %v106_v59 }
  0x26   :  { %v352_v7 = vld [vmem:[%s841_s0 + $0x178] sm:$0xf]  ;;  %v50_v8 = vmax.bf16 %v285_v1, %v21_v61  ;;  %v248_v10 = vmax.bf16 %v378_v48, %v219_v63  ;;  %v353_v12 = vld [vmem:[%s841_s0 + $0x17c] sm:$0xf]  ;;  %v366_v17 = vld [vmem:[%s841_s0 + $0x1b0] sm:$0xf] }
  0x27   :  { %v312_v9 = vld [vmem:[%s841_s0 + $0xd8] sm:$0xf]  ;;  %v163_v11 = vmax.bf16 %v338_v55, %v134_v0  ;;  %v78_v13 = vmax.bf16 %v298_v3, %v49_v2  ;;  %v313_v14 = vld [vmem:[%s841_s0 + $0xdc] sm:$0xf]  ;;  %v249_v15 = vmax.bf16 %v379_v52, %v220_v5  ;;  %v164_v16 = vmax.bf16 %v339_v56, %v135_v6  ;;  %v326_v19 = vld [vmem:[%s841_s0 + $0x110] sm:$0xf] }
  0x28   :  { %v79_v18 = vmax.bf16 %v299_v4, %v50_v8  ;;  %v367_v21 = vld [vmem:[%s841_s0 + $0x1b4] sm:$0xf]  ;;  %v380_v26 = vld [vmem:[%s841_s0 + $0x1e8] sm:$0xf]  ;;  %v381_v30 = vld [vmem:[%s841_s0 + $0x1ec] sm:$0xf] }
  0x29   :  { %v192_v20 = vmax.bf16 %v352_v7, %v163_v11  ;;  %v107_v22 = vmax.bf16 %v312_v9, %v78_v13  ;;  %v327_v23 = vld [vmem:[%s841_s0 + $0x114] sm:$0xf]  ;;  %v426_v24 = vcombine.low %v248_v10, %v249_v15  ;;  %v193_v25 = vmax.bf16 %v353_v12, %v164_v16  ;;  %v340_v28 = vld [vmem:[%s841_s0 + $0x148] sm:$0xf]  ;;  %v341_v32 = vld [vmem:[%s841_s0 + $0x14c] sm:$0xf] }
  0x2a   :  { %v108_v27 = vmax.bf16 %v313_v14, %v79_v18  ;;  %v354_v35 = vld [vmem:[%s841_s0 + $0x180] sm:$0xf]  ;;  %v355_v38 = vld [vmem:[%s841_s0 + $0x184] sm:$0xf]  ;;  %v368_v41 = vld [vmem:[%s841_s0 + $0x1b8] sm:$0xf] }
  0x2b   :  { %v221_v29 = vmax.bf16 %v366_v17, %v192_v20  ;;  %v136_v31 = vmax.bf16 %v326_v19, %v107_v22  ;;  %427 = vst [vmem:[%s842_s1 + $0x20] sm:$0xff] %v426_v24   ;;  %v222_v33 = vmax.bf16 %v367_v21, %v193_v25  ;;  %v369_v43 = vld [vmem:[%s841_s0 + $0x1bc] sm:$0xf]  ;;  %v382_v46 = vld [vmem:[%s841_s0 + $0x1f0] sm:$0xf] }
  0x2c   :  { %v137_v34 = vmax.bf16 %v327_v23, %v108_v27  ;;  %v383_v48 = vld [vmem:[%s841_s0 + $0x1f4] sm:$0xf] }
  0x2d   :  { %v250_v36 = vmax.bf16 %v380_v26, %v221_v29  ;;  %v165_v37 = vmax.bf16 %v340_v28, %v136_v31  ;;  %v251_v39 = vmax.bf16 %v381_v30, %v222_v33 }
  0x2e   :  { %v166_v40 = vmax.bf16 %v341_v32, %v137_v34 }
  0x2f   :  { %v194_v42 = vmax.bf16 %v354_v35, %v165_v37  ;;  %v428_v44 = vcombine.low %v250_v36, %v251_v39 }
  0x30   :  { %v195_v45 = vmax.bf16 %v355_v38, %v166_v40 }
  0x31   :  { %v223_v47 = vmax.bf16 %v368_v41, %v194_v42  ;;  %429 = vst [vmem:[%s842_s1 + $0x28] sm:$0xff] %v428_v44  }
  0x32   :  { %v224_v49 = vmax.bf16 %v369_v43, %v195_v45 }
  0x33   :  { %v252_v50 = vmax.bf16 %v382_v46, %v223_v47 }
  0x34   :  { %v253_v51 = vmax.bf16 %v383_v48, %v224_v49 }
  0x36   :  { %v430_v52 = vcombine.low %v252_v50, %v253_v51 }
  0x38   :  { %431 = vst [vmem:[%s842_s1 + $0x30] sm:$0xff] %v430_v52  }

// kernel: alexnet_map_forward.12
= control target key start
LH: loop header
LB: loop body
LE: loop exit
PB: predicated region body
PF: predicated region fallthrough
CT: control target
= control target key end

     0   :  { %vm2218_vm0 = vcmask 523264   ;;  %vm3711_vm1 = vcmask 1043456   ;;  %vm3712_vm2 = vcmask 523268   ;;  %vm3738_vm4 = vcmask 1041408   ;;  %s6772_s1 = inlined_call_operand.vmem [shape: bf16[1600,192], index: 1, kind: input, shape index: {}]   ;;  %s6773_s0 = inlined_call_operand.vmem [shape: bf16[196,1600], index: 0, kind: input, shape index: {}]   ;;  %s6774_s2 = inlined_call_operand.vmem [shape: f32[1,192], index: 2, kind: input, shape index: {}]   ;;  %s6775_s3 = inlined_call_operand.vmem [shape: f32[1,192], index: 3, kind: input, shape index: {}]   ;;  %s6776_s4 = inlined_call_operand.vmem [shape: bf16[196,192], index: 4, kind: output, shape index: {}]  }
   0x1   :  { %v4517_v0 = vld [vmem:[%s6772_s1 + $0x4] ss:$8 sps:$4 sm:$0xff]   ;;  %v4521_v2 = vld [vmem:[%s6772_s1] ss:$8 sps:$4 sm:$0xff]   ;;  %v4523_v4 = vld [vmem:[%s6772_s1 + $0x14] ss:$8 sps:$4 sm:$0xff]  }
   0x2   :  { %v4519_v1 = vld [vmem:[%s6772_s1 + $0x304] ss:$8 sps:$4 sm:$0xff]   ;;  %2258 = vmatprep.subr.bf16.mxu1 %v4517_v0  ;;  %v4522_v3 = vld [vmem:[%s6772_s1 + $0x300] ss:$8 sps:$4 sm:$0xff]   ;;  %v4525_v5 = vld [vmem:[%s6772_s1 + $0x314] ss:$8 sps:$4 sm:$0xff]  }
   0x3   :  { %2741 = vmatprep.subr.bf16.mxu0 %v4519_v1  ;;  %2259 = vmatpush1.bf16.msra.mxu1 %v4521_v2  ;;  %v4527_v6 = vld [vmem:[%s6772_s1 + $0x10] ss:$8 sps:$4 sm:$0xff]   ;;  %v4529_v8 = vld [vmem:[%s6772_s1 + $0x24] ss:$8 sps:$4 sm:$0xff]   ;;  %v4533_v10 = vld [vmem:[%s6772_s1 + $0x20] ss:$8 sps:$4 sm:$0xff]  }
   0x4   :  { %2742 = vmatpush1.bf16.msra.mxu0 %v4522_v3  ;;  %2260 = vmatprep.subr.bf16.mxu1 %v4523_v4  ;;  %v4528_v7 = vld [vmem:[%s6772_s1 + $0x310] ss:$8 sps:$4 sm:$0xff]   ;;  %v4531_v9 = vld [vmem:[%s6772_s1 + $0x324] ss:$8 sps:$4 sm:$0xff]   ;;  %v4534_v11 = vld [vmem:[%s6772_s1 + $0x320] ss:$8 sps:$4 sm:$0xff]  }
   0x5   :  { %2743 = vmatprep.subr.bf16.mxu0 %v4525_v5  ;;  %v4535_v12 = vld [vmem:[%s6772_s1 + $0x34] ss:$8 sps:$4 sm:$0xff]   ;;  %v4539_v14 = vld [vmem:[%s6772_s1 + $0x30] ss:$8 sps:$4 sm:$0xff]   ;;  %v4541_v16 = vld [vmem:[%s6772_s1 + $0x44] ss:$8 sps:$4 sm:$0xff]  }
   0x6   :  { %v4537_v13 = vld [vmem:[%s6772_s1 + $0x334] ss:$8 sps:$4 sm:$0xff]   ;;  %v4540_v15 = vld [vmem:[%s6772_s1 + $0x330] ss:$8 sps:$4 sm:$0xff]   ;;  %v4543_v17 = vld [vmem:[%s6772_s1 + $0x344] ss:$8 sps:$4 sm:$0xff]  }
   0x7   :  { %2261 = vmatpush1.bf16.msra.mxu1 %v4527_v6  ;;  %v4545_v18 = vld [vmem:[%s6772_s1 + $0x40] ss:$8 sps:$4 sm:$0xff]   ;;  %v4547_v20 = vld [vmem:[%s6772_s1 + $0x54] ss:$8 sps:$4 sm:$0xff]   ;;  %v4551_v22 = vld [vmem:[%s6772_s1 + $0x50] ss:$8 sps:$4 sm:$0xff]  }
   0x8   :  { %2744 = vmatpush1.bf16.msra.mxu0 %v4528_v7  ;;  %2262 = vmatprep.subr.bf16.mxu1 %v4529_v8  ;;  %v4546_v19 = vld [vmem:[%s6772_s1 + $0x340] ss:$8 sps:$4 sm:$0xff]   ;;  %v4549_v21 = vld [vmem:[%s6772_s1 + $0x354] ss:$8 sps:$4 sm:$0xff]   ;;  %v4552_v23 = vld [vmem:[%s6772_s1 + $0x350] ss:$8 sps:$4 sm:$0xff]  }
   0x9   :  { %2745 = vmatprep.subr.bf16.mxu0 %v4531_v9  ;;  %v4553_v24 = vld [vmem:[%s6772_s1 + $0x64] ss:$8 sps:$4 sm:$0xff]   ;;  %v4557_v26 = vld [vmem:[%s6772_s1 + $0x60] ss:$8 sps:$4 sm:$0xff]   ;;  %v4559_v28 = vld [vmem:[%s6772_s1 + $0x74] ss:$8 sps:$4 sm:$0xff]  }
   0xa   :  { %v4555_v25 = vld [vmem:[%s6772_s1 + $0x364] ss:$8 sps:$4 sm:$0xff]   ;;  %v4558_v27 = vld [vmem:[%s6772_s1 + $0x360] ss:$8 sps:$4 sm:$0xff]   ;;  %v4561_v29 = vld [vmem:[%s6772_s1 + $0x374] ss:$8 sps:$4 sm:$0xff]  }
   0xb   :  { %2263 = vmatpush1.bf16.msra.mxu1 %v4533_v10  ;;  %v4563_v30 = vld [vmem:[%s6772_s1 + $0x70] ss:$8 sps:$4 sm:$0xff]   ;;  %v4565_v32 = vld [vmem:[%s6772_s1 + $0x84] ss:$8 sps:$4 sm:$0xff]   ;;  %v4569_v34 = vld [vmem:[%s6772_s1 + $0x80] ss:$8 sps:$4 sm:$0xff]  }
   0xc   :  { %2746 = vmatpush1.bf16.msra.mxu0 %v4534_v11  ;;  %2264 = vmatprep.subr.bf16.mxu1 %v4535_v12  ;;  %v4564_v31 = vld [vmem:[%s6772_s1 + $0x370] ss:$8 sps:$4 sm:$0xff]   ;;  %v4567_v33 = vld [vmem:[%s6772_s1 + $0x384] ss:$8 sps:$4 sm:$0xff]   ;;  %v4570_v35 = vld [vmem:[%s6772_s1 + $0x380] ss:$8 sps:$4 sm:$0xff]  }
   0xd   :  { %2747 = vmatprep.subr.bf16.mxu0 %v4537_v13  ;;  %v4571_v36 = vld [vmem:[%s6772_s1 + $0x94] ss:$8 sps:$4 sm:$0xff]   ;;  %v4575_v38 = vld [vmem:[%s6772_s1 + $0x90] ss:$8 sps:$4 sm:$0xff]   ;;  %v4577_v40 = vld [vmem:[%s6772_s1 + $0xa4] ss:$8 sps:$4 sm:$0xff]  }
   0xe   :  { %v4573_v37 = vld [vmem:[%s6772_s1 + $0x394] ss:$8 sps:$4 sm:$0xff]   ;;  %v4576_v39 = vld [vmem:[%s6772_s1 + $0x390] ss:$8 sps:$4 sm:$0xff]   ;;  %v4579_v41 = vld [vmem:[%s6772_s1 + $0x3a4] ss:$8 sps:$4 sm:$0xff]  }
   0xf   :  { %2265 = vmatpush1.bf16.msra.mxu1 %v4539_v14  ;;  %v4581_v42 = vld [vmem:[%s6772_s1 + $0xa0] ss:$8 sps:$4 sm:$0xff]   ;;  %v4583_v44 = vld [vmem:[%s6772_s1 + $0xb4] ss:$8 sps:$4 sm:$0xff]   ;;  %v4587_v46 = vld [vmem:[%s6772_s1 + $0xb0] ss:$8 sps:$4 sm:$0xff]  }
  0x10   :  { %2748 = vmatpush1.bf16.msra.mxu0 %v4540_v15  ;;  %2266 = vmatprep.subr.bf16.mxu1 %v4541_v16  ;;  %v4582_v43 = vld [vmem:[%s6772_s1 + $0x3a0] ss:$8 sps:$4 sm:$0xff]   ;;  %v4585_v45 = vld [vmem:[%s6772_s1 + $0x3b4] ss:$8 sps:$4 sm:$0xff]   ;;  %v4588_v47 = vld [vmem:[%s6772_s1 + $0x3b0] ss:$8 sps:$4 sm:$0xff]  }
  0x11   :  { %2749 = vmatprep.subr.bf16.mxu0 %v4543_v17  ;;  %v4589_v48 = vld [vmem:[%s6772_s1 + $0xc4] ss:$8 sps:$4 sm:$0xff]   ;;  %v4618_v51 = vld [vmem:[%s6773_s0 + $0x1c] ss:$52 sps:$4 sm:$0xff]   ;;  %v4593_v52 = vld [vmem:[%s6772_s1 + $0xc0] ss:$8 sps:$4 sm:$0xff]  }
  0x12   :  { %v4615_v49 = vld [vmem:[%s6773_s0 + $0x4] ss:$52 sps:$4 sm:$0xff]   ;;  %v4594_v53 = vld [vmem:[%s6772_s1 + $0x3c0] ss:$8 sps:$4 sm:$0xff]   ;;  %2773 = vmatprep.mubr.bf16.mxu0 %v4618_v51  ;;  %v4595_v54 = vld [vmem:[%s6772_s1 + $0xd4] ss:$8 sps:$4 sm:$0xff]  }
  0x13   :  { %2267 = vmatpush1.bf16.msra.mxu1 %v4545_v18  ;;  %v4591_v50 = vld [vmem:[%s6772_s1 + $0x3c4] ss:$8 sps:$4 sm:$0xff]   ;;  %2290 = vmatprep.mubr.bf16.mxu1 %v4615_v49  ;;  %v4597_v55 = vld [vmem:[%s6772_s1 + $0x3d4] ss:$8 sps:$4 sm:$0xff]   ;;  %v4599_v56 = vld [vmem:[%s6772_s1 + $0xd0] ss:$8 sps:$4 sm:$0xff]  }
  0x14   :  { %2750 = vmatpush1.bf16.msra.mxu0 %v4546_v19  ;;  %2268 = vmatprep.subr.bf16.mxu1 %v4547_v20  ;;  %v4600_v57 = vld [vmem:[%s6772_s1 + $0x3d0] ss:$8 sps:$4 sm:$0xff]   ;;  %v4601_v58 = vld [vmem:[%s6772_s1 + $0xe4] ss:$8 sps:$4 sm:$0xff]   ;;  %v4605_v60 = vld [vmem:[%s6772_s1 + $0xe0] ss:$8 sps:$4 sm:$0xff]  }
  0x15   :  { %2751 = vmatprep.subr.bf16.mxu0 %v4549_v21  ;;  %v4603_v59 = vld [vmem:[%s6772_s1 + $0x3e4] ss:$8 sps:$4 sm:$0xff]   ;;  %v4606_v61 = vld [vmem:[%s6772_s1 + $0x3e0] ss:$8 sps:$4 sm:$0xff]   ;;  %v4607_v62 = vld [vmem:[%s6772_s1 + $0xf4] ss:$8 sps:$4 sm:$0xff]  }
  0x16   :  { %v4609_v63 = vld [vmem:[%s6772_s1 + $0x3f4] ss:$8 sps:$4 sm:$0xff]   ;;  %v4611_v0 = vld [vmem:[%s6772_s1 + $0xf0] ss:$8 sps:$4 sm:$0xff]   ;;  %v4621_v2 = vld [vmem:[%s6772_s1 + $0x404] ss:$8 sps:$4 sm:$0xff]  }
  0x17   :  { %2269 = vmatpush1.bf16.msra.mxu1 %v4551_v22  ;;  %v4612_v1 = vld [vmem:[%s6772_s1 + $0x3f0] ss:$8 sps:$4 sm:$0xff]   ;;  %v4613_v3 = vld [vmem:[%s6773_s0] ss:$52 sps:$4 sm:$0xff]   ;;  %v4624_v4 = vld [vmem:[%s6772_s1 + $0x104] ss:$8 sps:$4 sm:$0xff]  }
  0x18   :  { %2752 = vmatpush1.bf16.msra.mxu0 %v4552_v23  ;;  %2270 = vmatprep.subr.bf16.mxu1 %v4553_v24  ;;  %v4616_v5 = vld [vmem:[%s6773_s0 + $0x18] ss:$52 sps:$4 sm:$0xff]   ;;  %v4619_v6 = vld [vmem:[%s6772_s1 + $0x400] ss:$8 sps:$4 sm:$0xff]   ;;  %v4631_v10 = vld [vmem:[%s6772_s1 + $0x414] ss:$8 sps:$4 sm:$0xff]  }
  0x19   :  { %2753 = vmatprep.subr.bf16.mxu0 %v4555_v25  ;;  %v4622_v7 = vld [vmem:[%s6772_s1 + $0x100] ss:$8 sps:$4 sm:$0xff]   ;;  %v4627_v9 = vld [vmem:[%s6773_s0 + $0x84] ss:$52 sps:$4 sm:$0xff]   ;;  %v4636_v11 = vld [vmem:[%s6772_s1 + $0x114] ss:$8 sps:$4 sm:$0xff]  }
  0x1a   :  { %v4625_v8 = vld [vmem:[%s6773_s0 + $0x6c] ss:$52 sps:$4 sm:$0xff]   ;;  %v4629_v12 = vld [vmem:[%s6772_s1 + $0x410] ss:$8 sps:$4 sm:$0xff]   ;;  %v4632_v14 = vld [vmem:[%s6773_s0 + $0x68] ss:$52 sps:$4 sm:$0xff]  }
  0x1b   :  { %2271 = vmatpush1.bf16.msra.mxu1 %v4557_v26  ;;  %v4634_v13 = vld [vmem:[%s6772_s1 + $0x110] ss:$8 sps:$4 sm:$0xff]   ;;  %v4633_v15 = vld [vmem:[%s6773_s0 + $0x80] ss:$52 sps:$4 sm:$0xff]   ;;  %v4639_v16 = vld [vmem:[%s6772_s1 + $0x424] ss:$8 sps:$4 sm:$0xff]  }
  0x1c   :  { %2754 = vmatpush1.bf16.msra.mxu0 %v4558_v27  ;;  %2272 = vmatprep.subr.bf16.mxu1 %v4559_v28  ;;  %v4637_v17 = vld [vmem:[%s6772_s1 + $0x420] ss:$8 sps:$4 sm:$0xff]   ;;  %v4648_v18 = vld [vmem:[%s6772_s1 + $0x124] ss:$8 sps:$4 sm:$0xff]   ;;  %v4651_v22 = vld [vmem:[%s6772_s1 + $0x434] ss:$8 sps:$4 sm:$0xff]  }
  0x1d   :  { %2755 = vmatprep.subr.bf16.mxu0 %v4561_v29  ;;  %v4640_v19 = vld [vmem:[%s6773_s0 + $0xd4] ss:$52 sps:$4 sm:$0xff]   ;;  %v4642_v20 = vld [vmem:[%s6773_s0 + $0xec] ss:$52 sps:$4 sm:$0xff]   ;;  %v4649_v24 = vld [vmem:[%s6772_s1 + $0x430] ss:$8 sps:$4 sm:$0xff]  }
  0x1e   :  { %v4646_v21 = vld [vmem:[%s6772_s1 + $0x120] ss:$8 sps:$4 sm:$0xff]   ;;  %v4660_v23 = vld [vmem:[%s6772_s1 + $0x134] ss:$8 sps:$4 sm:$0xff]   ;;  %v4658_v25 = vld [vmem:[%s6772_s1 + $0x130] ss:$8 sps:$4 sm:$0xff]  }
  0x1f   :  { %2273 = vmatpush1.bf16.msra.mxu1 %v4563_v30  ;;  %v4644_v26 = vld [vmem:[%s6773_s0 + $0xd0] ss:$52 sps:$4 sm:$0xff]   ;;  %v4645_v28 = vld [vmem:[%s6773_s0 + $0xe8] ss:$52 sps:$4 sm:$0xff]   ;;  %v4668_v49 = vld [vmem:[%s6773_s0 + $0x1a0] ss:$52 sps:$4 sm:$0xff]  }
  0x20   :  { %2756 = vmatpush1.bf16.msra.mxu0 %v4564_v31  ;;  %2274 = vmatprep.subr.bf16.mxu1 %v4565_v32  ;;  %v4663_v27 = vld [vmem:[%s6772_s1 + $0x444] ss:$8 sps:$4 sm:$0xff]   ;;  %v4652_v30 = vld [vmem:[%s6773_s0 + $0x13c] ss:$52 sps:$4 sm:$0xff]   ;;  %v4654_v31 = vld [vmem:[%s6773_s0 + $0x154] ss:$52 sps:$4 sm:$0xff]  }
  0x21   :  { %2757 = vmatprep.subr.bf16.mxu0 %v4567_v33  ;;  %v4671_v29 = vld [vmem:[%s6772_s1 + $0x144] ss:$8 sps:$4 sm:$0xff]   ;;  %v4661_v32 = vld [vmem:[%s6772_s1 + $0x440] ss:$8 sps:$4 sm:$0xff]   ;;  %v4700_v51 = vld [vmem:[%s6772_s1 + $0x170] ss:$8 sps:$4 sm:$0xff]  }
  0x22   :  { %v4669_v33 = vld [vmem:[%s6772_s1 + $0x140] ss:$8 sps:$4 sm:$0xff]   ;;  %vm6453_vm3 = vmor %vm3712_vm2, %vm3711_vm1  ;;  %vm3739_vm5 = vcmask 521220  }
  0x23   :  { %2275 = vmatpush1.bf16.msra.mxu1 %v4569_v34  ;;  %v4675_v34 = vld [vmem:[%s6772_s1 + $0x454] ss:$8 sps:$4 sm:$0xff]   ;;  %vm3740_vm6 = vmor %vm3739_vm5, %vm3738_vm4 }
  0x24   :  { %2758 = vmatpush1.bf16.msra.mxu0 %v4570_v35  ;;  %2276 = vmatprep.subr.bf16.mxu1 %v4571_v36  ;;  %v4680_v35 = vld [vmem:[%s6772_s1 + $0x154] ss:$8 sps:$4 sm:$0xff]   ;;  %v4673_v36 = vld [vmem:[%s6772_s1 + $0x450] ss:$8 sps:$4 sm:$0xff]  }
  0x25   :  { %2759 = vmatprep.subr.bf16.mxu0 %v4573_v37  ;;  %v4656_v37 = vld [vmem:[%s6773_s0 + $0x138] ss:$52 sps:$4 sm:$0xff]  }
  0x27   :  { %2277 = vmatpush1.bf16.msra.mxu1 %v4575_v38  ;;  %v4657_v38 = vld [vmem:[%s6773_s0 + $0x150] ss:$52 sps:$4 sm:$0xff]  }
  0x28   :  { %2760 = vmatpush1.bf16.msra.mxu0 %v4576_v39  ;;  %2278 = vmatprep.subr.bf16.mxu1 %v4577_v40  ;;  %v4678_v39 = vld [vmem:[%s6772_s1 + $0x150] ss:$8 sps:$4 sm:$0xff]  }
  0x29   :  { %2761 = vmatprep.subr.bf16.mxu0 %v4579_v41  ;;  %v4664_v40 = vld [vmem:[%s6773_s0 + $0x1a4] ss:$52 sps:$4 sm:$0xff]  }
  0x2a   :  { %v4685_v41 = vld [vmem:[%s6772_s1 + $0x464] ss:$8 sps:$4 sm:$0xff]  }
  0x2b   :  { %2279 = vmatpush1.bf16.msra.mxu1 %v4581_v42  ;;  %v4690_v42 = vld [vmem:[%s6772_s1 + $0x164] ss:$8 sps:$4 sm:$0xff]  }
  0x2c   :  { %2762 = vmatpush1.bf16.msra.mxu0 %v4582_v43  ;;  %2280 = vmatprep.subr.bf16.mxu1 %v4583_v44  ;;  %v4666_v43 = vld [vmem:[%s6773_s0 + $0x1bc] ss:$52 sps:$4 sm:$0xff]   ;;  %v4683_v44 = vld [vmem:[%s6772_s1 + $0x460] ss:$8 sps:$4 sm:$0xff]  }
  0x2d   :  { %2763 = vmatprep.subr.bf16.mxu0 %v4585_v45  ;;  %v4688_v45 = vld [vmem:[%s6772_s1 + $0x160] ss:$8 sps:$4 sm:$0xff]  }
  0x2f   :  { %2281 = vmatpush1.bf16.msra.mxu1 %v4587_v46  ;;  %v4693_v46 = vld [vmem:[%s6772_s1 + $0x474] ss:$8 sps:$4 sm:$0xff]  }
  0x30   :  { %2764 = vmatpush1.bf16.msra.mxu0 %v4588_v47  ;;  %2282 = vmatprep.subr.bf16.mxu1 %v4589_v48  ;;  %v4702_v47 = vld [vmem:[%s6772_s1 + $0x174] ss:$8 sps:$4 sm:$0xff]   ;;  %v4691_v48 = vld [vmem:[%s6772_s1 + $0x470] ss:$8 sps:$4 sm:$0xff]  }
  0x31   :  { %2765 = vmatprep.subr.bf16.mxu0 %v4591_v50  ;;  %v4672_v50 = vld [vmem:[%s6773_s0 + $0x1b8] ss:$52 sps:$4 sm:$0xff]  }
  0x33   :  { %2283 = vmatpush1.bf16.msra.mxu1 %v4593_v52  ;;  %v4705_v52 = vld [vmem:[%s6772_s1 + $0x484] ss:$8 sps:$4 sm:$0xff]  }
  0x34   :  { %2766 = vmatpush1.bf16.msra.mxu0 %v4594_v53  ;;  %2284 = vmatprep.subr.bf16.mxu1 %v4595_v54  ;;  %v4714_v53 = vld [vmem:[%s6772_s1 + $0x184] ss:$8 sps:$4 sm:$0xff]  }
  0x35   :  { %2767 = vmatprep.subr.bf16.mxu0 %v4597_v55  ;;  %v4676_v54 = vld [vmem:[%s6773_s0 + $0x20c] ss:$52 sps:$4 sm:$0xff]   ;;  %v4681_v55 = vld [vmem:[%s6773_s0 + $0x224] ss:$52 sps:$4 sm:$0xff]  }
  0x37   :  { %2285 = vmatpush1.bf16.msra.mxu1 %v4599_v56  ;;  %v4703_v56 = vld [vmem:[%s6772_s1 + $0x480] ss:$8 sps:$4 sm:$0xff]  }
  0x38   :  { %2768 = vmatpush1.bf16.msra.mxu0 %v4600_v57  ;;  %2286 = vmatprep.subr.bf16.mxu1 %v4601_v58  ;;  %v4712_v57 = vld [vmem:[%s6772_s1 + $0x180] ss:$8 sps:$4 sm:$0xff]   ;;  %v4717_v58 = vld [vmem:[%s6772_s1 + $0x494] ss:$8 sps:$4 sm:$0xff]  }
  0x39   :  { %2769 = vmatprep.subr.bf16.mxu0 %v4603_v59  ;;  %v4726_v59 = vld [vmem:[%s6772_s1 + $0x194] ss:$8 sps:$4 sm:$0xff]  }
  0x3b   :  { %2287 = vmatpush1.bf16.msra.mxu1 %v4605_v60  ;;  %v4715_v60 = vld [vmem:[%s6772_s1 + $0x490] ss:$8 sps:$4 sm:$0xff]  }
  0x3c   :  { %2770 = vmatpush1.bf16.msra.mxu0 %v4606_v61  ;;  %2288 = vmatprep.subr.bf16.mxu1 %v4607_v62  ;;  %v4686_v61 = vld [vmem:[%s6773_s0 + $0x208] ss:$52 sps:$4 sm:$0xff]   ;;  %v4687_v62 = vld [vmem:[%s6773_s0 + $0x220] ss:$52 sps:$4 sm:$0xff]  }
  0x3d   :  { %2771 = vmatprep.subr.bf16.mxu0 %v4609_v63  ;;  %v4724_v63 = vld [vmem:[%s6772_s1 + $0x190] ss:$8 sps:$4 sm:$0xff]  }
  0x3f   :  { %2289 = vmatpush1.bf16.msra.mxu1 %v4611_v0  ;;  %v4729_v0 = vld [vmem:[%s6772_s1 + $0x4a4] ss:$8 sps:$4 sm:$0xff]  }
  0x40   :  { %2772 = vmatpush1.bf16.msra.mxu0 %v4612_v1  ;;  %2419 = vmatprep.subr.bf16.mxu1 %v4624_v4  ;;  %v4734_v1 = vld [vmem:[%s6772_s1 + $0x1a4] ss:$8 sps:$4 sm:$0xff]   ;;  %v4727_v4 = vld [vmem:[%s6772_s1 + $0x4a0] ss:$8 sps:$4 sm:$0xff]  }
  0x41   :  { %2902 = vmatprep.subr.bf16.mxu0 %v4621_v2  ;;  %v4694_v2 = vld [vmem:[%s6773_s0 + $0x274] ss:$52 sps:$4 sm:$0xff]  }
  0x42   :  { %2291 = vmatmul.mubr.bf16.vlgmr.msra.gmra.mrb[0].mxu1 %v4613_v3  ;;  %v4696_v3 = vld [vmem:[%s6773_s0 + $0x28c] ss:$52 sps:$4 sm:$0xff]  }
  0x43   :  { %2774 = vmatmul.mubr.bf16.vlgmr.msra.gmra.mrb[0].mxu0 %v4616_v5  ;;  %2300 = vmatprep.mubr.bf16.mxu1 %v4625_v8  ;;  %v4732_v5 = vld [vmem:[%s6772_s1 + $0x1a0] ss:$8 sps:$4 sm:$0xff]   ;;  %v4739_v8 = vld [vmem:[%s6772_s1 + $0x4b0] ss:$8 sps:$4 sm:$0xff]  }
  0x44   :  { %2903 = vmatpush1.bf16.msra.mxu0 %v4619_v6  ;;  %2420 = vmatpush1.bf16.msra.mxu1 %v4622_v7  ;;  %v4741_v6 = vld [vmem:[%s6772_s1 + $0x4b4] ss:$8 sps:$4 sm:$0xff]  }
  0x45   :  { %2783 = vmatprep.mubr.bf16.mxu0 %v4627_v9  ;;  %2904 = vmatprep.subr.bf16.mxu0 %v4631_v10  ;;  %v4744_v7 = vld [vmem:[%s6772_s1 + $0x1b4] ss:$8 sps:$4 sm:$0xff]   ;;  %v4698_v9 = vld [vmem:[%s6773_s0 + $0x270] ss:$52 sps:$4 sm:$0xff]  }
  0x46   :  { %2421 = vmatprep.subr.bf16.mxu1 %v4636_v11  ;;  %v4742_v10 = vld [vmem:[%s6772_s1 + $0x1b0] ss:$8 sps:$4 sm:$0xff]   ;;  %v4747_v11 = vld [vmem:[%s6772_s1 + $0x4c4] ss:$8 sps:$4 sm:$0xff]  }
  0x48   :  { %2905 = vmatpush1.bf16.msra.mxu0 %v4629_v12  ;;  %2422 = vmatpush1.bf16.msra.mxu1 %v4634_v13  ;;  %v4756_v12 = vld [vmem:[%s6772_s1 + $0x1c4] ss:$8 sps:$4 sm:$0xff]   ;;  %v4699_v13 = vld [vmem:[%s6773_s0 + $0x288] ss:$52 sps:$4 sm:$0xff]  }
  0x49   :  { %2906 = vmatprep.subr.bf16.mxu0 %v4639_v16  ;;  %2423 = vmatprep.subr.bf16.mxu1 %v4648_v18  ;;  %v4745_v16 = vld [vmem:[%s6772_s1 + $0x4c0] ss:$8 sps:$4 sm:$0xff]   ;;  %v4759_v18 = vld [vmem:[%s6772_s1 + $0x4d4] ss:$8 sps:$4 sm:$0xff]  }
  0x4a   :  { %2301 = vmatmul.mubr.bf16.gmra.mrb[4].mxu1 %v4632_v14  ;;  %v4706_v14 = vld [vmem:[%s6773_s0 + $0x2dc] ss:$52 sps:$4 sm:$0xff]  }
  0x4b   :  { %2784 = vmatmul.mubr.bf16.gmra.mrb[4].mxu0 %v4633_v15  ;;  %2310 = vmatprep.mubr.bf16.mxu1 %v4640_v19  ;;  %v4708_v15 = vld [vmem:[%s6773_s0 + $0x2f4] ss:$52 sps:$4 sm:$0xff]  }
  0x4c   :  { %2907 = vmatpush1.bf16.msra.mxu0 %v4637_v17  ;;  %2793 = vmatprep.mubr.bf16.mxu0 %v4642_v20  ;;  %v4754_v17 = vld [vmem:[%s6772_s1 + $0x1c0] ss:$8 sps:$4 sm:$0xff]   ;;  %v4768_v19 = vld [vmem:[%s6772_s1 + $0x1d4] ss:$8 sps:$4 sm:$0xff]   ;;  %v4757_v20 = vld [vmem:[%s6772_s1 + $0x4d0] ss:$8 sps:$4 sm:$0xff]  }
  0x4d   :  { %2424 = vmatpush1.bf16.msra.mxu1 %v4646_v21  ;;  %2908 = vmatprep.subr.bf16.mxu0 %v4651_v22  ;;  %v4710_v21 = vld [vmem:[%s6773_s0 + $0x2d8] ss:$52 sps:$4 sm:$0xff]   ;;  %v4711_v22 = vld [vmem:[%s6773_s0 + $0x2f0] ss:$52 sps:$4 sm:$0xff]  }
  0x4e   :  { %2425 = vmatprep.subr.bf16.mxu1 %v4660_v23  ;;  %v4766_v23 = vld [vmem:[%s6772_s1 + $0x1d0] ss:$8 sps:$4 sm:$0xff]  }
  0x50   :  { %2909 = vmatpush1.bf16.msra.mxu0 %v4649_v24  ;;  %v4771_v24 = vld [vmem:[%s6772_s1 + $0x4e4] ss:$8 sps:$4 sm:$0xff]  }
  0x51   :  { %2910 = vmatprep.subr.bf16.mxu0 %v4663_v27  ;;  %2426 = vmatpush1.bf16.msra.mxu1 %v4658_v25  ;;  %v4777_v25 = vld [vmem:[%s6772_s1 + $0x1e4] ss:$8 sps:$4 sm:$0xff]   ;;  %v4720_v27 = vld [vmem:[%s6773_s0 + $0x35c] ss:$52 sps:$4 sm:$0xff]  }
  0x52   :  { %2427 = vmatprep.subr.bf16.mxu1 %v4671_v29  ;;  %2311 = vmatmul.mubr.bf16.gmra.mrb[8].mxu1 %v4644_v26  ;;  %v4718_v26 = vld [vmem:[%s6773_s0 + $0x344] ss:$52 sps:$4 sm:$0xff]   ;;  %v4775_v29 = vld [vmem:[%s6772_s1 + $0x1e0] ss:$8 sps:$4 sm:$0xff]  }
  0x53   :  { %2794 = vmatmul.mubr.bf16.gmra.mrb[8].mxu0 %v4645_v28  ;;  %2320 = vmatprep.mubr.bf16.mxu1 %v4652_v30  ;;  %v4769_v28 = vld [vmem:[%s6772_s1 + $0x4e0] ss:$8 sps:$4 sm:$0xff]   ;;  %v4781_v30 = vld [vmem:[%s6772_s1 + $0x4f4] ss:$8 sps:$4 sm:$0xff]  }
  0x54   :  { %2803 = vmatprep.mubr.bf16.mxu0 %v4654_v31  ;;  %2911 = vmatpush1.bf16.msra.mxu0 %v4661_v32  ;;  %v4784_v31 = vld [vmem:[%s6772_s1 + $0x1f4] ss:$8 sps:$4 sm:$0xff]   ;;  %v4779_v32 = vld [vmem:[%s6772_s1 + $0x4f0] ss:$8 sps:$4 sm:$0xff]  }
  0x55   :  { %2428 = vmatpush1.bf16.msra.mxu1 %v4669_v33  ;;  %2912 = vmatprep.subr.bf16.mxu0 %v4675_v34  ;;  %v4782_v33 = vld [vmem:[%s6772_s1 + $0x1f0] ss:$8 sps:$4 sm:$0xff]   ;;  %v4722_v34 = vld [vmem:[%s6773_s0 + $0x340] ss:$52 sps:$4 sm:$0xff]  }
  0x56   :  { %2429 = vmatprep.subr.bf16.mxu1 %v4680_v35  ;;  %v5576_v35 = vld [vmem:[%s6772_s1 + $0x504] ss:$8 sps:$4 sm:$0xff]  }
  0x58   :  { %2913 = vmatpush1.bf16.msra.mxu0 %v4673_v36  ;;  %v4796_v36 = vld [vmem:[%s6772_s1 + $0x204] ss:$8 sps:$4 sm:$0xff]  }
  0x59   :  { %2430 = vmatpush1.bf16.msra.mxu1 %v4678_v39  ;;  %2914 = vmatprep.subr.bf16.mxu0 %v4685_v41  ;;  %v4735_v39 = vld [vmem:[%s6773_s0 + $0x3c4] ss:$52 sps:$4 sm:$0xff]   ;;  %v4738_v41 = vld [vmem:[%s6773_s0 + $0x3c0] ss:$52 sps:$4 sm:$0xff]  }
  0x5a   :  { %2431 = vmatprep.subr.bf16.mxu1 %v4690_v42  ;;  %2321 = vmatmul.mubr.bf16.gmra.mrb[12].mxu1 %v4656_v37  ;;  %v4723_v37 = vld [vmem:[%s6773_s0 + $0x358] ss:$52 sps:$4 sm:$0xff]   ;;  %v4748_v42 = vld [vmem:[%s6773_s0 + $0x414] ss:$52 sps:$4 sm:$0xff]  }
  0x5b   :  { %2804 = vmatmul.mubr.bf16.gmra.mrb[12].mxu0 %v4657_v38  ;;  %2330 = vmatprep.mubr.bf16.mxu1 %v4664_v40  ;;  %v4730_v38 = vld [vmem:[%s6773_s0 + $0x3ac] ss:$52 sps:$4 sm:$0xff]   ;;  %v4737_v40 = vld [vmem:[%s6773_s0 + $0x3a8] ss:$52 sps:$4 sm:$0xff]  }
  0x5c   :  { %2813 = vmatprep.mubr.bf16.mxu0 %v4666_v43  ;;  %2915 = vmatpush1.bf16.msra.mxu0 %v4683_v44  ;;  %v4750_v43 = vld [vmem:[%s6773_s0 + $0x42c] ss:$52 sps:$4 sm:$0xff]   ;;  %v4752_v44 = vld [vmem:[%s6773_s0 + $0x410] ss:$52 sps:$4 sm:$0xff]  }
  0x5d   :  { %2432 = vmatpush1.bf16.msra.mxu1 %v4688_v45  ;;  %2916 = vmatprep.subr.bf16.mxu0 %v4693_v46  ;;  %v4753_v45 = vld [vmem:[%s6773_s0 + $0x428] ss:$52 sps:$4 sm:$0xff]  }
  0x5e   :  { %2433 = vmatprep.subr.bf16.mxu1 %v4702_v47  ;;  %v4760_v46 = vld [vmem:[%s6773_s0 + $0x47c] ss:$52 sps:$4 sm:$0xff]   ;;  %v4762_v47 = vld [vmem:[%s6773_s0 + $0x494] ss:$52 sps:$4 sm:$0xff]  }
  0x60   :  { %2917 = vmatpush1.bf16.msra.mxu0 %v4691_v48  ;;  %v186_v48 = vld [vmem:[%s6773_s0 + $0x4e0] sm:$0x33] }
  0x61   :  { %2434 = vmatpush1.bf16.msra.mxu1 %v4700_v51  ;;  %2918 = vmatprep.subr.bf16.mxu0 %v4705_v52  ;;  %v4765_v51 = vld [vmem:[%s6773_s0 + $0x490] ss:$52 sps:$4 sm:$0xff]   ;;  %v3903_v52 = vcombine.high %v186_v48, %v186_v48 }
  0x62   :  { %2435 = vmatprep.subr.bf16.mxu1 %v4714_v53  ;;  %2331 = vmatmul.mubr.bf16.gmra.mrb[16].mxu1 %v4668_v49  ;;  %v189_v49 = vld [vmem:[%s6773_s0 + $0x4f8] sm:$0x33] }
  0x63   :  { %2814 = vmatmul.mubr.bf16.gmra.mrb[16].mxu0 %v4672_v50  ;;  %2340 = vmatprep.mubr.bf16.mxu1 %v4676_v54  ;;  %v4764_v50 = vld [vmem:[%s6773_s0 + $0x478] ss:$52 sps:$4 sm:$0xff]   ;;  %v3909_v53 = vcombine.high %v189_v49, %v189_v49  ;;  %v3902_v54 = vcombine.low %v186_v48, %v186_v48  ;;  %v4884_v48 = vld [vmem:[%s6772_s1 + $0x280] ss:$8 sps:$4 sm:$0xff]  }
  0x64   :  { %2823 = vmatprep.mubr.bf16.mxu0 %v4681_v55  ;;  %2919 = vmatpush1.bf16.msra.mxu0 %v4703_v56  ;;  %v3908_v55 = vcombine.low %v189_v49, %v189_v49  ;;  %v4787_v56 = vld [vmem:[%s6773_s0 + $0xc] ss:$52 sps:$4 sm:$0xff]   ;;  %v5847_v49 = vld [vmem:[%s6772_s1 + $0x594] ss:$8 sps:$4 sm:$0xff]  }
  0x65   :  { %2436 = vmatpush1.bf16.msra.mxu1 %v4712_v57  ;;  %2920 = vmatprep.subr.bf16.mxu0 %v4717_v58  ;;  %v4790_v57 = vld [vmem:[%s6773_s0 + $0x24] ss:$52 sps:$4 sm:$0xff]   ;;  %v4785_v58 = vld [vmem:[%s6773_s0 + $0x8] ss:$52 sps:$4 sm:$0xff]  }
  0x66   :  { %2437 = vmatprep.subr.bf16.mxu1 %v4726_v59  ;;  %v4788_v59 = vld [vmem:[%s6773_s0 + $0x20] ss:$52 sps:$4 sm:$0xff]  }
  0x68   :  { %2921 = vmatpush1.bf16.msra.mxu0 %v4715_v60  ;;  %v5642_v60 = vld [vmem:[%s6772_s1 + $0x500] ss:$8 sps:$4 sm:$0xff]  }
  0x69   :  { %2438 = vmatpush1.bf16.msra.mxu1 %v4724_v63  ;;  %2922 = vmatprep.subr.bf16.mxu0 %v4729_v0  ;;  %v4799_v63 = vld [vmem:[%s6773_s0 + $0x8c] ss:$52 sps:$4 sm:$0xff]   ;;  %v5656_v0 = vld [vmem:[%s6772_s1 + $0x514] ss:$8 sps:$4 sm:$0xff]  }
  0x6a   :  { %2439 = vmatprep.subr.bf16.mxu1 %v4734_v1  ;;  %2341 = vmatmul.mubr.bf16.gmra.mrb[20].mxu1 %v4686_v61  ;;  %v4794_v61 = vld [vmem:[%s6772_s1 + $0x200] ss:$8 sps:$4 sm:$0xff]   ;;  %v4808_v1 = vld [vmem:[%s6772_s1 + $0x214] ss:$8 sps:$4 sm:$0xff]  }
  0x6b   :  { %2824 = vmatmul.mubr.bf16.gmra.mrb[20].mxu0 %v4687_v62  ;;  %2350 = vmatprep.mubr.bf16.mxu1 %v4694_v2  ;;  %v4797_v62 = vld [vmem:[%s6773_s0 + $0x74] ss:$52 sps:$4 sm:$0xff]   ;;  %v5665_v2 = vld [vmem:[%s6772_s1 + $0x510] ss:$8 sps:$4 sm:$0xff]  }
  0x6c   :  { %2833 = vmatprep.mubr.bf16.mxu0 %v4696_v3  ;;  %2923 = vmatpush1.bf16.msra.mxu0 %v4727_v4  ;;  %v4804_v3 = vld [vmem:[%s6773_s0 + $0x70] ss:$52 sps:$4 sm:$0xff]   ;;  %v4805_v4 = vld [vmem:[%s6773_s0 + $0x88] ss:$52 sps:$4 sm:$0xff]  }
  0x6d   :  { %2440 = vmatpush1.bf16.msra.mxu1 %v4732_v5  ;;  %2924 = vmatprep.subr.bf16.mxu0 %v4741_v6  ;;  %v4806_v5 = vld [vmem:[%s6772_s1 + $0x210] ss:$8 sps:$4 sm:$0xff]   ;;  %v5679_v6 = vld [vmem:[%s6772_s1 + $0x524] ss:$8 sps:$4 sm:$0xff]  }
  0x6e   :  { %2441 = vmatprep.subr.bf16.mxu1 %v4744_v7  ;;  %v4820_v7 = vld [vmem:[%s6772_s1 + $0x224] ss:$8 sps:$4 sm:$0xff]  }
  0x70   :  { %2925 = vmatpush1.bf16.msra.mxu0 %v4739_v8  ;;  %v5688_v8 = vld [vmem:[%s6772_s1 + $0x520] ss:$8 sps:$4 sm:$0xff]  }
  0x71   :  { %2442 = vmatpush1.bf16.msra.mxu1 %v4742_v10  ;;  %2926 = vmatprep.subr.bf16.mxu0 %v4747_v11  ;;  %v4814_v10 = vld [vmem:[%s6773_s0 + $0xf4] ss:$52 sps:$4 sm:$0xff]  }
  0x72   :  { %2443 = vmatprep.subr.bf16.mxu1 %v4756_v12  ;;  %2351 = vmatmul.mubr.bf16.gmra.mrb[24].mxu1 %v4698_v9  ;;  %v4812_v9 = vld [vmem:[%s6773_s0 + $0xdc] ss:$52 sps:$4 sm:$0xff]   ;;  %v4818_v11 = vld [vmem:[%s6772_s1 + $0x220] ss:$8 sps:$4 sm:$0xff]  }
  0x73   :  { %2834 = vmatmul.mubr.bf16.gmra.mrb[24].mxu0 %v4699_v13  ;;  %2360 = vmatprep.mubr.bf16.mxu1 %v4706_v14  ;;  %v5704_v12 = vld [vmem:[%s6772_s1 + $0x534] ss:$8 sps:$4 sm:$0xff]   ;;  %v5713_v14 = vld [vmem:[%s6772_s1 + $0x530] ss:$8 sps:$4 sm:$0xff]  }
  0x74   :  { %2843 = vmatprep.mubr.bf16.mxu0 %v4708_v15  ;;  %2927 = vmatpush1.bf16.msra.mxu0 %v4745_v16  ;;  %v4832_v13 = vld [vmem:[%s6772_s1 + $0x234] ss:$8 sps:$4 sm:$0xff]   ;;  %v4816_v15 = vld [vmem:[%s6773_s0 + $0xd8] ss:$52 sps:$4 sm:$0xff]   ;;  %v4817_v16 = vld [vmem:[%s6773_s0 + $0xf0] ss:$52 sps:$4 sm:$0xff]  }
  0x75   :  { %2444 = vmatpush1.bf16.msra.mxu1 %v4754_v17  ;;  %2928 = vmatprep.subr.bf16.mxu0 %v4759_v18  ;;  %v4830_v17 = vld [vmem:[%s6772_s1 + $0x230] ss:$8 sps:$4 sm:$0xff]   ;;  %v5727_v18 = vld [vmem:[%s6772_s1 + $0x544] ss:$8 sps:$4 sm:$0xff]  }
  0x76   :  { %2445 = vmatprep.subr.bf16.mxu1 %v4768_v19  ;;  %v4843_v19 = vld [vmem:[%s6772_s1 + $0x244] ss:$8 sps:$4 sm:$0xff]  }
  0x78   :  { %2929 = vmatpush1.bf16.msra.mxu0 %v4757_v20  ;;  %v4824_v20 = vld [vmem:[%s6773_s0 + $0x144] ss:$52 sps:$4 sm:$0xff]  }
  0x79   :  { %2446 = vmatpush1.bf16.msra.mxu1 %v4766_v23  ;;  %2930 = vmatprep.subr.bf16.mxu0 %v4771_v24  ;;  %v4841_v23 = vld [vmem:[%s6772_s1 + $0x240] ss:$8 sps:$4 sm:$0xff]   ;;  %v5752_v24 = vld [vmem:[%s6772_s1 + $0x554] ss:$8 sps:$4 sm:$0xff]  }
  0x7a   :  { %2447 = vmatprep.subr.bf16.mxu1 %v4777_v25  ;;  %2361 = vmatmul.mubr.bf16.gmra.mrb[28].mxu1 %v4710_v21  ;;  %v4826_v21 = vld [vmem:[%s6773_s0 + $0x15c] ss:$52 sps:$4 sm:$0xff]  }
  0x7b   :  { %2844 = vmatmul.mubr.bf16.gmra.mrb[28].mxu0 %v4711_v22  ;;  %2370 = vmatprep.mubr.bf16.mxu1 %v4718_v26  ;;  %v5743_v22 = vld [vmem:[%s6772_s1 + $0x540] ss:$8 sps:$4 sm:$0xff]   ;;  %v4852_v25 = vld [vmem:[%s6772_s1 + $0x254] ss:$8 sps:$4 sm:$0xff]   ;;  %v5760_v26 = vld [vmem:[%s6772_s1 + $0x550] ss:$8 sps:$4 sm:$0xff]  }
  0x7c   :  { %2853 = vmatprep.mubr.bf16.mxu0 %v4720_v27  ;;  %2931 = vmatpush1.bf16.msra.mxu0 %v4769_v28  ;;  %v4828_v27 = vld [vmem:[%s6773_s0 + $0x140] ss:$52 sps:$4 sm:$0xff]   ;;  %v4829_v28 = vld [vmem:[%s6773_s0 + $0x158] ss:$52 sps:$4 sm:$0xff]  }
  0x7d   :  { %2448 = vmatpush1.bf16.msra.mxu1 %v4775_v29  ;;  %2932 = vmatprep.subr.bf16.mxu0 %v4781_v30  ;;  %v4850_v29 = vld [vmem:[%s6772_s1 + $0x250] ss:$8 sps:$4 sm:$0xff]   ;;  %v5776_v30 = vld [vmem:[%s6772_s1 + $0x564] ss:$8 sps:$4 sm:$0xff]  }
  0x7e   :  { %2449 = vmatprep.subr.bf16.mxu1 %v4784_v31  ;;  %v4862_v31 = vld [vmem:[%s6772_s1 + $0x264] ss:$8 sps:$4 sm:$0xff]  }
  0x80   :  { %2933 = vmatpush1.bf16.msra.mxu0 %v4779_v32  ;;  %v4836_v32 = vld [vmem:[%s6773_s0 + $0x1ac] ss:$52 sps:$4 sm:$0xff]  }
  0x81   :  { %2450 = vmatpush1.bf16.msra.mxu1 %v4782_v33  ;;  %3063 = vmatprep.subr.bf16.mxu0 %v5576_v35  ;;  %v4838_v33 = vld [vmem:[%s6773_s0 + $0x1c4] ss:$52 sps:$4 sm:$0xff]  }
  0x82   :  { %2580 = vmatprep.subr.bf16.mxu1 %v4796_v36  ;;  %2371 = vmatmul.mubr.bf16.gmra.mrb[32].mxu1 %v4722_v34  ;;  %v5790_v34 = vld [vmem:[%s6772_s1 + $0x560] ss:$8 sps:$4 sm:$0xff]  }
  0x83   :  { %2854 = vmatmul.mubr.bf16.gmra.mrb[32].mxu0 %v4723_v37  ;;  %2380 = vmatprep.mubr.bf16.mxu1 %v4730_v38  ;;  %v4860_v36 = vld [vmem:[%s6772_s1 + $0x260] ss:$8 sps:$4 sm:$0xff]   ;;  %v5800_v37 = vld [vmem:[%s6772_s1 + $0x574] ss:$8 sps:$4 sm:$0xff]  }
  0x84   :  { %2863 = vmatprep.mubr.bf16.mxu0 %v4735_v39  ;;  %v4874_v38 = vld [vmem:[%s6772_s1 + $0x274] ss:$8 sps:$4 sm:$0xff]   ;;  %v5808_v39 = vld [vmem:[%s6772_s1 + $0x570] ss:$8 sps:$4 sm:$0xff]  }
  0x8a   :  { %2381 = vmatmul.mubr.bf16.gmra.mrb[36].mxu1 %v4737_v40  ;;  %v4872_v40 = vld [vmem:[%s6772_s1 + $0x270] ss:$8 sps:$4 sm:$0xff]  }
  0x8b   :  { %2864 = vmatmul.mubr.bf16.gmra.mrb[36].mxu0 %v4738_v41  ;;  %2390 = vmatprep.mubr.bf16.mxu1 %v4748_v42  ;;  %v4840_v41 = vld [vmem:[%s6773_s0 + $0x1a8] ss:$52 sps:$4 sm:$0xff]   ;;  %v4844_v42 = vld [vmem:[%s6773_s0 + $0x1c0] ss:$52 sps:$4 sm:$0xff]  }
  0x8c   :  { %2873 = vmatprep.mubr.bf16.mxu0 %v4750_v43  ;;  %v5823_v43 = vld [vmem:[%s6772_s1 + $0x584] ss:$8 sps:$4 sm:$0xff]  }
  0x92   :  { %2391 = vmatmul.mubr.bf16.gmra.mrb[40].mxu1 %v4752_v44  ;;  %v4886_v44 = vld [vmem:[%s6772_s1 + $0x284] ss:$8 sps:$4 sm:$0xff]  }
  0x93   :  { %2874 = vmatmul.mubr.bf16.gmra.mrb[40].mxu0 %v4753_v45  ;;  %2400 = vmatprep.mubr.bf16.mxu1 %v4760_v46  ;;  %v4848_v45 = vld [vmem:[%s6773_s0 + $0x214] ss:$52 sps:$4 sm:$0xff]   ;;  %v4853_v46 = vld [vmem:[%s6773_s0 + $0x22c] ss:$52 sps:$4 sm:$0xff]  }
  0x94   :  { %2883 = vmatprep.mubr.bf16.mxu0 %v4762_v47  ;;  %v5838_v47 = vld [vmem:[%s6772_s1 + $0x580] ss:$8 sps:$4 sm:$0xff]  }
  0x9a   :  { %2401 = vmatmul.mubr.bf16.gmra.mrb[44].mxu1 %v4764_v50  ;;  %v4898_v50 = vld [vmem:[%s6772_s1 + $0x294] ss:$8 sps:$4 sm:$0xff]  }
  0x9b   :  { %2884 = vmatmul.mubr.bf16.gmra.mrb[44].mxu0 %v4765_v51  ;;  %2410 = vmatprep.mubr.bf16.mxu1 %v3903_v52  ;;  %v5856_v51 = vld [vmem:[%s6772_s1 + $0x590] ss:$8 sps:$4 sm:$0xff]  }
  0x9c   :  { %2893 = vmatprep.mubr.bf16.mxu0 %v3909_v53  ;;  %v4858_v52 = vld [vmem:[%s6773_s0 + $0x210] ss:$52 sps:$4 sm:$0xff]   ;;  %v4859_v53 = vld [vmem:[%s6773_s0 + $0x228] ss:$52 sps:$4 sm:$0xff]  }
  0xa2   :  { %2411 = vmatmul.mubr.bf16.gmra.mrb[48].mxu1 %v3902_v54  ;;  %v4896_v54 = vld [vmem:[%s6772_s1 + $0x290] ss:$8 sps:$4 sm:$0xff]  }
  0xa3   :  { %2894 = vmatmul.mubr.bf16.gmra.mrb[48].mxu0 %v3908_v55  ;;  %2451 = vmatprep.mubr.bf16.mxu1 %v4787_v56  ;;  %v5872_v55 = vld [vmem:[%s6772_s1 + $0x5a4] ss:$8 sps:$4 sm:$0xff]  }
  0xa4   :  { %2934 = vmatprep.mubr.bf16.mxu0 %v4790_v57  ;;  %v4906_v56 = vld [vmem:[%s6772_s1 + $0x2a4] ss:$8 sps:$4 sm:$0xff]   ;;  %v4866_v57 = vld [vmem:[%s6773_s0 + $0x27c] ss:$52 sps:$4 sm:$0xff]  }
  0xaa   :  { %2452 = vmatmul.mubr.bf16.vlgmr.msra.gmra.mrb[0].mxu1 %v4785_v58  ;;  %v4868_v58 = vld [vmem:[%s6773_s0 + $0x294] ss:$52 sps:$4 sm:$0xff]  }
  0xab   :  { %2935 = vmatmul.mubr.bf16.vlgmr.msra.gmra.mrb[0].mxu0 %v4788_v59  ;;  %2461 = vmatprep.mubr.bf16.mxu1 %v4797_v62  ;;  %v5886_v59 = vld [vmem:[%s6772_s1 + $0x5a0] ss:$8 sps:$4 sm:$0xff]   ;;  %v5896_v62 = vld [vmem:[%s6772_s1 + $0x5b4] ss:$8 sps:$4 sm:$0xff]  }
  0xac   :  { %3064 = vmatpush1.bf16.msra.mxu0 %v5642_v60  ;;  %2581 = vmatpush1.bf16.msra.mxu1 %v4794_v61  ;;  %v4904_v61 = vld [vmem:[%s6772_s1 + $0x2a0] ss:$8 sps:$4 sm:$0xff]  }
  0xad   :  { %2944 = vmatprep.mubr.bf16.mxu0 %v4799_v63  ;;  %3065 = vmatprep.subr.bf16.mxu0 %v5656_v0  ;;  %v4916_v63 = vld [vmem:[%s6772_s1 + $0x2b4] ss:$8 sps:$4 sm:$0xff]  }
  0xae   :  { %2582 = vmatprep.subr.bf16.mxu1 %v4808_v1  ;;  %v5904_v1 = vld [vmem:[%s6772_s1 + $0x5b0] ss:$8 sps:$4 sm:$0xff]  }
  0xb0   :  { %3066 = vmatpush1.bf16.msra.mxu0 %v5665_v2  ;;  %2583 = vmatpush1.bf16.msra.mxu1 %v4806_v5  ;;  %v4914_v5 = vld [vmem:[%s6772_s1 + $0x2b0] ss:$8 sps:$4 sm:$0xff]  }
  0xb1   :  { %3067 = vmatprep.subr.bf16.mxu0 %v5679_v6  ;;  %2584 = vmatprep.subr.bf16.mxu1 %v4820_v7  ;;  %v5920_v7 = vld [vmem:[%s6772_s1 + $0x5c4] ss:$8 sps:$4 sm:$0xff]  }
  0xb2   :  { %2462 = vmatmul.mubr.bf16.gmra.mrb[4].mxu1 %v4804_v3  ;;  %v4870_v3 = vld [vmem:[%s6773_s0 + $0x278] ss:$52 sps:$4 sm:$0xff]  }
  0xb3   :  { %2945 = vmatmul.mubr.bf16.gmra.mrb[4].mxu0 %v4805_v4  ;;  %2471 = vmatprep.mubr.bf16.mxu1 %v4812_v9  ;;  %v4871_v4 = vld [vmem:[%s6773_s0 + $0x290] ss:$52 sps:$4 sm:$0xff]  }
  0xb4   :  { %3068 = vmatpush1.bf16.msra.mxu0 %v5688_v8  ;;  %2954 = vmatprep.mubr.bf16.mxu0 %v4814_v10  ;;  %v4928_v9 = vld [vmem:[%s6772_s1 + $0x2c4] ss:$8 sps:$4 sm:$0xff]  }
  0xb5   :  { %2585 = vmatpush1.bf16.msra.mxu1 %v4818_v11  ;;  %3069 = vmatprep.subr.bf16.mxu0 %v5704_v12  ;;  %v4878_v10 = vld [vmem:[%s6773_s0 + $0x2e4] ss:$52 sps:$4 sm:$0xff]   ;;  %v4880_v11 = vld [vmem:[%s6773_s0 + $0x2fc] ss:$52 sps:$4 sm:$0xff]  }
  0xb6   :  { %2586 = vmatprep.subr.bf16.mxu1 %v4832_v13  ;;  %v5934_v13 = vld [vmem:[%s6772_s1 + $0x5c0] ss:$8 sps:$4 sm:$0xff]  }
  0xb8   :  { %3070 = vmatpush1.bf16.msra.mxu0 %v5713_v14 }
  0xb9   :  { %3071 = vmatprep.subr.bf16.mxu0 %v5727_v18  ;;  %2587 = vmatpush1.bf16.msra.mxu1 %v4830_v17  ;;  %v4940_v17 = vld [vmem:[%s6772_s1 + $0x2d4] ss:$8 sps:$4 sm:$0xff]  }
  0xba   :  { %2588 = vmatprep.subr.bf16.mxu1 %v4843_v19  ;;  %2472 = vmatmul.mubr.bf16.gmra.mrb[8].mxu1 %v4816_v15  ;;  %v4926_v15 = vld [vmem:[%s6772_s1 + $0x2c0] ss:$8 sps:$4 sm:$0xff]   ;;  %v5952_v19 = vld [vmem:[%s6772_s1 + $0x5d0] ss:$8 sps:$4 sm:$0xff]  }
  0xbb   :  { %2955 = vmatmul.mubr.bf16.gmra.mrb[8].mxu0 %v4817_v16  ;;  %2481 = vmatprep.mubr.bf16.mxu1 %v4824_v20  ;;  %v5944_v16 = vld [vmem:[%s6772_s1 + $0x5d4] ss:$8 sps:$4 sm:$0xff]   ;;  %v4938_v20 = vld [vmem:[%s6772_s1 + $0x2d0] ss:$8 sps:$4 sm:$0xff]  }
  0xbc   :  { %2964 = vmatprep.mubr.bf16.mxu0 %v4826_v21  ;;  %3072 = vmatpush1.bf16.msra.mxu0 %v5743_v22  ;;  %v4882_v21 = vld [vmem:[%s6773_s0 + $0x2e0] ss:$52 sps:$4 sm:$0xff]  }
  0xbd   :  { %2589 = vmatpush1.bf16.msra.mxu1 %v4841_v23  ;;  %3073 = vmatprep.subr.bf16.mxu0 %v5752_v24  ;;  %v4883_v23 = vld [vmem:[%s6773_s0 + $0x2f8] ss:$52 sps:$4 sm:$0xff]  }
  0xbe   :  { %2590 = vmatprep.subr.bf16.mxu1 %v4852_v25  ;;  %v5967_v25 = vld [vmem:[%s6772_s1 + $0x5e4] ss:$8 sps:$4 sm:$0xff]  }
  0xc0   :  { %3074 = vmatpush1.bf16.msra.mxu0 %v5760_v26 }
  0xc1   :  { %2591 = vmatpush1.bf16.msra.mxu1 %v4850_v29  ;;  %3075 = vmatprep.subr.bf16.mxu0 %v5776_v30  ;;  %v4892_v29 = vld [vmem:[%s6773_s0 + $0x364] ss:$52 sps:$4 sm:$0xff]  }
  0xc2   :  { %2592 = vmatprep.subr.bf16.mxu1 %v4862_v31  ;;  %2482 = vmatmul.mubr.bf16.gmra.mrb[12].mxu1 %v4828_v27  ;;  %v4890_v27 = vld [vmem:[%s6773_s0 + $0x34c] ss:$52 sps:$4 sm:$0xff]  }
  0xc3   :  { %2965 = vmatmul.mubr.bf16.gmra.mrb[12].mxu0 %v4829_v28  ;;  %2491 = vmatprep.mubr.bf16.mxu1 %v4836_v32  ;;  %v4949_v28 = vld [vmem:[%s6772_s1 + $0x2e4] ss:$8 sps:$4 sm:$0xff]   ;;  %v5982_v31 = vld [vmem:[%s6772_s1 + $0x5e0] ss:$8 sps:$4 sm:$0xff]  }
  0xc4   :  { %2974 = vmatprep.mubr.bf16.mxu0 %v4838_v33  ;;  %3076 = vmatpush1.bf16.msra.mxu0 %v5790_v34  ;;  %v4947_v32 = vld [vmem:[%s6772_s1 + $0x2e0] ss:$8 sps:$4 sm:$0xff]   ;;  %v5991_v33 = vld [vmem:[%s6772_s1 + $0x5f4] ss:$8 sps:$4 sm:$0xff]  }
  0xc5   :  { %2593 = vmatpush1.bf16.msra.mxu1 %v4860_v36  ;;  %3077 = vmatprep.subr.bf16.mxu0 %v5800_v37  ;;  %v4956_v36 = vld [vmem:[%s6772_s1 + $0x2f4] ss:$8 sps:$4 sm:$0xff]  }
  0xc6   :  { %2594 = vmatprep.subr.bf16.mxu1 %v4874_v38  ;;  %v6000_v38 = vld [vmem:[%s6772_s1 + $0x5f0] ss:$8 sps:$4 sm:$0xff]  }
  0xc8   :  { %3078 = vmatpush1.bf16.msra.mxu0 %v5808_v39 }
  0xc9   :  { %2595 = vmatpush1.bf16.msra.mxu1 %v4872_v40  ;;  %3079 = vmatprep.subr.bf16.mxu0 %v5823_v43  ;;  %v4954_v40 = vld [vmem:[%s6772_s1 + $0x2f0] ss:$8 sps:$4 sm:$0xff]  }
  0xca   :  { %2596 = vmatprep.subr.bf16.mxu1 %v4886_v44  ;;  %2492 = vmatmul.mubr.bf16.gmra.mrb[16].mxu1 %v4840_v41  ;;  %v4965_v41 = vld [vmem:[%s6772_s1 + $0x604] ss:$8 sps:$4 sm:$0xff]   ;;  %v4895_v44 = vld [vmem:[%s6773_s0 + $0x360] ss:$52 sps:$4 sm:$0xff]  }
  0xcb   :  { %2975 = vmatmul.mubr.bf16.gmra.mrb[16].mxu0 %v4844_v42  ;;  %2501 = vmatprep.mubr.bf16.mxu1 %v4848_v45  ;;  %v4894_v42 = vld [vmem:[%s6773_s0 + $0x348] ss:$52 sps:$4 sm:$0xff]  }
  0xcc   :  { %2984 = vmatprep.mubr.bf16.mxu0 %v4853_v46  ;;  %3080 = vmatpush1.bf16.msra.mxu0 %v5838_v47  ;;  %v4902_v45 = vld [vmem:[%s6773_s0 + $0x3b4] ss:$52 sps:$4 sm:$0xff]   ;;  %v4907_v46 = vld [vmem:[%s6773_s0 + $0x3cc] ss:$52 sps:$4 sm:$0xff]  }
  0xcd   :  { %2597 = vmatpush1.bf16.msra.mxu1 %v4884_v48  ;;  %3081 = vmatprep.subr.bf16.mxu0 %v5847_v49  ;;  %v4909_v48 = vld [vmem:[%s6773_s0 + $0x3b0] ss:$52 sps:$4 sm:$0xff]  }
  0xce   :  { %2598 = vmatprep.subr.bf16.mxu1 %v4898_v50  ;;  %v4910_v50 = vld [vmem:[%s6773_s0 + $0x3c8] ss:$52 sps:$4 sm:$0xff]  }
  0xd0   :  { %3082 = vmatpush1.bf16.msra.mxu0 %v5856_v51 }
  0xd1   :  { %2599 = vmatpush1.bf16.msra.mxu1 %v4896_v54  ;;  %3083 = vmatprep.subr.bf16.mxu0 %v5872_v55  ;;  %v4925_v54 = vld [vmem:[%s6773_s0 + $0x430] ss:$52 sps:$4 sm:$0xff]  }
  0xd2   :  { %2600 = vmatprep.subr.bf16.mxu1 %v4906_v56  ;;  %2502 = vmatmul.mubr.bf16.gmra.mrb[20].mxu1 %v4858_v52  ;;  %v4920_v52 = vld [vmem:[%s6773_s0 + $0x41c] ss:$52 sps:$4 sm:$0xff]   ;;  %v4932_v56 = vld [vmem:[%s6773_s0 + $0x484] ss:$52 sps:$4 sm:$0xff]  }
  0xd3   :  { %2985 = vmatmul.mubr.bf16.gmra.mrb[20].mxu0 %v4859_v53  ;;  %2511 = vmatprep.mubr.bf16.mxu1 %v4866_v57  ;;  %v4924_v53 = vld [vmem:[%s6773_s0 + $0x418] ss:$52 sps:$4 sm:$0xff]   ;;  %v4934_v57 = vld [vmem:[%s6773_s0 + $0x49c] ss:$52 sps:$4 sm:$0xff]  }
  0xd4   :  { %2994 = vmatprep.mubr.bf16.mxu0 %v4868_v58  ;;  %3084 = vmatpush1.bf16.msra.mxu0 %v5886_v59  ;;  %v187_v58 = vld [vmem:[%s6773_s0 + $0x4e8] sm:$0x33] }
  0xd5   :  { %2601 = vmatpush1.bf16.msra.mxu1 %v4904_v61  ;;  %3085 = vmatprep.subr.bf16.mxu0 %v5896_v62  ;;  %v190_v61 = vld [vmem:[%s6773_s0 + $0x500] sm:$0x33] }
  0xd6   :  { %2602 = vmatprep.subr.bf16.mxu1 %v4916_v63  ;;  %v4936_v63 = vld [vmem:[%s6773_s0 + $0x480] ss:$52 sps:$4 sm:$0xff]  }
  0xd8   :  { %3086 = vmatpush1.bf16.msra.mxu0 %v5904_v1 }
  0xd9   :  { %2603 = vmatpush1.bf16.msra.mxu1 %v4914_v5  ;;  %3087 = vmatprep.subr.bf16.mxu0 %v5920_v7  ;;  %v3911_v5 = vcombine.high %v190_v61, %v190_v61 }
  0xda   :  { %2604 = vmatprep.subr.bf16.mxu1 %v4928_v9  ;;  %2512 = vmatmul.mubr.bf16.gmra.mrb[24].mxu1 %v4870_v3  ;;  %v4937_v3 = vld [vmem:[%s6773_s0 + $0x498] ss:$52 sps:$4 sm:$0xff]   ;;  %v3904_v9 = vcombine.low %v187_v58, %v187_v58 }
  0xdb   :  { %2995 = vmatmul.mubr.bf16.gmra.mrb[24].mxu0 %v4871_v4  ;;  %2521 = vmatprep.mubr.bf16.mxu1 %v4878_v10  ;;  %v3905_v4 = vcombine.high %v187_v58, %v187_v58  ;;  %v3910_v10 = vcombine.low %v190_v61, %v190_v61  ;;  %v5034_v58 = vld [vmem:[%s6773_s0 + $0x300] ss:$52 sps:$4 sm:$0xff]  }
  0xdc   :  { %3004 = vmatprep.mubr.bf16.mxu0 %v4880_v11  ;;  %3088 = vmatpush1.bf16.msra.mxu0 %v5934_v13  ;;  %v4959_v11 = vld [vmem:[%s6773_s0 + $0x14] ss:$52 sps:$4 sm:$0xff]  }
  0xdd   :  { %2605 = vmatpush1.bf16.msra.mxu1 %v4926_v15  ;;  %3089 = vmatprep.subr.bf16.mxu0 %v5944_v16  ;;  %v4962_v15 = vld [vmem:[%s6773_s0 + $0x2c] ss:$52 sps:$4 sm:$0xff]  }
  0xde   :  { %2606 = vmatprep.subr.bf16.mxu1 %v4940_v17  ;;  %v4957_v17 = vld [vmem:[%s6773_s0 + $0x10] ss:$52 sps:$4 sm:$0xff]   ;;  %v5037_v61 = vld [vmem:[%s6773_s0 + $0x2a0] ss:$52 sps:$4 sm:$0xff]  }
  0xe0   :  { %3090 = vmatpush1.bf16.msra.mxu0 %v5952_v19 }
  0xe1   :  { %2607 = vmatpush1.bf16.msra.mxu1 %v4938_v20  ;;  %3091 = vmatprep.subr.bf16.mxu0 %v5967_v25  ;;  %v4960_v20 = vld [vmem:[%s6773_s0 + $0x28] ss:$52 sps:$4 sm:$0xff]  }
  0xe2   :  { %2608 = vmatprep.subr.bf16.mxu1 %v4949_v28  ;;  %2522 = vmatmul.mubr.bf16.gmra.mrb[28].mxu1 %v4882_v21  ;;  %v4963_v21 = vld [vmem:[%s6772_s1 + $0x600] ss:$8 sps:$4 sm:$0xff]   ;;  %v4974_v28 = vld [vmem:[%s6772_s1 + $0x614] ss:$8 sps:$4 sm:$0xff]  }
  0xe3   :  { %3005 = vmatmul.mubr.bf16.gmra.mrb[28].mxu0 %v4883_v23  ;;  %2531 = vmatprep.mubr.bf16.mxu1 %v4890_v27  ;;  %v4966_v23 = vld [vmem:[%s6773_s0 + $0x7c] ss:$52 sps:$4 sm:$0xff]   ;;  %v4968_v27 = vld [vmem:[%s6773_s0 + $0x94] ss:$52 sps:$4 sm:$0xff]  }
  0xe4   :  { %3014 = vmatprep.mubr.bf16.mxu0 %v4892_v29  ;;  %3092 = vmatpush1.bf16.msra.mxu0 %v5982_v31  ;;  %v4972_v29 = vld [vmem:[%s6772_s1 + $0x610] ss:$8 sps:$4 sm:$0xff]  }
  0xe5   :  { %2609 = vmatpush1.bf16.msra.mxu1 %v4947_v32  ;;  %3093 = vmatprep.subr.bf16.mxu0 %v5991_v33  ;;  %v4989_v32 = vld [vmem:[%s6772_s1 + $0x624] ss:$8 sps:$4 sm:$0xff]  }
  0xe6   :  { %2610 = vmatprep.subr.bf16.mxu1 %v4956_v36  ;;  %v4970_v36 = vld [vmem:[%s6773_s0 + $0x78] ss:$52 sps:$4 sm:$0xff]  }
  0xe8   :  { %3094 = vmatpush1.bf16.msra.mxu0 %v6000_v38 }
  0xe9   :  { %2611 = vmatpush1.bf16.msra.mxu1 %v4954_v40  ;;  %3224 = vmatprep.subr.bf16.mxu0 %v4965_v41  ;;  %v4971_v40 = vld [vmem:[%s6773_s0 + $0x90] ss:$52 sps:$4 sm:$0xff]  }
  0xea   :  { %4178 = vmatprep.subr.bf16.mxu1 %v5576_v35  ;;  %2532 = vmatmul.mubr.bf16.gmra.mrb[32].mxu1 %v4894_v42  ;;  %v4922_v35 = vld [vmem:[%s6773_s0 + $0x434] ss:$52 sps:$4 sm:$0xff]   ;;  %v4977_v41 = vld [vmem:[%s6773_s0 + $0xfc] ss:$52 sps:$4 sm:$0xff]  }
  0xeb   :  { %3015 = vmatmul.mubr.bf16.gmra.mrb[32].mxu0 %v4895_v44  ;;  %2541 = vmatprep.mubr.bf16.mxu1 %v4902_v45  ;;  %v5004_v42 = vld [vmem:[%s6772_s1 + $0x634] ss:$8 sps:$4 sm:$0xff]   ;;  %v4980_v44 = vld [vmem:[%s6773_s0 + $0xf8] ss:$52 sps:$4 sm:$0xff]  }
  0xec   :  { %3024 = vmatprep.mubr.bf16.mxu0 %v4907_v46  ;;  %v4983_v45 = vld [vmem:[%s6773_s0 + $0x164] ss:$52 sps:$4 sm:$0xff]   ;;  %v4986_v46 = vld [vmem:[%s6773_s0 + $0x160] ss:$52 sps:$4 sm:$0xff]  }
  0xf2   :  { %2542 = vmatmul.mubr.bf16.gmra.mrb[36].mxu1 %v4909_v48  ;;  %v5027_v48 = vld [vmem:[%s6773_s0 + $0x48c] ss:$52 sps:$4 sm:$0xff]  }
  0xf3   :  { %3025 = vmatmul.mubr.bf16.gmra.mrb[36].mxu0 %v4910_v50  ;;  %2551 = vmatprep.mubr.bf16.mxu1 %v4920_v52  ;;  %v188_v50 = vld [vmem:[%s6773_s0 + $0x4f0] sm:$0x33]  ;;  %v5029_v52 = vld [vmem:[%s6773_s0 + $0x488] ss:$52 sps:$4 sm:$0xff]  }
  0xf4   :  { %3034 = vmatprep.mubr.bf16.mxu0 %v4922_v35  ;;  %v5030_v35 = vld [vmem:[%s6773_s0 + $0x1d0] ss:$52 sps:$4 sm:$0xff]  }
  0xfa   :  { %2552 = vmatmul.mubr.bf16.gmra.mrb[40].mxu1 %v4924_v53  ;;  %v3907_v53 = vcombine.high %v188_v50, %v188_v50 }
  0xfb   :  { %3035 = vmatmul.mubr.bf16.gmra.mrb[40].mxu0 %v4925_v54  ;;  %2561 = vmatprep.mubr.bf16.mxu1 %v4932_v56  ;;  %v3906_v54 = vcombine.low %v188_v50, %v188_v50  ;;  %v5033_v56 = vld [vmem:[%s6773_s0 + $0x238] ss:$52 sps:$4 sm:$0xff]  }
  0xfc   :  { %3044 = vmatprep.mubr.bf16.mxu0 %v4934_v57  ;;  %v5036_v57 = vld [vmem:[%s6773_s0 + $0x304] ss:$52 sps:$4 sm:$0xff]  }
 0x102   :  { %2562 = vmatmul.mubr.bf16.gmra.mrb[44].mxu1 %v4936_v63  ;;  %v5038_v63 = vld [vmem:[%s6773_s0 + $0x36c] ss:$52 sps:$4 sm:$0xff]  }
 0x103   :  { %3045 = vmatmul.mubr.bf16.gmra.mrb[44].mxu0 %v4937_v3  ;;  %2571 = vmatprep.mubr.bf16.mxu1 %v3905_v4  ;;  %v5040_v3 = vld [vmem:[%s6773_s0 + $0x368] ss:$52 sps:$4 sm:$0xff]  }
 0x104   :  { %3054 = vmatprep.mubr.bf16.mxu0 %v3911_v5  ;;  %v5041_v4 = vld [vmem:[%s6773_s0 + $0x308] ss:$52 sps:$4 sm:$0xff]  }
 0x105   :  { %v5042_v5 = vld [vmem:[%s6773_s0 + $0x3d4] ss:$52 sps:$4 sm:$0xff]  }
 0x10a   :  { %2572 = vmatmul.mubr.bf16.gmra.mrb[48].mxu1 %v3904_v9  ;;  %v5044_v9 = vld [vmem:[%s6773_s0 + $0x3d0] ss:$52 sps:$4 sm:$0xff]  }
 0x10b   :  { %3055 = vmatmul.mubr.bf16.gmra.mrb[48].mxu0 %v3910_v10  ;;  %2612 = vmatprep.mubr.bf16.mxu1 %v4959_v11  ;;  %v5045_v10 = vld [vmem:[%s6773_s0 + $0x370] ss:$52 sps:$4 sm:$0xff]  }
 0x10c   :  { %3095 = vmatprep.mubr.bf16.mxu0 %v4962_v15  ;;  %v5046_v11 = vld [vmem:[%s6773_s0 + $0x43c] ss:$52 sps:$4 sm:$0xff]   ;;  %v5048_v15 = vld [vmem:[%s6773_s0 + $0x438] ss:$52 sps:$4 sm:$0xff]  }
 0x112   :  { %2613 = vmatmul.mubr.bf16.vlgmr.msra.gmra.mrb[0].mxu1 %v4957_v17  ;;  %v5049_v17 = vld [vmem:[%s6773_s0 + $0x3d8] ss:$52 sps:$4 sm:$0xff]  }
 0x113   :  { %3096 = vmatmul.mubr.bf16.vlgmr.msra.gmra.mrb[0].mxu0 %v4960_v20  ;;  %2622 = vmatprep.mubr.bf16.mxu1 %v4966_v23  ;;  %v5050_v20 = vld [vmem:[%s6773_s0 + $0x4a4] ss:$52 sps:$4 sm:$0xff]   ;;  %v5052_v23 = vld [vmem:[%s6773_s0 + $0x4a0] ss:$52 sps:$4 sm:$0xff]  }
 0x114   :  { %3225 = vmatpush1.bf16.msra.mxu0 %v4963_v21  ;;  %4194 = vmatpush1.bf16.msra.mxu1 %v5642_v60  ;;  %v4975_v60 = vld [vmem:[%s6773_s0 + $0xe4] ss:$52 sps:$4 sm:$0xff]   ;;  %v191_v21 = vld [vmem:[%s6773_s0 + $0x508] sm:$0x33] }
 0x115   :  { %3105 = vmatprep.mubr.bf16.mxu0 %v4968_v27  ;;  %4179 = vmatprep.subr.bf16.mxu1 %v5656_v0  ;;  %v4987_v0 = vld [vmem:[%s6772_s1 + $0x620] ss:$8 sps:$4 sm:$0xff]  }
 0x116   :  { %3226 = vmatprep.subr.bf16.mxu0 %v4974_v28  ;;  %v5053_v27 = vld [vmem:[%s6773_s0 + $0x440] ss:$52 sps:$4 sm:$0xff]   ;;  %v3913_v28 = vcombine.high %v191_v21, %v191_v21 }
 0x118   :  { %3227 = vmatpush1.bf16.msra.mxu0 %v4972_v29  ;;  %4195 = vmatpush1.bf16.msra.mxu1 %v5665_v2  ;;  %v5002_v2 = vld [vmem:[%s6772_s1 + $0x630] ss:$8 sps:$4 sm:$0xff]   ;;  %v3912_v29 = vcombine.low %v191_v21, %v191_v21  ;;  %v3447_v21 = vld [vmem:[%s6775_s3] sm:$0x3] }
 0x119   :  { %3228 = vmatprep.subr.bf16.mxu0 %v4989_v32  ;;  %4180 = vmatprep.subr.bf16.mxu1 %v5679_v6  ;;  %v4979_v6 = vld [vmem:[%s6773_s0 + $0xe0] ss:$52 sps:$4 sm:$0xff]   ;;  %v5056_v32 = vld [vmem:[%s6773_s0 + $0x4a8] ss:$52 sps:$4 sm:$0xff]  }
 0x11a   :  { %2623 = vmatmul.mubr.bf16.gmra.mrb[4].mxu1 %v4970_v36  ;;  %v5057_v36 = vld [vmem:[%s6773_s0 + $0x510] ss:$0 sps:$4 sm:$0x33]  }
 0x11b   :  { %3106 = vmatmul.mubr.bf16.gmra.mrb[4].mxu0 %v4971_v40  ;;  %2632 = vmatprep.mubr.bf16.mxu1 %v4975_v60 }
 0x11c   :  { %3115 = vmatprep.mubr.bf16.mxu0 %v4977_v41  ;;  %4196 = vmatpush1.bf16.msra.mxu1 %v5688_v8  ;;  %v4981_v8 = vld [vmem:[%s6773_s0 + $0x14c] ss:$52 sps:$4 sm:$0xff]  }
 0x11d   :  { %3229 = vmatpush1.bf16.msra.mxu0 %v4987_v0  ;;  %4181 = vmatprep.subr.bf16.mxu1 %v5704_v12  ;;  %v4985_v12 = vld [vmem:[%s6773_s0 + $0x148] ss:$52 sps:$4 sm:$0xff]  }
 0x11e   :  { %3230 = vmatprep.subr.bf16.mxu0 %v5004_v42 }
 0x120   :  { %4197 = vmatpush1.bf16.msra.mxu1 %v5713_v14  ;;  %v4990_v14 = vld [vmem:[%s6773_s0 + $0x1b4] ss:$52 sps:$4 sm:$0xff]  }
 0x121   :  { %3231 = vmatpush1.bf16.msra.mxu0 %v5002_v2  ;;  %4182 = vmatprep.subr.bf16.mxu1 %v5727_v18  ;;  %v4992_v18 = vld [vmem:[%s6773_s0 + $0x1cc] ss:$52 sps:$4 sm:$0xff]  }
 0x122   :  { %2633 = vmatmul.mubr.bf16.gmra.mrb[8].mxu1 %v4979_v6 }
 0x123   :  { %3116 = vmatmul.mubr.bf16.gmra.mrb[8].mxu0 %v4980_v44  ;;  %2642 = vmatprep.mubr.bf16.mxu1 %v4981_v8 }
 0x124   :  { %3125 = vmatprep.mubr.bf16.mxu0 %v4983_v45  ;;  %4198 = vmatpush1.bf16.msra.mxu1 %v5743_v22  ;;  %v4994_v22 = vld [vmem:[%s6773_s0 + $0x1b0] ss:$52 sps:$4 sm:$0xff]  }
 0x125   :  { %4183 = vmatprep.subr.bf16.mxu1 %v5752_v24  ;;  %v4995_v24 = vld [vmem:[%s6773_s0 + $0x1c8] ss:$52 sps:$4 sm:$0xff]  }
 0x128   :  { %4199 = vmatpush1.bf16.msra.mxu1 %v5760_v26  ;;  %v4996_v26 = vld [vmem:[%s6773_s0 + $0x21c] ss:$52 sps:$4 sm:$0xff]  }
 0x129   :  { %4184 = vmatprep.subr.bf16.mxu1 %v5776_v30  ;;  %v4998_v30 = vld [vmem:[%s6773_s0 + $0x234] ss:$52 sps:$4 sm:$0xff]  }
 0x12a   :  { %2643 = vmatmul.mubr.bf16.gmra.mrb[12].mxu1 %v4985_v12 }
 0x12b   :  { %3126 = vmatmul.mubr.bf16.gmra.mrb[12].mxu0 %v4986_v46  ;;  %2652 = vmatprep.mubr.bf16.mxu1 %v4990_v14 }
 0x12c   :  { %3135 = vmatprep.mubr.bf16.mxu0 %v4992_v18  ;;  %4200 = vmatpush1.bf16.msra.mxu1 %v5790_v34  ;;  %v5000_v34 = vld [vmem:[%s6773_s0 + $0x218] ss:$52 sps:$4 sm:$0xff]  }
 0x12d   :  { %4185 = vmatprep.subr.bf16.mxu1 %v5800_v37  ;;  %v5001_v37 = vld [vmem:[%s6773_s0 + $0x230] ss:$52 sps:$4 sm:$0xff]  }
 0x130   :  { %4201 = vmatpush1.bf16.msra.mxu1 %v5808_v39  ;;  %v5005_v39 = vld [vmem:[%s6773_s0 + $0x284] ss:$52 sps:$4 sm:$0xff]  }
 0x131   :  { %4186 = vmatprep.subr.bf16.mxu1 %v5823_v43  ;;  %v5007_v43 = vld [vmem:[%s6773_s0 + $0x29c] ss:$52 sps:$4 sm:$0xff]  }
 0x132   :  { %2653 = vmatmul.mubr.bf16.gmra.mrb[16].mxu1 %v4994_v22 }
 0x133   :  { %3136 = vmatmul.mubr.bf16.gmra.mrb[16].mxu0 %v4995_v24  ;;  %2662 = vmatprep.mubr.bf16.mxu1 %v4996_v26 }
 0x134   :  { %3145 = vmatprep.mubr.bf16.mxu0 %v4998_v30  ;;  %4202 = vmatpush1.bf16.msra.mxu1 %v5838_v47  ;;  %v5009_v47 = vld [vmem:[%s6773_s0 + $0x280] ss:$52 sps:$4 sm:$0xff]  }
 0x135   :  { %4187 = vmatprep.subr.bf16.mxu1 %v5847_v49  ;;  %v5010_v49 = vld [vmem:[%s6773_s0 + $0x298] ss:$52 sps:$4 sm:$0xff]  }
 0x138   :  { %4203 = vmatpush1.bf16.msra.mxu1 %v5856_v51  ;;  %v5011_v51 = vld [vmem:[%s6773_s0 + $0x2ec] ss:$52 sps:$4 sm:$0xff]  }
 0x139   :  { %4188 = vmatprep.subr.bf16.mxu1 %v5872_v55  ;;  %v5058_v55 = vmov 0  }
 0x13a   :  { %2663 = vmatmul.mubr.bf16.gmra.mrb[20].mxu1 %v5000_v34 }
 0x13b   :  { %3146 = vmatmul.mubr.bf16.gmra.mrb[20].mxu0 %v5001_v37  ;;  %2672 = vmatprep.mubr.bf16.mxu1 %v5005_v39 }
 0x13c   :  { %3155 = vmatprep.mubr.bf16.mxu0 %v5007_v43  ;;  %4204 = vmatpush1.bf16.msra.mxu1 %v5886_v59  ;;  %v5013_v59 = vld [vmem:[%s6773_s0 + $0x2e8] ss:$52 sps:$4 sm:$0xff]  }
 0x13d   :  { %4189 = vmatprep.subr.bf16.mxu1 %v5896_v62  ;;  %v5014_v62 = vld [vmem:[%s6773_s0 + $0x30] ss:$52 sps:$4 sm:$0xff]  }
 0x140   :  { %4205 = vmatpush1.bf16.msra.mxu1 %v5904_v1  ;;  %v5015_v1 = vld [vmem:[%s6773_s0 + $0x354] ss:$52 sps:$4 sm:$0xff]  }
 0x141   :  { %4190 = vmatprep.subr.bf16.mxu1 %v5920_v7  ;;  %v5017_v7 = vld [vmem:[%s6773_s0 + $0x350] ss:$52 sps:$4 sm:$0xff]  }
 0x142   :  { %2673 = vmatmul.mubr.bf16.gmra.mrb[24].mxu1 %v5009_v47 }
 0x143   :  { %3156 = vmatmul.mubr.bf16.gmra.mrb[24].mxu0 %v5010_v49  ;;  %2682 = vmatprep.mubr.bf16.mxu1 %v5011_v51 }
 0x144   :  { %3256 = vmatprep.mubr.bf16.mxu0 %v5058_v55  ;;  %4206 = vmatpush1.bf16.msra.mxu1 %v5934_v13  ;;  %v5018_v13 = vld [vmem:[%s6773_s0 + $0x98] ss:$52 sps:$4 sm:$0xff]  }
 0x145   :  { %4191 = vmatprep.subr.bf16.mxu1 %v5944_v16  ;;  %v5019_v16 = vld [vmem:[%s6773_s0 + $0x3bc] ss:$52 sps:$4 sm:$0xff]  }
 0x148   :  { %4207 = vmatpush1.bf16.msra.mxu1 %v5952_v19  ;;  %v5021_v19 = vld [vmem:[%s6773_s0 + $0x3b8] ss:$52 sps:$4 sm:$0xff]  }
 0x149   :  { %4192 = vmatprep.subr.bf16.mxu1 %v5967_v25  ;;  %v5022_v25 = vld [vmem:[%s6773_s0 + $0x100] ss:$52 sps:$4 sm:$0xff]  }
 0x14a   :  { %2683 = vmatmul.mubr.bf16.gmra.mrb[28].mxu1 %v5013_v59 }
 0x14b   :  { %4115 = vmatmul.mubr.msk.bf16.vlgmr.msra.gmra.mrb[0].mxu0 %vm2218_vm0, %v5014_v62  ;;  %2692 = vmatprep.mubr.bf16.mxu1 %v5015_v1 }
 0x14c   :  { %3266 = vmatprep.mubr.bf16.mxu0 %v5058_v55  ;;  %4208 = vmatpush1.bf16.msra.mxu1 %v5982_v31  ;;  %v5023_v31 = vld [vmem:[%s6773_s0 + $0x424] ss:$52 sps:$4 sm:$0xff]  }
 0x14d   :  { %4193 = vmatprep.subr.bf16.mxu1 %v5991_v33  ;;  %v5025_v33 = vld [vmem:[%s6773_s0 + $0x420] ss:$52 sps:$4 sm:$0xff]  }
 0x150   :  { %4209 = vmatpush1.bf16.msra.mxu1 %v6000_v38  ;;  %v5026_v38 = vld [vmem:[%s6773_s0 + $0x168] ss:$52 sps:$4 sm:$0xff]  }
 0x152   :  { %2693 = vmatmul.mubr.bf16.gmra.mrb[32].mxu1 %v5017_v7 }
 0x153   :  { %4116 = vmatmul.mubr.msk.bf16.gmra.mrb[4].mxu0 %vm2218_vm0, %v5018_v13  ;;  %2702 = vmatprep.mubr.bf16.mxu1 %v5019_v16 }
 0x154   :  { %3276 = vmatprep.mubr.bf16.mxu0 %v5058_v55 }
 0x15a   :  { %2703 = vmatmul.mubr.bf16.gmra.mrb[36].mxu1 %v5021_v19 }
 0x15b   :  { %4117 = vmatmul.mubr.msk.bf16.gmra.mrb[8].mxu0 %vm2218_vm0, %v5022_v25  ;;  %2712 = vmatprep.mubr.bf16.mxu1 %v5023_v31 }
 0x15c   :  { %3286 = vmatprep.mubr.bf16.mxu0 %v5058_v55 }
 0x162   :  { %2713 = vmatmul.mubr.bf16.gmra.mrb[40].mxu1 %v5025_v33 }
 0x163   :  { %4118 = vmatmul.mubr.msk.bf16.gmra.mrb[12].mxu0 %vm2218_vm0, %v5026_v38  ;;  %2722 = vmatprep.mubr.bf16.mxu1 %v5027_v48 }
 0x164   :  { %3296 = vmatprep.mubr.bf16.mxu0 %v5058_v55 }
 0x16a   :  { %2723 = vmatmul.mubr.bf16.gmra.mrb[44].mxu1 %v5029_v52 }
 0x16b   :  { %4119 = vmatmul.mubr.msk.bf16.gmra.mrb[16].mxu0 %vm2218_vm0, %v5030_v35  ;;  %2732 = vmatprep.mubr.bf16.mxu1 %v3907_v53 }
 0x16c   :  { %3306 = vmatprep.mubr.bf16.mxu0 %v5058_v55 }
 0x172   :  { %2733 = vmatmul.mubr.bf16.gmra.mrb[48].mxu1 %v3906_v54 }
 0x173   :  { %4120 = vmatmul.mubr.msk.bf16.gmra.mrb[20].mxu0 %vm2218_vm0, %v5033_v56  ;;  %3165 = vmatprep.mubr.bf16.mxu1 %v5036_v57 }
 0x174   :  { %3316 = vmatprep.mubr.bf16.mxu0 %v5058_v55 }
 0x17a   :  { %3166 = vmatmul.mubr.bf16.vlgmr.msra.gmra.mrb[52].mxu1 %v5034_v58 }
 0x17b   :  { %4121 = vmatmul.mubr.msk.bf16.gmra.mrb[24].mxu0 %vm2218_vm0, %v5037_v61  ;;  %3175 = vmatprep.mubr.bf16.mxu1 %v5038_v63 }
 0x17c   :  { %3326 = vmatprep.mubr.bf16.mxu0 %v5058_v55 }
 0x182   :  { %3176 = vmatmul.mubr.bf16.gmra.mrb[56].mxu1 %v5040_v3  ;;  %v3387_v3 = vlaneseq }
 0x183   :  { %4122 = vmatmul.mubr.msk.bf16.gmra.mrb[52].mxu0 %vm2218_vm0, %v5041_v4  ;;  %3185 = vmatprep.mubr.bf16.mxu1 %v5042_v5 }
 0x184   :  { %3336 = vmatprep.mubr.bf16.mxu0 %v5058_v55  ;;  %v3388_v4 = vshrl.u32 %v3387_v3, 7 }
 0x18a   :  { %3186 = vmatmul.mubr.bf16.gmra.mrb[60].mxu1 %v5044_v9 }
 0x18b   :  { %4123 = vmatmul.mubr.msk.bf16.gmra.mrb[56].mxu0 %vm2218_vm0, %v5045_v10  ;;  %3195 = vmatprep.mubr.bf16.mxu1 %v5046_v11 }
 0x18c   :  { %3346 = vmatprep.mubr.bf16.mxu0 %v5058_v55 }
 0x192   :  { %3196 = vmatmul.mubr.bf16.gmra.mrb[64].mxu1 %v5048_v15  ;;  %v3389_v15 = vsub.s32 0, %v3388_v4 }
 0x193   :  { %4124 = vmatmul.mubr.msk.bf16.gmra.mrb[60].mxu0 %vm2218_vm0, %v5049_v17  ;;  %3205 = vmatprep.mubr.bf16.mxu1 %v5050_v20  ;;  %v3385_v17 = vld [vmem:[%s6774_s2] sm:$0x3]  ;;  %v3393_v20 = vsub.s32 1, %v3388_v4 }
 0x194   :  { %3356 = vmatprep.mubr.bf16.mxu0 %v5058_v55 }
 0x19a   :  { %3206 = vmatmul.mubr.bf16.gmra.mrb[68].mxu1 %v5052_v23  ;;  %v6425_v23 = vrot.slane %v3385_v17, %v3389_v15 }
 0x19b   :  { %4125 = vmatmul.mubr.msk.bf16.gmra.mrb[64].mxu0 %vm2218_vm0, %v5053_v27  ;;  %3215 = vmatprep.mubr.bf16.mxu1 %v3913_v28 }
 0x19c   :  { %3366 = vmatprep.mubr.bf16.mxu0 %v5058_v55 }
 0x1a2   :  { %3216 = vmatmul.mubr.bf16.gmra.mrb[72].mxu1 %v3912_v29  ;;  %v6427_v29 = vrot.slane %v3385_v17, %v3393_v20 }
 0x1a3   :  { %4126 = vmatmul.mubr.msk.bf16.gmra.mrb[68].mxu0 %vm2218_vm0, %v5056_v32 }
 0x1a4   :  { %3376 = vmatprep.mubr.bf16.mxu0 %v5058_v55 }
 0x1ab   :  { %4127 = vmatmul.mubr.msk.bf16.gmra.mrb[72].mxu0 %vm2218_vm0, %v5057_v36 }
 0x1b6   :  { %v6327_v40 = vpop.f32.mrb[28].mxu0 }
 0x1b7   :  { %v6329_v60 = vpop.f32.mrb[29].mxu0 }
 0x1b8   :  { %v6331_v41 = vpop.f32.mrb[30].mxu0 }
 0x1b9   :  { %v6333_v0 = vpop.f32.mrb[31].mxu0 }
 0x1be   :  { %v6335_v42 = vpop.f32.mrb[32].mxu0 }
 0x1bf   :  { %v6337_v2 = vpop.f32.mrb[33].mxu0 }
 0x1c0   :  { %v6339_v6 = vpop.f32.mrb[34].mxu0 }
 0x1c1   :  { %v6341_v44 = vpop.f32.mrb[35].mxu0 }
 0x1c6   :  { %v6343_v8 = vpop.f32.mrb[36].mxu0 }
 0x1c7   :  { %v6345_v45 = vpop.f32.mrb[37].mxu0 }
 0x1c8   :  { %v6347_v12 = vpop.f32.mrb[38].mxu0 }
 0x1c9   :  { %v6349_v46 = vpop.f32.mrb[39].mxu0 }
 0x1ce   :  { %v6351_v14 = vpop.f32.mrb[40].mxu0 }
 0x1cf   :  { %v6353_v18 = vpop.f32.mrb[41].mxu0 }
 0x1d0   :  { %v6355_v22 = vpop.f32.mrb[42].mxu0 }
 0x1d1   :  { %v6357_v24 = vpop.f32.mrb[43].mxu0 }
 0x1d6   :  { %v6359_v26 = vpop.f32.mrb[44].mxu0 }
 0x1d7   :  { %v6361_v30 = vpop.f32.mrb[45].mxu0 }
 0x1d8   :  { %v6363_v34 = vpop.f32.mrb[46].mxu0 }
 0x1d9   :  { %v6365_v37 = vpop.f32.mrb[47].mxu0 }
 0x1de   :  { %v6367_v39 = vpop.f32.mrb[48].mxu0 }
 0x1df   :  { %v6369_v43 = vpop.f32.mrb[49].mxu0 }
 0x1e0   :  { %v3060_v47 = vpop.f32.mrb[50].mxu0 }
 0x1e1   :  { %v3061_v49 = vpop.f32.mrb[51].mxu0  ;;  %v6432_v47 = vrot.slane %v3447_v21, %v3389_v15 }
 0x1e5   :  { %v2614_v51 = vpop.f32.mrb[0].mxu1 }
 0x1e6   :  { %v2616_v55 = vpop.f32.mrb[1].mxu1 }
 0x1e7   :  { %v2618_v59 = vpop.f32.mrb[2].mxu1 }
 0x1e8   :  { %v2620_v62 = vpop.f32.mrb[3].mxu1 }
 0x1ed   :  { %v6371_v1 = vpop.f32.mrb[4].mxu1 }
 0x1ee   :  { %v6373_v7 = vpop.f32.mrb[5].mxu1 }
 0x1ef   :  { %v6375_v13 = vpop.f32.mrb[6].mxu1 }
 0x1f0   :  { %v6377_v16 = vpop.f32.mrb[7].mxu1 }
 0x1f5   :  { %v6379_v19 = vpop.f32.mrb[8].mxu1 }
 0x1f6   :  { %v6381_v25 = vpop.f32.mrb[9].mxu1 }
 0x1f7   :  { %v6383_v31 = vpop.f32.mrb[10].mxu1 }
 0x1f8   :  { %v6385_v33 = vpop.f32.mrb[11].mxu1 }
 0x1fd   :  { %v6387_v38 = vpop.f32.mrb[12].mxu1 }
 0x1fe   :  { %v6389_v48 = vpop.f32.mrb[13].mxu1 }
 0x1ff   :  { %v6391_v50 = vpop.f32.mrb[14].mxu1 }
 0x200   :  { %v6393_v52 = vpop.f32.mrb[15].mxu1 }
 0x205   :  { %v6395_v35 = vpop.f32.mrb[16].mxu1 }
 0x206   :  { %v6397_v53 = vpop.f32.mrb[17].mxu1 }
 0x207   :  { %v6399_v54 = vpop.f32.mrb[18].mxu1 }
 0x208   :  { %v6401_v56 = vpop.f32.mrb[19].mxu1 }
 0x20d   :  { %v6403_v57 = vpop.f32.mrb[20].mxu1 }
 0x20e   :  { %v6405_v58 = vpop.f32.mrb[21].mxu1 }
 0x20f   :  { %v6407_v61 = vpop.f32.mrb[22].mxu1 }
 0x210   :  { %v6409_v63 = vpop.f32.mrb[23].mxu1 }
 0x211   :  { %6777 = vst [vmem:[#allocation2_spill] sm:$0xff] %v6409_v63 }
 0x215   :  { %v6411_v5 = vpop.f32.mrb[24].mxu1 }
 0x216   :  { %6778 = vst [vmem:[#allocation3_spill] sm:$0xff] %v6411_v5  ;;  %v6413_v9 = vpop.f32.mrb[25].mxu1 }
 0x217   :  { %6779 = vst [vmem:[#allocation4_spill] sm:$0xff] %v6413_v9  ;;  %v6415_v10 = vpop.f32.mrb[26].mxu1 }
 0x218   :  { %6780 = vst [vmem:[#allocation5_spill] sm:$0xff] %v6415_v10  ;;  %v6417_v11 = vpop.f32.mrb[27].mxu1  ;;  %v6437_v10 = vrot.slane %v3447_v21, %v3393_v20 }
 0x219   :  { %6781 = vst [vmem:[#allocation6_spill] sm:$0xff] %v6417_v11 }
 0x21d   :  { %v2684_v27 = vpop.f32.mrb[28].mxu1 }
 0x21e   :  { %v3258_v28 = vpop.f32.mrb[0].mxu0  ;;  %v6430_v32 = vadd.f32 %v6327_v40, %v2684_v27  ;;  %v2686_v49 = vpop.f32.mrb[29].mxu1 }
 0x21f   :  { %v4210_v36 = vadd.f32 %v3258_v28, %v2614_v51  ;;  %v3260_v3 = vpop.f32.mrb[1].mxu0  ;;  %v6435_v4 = vadd.f32 %v6329_v60, %v2686_v49  ;;  %v2688_v9 = vpop.f32.mrb[30].mxu1 }
 0x220   :  { %v4211_v11 = vadd.f32 %v3260_v3, %v2616_v55  ;;  %v3262_v5 = vpop.f32.mrb[2].mxu0  ;;  %v6441_v17 = vadd.f32 %v6331_v41, %v2688_v9  ;;  %v2690_v27 = vpop.f32.mrb[31].mxu1 }
 0x221   :  { %v3397_v63 = vmul.f32 %v4210_v36, %v6425_v23  ;;  %v4212_v40 = vadd.f32 %v3262_v5, %v2618_v59  ;;  %v3264_v51 = vpop.f32.mrb[3].mxu0  ;;  %v6445_v28 = vadd.f32 %v6333_v0, %v2690_v27 }
 0x222   :  { %v3398_v15 = vmul.f32 %v4211_v11, %v6427_v29  ;;  %v4213_v60 = vadd.f32 %v3264_v51, %v2620_v62 }
 0x223   :  { %v3459_v55 = vadd.f32 %v6432_v47, %v3397_v63  ;;  %v3399_v20 = vmul.f32 %v4212_v40, %v6425_v23 }
 0x224   :  { %v3460_v21 = vadd.f32 %v6437_v10, %v3398_v15  ;;  %v3400_v41 = vmul.f32 %v4213_v60, %v6427_v29 }
 0x225   :  { %v3509_v9 = vmax.f32 %v3459_v55, 0.0  ;;  %v3461_v59 = vadd.f32 %v6432_v47, %v3399_v20  ;;  %v2694_v36 = vpop.f32.mrb[32].mxu1 }
 0x226   :  { %v3510_v5 = vmax.f32 %v3460_v21, 0.0  ;;  %v3462_v11 = vadd.f32 %v6437_v10, %v3400_v41  ;;  %v3268_v0 = vpop.f32.mrb[4].mxu0  ;;  %v6458_v49 = vadd.f32 %v6335_v42, %v2694_v36  ;;  %v2696_v40 = vpop.f32.mrb[33].mxu1 }
 0x227   :  { %v3511_v63 = vmax.f32 %v3461_v59, 0.0  ;;  %v4214_v3 = vadd.f32 %v3268_v0, %v6371_v1  ;;  %v3270_v27 = vpop.f32.mrb[5].mxu0  ;;  %v6462_v60 = vadd.f32 %v6337_v2, %v2696_v40  ;;  %v2698_v20 = vpop.f32.mrb[34].mxu1 }
 0x228   :  { %v4153_v51 = vpack.c.bf16 %v3510_v5, %v3509_v9  ;;  %v3512_v15 = vmax.f32 %v3462_v11, 0.0  ;;  %v4215_v55 = vadd.f32 %v3270_v27, %v6373_v7  ;;  %v3272_v21 = vpop.f32.mrb[6].mxu0  ;;  %v6467_v59 = vadd.f32 %v6339_v6, %v2698_v20  ;;  %v2700_v36 = vpop.f32.mrb[35].mxu1 }
 0x229   :  { %v3401_v41 = vmul.f32 %v4214_v3, %v6425_v23  ;;  %v4216_v42 = vadd.f32 %v3272_v21, %v6375_v13  ;;  %v3274_v1 = vpop.f32.mrb[7].mxu0  ;;  %v6477_v9 = vadd.f32 %v6341_v44, %v2700_v36 }
 0x22a   :  { %3714 = vst.msk [vmem:[%s6776_s4] sm:$0xff] %vm6453_vm3, %v4153_v51  ;;  %v4154_v2 = vpack.c.bf16 %v3512_v15, %v3511_v63  ;;  %v3402_v7 = vmul.f32 %v4215_v55, %v6427_v29  ;;  %v4217_v5 = vadd.f32 %v3274_v1, %v6377_v16 }
 0x22b   :  { %v3463_v6 = vadd.f32 %v6432_v47, %v3401_v41  ;;  %v3403_v13 = vmul.f32 %v4216_v42, %v6425_v23 }
 0x22c   :  { %3715 = vst.msk [vmem:[%s6776_s4 + $0x8] sm:$0xff] %vm6453_vm3, %v4154_v2  ;;  %v3464_v11 = vadd.f32 %v6437_v10, %v3402_v7  ;;  %v3404_v0 = vmul.f32 %v4217_v5, %v6427_v29 }
 0x22d   :  { %v3513_v63 = vmax.f32 %v3463_v6, 0.0  ;;  %v3465_v44 = vadd.f32 %v6432_v47, %v3403_v13  ;;  %v2704_v40 = vpop.f32.mrb[36].mxu1 }
 0x22e   :  { %v3514_v3 = vmax.f32 %v3464_v11, 0.0  ;;  %v3466_v16 = vadd.f32 %v6437_v10, %v3404_v0  ;;  %v3278_v27 = vpop.f32.mrb[8].mxu0  ;;  %v6492_v15 = vadd.f32 %v6343_v8, %v2704_v40  ;;  %v2706_v20 = vpop.f32.mrb[37].mxu1 }
 0x22f   :  { %v3515_v51 = vmax.f32 %v3465_v44, 0.0  ;;  %v4218_v55 = vadd.f32 %v3278_v27, %v6379_v19  ;;  %v3280_v21 = vpop.f32.mrb[9].mxu0  ;;  %v6496_v36 = vadd.f32 %v6345_v45, %v2706_v20  ;;  %v2708_v2 = vpop.f32.mrb[38].mxu1 }
 0x230   :  { %v4155_v41 = vpack.c.bf16 %v3514_v3, %v3513_v63  ;;  %v3516_v42 = vmax.f32 %v3466_v16, 0.0  ;;  %v4219_v1 = vadd.f32 %v3280_v21, %v6381_v25  ;;  %v3282_v7 = vpop.f32.mrb[10].mxu0  ;;  %v6501_v6 = vadd.f32 %v6347_v12, %v2708_v2  ;;  %v2710_v13 = vpop.f32.mrb[39].mxu1 }
 0x231   :  { %v3405_v5 = vmul.f32 %v4218_v55, %v6425_v23  ;;  %v4220_v8 = vadd.f32 %v3282_v7, %v6383_v31  ;;  %v3284_v19 = vpop.f32.mrb[11].mxu0  ;;  %v6511_v11 = vadd.f32 %v6349_v46, %v2710_v13 }
 0x232   :  { %3716 = vst.msk [vmem:[%s6776_s4 + $0x10] sm:$0xff] %vm6453_vm3, %v4155_v41  ;;  %v4156_v45 = vpack.c.bf16 %v3516_v42, %v3515_v51  ;;  %v3406_v25 = vmul.f32 %v4219_v1, %v6427_v29  ;;  %v4221_v0 = vadd.f32 %v3284_v19, %v6385_v33 }
 0x233   :  { %v3467_v12 = vadd.f32 %v6432_v47, %v3405_v5  ;;  %v3407_v31 = vmul.f32 %v4220_v8, %v6425_v23 }
 0x234   :  { %3717 = vst.msk [vmem:[%s6776_s4 + $0x18] sm:$0xff] %vm6453_vm3, %v4156_v45  ;;  %v3468_v63 = vadd.f32 %v6437_v10, %v3406_v25  ;;  %v3408_v44 = vmul.f32 %v4221_v0, %v6427_v29 }
 0x235   :  { %v3517_v3 = vmax.f32 %v3467_v12, 0.0  ;;  %v3469_v46 = vadd.f32 %v6432_v47, %v3407_v31  ;;  %v2714_v40 = vpop.f32.mrb[40].mxu1 }
 0x236   :  { %v3518_v16 = vmax.f32 %v3468_v63, 0.0  ;;  %v3470_v33 = vadd.f32 %v6437_v10, %v3408_v44  ;;  %v3288_v27 = vpop.f32.mrb[12].mxu0  ;;  %v6526_v55 = vadd.f32 %v6351_v14, %v2714_v40  ;;  %v2716_v21 = vpop.f32.mrb[41].mxu1 }
 0x237   :  { %v3519_v51 = vmax.f32 %v3469_v46, 0.0  ;;  %v4222_v20 = vadd.f32 %v3288_v27, %v6387_v38  ;;  %v3290_v41 = vpop.f32.mrb[13].mxu0  ;;  %v6530_v2 = vadd.f32 %v6353_v18, %v2716_v21  ;;  %v2718_v5 = vpop.f32.mrb[42].mxu1 }
 0x238   :  { %v4157_v42 = vpack.c.bf16 %v3518_v16, %v3517_v3  ;;  %v3520_v1 = vmax.f32 %v3470_v33, 0.0  ;;  %v4223_v7 = vadd.f32 %v3290_v41, %v6389_v48  ;;  %v3292_v8 = vpop.f32.mrb[14].mxu0  ;;  %v6535_v19 = vadd.f32 %v6355_v22, %v2718_v5  ;;  %v2720_v45 = vpop.f32.mrb[43].mxu1 }
 0x239   :  { %v3409_v13 = vmul.f32 %v4222_v20, %v6425_v23  ;;  %v4224_v14 = vadd.f32 %v3292_v8, %v6391_v50  ;;  %v3294_v38 = vpop.f32.mrb[15].mxu0  ;;  %v6545_v25 = vadd.f32 %v6357_v24, %v2720_v45 }
 0x23a   :  { %3718 = vst.msk [vmem:[%s6776_s4 + $0x20] sm:$0xff] %vm6453_vm3, %v4157_v42  ;;  %v4158_v18 = vpack.c.bf16 %v3520_v1, %v3519_v51  ;;  %v3410_v48 = vmul.f32 %v4223_v7, %v6427_v29  ;;  %v4225_v0 = vadd.f32 %v3294_v38, %v6393_v52 }
 0x23b   :  { %v3471_v22 = vadd.f32 %v6432_v47, %v3409_v13  ;;  %v3411_v50 = vmul.f32 %v4224_v14, %v6425_v23 }
 0x23c   :  { %3719 = vst.msk [vmem:[%s6776_s4 + $0x28] sm:$0xff] %vm6453_vm3, %v4158_v18  ;;  %v3472_v12 = vadd.f32 %v6437_v10, %v3410_v48  ;;  %v3412_v31 = vmul.f32 %v4225_v0, %v6427_v29 }
 0x23d   :  { %v3521_v63 = vmax.f32 %v3471_v22, 0.0  ;;  %v3473_v24 = vadd.f32 %v6432_v47, %v3411_v50  ;;  %v2724_v3 = vpop.f32.mrb[44].mxu1 }
 0x23e   :  { %v3522_v44 = vmax.f32 %v3472_v12, 0.0  ;;  %v3474_v52 = vadd.f32 %v6437_v10, %v3412_v31  ;;  %v3298_v46 = vpop.f32.mrb[16].mxu0  ;;  %v6560_v33 = vadd.f32 %v6359_v26, %v2724_v3  ;;  %v2726_v27 = vpop.f32.mrb[45].mxu1 }
 0x23f   :  { %v3523_v16 = vmax.f32 %v3473_v24, 0.0  ;;  %v4226_v40 = vadd.f32 %v3298_v46, %v6395_v35  ;;  %v3300_v51 = vpop.f32.mrb[17].mxu0  ;;  %v6564_v41 = vadd.f32 %v6361_v30, %v2726_v27  ;;  %v2728_v1 = vpop.f32.mrb[46].mxu1 }
 0x240   :  { %v4159_v20 = vpack.c.bf16 %v3522_v44, %v3521_v63  ;;  %v3524_v21 = vmax.f32 %v3474_v52, 0.0  ;;  %v4227_v42 = vadd.f32 %v3300_v51, %v6397_v53  ;;  %v3302_v7 = vpop.f32.mrb[18].mxu0  ;;  %v6569_v8 = vadd.f32 %v6363_v34, %v2728_v1  ;;  %v2730_v13 = vpop.f32.mrb[47].mxu1 }
 0x241   :  { %v3413_v5 = vmul.f32 %v4226_v40, %v6425_v23  ;;  %v4228_v26 = vadd.f32 %v3302_v7, %v6399_v54  ;;  %v3304_v35 = vpop.f32.mrb[19].mxu0  ;;  %v6579_v14 = vadd.f32 %v6365_v37, %v2730_v13 }
 0x242   :  { %3720 = vst.msk [vmem:[%s6776_s4 + $0x30] sm:$0xff] %vm6453_vm3, %v4159_v20  ;;  %v4160_v30 = vpack.c.bf16 %v3524_v21, %v3523_v16  ;;  %v3414_v53 = vmul.f32 %v4227_v42, %v6427_v29  ;;  %v4229_v45 = vadd.f32 %v3304_v35, %v6401_v56  ;;  %v6784_v42 = vld [vmem:[#allocation2_spill] sm:$0xff] }
 0x243   :  { %v3475_v34 = vadd.f32 %v6432_v47, %v3413_v5  ;;  %v3415_v54 = vmul.f32 %v4228_v26, %v6425_v23 }
 0x244   :  { %3721 = vst.msk [vmem:[%s6776_s4 + $0x38] sm:$0xff] %vm6453_vm3, %v4160_v30  ;;  %v3476_v38 = vadd.f32 %v6437_v10, %v3414_v53  ;;  %v3416_v18 = vmul.f32 %v4229_v45, %v6427_v29 }
 0x245   :  { %v3525_v48 = vmax.f32 %v3475_v34, 0.0  ;;  %v3477_v37 = vadd.f32 %v6432_v47, %v3415_v54  ;;  %v2734_v22 = vpop.f32.mrb[48].mxu1 }
 0x246   :  { %v3526_v0 = vmax.f32 %v3476_v38, 0.0  ;;  %v3478_v56 = vadd.f32 %v6437_v10, %v3416_v18  ;;  %v3308_v50 = vpop.f32.mrb[20].mxu0  ;;  %v6594_v31 = vadd.f32 %v6367_v39, %v2734_v22  ;;  %v2736_v24 = vpop.f32.mrb[49].mxu1  ;;  %v6785_v38 = vld [vmem:[#allocation3_spill] sm:$0xff] }
 0x247   :  { %v3527_v12 = vmax.f32 %v3477_v37, 0.0  ;;  %v4230_v63 = vadd.f32 %v3308_v50, %v6403_v57  ;;  %v3310_v44 = vpop.f32.mrb[21].mxu0  ;;  %v6598_v46 = vadd.f32 %v6369_v43, %v2736_v24  ;;  %v2738_v40 = vpop.f32.mrb[50].mxu1  ;;  %v6786_v50 = vld [vmem:[#allocation4_spill] sm:$0xff] }
 0x248   :  { %v4161_v52 = vpack.c.bf16 %v3526_v0, %v3525_v48  ;;  %v3528_v3 = vmax.f32 %v3478_v56, 0.0  ;;  %v4231_v16 = vadd.f32 %v3310_v44, %v6405_v58  ;;  %v3312_v27 = vpop.f32.mrb[22].mxu0  ;;  %v2739_v21 = vpop.f32.mrb[51].mxu1 }
 0x249   :  { %v3417_v51 = vmul.f32 %v4230_v63, %v6425_v23  ;;  %v4232_v20 = vadd.f32 %v3312_v27, %v6407_v61  ;;  %v3314_v39 = vpop.f32.mrb[23].mxu0 }
 0x24a   :  { %3722 = vst.msk [vmem:[%s6776_s4 + $0x40] sm:$0xff] %vm6453_vm3, %v4161_v52  ;;  %v4162_v57 = vpack.c.bf16 %v3528_v3, %v3527_v12  ;;  %v3418_v43 = vmul.f32 %v4231_v16, %v6427_v29  ;;  %v4233_v1 = vadd.f32 %v3314_v39, %v6784_v42  ;;  %v6787_v3 = vld [vmem:[#allocation5_spill] sm:$0xff] }
 0x24b   :  { %v3479_v58 = vadd.f32 %v6432_v47, %v3417_v51  ;;  %v3419_v7 = vmul.f32 %v4232_v20, %v6425_v23  ;;  %v6788_v20 = vld [vmem:[#allocation6_spill] sm:$0xff] }
 0x24c   :  { %3723 = vst.msk [vmem:[%s6776_s4 + $0x48] sm:$0xff] %vm6453_vm3, %v4162_v57  ;;  %v3480_v61 = vadd.f32 %v6437_v10, %v3418_v43  ;;  %v3420_v5 = vmul.f32 %v4233_v1, %v6427_v29 }
 0x24d   :  { %v3529_v26 = vmax.f32 %v3479_v58, 0.0  ;;  %v3481_v13 = vadd.f32 %v6432_v47, %v3419_v7  ;;  %v3167_v53 = vpop.f32.mrb[52].mxu1 }
 0x24e   :  { %v3530_v35 = vmax.f32 %v3480_v61, 0.0  ;;  %v3482_v30 = vadd.f32 %v6437_v10, %v3420_v5  ;;  %v3318_v45 = vpop.f32.mrb[24].mxu0  ;;  %v4239_v54 = vadd.f32 %v6430_v32, %v3167_v53  ;;  %v3169_v48 = vpop.f32.mrb[53].mxu1 }
 0x24f   :  { %v3531_v34 = vmax.f32 %v3481_v13, 0.0  ;;  %v4234_v18 = vadd.f32 %v3318_v45, %v6785_v38  ;;  %v3320_v37 = vpop.f32.mrb[25].mxu0  ;;  %v4242_v22 = vadd.f32 %v6435_v4, %v3169_v48  ;;  %v3171_v63 = vpop.f32.mrb[54].mxu1 }
 0x250   :  { %v4163_v0 = vpack.c.bf16 %v3530_v35, %v3529_v26  ;;  %v3532_v56 = vmax.f32 %v3482_v30, 0.0  ;;  %v4235_v12 = vadd.f32 %v3320_v37, %v6786_v50  ;;  %v3322_v24 = vpop.f32.mrb[26].mxu0  ;;  %v4245_v52 = vadd.f32 %v6441_v17, %v3171_v63  ;;  %v3173_v40 = vpop.f32.mrb[55].mxu1 }
 0x251   :  { %v3421_v44 = vmul.f32 %v4234_v18, %v6425_v23  ;;  %v4236_v16 = vadd.f32 %v3322_v24, %v6787_v3  ;;  %v3324_v32 = vpop.f32.mrb[27].mxu0  ;;  %v4248_v51 = vadd.f32 %v6445_v28, %v3173_v40 }
 0x252   :  { %3724 = vst.msk [vmem:[%s6776_s4 + $0x50] sm:$0xff] %vm6453_vm3, %v4163_v0  ;;  %v4164_v27 = vpack.c.bf16 %v3532_v56, %v3531_v34  ;;  %v3422_v4 = vmul.f32 %v4235_v12, %v6427_v29  ;;  %v4237_v21 = vadd.f32 %v3324_v32, %v6788_v20 }
 0x253   :  { %v3483_v39 = vadd.f32 %v6432_v47, %v3421_v44  ;;  %v3423_v17 = vmul.f32 %v4236_v16, %v6425_v23 }
 0x254   :  { %3725 = vst.msk [vmem:[%s6776_s4 + $0x58] sm:$0xff] %vm6453_vm3, %v4164_v27  ;;  %v3484_v57 = vadd.f32 %v6437_v10, %v3422_v4  ;;  %v3424_v43 = vmul.f32 %v4237_v21, %v6427_v29 }
 0x255   :  { %v3533_v42 = vmax.f32 %v3483_v39, 0.0  ;;  %v3485_v1 = vadd.f32 %v6432_v47, %v3423_v17  ;;  %v3177_v7 = vpop.f32.mrb[56].mxu1 }
 0x256   :  { %v3534_v28 = vmax.f32 %v3484_v57, 0.0  ;;  %v3486_v58 = vadd.f32 %v6437_v10, %v3424_v43  ;;  %v3328_v61 = vpop.f32.mrb[52].mxu0  ;;  %v4251_v26 = vadd.f32 %v6458_v49, %v3177_v7  ;;  %v3179_v35 = vpop.f32.mrb[57].mxu1 }
 0x257   :  { %v3535_v5 = vmax.f32 %v3485_v1, 0.0  ;;  %v4240_v13 = vadd.f32 %v4239_v54, %v3328_v61  ;;  %v3330_v30 = vpop.f32.mrb[53].mxu0  ;;  %v4254_v34 = vadd.f32 %v6462_v60, %v3179_v35  ;;  %v3181_v18 = vpop.f32.mrb[58].mxu1 }
 0x258   :  { %v4165_v53 = vpack.c.bf16 %v3534_v28, %v3533_v42  ;;  %v3536_v45 = vmax.f32 %v3486_v58, 0.0  ;;  %v4243_v38 = vadd.f32 %v4242_v22, %v3330_v30  ;;  %v3332_v48 = vpop.f32.mrb[54].mxu0  ;;  %v4257_v0 = vadd.f32 %v6467_v59, %v3181_v18  ;;  %v3183_v50 = vpop.f32.mrb[59].mxu1 }
 0x259   :  { %v3425_v37 = vmul.f32 %v4240_v13, %v6425_v23  ;;  %v4246_v56 = vadd.f32 %v4245_v52, %v3332_v48  ;;  %v3334_v12 = vpop.f32.mrb[55].mxu0  ;;  %v4260_v60 = vadd.f32 %v6477_v9, %v3183_v50 }
 0x25a   :  { %3726 = vst.msk [vmem:[%s6776_s4 + $0x60] sm:$0xff] %vm6453_vm3, %v4165_v53  ;;  %v4166_v49 = vpack.c.bf16 %v3536_v45, %v3535_v5  ;;  %v3426_v54 = vmul.f32 %v4243_v38, %v6427_v29  ;;  %v4249_v22 = vadd.f32 %v4248_v51, %v3334_v12 }
 0x25b   :  { %v3487_v63 = vadd.f32 %v6432_v47, %v3425_v37  ;;  %v3427_v24 = vmul.f32 %v4246_v56, %v6425_v23 }
 0x25c   :  { %3727 = vst.msk [vmem:[%s6776_s4 + $0x68] sm:$0xff] %vm6453_vm3, %v4166_v49  ;;  %v3488_v59 = vadd.f32 %v6437_v10, %v3426_v54  ;;  %v3428_v44 = vmul.f32 %v4249_v22, %v6427_v29 }
 0x25d   :  { %v3537_v52 = vmax.f32 %v3487_v63, 0.0  ;;  %v3489_v3 = vadd.f32 %v6432_v47, %v3427_v24  ;;  %v3187_v40 = vpop.f32.mrb[60].mxu1 }
 0x25e   :  { %v3538_v16 = vmax.f32 %v3488_v59, 0.0  ;;  %v3490_v9 = vadd.f32 %v6437_v10, %v3428_v44  ;;  %v3338_v32 = vpop.f32.mrb[56].mxu0  ;;  %v4263_v4 = vadd.f32 %v6492_v15, %v3187_v40  ;;  %v3189_v20 = vpop.f32.mrb[61].mxu1 }
 0x25f   :  { %v3539_v27 = vmax.f32 %v3489_v3, 0.0  ;;  %v4252_v51 = vadd.f32 %v4251_v26, %v3338_v32  ;;  %v3340_v21 = vpop.f32.mrb[57].mxu0  ;;  %v4266_v57 = vadd.f32 %v6496_v36, %v3189_v20  ;;  %v3191_v42 = vpop.f32.mrb[62].mxu1 }
 0x260   :  { %v4167_v39 = vpack.c.bf16 %v3538_v16, %v3537_v52  ;;  %v3540_v17 = vmax.f32 %v3490_v9, 0.0  ;;  %v4255_v43 = vadd.f32 %v4254_v34, %v3340_v21  ;;  %v3342_v1 = vpop.f32.mrb[58].mxu0  ;;  %v4269_v58 = vadd.f32 %v6501_v6, %v3191_v42  ;;  %v3193_v61 = vpop.f32.mrb[63].mxu1 }
 0x261   :  { %v3429_v28 = vmul.f32 %v4252_v51, %v6425_v23  ;;  %v4258_v7 = vadd.f32 %v4257_v0, %v3342_v1  ;;  %v3344_v5 = vpop.f32.mrb[59].mxu0  ;;  %v4272_v36 = vadd.f32 %v6511_v11, %v3193_v61 }
 0x262   :  { %3728 = vst.msk [vmem:[%s6776_s4 + $0x70] sm:$0xff] %vm6453_vm3, %v4167_v39  ;;  %v4168_v15 = vpack.c.bf16 %v3540_v17, %v3539_v27  ;;  %v3430_v26 = vmul.f32 %v4255_v43, %v6427_v29  ;;  %v4261_v13 = vadd.f32 %v4260_v60, %v3344_v5 }
 0x263   :  { %v3491_v35 = vadd.f32 %v6432_v47, %v3429_v28  ;;  %v3431_v30 = vmul.f32 %v4258_v7, %v6425_v23 }
 0x264   :  { %3729 = vst.msk [vmem:[%s6776_s4 + $0x78] sm:$0xff] %vm6453_vm3, %v4168_v15  ;;  %v3492_v6 = vadd.f32 %v6437_v10, %v3430_v26  ;;  %v3432_v53 = vmul.f32 %v4261_v13, %v6427_v29 }
 0x265   :  { %v3541_v45 = vmax.f32 %v3491_v35, 0.0  ;;  %v3493_v34 = vadd.f32 %v6432_v47, %v3431_v30  ;;  %v3197_v18 = vpop.f32.mrb[64].mxu1 }
 0x266   :  { %v3542_v38 = vmax.f32 %v3492_v6, 0.0  ;;  %v3494_v11 = vadd.f32 %v6437_v10, %v3432_v53  ;;  %v3348_v48 = vpop.f32.mrb[60].mxu0  ;;  %v4275_v0 = vadd.f32 %v6526_v55, %v3197_v18  ;;  %v3199_v50 = vpop.f32.mrb[65].mxu1 }
 0x267   :  { %v3543_v37 = vmax.f32 %v3493_v34, 0.0  ;;  %v4264_v56 = vadd.f32 %v4263_v4, %v3348_v48  ;;  %v3350_v12 = vpop.f32.mrb[61].mxu0  ;;  %v4278_v60 = vadd.f32 %v6530_v2, %v3199_v50  ;;  %v3201_v63 = vpop.f32.mrb[66].mxu1 }
 0x268   :  { %v4169_v49 = vpack.c.bf16 %v3542_v38, %v3541_v45  ;;  %v3544_v54 = vmax.f32 %v3494_v11, 0.0  ;;  %v4267_v22 = vadd.f32 %v4266_v57, %v3350_v12  ;;  %v3352_v24 = vpop.f32.mrb[62].mxu0  ;;  %v4281_v44 = vadd.f32 %v6535_v19, %v3201_v63  ;;  %v3203_v3 = vpop.f32.mrb[67].mxu1 }
 0x269   :  { %v3433_v59 = vmul.f32 %v4264_v56, %v6425_v23  ;;  %v4270_v52 = vadd.f32 %v4269_v58, %v3352_v24  ;;  %v3354_v16 = vpop.f32.mrb[63].mxu0  ;;  %v4284_v2 = vadd.f32 %v6545_v25, %v3203_v3 }
 0x26a   :  { %3730 = vst.msk [vmem:[%s6776_s4 + $0x80] sm:$0xff] %vm6453_vm3, %v4169_v49  ;;  %v4170_v55 = vpack.c.bf16 %v3544_v54, %v3543_v37  ;;  %v3434_v9 = vmul.f32 %v4267_v22, %v6427_v29  ;;  %v4273_v40 = vadd.f32 %v4272_v36, %v3354_v16 }
 0x26b   :  { %v3495_v32 = vadd.f32 %v6432_v47, %v3433_v59  ;;  %v3435_v27 = vmul.f32 %v4270_v52, %v6425_v23 }
 0x26c   :  { %3731 = vst.msk [vmem:[%s6776_s4 + $0x88] sm:$0xff] %vm6453_vm3, %v4170_v55  ;;  %v3496_v19 = vadd.f32 %v6437_v10, %v3434_v9  ;;  %v3436_v4 = vmul.f32 %v4273_v40, %v6427_v29 }
 0x26d   :  { %v3545_v51 = vmax.f32 %v3495_v32, 0.0  ;;  %v3497_v20 = vadd.f32 %v6432_v47, %v3435_v27  ;;  %v3207_v39 = vpop.f32.mrb[68].mxu1 }
 0x26e   :  { %v3546_v21 = vmax.f32 %v3496_v19, 0.0  ;;  %v3498_v25 = vadd.f32 %v6437_v10, %v3436_v4  ;;  %v3358_v17 = vpop.f32.mrb[64].mxu0  ;;  %v4287_v43 = vadd.f32 %v6560_v33, %v3207_v39  ;;  %v3209_v1 = vpop.f32.mrb[69].mxu1 }
 0x26f   :  { %v3547_v57 = vmax.f32 %v3497_v20, 0.0  ;;  %v4276_v42 = vadd.f32 %v4275_v0, %v3358_v17  ;;  %v3360_v28 = vpop.f32.mrb[65].mxu0  ;;  %v4290_v61 = vadd.f32 %v6564_v41, %v3209_v1  ;;  %v3211_v15 = vpop.f32.mrb[70].mxu1 }
 0x270   :  { %v4171_v58 = vpack.c.bf16 %v3546_v21, %v3545_v51  ;;  %v3548_v7 = vmax.f32 %v3498_v25, 0.0  ;;  %v4279_v5 = vadd.f32 %v4278_v60, %v3360_v28  ;;  %v3362_v26 = vpop.f32.mrb[66].mxu0  ;;  %v4293_v13 = vadd.f32 %v6569_v8, %v3211_v15  ;;  %v3213_v30 = vpop.f32.mrb[71].mxu1 }
 0x271   :  { %v3437_v36 = vmul.f32 %v4276_v42, %v6425_v23  ;;  %v4282_v35 = vadd.f32 %v4281_v44, %v3362_v26  ;;  %v3364_v6 = vpop.f32.mrb[67].mxu0  ;;  %v4296_v41 = vadd.f32 %v6579_v14, %v3213_v30 }
 0x272   :  { %3732 = vst.msk [vmem:[%s6776_s4 + $0x90] sm:$0xff] %vm6453_vm3, %v4171_v58  ;;  %v4172_v33 = vpack.c.bf16 %v3548_v7, %v3547_v57  ;;  %v3438_v53 = vmul.f32 %v4279_v5, %v6427_v29  ;;  %v4285_v45 = vadd.f32 %v4284_v2, %v3364_v6 }
 0x273   :  { %v3499_v34 = vadd.f32 %v6432_v47, %v3437_v36  ;;  %v3439_v38 = vmul.f32 %v4282_v35, %v6425_v23 }
 0x274   :  { %3733 = vst.msk [vmem:[%s6776_s4 + $0x98] sm:$0xff] %vm6453_vm3, %v4172_v33  ;;  %v3500_v8 = vadd.f32 %v6437_v10, %v3438_v53  ;;  %v3440_v11 = vmul.f32 %v4285_v45, %v6427_v29 }
 0x275   :  { %v3549_v18 = vmax.f32 %v3499_v34, 0.0  ;;  %v3501_v48 = vadd.f32 %v6432_v47, %v3439_v38  ;;  %v3217_v0 = vpop.f32.mrb[72].mxu1 }
 0x276   :  { %v3550_v37 = vmax.f32 %v3500_v8, 0.0  ;;  %v3502_v14 = vadd.f32 %v6437_v10, %v3440_v11  ;;  %v3368_v56 = vpop.f32.mrb[68].mxu0  ;;  %v4299_v12 = vadd.f32 %v6594_v31, %v3217_v0  ;;  %v3219_v54 = vpop.f32.mrb[73].mxu1 }
 0x277   :  { %v3551_v50 = vmax.f32 %v3501_v48, 0.0  ;;  %v4288_v49 = vadd.f32 %v4287_v43, %v3368_v56  ;;  %v3370_v60 = vpop.f32.mrb[69].mxu0  ;;  %v4302_v24 = vadd.f32 %v6598_v46, %v3219_v54  ;;  %v3221_v52 = vpop.f32.mrb[74].mxu1 }
 0x278   :  { %v4173_v22 = vpack.c.bf16 %v3550_v37, %v3549_v18  ;;  %v3552_v63 = vmax.f32 %v3502_v14, 0.0  ;;  %v4291_v59 = vadd.f32 %v4290_v61, %v3370_v60  ;;  %v3372_v44 = vpop.f32.mrb[70].mxu0  ;;  %v3222_v9 = vpop.f32.mrb[75].mxu1 }
 0x279   :  { %v3441_v3 = vmul.f32 %v4288_v49, %v6425_v23  ;;  %v4294_v16 = vadd.f32 %v4293_v13, %v3372_v44  ;;  %v3374_v55 = vpop.f32.mrb[71].mxu0 }
 0x27a   :  { %3734 = vst.msk [vmem:[%s6776_s4 + $0xa0] sm:$0xff] %vm6453_vm3, %v4173_v22  ;;  %v4174_v31 = vpack.c.bf16 %v3552_v63, %v3551_v50  ;;  %v3442_v2 = vmul.f32 %v4291_v59, %v6427_v29  ;;  %v4297_v40 = vadd.f32 %v4296_v41, %v3374_v55 }
 0x27b   :  { %v3503_v46 = vadd.f32 %v6432_v47, %v3441_v3  ;;  %v3443_v32 = vmul.f32 %v4294_v16, %v6425_v23 }
 0x27c   :  { %3735 = vst.msk [vmem:[%s6776_s4 + $0xa8] sm:$0xff] %vm6453_vm3, %v4174_v31  ;;  %v3504_v27 = vadd.f32 %v6437_v10, %v3442_v2  ;;  %v3444_v19 = vmul.f32 %v4297_v40, %v6427_v29 }
 0x27d   :  { %v3553_v4 = vmax.f32 %v3503_v46, 0.0  ;;  %v3505_v51 = vadd.f32 %v6432_v47, %v3443_v32 }
 0x27e   :  { %v3554_v20 = vmax.f32 %v3504_v27, 0.0  ;;  %v3506_v21 = vadd.f32 %v6437_v10, %v3444_v19  ;;  %v3378_v25 = vpop.f32.mrb[72].mxu0 }
 0x27f   :  { %v3555_v39 = vmax.f32 %v3505_v51, 0.0  ;;  %v4300_v17 = vadd.f32 %v4299_v12, %v3378_v25  ;;  %v3380_v57 = vpop.f32.mrb[73].mxu0 }
 0x280   :  { %v4175_v43 = vpack.c.bf16 %v3554_v20, %v3553_v4  ;;  %v3556_v42 = vmax.f32 %v3506_v21, 0.0  ;;  %v4303_v1 = vadd.f32 %v4302_v24, %v3380_v57  ;;  %v3382_v28 = vpop.f32.mrb[74].mxu0 }
 0x281   :  { %v3445_v58 = vmul.f32 %v4300_v17, %v6425_v23  ;;  %v3383_v7 = vpop.f32.mrb[75].mxu0 }
 0x282   :  { %3736 = vst.msk [vmem:[%s6776_s4 + $0xb0] sm:$0xff] %vm6453_vm3, %v4175_v43  ;;  %v4176_v61 = vpack.c.bf16 %v3556_v42, %v3555_v39  ;;  %v3446_v5 = vmul.f32 %v4303_v1, %v6427_v29 }
 0x283   :  { %v3507_v15 = vadd.f32 %v6432_v47, %v3445_v58 }
 0x284   :  { %3737 = vst.msk [vmem:[%s6776_s4 + $0xb8] sm:$0xff] %vm6453_vm3, %v4176_v61  ;;  %v3508_v23 = vadd.f32 %v6437_v10, %v3446_v5 }
 0x285   :  { %v3557_v26 = vmax.f32 %v3507_v15, 0.0 }
 0x286   :  { %v3558_v36 = vmax.f32 %v3508_v23, 0.0 }
 0x288   :  { %v4177_v13 = vpack.c.bf16 %v3558_v36, %v3557_v26 }
 0x28a   :  { %3741 = vst.msk [vmem:[%s6776_s4 + $0xc0] sm:$0x33] %vm3740_vm6, %v4177_v13 }

// kernel: alexnet_map_forward.13
= control target key start
LH: loop header
LB: loop body
LE: loop exit
PB: predicated region body
PF: predicated region fallthrough
CT: control target
= control target key end

     0   :  { %s493_s0 = inlined_call_operand.vmem [shape: bf16[9,64,128], index: 0, kind: input, shape index: {}]   ;;  %s494_s1 = inlined_call_operand.vmem [shape: bf16[64,128], index: 1, kind: output, shape index: {}]  }
   0x1   :  { %v8_v0 = vld [vmem:[%s493_s0] sm:$0xf]  ;;  %v9_v1 = vld [vmem:[%s493_s0 + $0x4] sm:$0xf]  ;;  %v10_v18 = vld [vmem:[%s493_s0 + $0x8] sm:$0xf] }
   0x2   :  { %v164_v2 = vld [vmem:[%s493_s0 + $0x20] sm:$0xf]  ;;  %v165_v3 = vld [vmem:[%s493_s0 + $0x24] sm:$0xf]  ;;  %v11_v19 = vld [vmem:[%s493_s0 + $0xc] sm:$0xf] }
   0x3   :  { %v25_v4 = vmax.bf16 %v164_v2, %v8_v0  ;;  %v172_v5 = vld [vmem:[%s493_s0 + $0x40] sm:$0xf]  ;;  %v173_v6 = vld [vmem:[%s493_s0 + $0x44] sm:$0xf]  ;;  %v26_v7 = vmax.bf16 %v165_v3, %v9_v1  ;;  %v166_v20 = vld [vmem:[%s493_s0 + $0x28] sm:$0xf] }
   0x4   :  { %v180_v8 = vld [vmem:[%s493_s0 + $0x60] sm:$0xf]  ;;  %v181_v10 = vld [vmem:[%s493_s0 + $0x64] sm:$0xf]  ;;  %v167_v22 = vld [vmem:[%s493_s0 + $0x2c] sm:$0xf]  ;;  %v27_v23 = vmax.bf16 %v166_v20, %v10_v18 }
   0x5   :  { %v42_v9 = vmax.bf16 %v172_v5, %v25_v4  ;;  %v43_v11 = vmax.bf16 %v173_v6, %v26_v7  ;;  %v188_v12 = vld [vmem:[%s493_s0 + $0x80] sm:$0xf]  ;;  %v189_v14 = vld [vmem:[%s493_s0 + $0x84] sm:$0xf]  ;;  %v174_v24 = vld [vmem:[%s493_s0 + $0x48] sm:$0xf]  ;;  %v28_v28 = vmax.bf16 %v167_v22, %v11_v19 }
   0x6   :  { %v196_v15 = vld [vmem:[%s493_s0 + $0xa0] sm:$0xf]  ;;  %v197_v16 = vld [vmem:[%s493_s0 + $0xa4] sm:$0xf]  ;;  %v175_v25 = vld [vmem:[%s493_s0 + $0x4c] sm:$0xf]  ;;  %v44_v33 = vmax.bf16 %v174_v24, %v27_v23 }
   0x7   :  { %v59_v13 = vmax.bf16 %v180_v8, %v42_v9  ;;  %v60_v17 = vmax.bf16 %v181_v10, %v43_v11  ;;  %v204_v27 = vld [vmem:[%s493_s0 + $0xc0] sm:$0xf]  ;;  %v182_v29 = vld [vmem:[%s493_s0 + $0x68] sm:$0xf]  ;;  %v205_v31 = vld [vmem:[%s493_s0 + $0xc4] sm:$0xf]  ;;  %v45_v38 = vmax.bf16 %v175_v25, %v28_v28 }
   0x8   :  { %v212_v32 = vld [vmem:[%s493_s0 + $0xe0] sm:$0xf]  ;;  %v183_v34 = vld [vmem:[%s493_s0 + $0x6c] sm:$0xf]  ;;  %v213_v36 = vld [vmem:[%s493_s0 + $0xe4] sm:$0xf]  ;;  %v61_v42 = vmax.bf16 %v182_v29, %v44_v33 }
   0x9   :  { %v76_v21 = vmax.bf16 %v188_v12, %v59_v13  ;;  %v77_v26 = vmax.bf16 %v189_v14, %v60_v17  ;;  %v220_v37 = vld [vmem:[%s493_s0 + $0x100] sm:$0xf]  ;;  %v190_v39 = vld [vmem:[%s493_s0 + $0x88] sm:$0xf]  ;;  %v221_v41 = vld [vmem:[%s493_s0 + $0x104] sm:$0xf]  ;;  %v62_v47 = vmax.bf16 %v183_v34, %v45_v38 }
   0xa   :  { %v191_v43 = vld [vmem:[%s493_s0 + $0x8c] sm:$0xf]  ;;  %v198_v44 = vld [vmem:[%s493_s0 + $0xa8] sm:$0xf]  ;;  %v12_v48 = vld [vmem:[%s493_s0 + $0x10] sm:$0xf]  ;;  %v78_v52 = vmax.bf16 %v190_v39, %v61_v42 }
   0xb   :  { %v93_v30 = vmax.bf16 %v196_v15, %v76_v21  ;;  %v94_v35 = vmax.bf16 %v197_v16, %v77_v26  ;;  %v199_v45 = vld [vmem:[%s493_s0 + $0xac] sm:$0xf]  ;;  %v13_v49 = vld [vmem:[%s493_s0 + $0x14] sm:$0xf]  ;;  %v168_v50 = vld [vmem:[%s493_s0 + $0x30] sm:$0xf]  ;;  %v79_v58 = vmax.bf16 %v191_v43, %v62_v47 }
   0xc   :  { %v169_v53 = vld [vmem:[%s493_s0 + $0x34] sm:$0xf]  ;;  %v29_v54 = vmax.bf16 %v168_v50, %v12_v48  ;;  %v176_v55 = vld [vmem:[%s493_s0 + $0x50] sm:$0xf]  ;;  %v206_v59 = vld [vmem:[%s493_s0 + $0xc8] sm:$0xf]  ;;  %v95_v63 = vmax.bf16 %v198_v44, %v78_v52 }
   0xd   :  { %v110_v40 = vmax.bf16 %v204_v27, %v93_v30  ;;  %v111_v46 = vmax.bf16 %v205_v31, %v94_v35  ;;  %v177_v56 = vld [vmem:[%s493_s0 + $0x54] sm:$0xf]  ;;  %v30_v60 = vmax.bf16 %v169_v53, %v13_v49  ;;  %v184_v61 = vld [vmem:[%s493_s0 + $0x70] sm:$0xf]  ;;  %v207_v0 = vld [vmem:[%s493_s0 + $0xcc] sm:$0xf]  ;;  %v96_v5 = vmax.bf16 %v199_v45, %v79_v58 }
   0xe   :  { %v214_v1 = vld [vmem:[%s493_s0 + $0xe8] sm:$0xf]  ;;  %v46_v2 = vmax.bf16 %v176_v55, %v29_v54  ;;  %v185_v3 = vld [vmem:[%s493_s0 + $0x74] sm:$0xf]  ;;  %v215_v6 = vld [vmem:[%s493_s0 + $0xec] sm:$0xf]  ;;  %v112_v10 = vmax.bf16 %v206_v59, %v95_v63 }
   0xf   :  { %v127_v51 = vmax.bf16 %v212_v32, %v110_v40  ;;  %v128_v57 = vmax.bf16 %v213_v36, %v111_v46  ;;  %v222_v7 = vld [vmem:[%s493_s0 + $0x108] sm:$0xf]  ;;  %v47_v8 = vmax.bf16 %v177_v56, %v30_v60  ;;  %v192_v9 = vld [vmem:[%s493_s0 + $0x90] sm:$0xf]  ;;  %v223_v11 = vld [vmem:[%s493_s0 + $0x10c] sm:$0xf]  ;;  %v113_v17 = vmax.bf16 %v207_v0, %v96_v5 }
  0x10   :  { %v63_v12 = vmax.bf16 %v184_v61, %v46_v2  ;;  %v193_v13 = vld [vmem:[%s493_s0 + $0x94] sm:$0xf]  ;;  %v200_v14 = vld [vmem:[%s493_s0 + $0xb0] sm:$0xf]  ;;  %v14_v19 = vld [vmem:[%s493_s0 + $0x18] sm:$0xf]  ;;  %v129_v22 = vmax.bf16 %v214_v1, %v112_v10 }
  0x11   :  { %v144_v62 = vmax.bf16 %v220_v37, %v127_v51  ;;  %v145_v4 = vmax.bf16 %v221_v41, %v128_v57  ;;  %v201_v15 = vld [vmem:[%s493_s0 + $0xb4] sm:$0xf]  ;;  %v64_v18 = vmax.bf16 %v185_v3, %v47_v8  ;;  %v15_v20 = vld [vmem:[%s493_s0 + $0x1c] sm:$0xf]  ;;  %v170_v21 = vld [vmem:[%s493_s0 + $0x38] sm:$0xf]  ;;  %v130_v28 = vmax.bf16 %v215_v6, %v113_v17 }
  0x12   :  { %v80_v23 = vmax.bf16 %v192_v9, %v63_v12  ;;  %v171_v24 = vld [vmem:[%s493_s0 + $0x3c] sm:$0xf]  ;;  %v31_v25 = vmax.bf16 %v170_v21, %v14_v19  ;;  %v178_v26 = vld [vmem:[%s493_s0 + $0x58] sm:$0xf]  ;;  %v208_v30 = vld [vmem:[%s493_s0 + $0xd0] sm:$0xf]  ;;  %v146_v33 = vmax.bf16 %v222_v7, %v129_v22 }
  0x13   :  { %v248_v16 = vcombine.low %v144_v62, %v145_v4  ;;  %v179_v27 = vld [vmem:[%s493_s0 + $0x5c] sm:$0xf]  ;;  %v81_v29 = vmax.bf16 %v193_v13, %v64_v18  ;;  %v32_v31 = vmax.bf16 %v171_v24, %v15_v20  ;;  %v186_v32 = vld [vmem:[%s493_s0 + $0x78] sm:$0xf]  ;;  %v209_v35 = vld [vmem:[%s493_s0 + $0xd4] sm:$0xf]  ;;  %v147_v38 = vmax.bf16 %v223_v11, %v130_v28 }
  0x14   :  { %v97_v34 = vmax.bf16 %v200_v14, %v80_v23  ;;  %v48_v36 = vmax.bf16 %v178_v26, %v31_v25  ;;  %v187_v37 = vld [vmem:[%s493_s0 + $0x7c] sm:$0xf]  ;;  %v216_v40 = vld [vmem:[%s493_s0 + $0xf0] sm:$0xf]  ;;  %v194_v42 = vld [vmem:[%s493_s0 + $0x98] sm:$0xf] }
  0x15   :  { %232 = vst [vmem:[%s494_s1] sm:$0xff] %v248_v16   ;;  %v98_v39 = vmax.bf16 %v201_v15, %v81_v29  ;;  %v49_v41 = vmax.bf16 %v179_v27, %v32_v31  ;;  %v217_v44 = vld [vmem:[%s493_s0 + $0xf4] sm:$0xf]  ;;  %v195_v46 = vld [vmem:[%s493_s0 + $0x9c] sm:$0xf]  ;;  %v249_v47 = vcombine.low %v146_v33, %v147_v38  ;;  %v224_v49 = vld [vmem:[%s493_s0 + $0x110] sm:$0xf] }
  0x16   :  { %v114_v43 = vmax.bf16 %v208_v30, %v97_v34  ;;  %v65_v45 = vmax.bf16 %v186_v32, %v48_v36  ;;  %v202_v51 = vld [vmem:[%s493_s0 + $0xb8] sm:$0xf]  ;;  %v225_v53 = vld [vmem:[%s493_s0 + $0x114] sm:$0xf]  ;;  %v203_v55 = vld [vmem:[%s493_s0 + $0xbc] sm:$0xf] }
  0x17   :  { %v115_v48 = vmax.bf16 %v209_v35, %v98_v39  ;;  %v66_v50 = vmax.bf16 %v187_v37, %v49_v41  ;;  %250 = vst [vmem:[%s494_s1 + $0x8] sm:$0xff] %v249_v47   ;;  %v210_v58 = vld [vmem:[%s493_s0 + $0xd8] sm:$0xf]  ;;  %v211_v61 = vld [vmem:[%s493_s0 + $0xdc] sm:$0xf] }
  0x18   :  { %v131_v52 = vmax.bf16 %v216_v40, %v114_v43  ;;  %v82_v54 = vmax.bf16 %v194_v42, %v65_v45  ;;  %v218_v0 = vld [vmem:[%s493_s0 + $0xf8] sm:$0xf]  ;;  %v219_v2 = vld [vmem:[%s493_s0 + $0xfc] sm:$0xf] }
  0x19   :  { %v132_v56 = vmax.bf16 %v217_v44, %v115_v48  ;;  %v83_v57 = vmax.bf16 %v195_v46, %v66_v50  ;;  %v226_v5 = vld [vmem:[%s493_s0 + $0x118] sm:$0xf]  ;;  %v227_v7 = vld [vmem:[%s493_s0 + $0x11c] sm:$0xf] }
  0x1a   :  { %v148_v59 = vmax.bf16 %v224_v49, %v131_v52  ;;  %v99_v60 = vmax.bf16 %v202_v51, %v82_v54 }
  0x1b   :  { %v149_v62 = vmax.bf16 %v225_v53, %v132_v56  ;;  %v100_v63 = vmax.bf16 %v203_v55, %v83_v57 }
  0x1c   :  { %v116_v1 = vmax.bf16 %v210_v58, %v99_v60 }
  0x1d   :  { %v251_v3 = vcombine.low %v148_v59, %v149_v62  ;;  %v117_v4 = vmax.bf16 %v211_v61, %v100_v63 }
  0x1e   :  { %v133_v6 = vmax.bf16 %v218_v0, %v116_v1 }
  0x1f   :  { %252 = vst [vmem:[%s494_s1 + $0x10] sm:$0xff] %v251_v3   ;;  %v134_v8 = vmax.bf16 %v219_v2, %v117_v4 }
  0x20   :  { %v150_v9 = vmax.bf16 %v226_v5, %v133_v6 }
  0x21   :  { %v151_v10 = vmax.bf16 %v227_v7, %v134_v8 }
  0x23   :  { %v253_v11 = vcombine.low %v150_v9, %v151_v10 }
  0x25   :  { %254 = vst [vmem:[%s494_s1 + $0x18] sm:$0xff] %v253_v11  }

// kernel: alexnet_map_forward.14
= control target key start
LH: loop header
LB: loop body
LE: loop exit
PB: predicated region body
PF: predicated region fallthrough
CT: control target
= control target key end

     0   :  { %s4502_s1 = inlined_call_operand.vmem [shape: bf16[3456,128], index: 1, kind: input, shape index: {}]   ;;  %s4503_s0 = inlined_call_operand.vmem [shape: bf16[18,3456], index: 0, kind: input, shape index: {}]   ;;  %s4504_s2 = inlined_call_operand.vmem [shape: f32[1,128], index: 2, kind: input, shape index: {}]   ;;  %s4505_s3 = inlined_call_operand.vmem [shape: f32[1,128], index: 3, kind: input, shape index: {}]   ;;  %s4506_s4 = inlined_call_operand.vmem [shape: bf16[18,128], index: 4, kind: output, shape index: {}]  }
   0x1   :  { %v3411_v0 = vld [vmem:[%s4502_s1 + $0x40] sm:$0xff]   ;;  %v3415_v4 = vld [vmem:[%s4502_s1 + $0x48] sm:$0xff]   ;;  %v3419_v8 = vld [vmem:[%s4502_s1 + $0x50] sm:$0xff]  }
   0x2   :  { %v3412_v1 = vld [vmem:[%s4502_s1 + $0xc0] sm:$0xff]   ;;  %3017 = vmatprep.subr.bf16.mxu0 %v3411_v0  ;;  %v3416_v5 = vld [vmem:[%s4502_s1 + $0xc8] sm:$0xff]   ;;  %v3420_v9 = vld [vmem:[%s4502_s1 + $0xd0] sm:$0xff]  }
   0x3   :  { %v3413_v2 = vld [vmem:[%s4502_s1] sm:$0xff]   ;;  %3045 = vmatprep.subr.bf16.mxu1 %v3412_v1  ;;  %v3417_v6 = vld [vmem:[%s4502_s1 + $0x8] sm:$0xff]   ;;  %v3421_v10 = vld [vmem:[%s4502_s1 + $0x10] sm:$0xff]  }
   0x4   :  { %v3414_v3 = vld [vmem:[%s4502_s1 + $0x80] sm:$0xff]   ;;  %3018 = vmatpush3.bf16.msra.mxu0 %v3413_v2  ;;  %v3418_v7 = vld [vmem:[%s4502_s1 + $0x88] sm:$0xff]   ;;  %v3422_v11 = vld [vmem:[%s4502_s1 + $0x90] sm:$0xff]  }
   0x5   :  { %3046 = vmatpush3.bf16.msra.mxu1 %v3414_v3  ;;  %3019 = vmatprep.subr.bf16.mxu0 %v3415_v4  ;;  %v3423_v12 = vld [vmem:[%s4502_s1 + $0x58] sm:$0xff]   ;;  %v3427_v16 = vld [vmem:[%s4502_s1 + $0x60] sm:$0xff]   ;;  %v3431_v20 = vld [vmem:[%s4502_s1 + $0x68] sm:$0xff]  }
   0x6   :  { %3047 = vmatprep.subr.bf16.mxu1 %v3416_v5  ;;  %v3424_v13 = vld [vmem:[%s4502_s1 + $0xd8] sm:$0xff]   ;;  %v3428_v17 = vld [vmem:[%s4502_s1 + $0xe0] sm:$0xff]   ;;  %v3432_v21 = vld [vmem:[%s4502_s1 + $0xe8] sm:$0xff]  }
   0x7   :  { %v3425_v14 = vld [vmem:[%s4502_s1 + $0x18] sm:$0xff]   ;;  %v3429_v18 = vld [vmem:[%s4502_s1 + $0x20] sm:$0xff]   ;;  %v3433_v22 = vld [vmem:[%s4502_s1 + $0x28] sm:$0xff]  }
   0x8   :  { %3020 = vmatpush3.bf16.msra.mxu0 %v3417_v6  ;;  %v3426_v15 = vld [vmem:[%s4502_s1 + $0x98] sm:$0xff]   ;;  %v3430_v19 = vld [vmem:[%s4502_s1 + $0xa0] sm:$0xff]   ;;  %v3434_v23 = vld [vmem:[%s4502_s1 + $0xa8] sm:$0xff]  }
   0x9   :  { %3048 = vmatpush3.bf16.msra.mxu1 %v3418_v7  ;;  %3021 = vmatprep.subr.bf16.mxu0 %v3419_v8  ;;  %v3435_v24 = vld [vmem:[%s4502_s1 + $0x70] sm:$0xff]   ;;  %v3439_v28 = vld [vmem:[%s4502_s1 + $0x78] sm:$0xff]   ;;  %v3443_v32 = vld [vmem:[%s4503_s0] ss:$108 sps:$4 sm:$0xff]  }
   0xa   :  { %3049 = vmatprep.subr.bf16.mxu1 %v3420_v9  ;;  %v3436_v25 = vld [vmem:[%s4502_s1 + $0xf0] sm:$0xff]   ;;  %v3440_v29 = vld [vmem:[%s4502_s1 + $0xf8] sm:$0xff]   ;;  %v3449_v36 = vld [vmem:[%s4502_s1 + $0x140] sm:$0xff]  }
   0xb   :  { %v3437_v26 = vld [vmem:[%s4502_s1 + $0x30] sm:$0xff]   ;;  %v3441_v30 = vld [vmem:[%s4502_s1 + $0x38] sm:$0xff]   ;;  %v3450_v37 = vld [vmem:[%s4502_s1 + $0x100] sm:$0xff]  }
   0xc   :  { %3022 = vmatpush3.bf16.msra.mxu0 %v3421_v10  ;;  %v3438_v27 = vld [vmem:[%s4502_s1 + $0xb0] sm:$0xff]   ;;  %v3442_v31 = vld [vmem:[%s4502_s1 + $0xb8] sm:$0xff]   ;;  %v3451_v38 = vld [vmem:[%s4502_s1 + $0x1c0] sm:$0xff]  }
   0xd   :  { %3050 = vmatpush3.bf16.msra.mxu1 %v3422_v11  ;;  %3023 = vmatprep.subr.bf16.mxu0 %v3423_v12  ;;  %v3445_v33 = vld [vmem:[%s4503_s0 + $0x4] ss:$108 sps:$4 sm:$0xff]   ;;  %v3446_v34 = vld [vmem:[%s4503_s0 + $0x8] ss:$108 sps:$4 sm:$0xff]   ;;  %v3448_v35 = vld [vmem:[%s4503_s0 + $0xc] ss:$108 sps:$4 sm:$0xff]  }
   0xe   :  { %3051 = vmatprep.subr.bf16.mxu1 %v3424_v13  ;;  %2051 = vmatprep.mubr.bf16.mxu0 %v3445_v33  ;;  %v3452_v39 = vld [vmem:[%s4502_s1 + $0x180] sm:$0xff]   ;;  %v3453_v40 = vld [vmem:[%s4502_s1 + $0x148] sm:$0xff]   ;;  %v3457_v44 = vld [vmem:[%s4502_s1 + $0x150] sm:$0xff]  }
   0xf   :  { %2099 = vmatprep.mubr.bf16.mxu1 %v3448_v35  ;;  %v3454_v41 = vld [vmem:[%s4502_s1 + $0x108] sm:$0xff]   ;;  %v3458_v45 = vld [vmem:[%s4502_s1 + $0x110] sm:$0xff]   ;;  %v3461_v48 = vld [vmem:[%s4502_s1 + $0x158] sm:$0xff]  }
  0x10   :  { %3024 = vmatpush3.bf16.msra.mxu0 %v3425_v14  ;;  %v3455_v42 = vld [vmem:[%s4502_s1 + $0x1c8] sm:$0xff]   ;;  %v3459_v46 = vld [vmem:[%s4502_s1 + $0x1d0] sm:$0xff]   ;;  %v3462_v49 = vld [vmem:[%s4502_s1 + $0x118] sm:$0xff]  }
  0x11   :  { %3052 = vmatpush3.bf16.msra.mxu1 %v3426_v15  ;;  %3025 = vmatprep.subr.bf16.mxu0 %v3427_v16  ;;  %v3456_v43 = vld [vmem:[%s4502_s1 + $0x188] sm:$0xff]   ;;  %v3460_v47 = vld [vmem:[%s4502_s1 + $0x190] sm:$0xff]   ;;  %v3463_v50 = vld [vmem:[%s4502_s1 + $0x1d8] sm:$0xff]  }
  0x12   :  { %3053 = vmatprep.subr.bf16.mxu1 %v3428_v17  ;;  %v3464_v51 = vld [vmem:[%s4502_s1 + $0x198] sm:$0xff]   ;;  %v3465_v52 = vld [vmem:[%s4502_s1 + $0x160] sm:$0xff]   ;;  %v3469_v56 = vld [vmem:[%s4502_s1 + $0x168] sm:$0xff]  }
  0x13   :  { %v3466_v53 = vld [vmem:[%s4502_s1 + $0x120] sm:$0xff]   ;;  %v46_v57 = vld [vmem:[%s4503_s0 + $0xd8] sm:$0x11]  ;;  %v3471_v59 = vld [vmem:[%s4502_s1 + $0x128] sm:$0xff]  }
  0x14   :  { %3026 = vmatpush3.bf16.msra.mxu0 %v3429_v18  ;;  %v3467_v54 = vld [vmem:[%s4502_s1 + $0x1e0] sm:$0xff]   ;;  %v2762_v58 = vcombine.high %v46_v57, %v46_v57  ;;  %v2761_v60 = vcombine.low %v46_v57, %v46_v57  ;;  %v3473_v61 = vld [vmem:[%s4502_s1 + $0x1e8] sm:$0xff]   ;;  %v3477_v2 = vld [vmem:[%s4502_s1 + $0x170] sm:$0xff]  }
  0x15   :  { %3054 = vmatpush3.bf16.msra.mxu1 %v3430_v19  ;;  %3027 = vmatprep.subr.bf16.mxu0 %v3431_v20  ;;  %v3468_v55 = vld [vmem:[%s4502_s1 + $0x1a0] sm:$0xff]   ;;  %v3475_v0 = vld [vmem:[%s4502_s1 + $0x1a8] sm:$0xff]   ;;  %v3478_v3 = vld [vmem:[%s4502_s1 + $0x130] sm:$0xff]  }
  0x16   :  { %3055 = vmatprep.subr.bf16.mxu1 %v3432_v21  ;;  %v47_v62 = vld [vmem:[%s4503_s0 + $0xe0] sm:$0x11]  ;;  %v3479_v4 = vld [vmem:[%s4502_s1 + $0x1f0] sm:$0xff]   ;;  %v3481_v6 = vld [vmem:[%s4502_s1 + $0x178] sm:$0xff]  }
  0x17   :  { %v2764_v63 = vcombine.high %v47_v62, %v47_v62  ;;  %v2763_v1 = vcombine.low %v47_v62, %v47_v62  ;;  %v3480_v5 = vld [vmem:[%s4502_s1 + $0x1b0] sm:$0xff]   ;;  %v3482_v7 = vld [vmem:[%s4502_s1 + $0x138] sm:$0xff]   ;;  %v3488_v12 = vld [vmem:[%s4502_s1 + $0x240] sm:$0xff]  }
  0x18   :  { %3028 = vmatpush3.bf16.msra.mxu0 %v3433_v22  ;;  %v3483_v8 = vld [vmem:[%s4502_s1 + $0x1f8] sm:$0xff]   ;;  %v3486_v10 = vld [vmem:[%s4503_s0 + $0x14] ss:$108 sps:$4 sm:$0xff]   ;;  %v3495_v18 = vld [vmem:[%s4502_s1 + $0x248] sm:$0xff]  }
  0x19   :  { %3056 = vmatpush3.bf16.msra.mxu1 %v3434_v23  ;;  %3029 = vmatprep.subr.bf16.mxu0 %v3435_v24  ;;  %v3484_v9 = vld [vmem:[%s4503_s0 + $0x10] ss:$108 sps:$4 sm:$0xff]   ;;  %v3489_v13 = vld [vmem:[%s4503_s0 + $0x18] ss:$108 sps:$4 sm:$0xff]   ;;  %v3496_v19 = vld [vmem:[%s4502_s1 + $0x208] sm:$0xff]  }
  0x1a   :  { %3057 = vmatprep.subr.bf16.mxu1 %v3436_v25  ;;  %v3487_v11 = vld [vmem:[%s4502_s1 + $0x1b8] sm:$0xff]   ;;  %v3492_v15 = vld [vmem:[%s4502_s1 + $0x200] sm:$0xff]   ;;  %v3497_v20 = vld [vmem:[%s4502_s1 + $0x2c8] sm:$0xff]  }
  0x1b   :  { %v3491_v14 = vld [vmem:[%s4503_s0 + $0x1c] ss:$108 sps:$4 sm:$0xff]   ;;  %v3493_v16 = vld [vmem:[%s4502_s1 + $0x2c0] sm:$0xff]   ;;  %v3501_v25 = vld [vmem:[%s4502_s1 + $0x250] sm:$0xff]  }
  0x1c   :  { %3030 = vmatpush3.bf16.msra.mxu0 %v3437_v26  ;;  %v3494_v17 = vld [vmem:[%s4502_s1 + $0x280] sm:$0xff]   ;;  %v48_v21 = vld [vmem:[%s4503_s0 + $0xe8] sm:$0x11]  ;;  %v49_v26 = vld [vmem:[%s4503_s0 + $0xf0] sm:$0x11] }
  0x1d   :  { %3058 = vmatpush3.bf16.msra.mxu1 %v3438_v27  ;;  %3031 = vmatprep.subr.bf16.mxu0 %v3439_v28  ;;  %v2766_v22 = vcombine.high %v48_v21, %v48_v21  ;;  %v3499_v23 = vld [vmem:[%s4502_s1 + $0x288] sm:$0xff]   ;;  %v2765_v24 = vcombine.low %v48_v21, %v48_v21  ;;  %v2768_v27 = vcombine.high %v49_v26, %v49_v26  ;;  %v3503_v28 = vld [vmem:[%s4502_s1 + $0x210] sm:$0xff]   ;;  %v3508_v33 = vld [vmem:[%s4502_s1 + $0x218] sm:$0xff]  }
  0x1e   :  { %3059 = vmatprep.subr.bf16.mxu1 %v3440_v29  ;;  %v2767_v29 = vcombine.low %v49_v26, %v49_v26  ;;  %v3510_v35 = vld [vmem:[%s4502_s1 + $0x298] sm:$0xff]   ;;  %v3534_v57 = vld [vmem:[%s4502_s1 + $0x300] sm:$0xff]   ;;  %v3539_v62 = vld [vmem:[%s4502_s1 + $0x3c8] sm:$0xff]  }
  0x1f   :  { %v3560_v21 = vld [vmem:[%s4502_s1 + $0x3a8] sm:$0xff]   ;;  %v3565_v26 = vld [vmem:[%s4502_s1 + $0x378] sm:$0xff]  }
  0x20   :  { %3032 = vmatpush3.bf16.msra.mxu0 %v3441_v30  ;;  %v3505_v30 = vld [vmem:[%s4502_s1 + $0x2d0] sm:$0xff]  }
  0x21   :  { %3060 = vmatpush3.bf16.msra.mxu1 %v3442_v31  ;;  %3073 = vmatprep.subr.bf16.mxu0 %v3449_v36  ;;  %v3506_v31 = vld [vmem:[%s4502_s1 + $0x290] sm:$0xff]   ;;  %v3511_v36 = vld [vmem:[%s4502_s1 + $0x260] sm:$0xff]  }
  0x22   :  { %3101 = vmatprep.subr.bf16.mxu1 %v3451_v38  ;;  %v3513_v38 = vld [vmem:[%s4502_s1 + $0x2e0] sm:$0xff]  }
  0x23   :  { %2052 = vmatmul.mubr.bf16.vlgmr.msra.gmra.mrb[0].mxu0 %v3443_v32  ;;  %v3507_v32 = vld [vmem:[%s4502_s1 + $0x258] sm:$0xff]  }
  0x24   :  { %2100 = vmatmul.mubr.bf16.vlgmr.msra.gmra.mrb[0].mxu1 %v3446_v34  ;;  %3074 = vmatpush3.bf16.msra.mxu0 %v3450_v37  ;;  %v3509_v34 = vld [vmem:[%s4502_s1 + $0x2d8] sm:$0xff]   ;;  %v3512_v37 = vld [vmem:[%s4502_s1 + $0x220] sm:$0xff]  }
  0x25   :  { %3102 = vmatpush3.bf16.msra.mxu1 %v3452_v39  ;;  %3075 = vmatprep.subr.bf16.mxu0 %v3453_v40  ;;  %v3514_v39 = vld [vmem:[%s4502_s1 + $0x2a0] sm:$0xff]   ;;  %v3515_v40 = vld [vmem:[%s4502_s1 + $0x268] sm:$0xff]  }
  0x26   :  { %3103 = vmatprep.subr.bf16.mxu1 %v3455_v42  ;;  %2059 = vmatprep.mubr.bf16.mxu0 %v2762_v58  ;;  %v3517_v42 = vld [vmem:[%s4502_s1 + $0x2e8] sm:$0xff]   ;;  %v3535_v58 = vld [vmem:[%s4502_s1 + $0x3c0] sm:$0xff]  }
  0x27   :  { %2107 = vmatprep.mubr.bf16.mxu1 %v2764_v63  ;;  %v50_v63 = vld [vmem:[%s4503_s0 + $0xf8] sm:$0x11] }
  0x28   :  { %3076 = vmatpush3.bf16.msra.mxu0 %v3454_v41  ;;  %v3516_v41 = vld [vmem:[%s4502_s1 + $0x228] sm:$0xff]  }
  0x29   :  { %3104 = vmatpush3.bf16.msra.mxu1 %v3456_v43  ;;  %3077 = vmatprep.subr.bf16.mxu0 %v3457_v44  ;;  %v3518_v43 = vld [vmem:[%s4502_s1 + $0x2a8] sm:$0xff]   ;;  %v3519_v44 = vld [vmem:[%s4502_s1 + $0x270] sm:$0xff]  }
  0x2a   :  { %3105 = vmatprep.subr.bf16.mxu1 %v3459_v46  ;;  %v3521_v46 = vld [vmem:[%s4502_s1 + $0x2f0] sm:$0xff]  }
  0x2b   :  { %2060 = vmatmul.mubr.bf16.gmra.mrb[4].mxu0 %v2761_v60  ;;  %v3537_v60 = vld [vmem:[%s4502_s1 + $0x348] sm:$0xff]  }
  0x2c   :  { %3078 = vmatpush3.bf16.msra.mxu0 %v3458_v45  ;;  %2108 = vmatmul.mubr.bf16.gmra.mrb[4].mxu1 %v2763_v1  ;;  %v3520_v45 = vld [vmem:[%s4502_s1 + $0x230] sm:$0xff]   ;;  %v3541_v1 = vld [vmem:[%s4502_s1 + $0x388] sm:$0xff]  }
  0x2d   :  { %3106 = vmatpush3.bf16.msra.mxu1 %v3460_v47  ;;  %3079 = vmatprep.subr.bf16.mxu0 %v3461_v48  ;;  %v3522_v47 = vld [vmem:[%s4502_s1 + $0x2b0] sm:$0xff]   ;;  %v3523_v48 = vld [vmem:[%s4502_s1 + $0x278] sm:$0xff]  }
  0x2e   :  { %3107 = vmatprep.subr.bf16.mxu1 %v3463_v50  ;;  %2147 = vmatprep.mubr.bf16.mxu0 %v3486_v10  ;;  %v3525_v50 = vld [vmem:[%s4502_s1 + $0x2f8] sm:$0xff]  }
  0x2f   :  { %2195 = vmatprep.mubr.bf16.mxu1 %v3491_v14  ;;  %v3549_v10 = vld [vmem:[%s4502_s1 + $0x358] sm:$0xff]   ;;  %v3553_v14 = vld [vmem:[%s4502_s1 + $0x360] sm:$0xff]  }
  0x30   :  { %3080 = vmatpush3.bf16.msra.mxu0 %v3462_v49  ;;  %v3524_v49 = vld [vmem:[%s4502_s1 + $0x238] sm:$0xff]  }
  0x31   :  { %3108 = vmatpush3.bf16.msra.mxu1 %v3464_v51  ;;  %3081 = vmatprep.subr.bf16.mxu0 %v3465_v52  ;;  %v3526_v51 = vld [vmem:[%s4503_s0 + $0x20] ss:$108 sps:$4 sm:$0xff]   ;;  %v3528_v52 = vld [vmem:[%s4503_s0 + $0x24] ss:$108 sps:$4 sm:$0xff]  }
  0x32   :  { %3109 = vmatprep.subr.bf16.mxu1 %v3467_v54  ;;  %v3530_v54 = vld [vmem:[%s4502_s1 + $0x340] sm:$0xff]  }
  0x34   :  { %3082 = vmatpush3.bf16.msra.mxu0 %v3466_v53  ;;  %v3529_v53 = vld [vmem:[%s4502_s1 + $0x2b8] sm:$0xff]  }
  0x35   :  { %3110 = vmatpush3.bf16.msra.mxu1 %v3468_v55  ;;  %3083 = vmatprep.subr.bf16.mxu0 %v3469_v56  ;;  %v3531_v55 = vld [vmem:[%s4503_s0 + $0x28] ss:$108 sps:$4 sm:$0xff]   ;;  %v3533_v56 = vld [vmem:[%s4503_s0 + $0x2c] ss:$108 sps:$4 sm:$0xff]  }
  0x36   :  { %3111 = vmatprep.subr.bf16.mxu1 %v3473_v61  ;;  %v3538_v61 = vld [vmem:[%s4502_s1 + $0x308] sm:$0xff]  }
  0x38   :  { %3084 = vmatpush3.bf16.msra.mxu0 %v3471_v59  ;;  %v3536_v59 = vld [vmem:[%s4502_s1 + $0x380] sm:$0xff]  }
  0x39   :  { %3112 = vmatpush3.bf16.msra.mxu1 %v3475_v0  ;;  %3085 = vmatprep.subr.bf16.mxu0 %v3477_v2  ;;  %v2770_v0 = vcombine.high %v50_v63, %v50_v63  ;;  %v2769_v2 = vcombine.low %v50_v63, %v50_v63  ;;  %v3602_v63 = vld [vmem:[%s4502_s1 + $0x4a8] sm:$0xff]  }
  0x3a   :  { %3113 = vmatprep.subr.bf16.mxu1 %v3479_v4  ;;  %v51_v4 = vld [vmem:[%s4503_s0 + $0x100] sm:$0x11] }
  0x3c   :  { %3086 = vmatpush3.bf16.msra.mxu0 %v3478_v3  ;;  %v3543_v3 = vld [vmem:[%s4502_s1 + $0x350] sm:$0xff]  }
  0x3d   :  { %3114 = vmatpush3.bf16.msra.mxu1 %v3480_v5  ;;  %3087 = vmatprep.subr.bf16.mxu0 %v3481_v6  ;;  %v2772_v5 = vcombine.high %v51_v4, %v51_v4  ;;  %v3545_v6 = vld [vmem:[%s4502_s1 + $0x310] sm:$0xff]  }
  0x3e   :  { %3115 = vmatprep.subr.bf16.mxu1 %v3483_v8  ;;  %v3547_v8 = vld [vmem:[%s4502_s1 + $0x3d0] sm:$0xff]  }
  0x40   :  { %3088 = vmatpush3.bf16.msra.mxu0 %v3482_v7  ;;  %v2771_v7 = vcombine.low %v51_v4, %v51_v4  ;;  %v3607_v4 = vld [vmem:[%s4502_s1 + $0x478] sm:$0xff]  }
  0x41   :  { %3116 = vmatpush3.bf16.msra.mxu1 %v3487_v11  ;;  %3129 = vmatprep.subr.bf16.mxu0 %v3488_v12  ;;  %v3550_v11 = vld [vmem:[%s4502_s1 + $0x318] sm:$0xff]  }
  0x42   :  { %3157 = vmatprep.subr.bf16.mxu1 %v3493_v16  ;;  %v3551_v12 = vld [vmem:[%s4502_s1 + $0x3d8] sm:$0xff]   ;;  %v3555_v16 = vld [vmem:[%s4502_s1 + $0x3e0] sm:$0xff]  }
  0x43   :  { %2148 = vmatmul.mubr.bf16.vlgmr.msra.gmra.mrb[8].mxu0 %v3484_v9  ;;  %v3548_v9 = vld [vmem:[%s4502_s1 + $0x390] sm:$0xff]  }
  0x44   :  { %3130 = vmatpush3.bf16.msra.mxu0 %v3492_v15  ;;  %2196 = vmatmul.mubr.bf16.vlgmr.msra.gmra.mrb[8].mxu1 %v3489_v13  ;;  %v3552_v13 = vld [vmem:[%s4502_s1 + $0x398] sm:$0xff]   ;;  %v3554_v15 = vld [vmem:[%s4502_s1 + $0x320] sm:$0xff]  }
  0x45   :  { %3158 = vmatpush3.bf16.msra.mxu1 %v3494_v17  ;;  %3131 = vmatprep.subr.bf16.mxu0 %v3495_v18  ;;  %v3556_v17 = vld [vmem:[%s4502_s1 + $0x3a0] sm:$0xff]   ;;  %v3557_v18 = vld [vmem:[%s4502_s1 + $0x368] sm:$0xff]  }
  0x46   :  { %3159 = vmatprep.subr.bf16.mxu1 %v3497_v20  ;;  %2155 = vmatprep.mubr.bf16.mxu0 %v2766_v22  ;;  %v3559_v20 = vld [vmem:[%s4502_s1 + $0x3e8] sm:$0xff]   ;;  %v3561_v22 = vld [vmem:[%s4502_s1 + $0x370] sm:$0xff]  }
  0x47   :  { %2203 = vmatprep.mubr.bf16.mxu1 %v2768_v27  ;;  %v3566_v27 = vld [vmem:[%s4502_s1 + $0x338] sm:$0xff]  }
  0x48   :  { %3132 = vmatpush3.bf16.msra.mxu0 %v3496_v19  ;;  %v3558_v19 = vld [vmem:[%s4502_s1 + $0x328] sm:$0xff]  }
  0x49   :  { %3160 = vmatpush3.bf16.msra.mxu1 %v3499_v23  ;;  %3133 = vmatprep.subr.bf16.mxu0 %v3501_v25  ;;  %v3562_v23 = vld [vmem:[%s4502_s1 + $0x330] sm:$0xff]  }
  0x4a   :  { %3161 = vmatprep.subr.bf16.mxu1 %v3505_v30  ;;  %v3564_v25 = vld [vmem:[%s4502_s1 + $0x3b0] sm:$0xff]  }
  0x4b   :  { %2156 = vmatmul.mubr.bf16.gmra.mrb[12].mxu0 %v2765_v24  ;;  %v3563_v24 = vld [vmem:[%s4502_s1 + $0x3f0] sm:$0xff]  }
  0x4c   :  { %3134 = vmatpush3.bf16.msra.mxu0 %v3503_v28  ;;  %2204 = vmatmul.mubr.bf16.gmra.mrb[12].mxu1 %v2767_v29  ;;  %v3567_v28 = vld [vmem:[%s4502_s1 + $0x3f8] sm:$0xff]   ;;  %v3570_v30 = vld [vmem:[%s4503_s0 + $0x34] ss:$108 sps:$4 sm:$0xff]  }
  0x4d   :  { %3162 = vmatpush3.bf16.msra.mxu1 %v3506_v31  ;;  %3135 = vmatprep.subr.bf16.mxu0 %v3507_v32  ;;  %v3568_v29 = vld [vmem:[%s4503_s0 + $0x30] ss:$108 sps:$4 sm:$0xff]   ;;  %v3572_v32 = vld [vmem:[%s4502_s1 + $0x440] sm:$0xff]  }
  0x4e   :  { %3163 = vmatprep.subr.bf16.mxu1 %v3509_v34  ;;  %2243 = vmatprep.mubr.bf16.mxu0 %v3528_v52  ;;  %v3571_v31 = vld [vmem:[%s4502_s1 + $0x3b8] sm:$0xff]  }
  0x4f   :  { %2291 = vmatprep.mubr.bf16.mxu1 %v3533_v56  ;;  %v3575_v34 = vld [vmem:[%s4503_s0 + $0x3c] ss:$108 sps:$4 sm:$0xff]   ;;  %v3595_v56 = vld [vmem:[%s4502_s1 + $0x460] sm:$0xff]  }
  0x50   :  { %3136 = vmatpush3.bf16.msra.mxu0 %v3508_v33  ;;  %v3573_v33 = vld [vmem:[%s4503_s0 + $0x38] ss:$108 sps:$4 sm:$0xff]  }
  0x51   :  { %3164 = vmatpush3.bf16.msra.mxu1 %v3510_v35  ;;  %3137 = vmatprep.subr.bf16.mxu0 %v3511_v36  ;;  %v3576_v35 = vld [vmem:[%s4502_s1 + $0x400] sm:$0xff]   ;;  %v3591_v52 = vld [vmem:[%s4502_s1 + $0x458] sm:$0xff]  }
  0x52   :  { %3165 = vmatprep.subr.bf16.mxu1 %v3513_v38  ;;  %v3577_v36 = vld [vmem:[%s4502_s1 + $0x4c0] sm:$0xff]   ;;  %v3579_v38 = vld [vmem:[%s4502_s1 + $0x448] sm:$0xff]  }
  0x54   :  { %3138 = vmatpush3.bf16.msra.mxu0 %v3512_v37  ;;  %v3578_v37 = vld [vmem:[%s4502_s1 + $0x480] sm:$0xff]  }
  0x55   :  { %3166 = vmatpush3.bf16.msra.mxu1 %v3514_v39  ;;  %3139 = vmatprep.subr.bf16.mxu0 %v3515_v40  ;;  %v3580_v39 = vld [vmem:[%s4502_s1 + $0x408] sm:$0xff]  }
  0x56   :  { %3167 = vmatprep.subr.bf16.mxu1 %v3517_v42  ;;  %v3581_v40 = vld [vmem:[%s4502_s1 + $0x4c8] sm:$0xff]  }
  0x58   :  { %3140 = vmatpush3.bf16.msra.mxu0 %v3516_v41  ;;  %v52_v41 = vld [vmem:[%s4503_s0 + $0x108] sm:$0x11] }
  0x59   :  { %3168 = vmatpush3.bf16.msra.mxu1 %v3518_v43  ;;  %3141 = vmatprep.subr.bf16.mxu0 %v3519_v44  ;;  %v2774_v42 = vcombine.high %v52_v41, %v52_v41  ;;  %v3583_v43 = vld [vmem:[%s4502_s1 + $0x488] sm:$0xff]   ;;  %v2773_v44 = vcombine.low %v52_v41, %v52_v41 }
  0x5a   :  { %3169 = vmatprep.subr.bf16.mxu1 %v3521_v46  ;;  %v53_v46 = vld [vmem:[%s4503_s0 + $0x110] sm:$0x11]  ;;  %v3644_v41 = vld [vmem:[%s4502_s1 + $0x5a8] sm:$0xff]  }
  0x5c   :  { %3142 = vmatpush3.bf16.msra.mxu0 %v3520_v45  ;;  %v3585_v45 = vld [vmem:[%s4502_s1 + $0x450] sm:$0xff]  }
  0x5d   :  { %3170 = vmatpush3.bf16.msra.mxu1 %v3522_v47  ;;  %3143 = vmatprep.subr.bf16.mxu0 %v3523_v48  ;;  %v2776_v47 = vcombine.high %v53_v46, %v53_v46  ;;  %v3587_v48 = vld [vmem:[%s4502_s1 + $0x410] sm:$0xff]  }
  0x5e   :  { %3171 = vmatprep.subr.bf16.mxu1 %v3525_v50  ;;  %v3589_v50 = vld [vmem:[%s4502_s1 + $0x4d0] sm:$0xff]  }
  0x60   :  { %3144 = vmatpush3.bf16.msra.mxu0 %v3524_v49  ;;  %v2775_v49 = vcombine.low %v53_v46, %v53_v46  ;;  %v3649_v46 = vld [vmem:[%s4502_s1 + $0x578] sm:$0xff]  }
  0x61   :  { %3172 = vmatpush3.bf16.msra.mxu1 %v3529_v53  ;;  %3185 = vmatprep.subr.bf16.mxu0 %v3530_v54  ;;  %v3592_v53 = vld [vmem:[%s4502_s1 + $0x418] sm:$0xff]  }
  0x62   :  { %3213 = vmatprep.subr.bf16.mxu1 %v3535_v58  ;;  %v3593_v54 = vld [vmem:[%s4502_s1 + $0x4d8] sm:$0xff]   ;;  %v3597_v58 = vld [vmem:[%s4502_s1 + $0x4e0] sm:$0xff]  }
  0x63   :  { %2244 = vmatmul.mubr.bf16.vlgmr.msra.gmra.mrb[16].mxu0 %v3526_v51  ;;  %v3590_v51 = vld [vmem:[%s4502_s1 + $0x490] sm:$0xff]  }
  0x64   :  { %3186 = vmatpush3.bf16.msra.mxu0 %v3534_v57  ;;  %2292 = vmatmul.mubr.bf16.vlgmr.msra.gmra.mrb[16].mxu1 %v3531_v55  ;;  %v3594_v55 = vld [vmem:[%s4502_s1 + $0x498] sm:$0xff]   ;;  %v3596_v57 = vld [vmem:[%s4502_s1 + $0x420] sm:$0xff]  }
  0x65   :  { %3214 = vmatpush3.bf16.msra.mxu1 %v3536_v59  ;;  %3187 = vmatprep.subr.bf16.mxu0 %v3537_v60  ;;  %v3598_v59 = vld [vmem:[%s4502_s1 + $0x4a0] sm:$0xff]   ;;  %v3599_v60 = vld [vmem:[%s4502_s1 + $0x468] sm:$0xff]  }
  0x66   :  { %3215 = vmatprep.subr.bf16.mxu1 %v3539_v62  ;;  %2251 = vmatprep.mubr.bf16.mxu0 %v2770_v0  ;;  %v3601_v62 = vld [vmem:[%s4502_s1 + $0x4e8] sm:$0xff]   ;;  %v3603_v0 = vld [vmem:[%s4502_s1 + $0x470] sm:$0xff]  }
  0x67   :  { %2299 = vmatprep.mubr.bf16.mxu1 %v2772_v5  ;;  %v3608_v5 = vld [vmem:[%s4502_s1 + $0x438] sm:$0xff]  }
  0x68   :  { %3188 = vmatpush3.bf16.msra.mxu0 %v3538_v61  ;;  %v3600_v61 = vld [vmem:[%s4502_s1 + $0x428] sm:$0xff]  }
  0x69   :  { %3216 = vmatpush3.bf16.msra.mxu1 %v3541_v1  ;;  %3189 = vmatprep.subr.bf16.mxu0 %v3543_v3  ;;  %v3604_v1 = vld [vmem:[%s4502_s1 + $0x430] sm:$0xff]  }
  0x6a   :  { %3217 = vmatprep.subr.bf16.mxu1 %v3547_v8  ;;  %v3606_v3 = vld [vmem:[%s4502_s1 + $0x4b0] sm:$0xff]  }
  0x6b   :  { %2252 = vmatmul.mubr.bf16.gmra.mrb[20].mxu0 %v2769_v2  ;;  %v3605_v2 = vld [vmem:[%s4502_s1 + $0x4f0] sm:$0xff]  }
  0x6c   :  { %3190 = vmatpush3.bf16.msra.mxu0 %v3545_v6  ;;  %2300 = vmatmul.mubr.bf16.gmra.mrb[20].mxu1 %v2771_v7  ;;  %v3609_v6 = vld [vmem:[%s4502_s1 + $0x4f8] sm:$0xff]   ;;  %v3610_v7 = vld [vmem:[%s4503_s0 + $0x40] ss:$108 sps:$4 sm:$0xff]   ;;  %v3612_v8 = vld [vmem:[%s4503_s0 + $0x44] ss:$108 sps:$4 sm:$0xff]  }
  0x6d   :  { %3218 = vmatpush3.bf16.msra.mxu1 %v3548_v9  ;;  %3191 = vmatprep.subr.bf16.mxu0 %v3549_v10  ;;  %v3613_v9 = vld [vmem:[%s4502_s1 + $0x4b8] sm:$0xff]   ;;  %v3614_v10 = vld [vmem:[%s4502_s1 + $0x540] sm:$0xff]  }
  0x6e   :  { %3219 = vmatprep.subr.bf16.mxu1 %v3551_v12  ;;  %2339 = vmatprep.mubr.bf16.mxu0 %v3570_v30  ;;  %v3617_v12 = vld [vmem:[%s4503_s0 + $0x4c] ss:$108 sps:$4 sm:$0xff]  }
  0x6f   :  { %2387 = vmatprep.mubr.bf16.mxu1 %v3575_v34  ;;  %v3633_v30 = vld [vmem:[%s4502_s1 + $0x558] sm:$0xff]   ;;  %v3637_v34 = vld [vmem:[%s4502_s1 + $0x560] sm:$0xff]  }
  0x70   :  { %3192 = vmatpush3.bf16.msra.mxu0 %v3550_v11  ;;  %v3615_v11 = vld [vmem:[%s4503_s0 + $0x48] ss:$108 sps:$4 sm:$0xff]  }
  0x71   :  { %3220 = vmatpush3.bf16.msra.mxu1 %v3552_v13  ;;  %3193 = vmatprep.subr.bf16.mxu0 %v3553_v14  ;;  %v3618_v13 = vld [vmem:[%s4502_s1 + $0x500] sm:$0xff]  }
  0x72   :  { %3221 = vmatprep.subr.bf16.mxu1 %v3555_v16  ;;  %v3619_v14 = vld [vmem:[%s4502_s1 + $0x5c0] sm:$0xff]   ;;  %v3621_v16 = vld [vmem:[%s4502_s1 + $0x548] sm:$0xff]  }
  0x74   :  { %3194 = vmatpush3.bf16.msra.mxu0 %v3554_v15  ;;  %v3620_v15 = vld [vmem:[%s4502_s1 + $0x580] sm:$0xff]  }
  0x75   :  { %3222 = vmatpush3.bf16.msra.mxu1 %v3556_v17  ;;  %3195 = vmatprep.subr.bf16.mxu0 %v3557_v18  ;;  %v3622_v17 = vld [vmem:[%s4502_s1 + $0x508] sm:$0xff]  }
  0x76   :  { %3223 = vmatprep.subr.bf16.mxu1 %v3559_v20  ;;  %v3623_v18 = vld [vmem:[%s4502_s1 + $0x5c8] sm:$0xff]  }
  0x78   :  { %3196 = vmatpush3.bf16.msra.mxu0 %v3558_v19  ;;  %v54_v19 = vld [vmem:[%s4503_s0 + $0x118] sm:$0x11] }
  0x79   :  { %3224 = vmatpush3.bf16.msra.mxu1 %v3560_v21  ;;  %3197 = vmatprep.subr.bf16.mxu0 %v3561_v22  ;;  %v2778_v20 = vcombine.high %v54_v19, %v54_v19  ;;  %v3625_v21 = vld [vmem:[%s4502_s1 + $0x588] sm:$0xff]   ;;  %v2777_v22 = vcombine.low %v54_v19, %v54_v19 }
  0x7a   :  { %3225 = vmatprep.subr.bf16.mxu1 %v3563_v24  ;;  %v55_v24 = vld [vmem:[%s4503_s0 + $0x120] sm:$0x11]  ;;  %v3690_v19 = vld [vmem:[%s4503_s0 + $0x68] ss:$108 sps:$4 sm:$0xff]  }
  0x7c   :  { %3198 = vmatpush3.bf16.msra.mxu0 %v3562_v23  ;;  %v3627_v23 = vld [vmem:[%s4502_s1 + $0x550] sm:$0xff]  }
  0x7d   :  { %3226 = vmatpush3.bf16.msra.mxu1 %v3564_v25  ;;  %3199 = vmatprep.subr.bf16.mxu0 %v3565_v26  ;;  %v2780_v25 = vcombine.high %v55_v24, %v55_v24  ;;  %v3629_v26 = vld [vmem:[%s4502_s1 + $0x510] sm:$0xff]  }
  0x7e   :  { %3227 = vmatprep.subr.bf16.mxu1 %v3567_v28  ;;  %v3631_v28 = vld [vmem:[%s4502_s1 + $0x5d0] sm:$0xff]  }
  0x80   :  { %3200 = vmatpush3.bf16.msra.mxu0 %v3566_v27  ;;  %v2779_v27 = vcombine.low %v55_v24, %v55_v24 }
  0x81   :  { %3228 = vmatpush3.bf16.msra.mxu1 %v3571_v31  ;;  %3241 = vmatprep.subr.bf16.mxu0 %v3572_v32  ;;  %v3634_v31 = vld [vmem:[%s4502_s1 + $0x518] sm:$0xff]  }
  0x82   :  { %3269 = vmatprep.subr.bf16.mxu1 %v3577_v36  ;;  %v3635_v32 = vld [vmem:[%s4502_s1 + $0x5d8] sm:$0xff]   ;;  %v3639_v36 = vld [vmem:[%s4502_s1 + $0x5e0] sm:$0xff]  }
  0x83   :  { %2340 = vmatmul.mubr.bf16.vlgmr.msra.gmra.mrb[24].mxu0 %v3568_v29  ;;  %v3632_v29 = vld [vmem:[%s4502_s1 + $0x590] sm:$0xff]  }
  0x84   :  { %3242 = vmatpush3.bf16.msra.mxu0 %v3576_v35  ;;  %2388 = vmatmul.mubr.bf16.vlgmr.msra.gmra.mrb[24].mxu1 %v3573_v33  ;;  %v3636_v33 = vld [vmem:[%s4502_s1 + $0x598] sm:$0xff]   ;;  %v3638_v35 = vld [vmem:[%s4502_s1 + $0x520] sm:$0xff]  }
  0x85   :  { %3270 = vmatpush3.bf16.msra.mxu1 %v3578_v37  ;;  %3243 = vmatprep.subr.bf16.mxu0 %v3579_v38  ;;  %v3640_v37 = vld [vmem:[%s4502_s1 + $0x5a0] sm:$0xff]   ;;  %v3641_v38 = vld [vmem:[%s4502_s1 + $0x568] sm:$0xff]  }
  0x86   :  { %3271 = vmatprep.subr.bf16.mxu1 %v3581_v40  ;;  %2347 = vmatprep.mubr.bf16.mxu0 %v2774_v42  ;;  %v3643_v40 = vld [vmem:[%s4502_s1 + $0x5e8] sm:$0xff]   ;;  %v3645_v42 = vld [vmem:[%s4502_s1 + $0x570] sm:$0xff]  }
  0x87   :  { %2395 = vmatprep.mubr.bf16.mxu1 %v2776_v47  ;;  %v3650_v47 = vld [vmem:[%s4502_s1 + $0x538] sm:$0xff]  }
  0x88   :  { %3244 = vmatpush3.bf16.msra.mxu0 %v3580_v39  ;;  %v3642_v39 = vld [vmem:[%s4502_s1 + $0x528] sm:$0xff]  }
  0x89   :  { %3272 = vmatpush3.bf16.msra.mxu1 %v3583_v43  ;;  %3245 = vmatprep.subr.bf16.mxu0 %v3585_v45  ;;  %v3646_v43 = vld [vmem:[%s4502_s1 + $0x530] sm:$0xff]  }
  0x8a   :  { %3273 = vmatprep.subr.bf16.mxu1 %v3589_v50  ;;  %v3648_v45 = vld [vmem:[%s4502_s1 + $0x5b0] sm:$0xff]  }
  0x8b   :  { %2348 = vmatmul.mubr.bf16.gmra.mrb[28].mxu0 %v2773_v44  ;;  %v3647_v44 = vld [vmem:[%s4502_s1 + $0x5f0] sm:$0xff]  }
  0x8c   :  { %3246 = vmatpush3.bf16.msra.mxu0 %v3587_v48  ;;  %2396 = vmatmul.mubr.bf16.gmra.mrb[28].mxu1 %v2775_v49  ;;  %v3651_v48 = vld [vmem:[%s4502_s1 + $0x5f8] sm:$0xff]   ;;  %v3654_v50 = vld [vmem:[%s4503_s0 + $0x54] ss:$108 sps:$4 sm:$0xff]  }
  0x8d   :  { %3274 = vmatpush3.bf16.msra.mxu1 %v3590_v51  ;;  %3247 = vmatprep.subr.bf16.mxu0 %v3591_v52  ;;  %v3652_v49 = vld [vmem:[%s4503_s0 + $0x50] ss:$108 sps:$4 sm:$0xff]   ;;  %v3656_v52 = vld [vmem:[%s4502_s1 + $0x640] sm:$0xff]  }
  0x8e   :  { %3275 = vmatprep.subr.bf16.mxu1 %v3593_v54  ;;  %2435 = vmatprep.mubr.bf16.mxu0 %v3612_v8  ;;  %v3655_v51 = vld [vmem:[%s4502_s1 + $0x5b8] sm:$0xff]  }
  0x8f   :  { %2483 = vmatprep.mubr.bf16.mxu1 %v3617_v12  ;;  %v3659_v54 = vld [vmem:[%s4503_s0 + $0x5c] ss:$108 sps:$4 sm:$0xff]  }
  0x90   :  { %3248 = vmatpush3.bf16.msra.mxu0 %v3592_v53  ;;  %v3657_v53 = vld [vmem:[%s4503_s0 + $0x58] ss:$108 sps:$4 sm:$0xff]   ;;  %v3679_v12 = vld [vmem:[%s4502_s1 + $0x628] sm:$0xff]  }
  0x91   :  { %3276 = vmatpush3.bf16.msra.mxu1 %v3594_v55  ;;  %3249 = vmatprep.subr.bf16.mxu0 %v3595_v56  ;;  %v3660_v55 = vld [vmem:[%s4502_s1 + $0x600] sm:$0xff]   ;;  %v3661_v56 = vld [vmem:[%s4502_s1 + $0x648] sm:$0xff]   ;;  %v3675_v8 = vld [vmem:[%s4502_s1 + $0x698] sm:$0xff]  }
  0x92   :  { %3277 = vmatprep.subr.bf16.mxu1 %v3597_v58  ;;  %v3663_v58 = vld [vmem:[%s4502_s1 + $0x608] sm:$0xff]  }
  0x94   :  { %3250 = vmatpush3.bf16.msra.mxu0 %v3596_v57  ;;  %v3662_v57 = vld [vmem:[%s4502_s1 + $0x680] sm:$0xff]  }
  0x95   :  { %3278 = vmatpush3.bf16.msra.mxu1 %v3598_v59  ;;  %3251 = vmatprep.subr.bf16.mxu0 %v3599_v60  ;;  %v56_v59 = vld [vmem:[%s4503_s0 + $0x128] sm:$0x11] }
  0x96   :  { %3279 = vmatprep.subr.bf16.mxu1 %v3601_v62  ;;  %v2782_v60 = vcombine.high %v56_v59, %v56_v59  ;;  %v3666_v62 = vld [vmem:[%s4502_s1 + $0x650] sm:$0xff]  }
  0x98   :  { %3252 = vmatpush3.bf16.msra.mxu0 %v3600_v61  ;;  %v2781_v61 = vcombine.low %v56_v59, %v56_v59 }
  0x99   :  { %3280 = vmatpush3.bf16.msra.mxu1 %v3602_v63  ;;  %3253 = vmatprep.subr.bf16.mxu0 %v3603_v0  ;;  %v3667_v63 = vld [vmem:[%s4502_s1 + $0x688] sm:$0xff]   ;;  %v57_v0 = vld [vmem:[%s4503_s0 + $0x130] sm:$0x11] }
  0x9a   :  { %3281 = vmatprep.subr.bf16.mxu1 %v3605_v2  ;;  %v3669_v2 = vld [vmem:[%s4502_s1 + $0x610] sm:$0xff]  }
  0x9c   :  { %3254 = vmatpush3.bf16.msra.mxu0 %v3604_v1  ;;  %v2784_v1 = vcombine.high %v57_v0, %v57_v0 }
  0x9d   :  { %3282 = vmatpush3.bf16.msra.mxu1 %v3606_v3  ;;  %3255 = vmatprep.subr.bf16.mxu0 %v3607_v4  ;;  %v2783_v3 = vcombine.low %v57_v0, %v57_v0  ;;  %v3671_v4 = vld [vmem:[%s4502_s1 + $0x658] sm:$0xff]  }
  0x9e   :  { %3283 = vmatprep.subr.bf16.mxu1 %v3609_v6  ;;  %v3673_v6 = vld [vmem:[%s4502_s1 + $0x618] sm:$0xff]  }
  0xa0   :  { %3256 = vmatpush3.bf16.msra.mxu0 %v3608_v5  ;;  %v3672_v5 = vld [vmem:[%s4502_s1 + $0x690] sm:$0xff]  }
  0xa1   :  { %3284 = vmatpush3.bf16.msra.mxu1 %v3613_v9  ;;  %3297 = vmatprep.subr.bf16.mxu0 %v3614_v10  ;;  %v3676_v9 = vld [vmem:[%s4502_s1 + $0x620] sm:$0xff]  }
  0xa2   :  { %3325 = vmatprep.subr.bf16.mxu1 %v3619_v14  ;;  %v3678_v10 = vld [vmem:[%s4502_s1 + $0x6a0] sm:$0xff]   ;;  %v3680_v14 = vld [vmem:[%s4502_s1 + $0x670] sm:$0xff]  }
  0xa3   :  { %2436 = vmatmul.mubr.bf16.vlgmr.msra.gmra.mrb[32].mxu0 %v3610_v7  ;;  %v3674_v7 = vld [vmem:[%s4502_s1 + $0x660] sm:$0xff]  }
  0xa4   :  { %3298 = vmatpush3.bf16.msra.mxu0 %v3618_v13  ;;  %2484 = vmatmul.mubr.bf16.vlgmr.msra.gmra.mrb[32].mxu1 %v3615_v11  ;;  %v3677_v11 = vld [vmem:[%s4502_s1 + $0x668] sm:$0xff]  }
  0xa5   :  { %3326 = vmatpush3.bf16.msra.mxu1 %v3620_v15  ;;  %3299 = vmatprep.subr.bf16.mxu0 %v3621_v16  ;;  %v3681_v13 = vld [vmem:[%s4502_s1 + $0x6a8] sm:$0xff]   ;;  %v3682_v15 = vld [vmem:[%s4502_s1 + $0x630] sm:$0xff]   ;;  %v3683_v16 = vld [vmem:[%s4502_s1 + $0x678] sm:$0xff]  }
  0xa6   :  { %3327 = vmatprep.subr.bf16.mxu1 %v3623_v18  ;;  %2443 = vmatprep.mubr.bf16.mxu0 %v2778_v20  ;;  %v3688_v18 = vld [vmem:[%s4503_s0 + $0x64] ss:$108 sps:$4 sm:$0xff]   ;;  %v3685_v20 = vld [vmem:[%s4502_s1 + $0x638] sm:$0xff]  }
  0xa7   :  { %2491 = vmatprep.mubr.bf16.mxu1 %v2780_v25  ;;  %v3691_v25 = vld [vmem:[%s4503_s0 + $0x140] ss:$0 sps:$4 sm:$0x11]  }
  0xa8   :  { %3300 = vmatpush3.bf16.msra.mxu0 %v3622_v17  ;;  %v3684_v17 = vld [vmem:[%s4502_s1 + $0x6b0] sm:$0xff]  }
  0xa9   :  { %3328 = vmatpush3.bf16.msra.mxu1 %v3625_v21  ;;  %3301 = vmatprep.subr.bf16.mxu0 %v3627_v23  ;;  %v3689_v21 = vld [vmem:[%s4502_s1 + $0x6b8] sm:$0xff]   ;;  %v3686_v23 = vld [vmem:[%s4503_s0 + $0x60] ss:$108 sps:$4 sm:$0xff]  }
  0xaa   :  { %3329 = vmatprep.subr.bf16.mxu1 %v3631_v28 }
  0xab   :  { %2444 = vmatmul.mubr.bf16.gmra.mrb[36].mxu0 %v2777_v22  ;;  %v58_v22 = vld [vmem:[%s4503_s0 + $0x138] sm:$0x11] }
  0xac   :  { %3302 = vmatpush3.bf16.msra.mxu0 %v3629_v26  ;;  %2492 = vmatmul.mubr.bf16.gmra.mrb[36].mxu1 %v2779_v27  ;;  %v2786_v24 = vcombine.high %v58_v22, %v58_v22 }
  0xad   :  { %3330 = vmatpush3.bf16.msra.mxu1 %v3632_v29  ;;  %3303 = vmatprep.subr.bf16.mxu0 %v3633_v30 }
  0xae   :  { %3331 = vmatprep.subr.bf16.mxu1 %v3635_v32  ;;  %2531 = vmatprep.mubr.bf16.mxu0 %v3654_v50  ;;  %v2785_v32 = vcombine.low %v58_v22, %v58_v22 }
  0xaf   :  { %2579 = vmatprep.mubr.bf16.mxu1 %v3659_v54 }
  0xb0   :  { %3304 = vmatpush3.bf16.msra.mxu0 %v3634_v31 }
  0xb1   :  { %3332 = vmatpush3.bf16.msra.mxu1 %v3636_v33  ;;  %3305 = vmatprep.subr.bf16.mxu0 %v3637_v34 }
  0xb2   :  { %3333 = vmatprep.subr.bf16.mxu1 %v3639_v36 }
  0xb4   :  { %3306 = vmatpush3.bf16.msra.mxu0 %v3638_v35 }
  0xb5   :  { %3334 = vmatpush3.bf16.msra.mxu1 %v3640_v37  ;;  %3307 = vmatprep.subr.bf16.mxu0 %v3641_v38 }
  0xb6   :  { %3335 = vmatprep.subr.bf16.mxu1 %v3643_v40 }
  0xb8   :  { %3308 = vmatpush3.bf16.msra.mxu0 %v3642_v39 }
  0xb9   :  { %3336 = vmatpush3.bf16.msra.mxu1 %v3644_v41  ;;  %3309 = vmatprep.subr.bf16.mxu0 %v3645_v42 }
  0xba   :  { %3337 = vmatprep.subr.bf16.mxu1 %v3647_v44 }
  0xbc   :  { %3310 = vmatpush3.bf16.msra.mxu0 %v3646_v43 }
  0xbd   :  { %3338 = vmatpush3.bf16.msra.mxu1 %v3648_v45  ;;  %3311 = vmatprep.subr.bf16.mxu0 %v3649_v46 }
  0xbe   :  { %3339 = vmatprep.subr.bf16.mxu1 %v3651_v48 }
  0xc0   :  { %3312 = vmatpush3.bf16.msra.mxu0 %v3650_v47 }
  0xc1   :  { %3340 = vmatpush3.bf16.msra.mxu1 %v3655_v51  ;;  %3353 = vmatprep.subr.bf16.mxu0 %v3656_v52 }
  0xc2   :  { %3391 = vmatprep.subr.bf16.mxu1 %v3662_v57 }
  0xc3   :  { %2532 = vmatmul.mubr.bf16.vlgmr.msra.gmra.mrb[40].mxu0 %v3652_v49 }
  0xc4   :  { %3354 = vmatpush3.bf16.msra.mxu0 %v3660_v55  ;;  %2580 = vmatmul.mubr.bf16.vlgmr.msra.gmra.mrb[40].mxu1 %v3657_v53 }
  0xc5   :  { %3355 = vmatprep.subr.bf16.mxu0 %v3661_v56  ;;  %3392 = vmatpush3.bf16.msra.mxu1 %v3662_v57 }
  0xc6   :  { %2539 = vmatprep.mubr.bf16.mxu0 %v2782_v60  ;;  %3393 = vmatprep.subr.bf16.mxu1 %v3667_v63 }
  0xc7   :  { %2587 = vmatprep.mubr.bf16.mxu1 %v2784_v1 }
  0xc8   :  { %3356 = vmatpush3.bf16.msra.mxu0 %v3663_v58 }
  0xc9   :  { %3357 = vmatprep.subr.bf16.mxu0 %v3666_v62  ;;  %3394 = vmatpush3.bf16.msra.mxu1 %v3667_v63 }
  0xca   :  { %3395 = vmatprep.subr.bf16.mxu1 %v3672_v5 }
  0xcb   :  { %2540 = vmatmul.mubr.bf16.gmra.mrb[44].mxu0 %v2781_v61 }
  0xcc   :  { %3358 = vmatpush3.bf16.msra.mxu0 %v3669_v2  ;;  %2588 = vmatmul.mubr.bf16.gmra.mrb[44].mxu1 %v2783_v3 }
  0xcd   :  { %3359 = vmatprep.subr.bf16.mxu0 %v3671_v4  ;;  %3396 = vmatpush3.bf16.msra.mxu1 %v3672_v5 }
  0xce   :  { %3397 = vmatprep.subr.bf16.mxu1 %v3675_v8  ;;  %2627 = vmatprep.mubr.bf16.mxu0 %v3688_v18 }
  0xcf   :  { %3407 = vmatprep.mubr.bf16.mxu1 %v3690_v19 }
  0xd0   :  { %3360 = vmatpush3.bf16.msra.mxu0 %v3673_v6 }
  0xd1   :  { %3361 = vmatprep.subr.bf16.mxu0 %v3674_v7  ;;  %3398 = vmatpush3.bf16.msra.mxu1 %v3675_v8 }
  0xd2   :  { %3399 = vmatprep.subr.bf16.mxu1 %v3678_v10 }
  0xd4   :  { %3362 = vmatpush3.bf16.msra.mxu0 %v3676_v9 }
  0xd5   :  { %3363 = vmatprep.subr.bf16.mxu0 %v3677_v11  ;;  %3400 = vmatpush3.bf16.msra.mxu1 %v3678_v10 }
  0xd6   :  { %3401 = vmatprep.subr.bf16.mxu1 %v3681_v13 }
  0xd8   :  { %3364 = vmatpush3.bf16.msra.mxu0 %v3679_v12 }
  0xd9   :  { %3365 = vmatprep.subr.bf16.mxu0 %v3680_v14  ;;  %3402 = vmatpush3.bf16.msra.mxu1 %v3681_v13 }
  0xda   :  { %3403 = vmatprep.subr.bf16.mxu1 %v3684_v17 }
  0xdc   :  { %3366 = vmatpush3.bf16.msra.mxu0 %v3682_v15 }
  0xdd   :  { %3367 = vmatprep.subr.bf16.mxu0 %v3683_v16  ;;  %3404 = vmatpush3.bf16.msra.mxu1 %v3684_v17 }
  0xde   :  { %3405 = vmatprep.subr.bf16.mxu1 %v3689_v21 }
  0xe0   :  { %3368 = vmatpush3.bf16.msra.mxu0 %v3685_v20 }
  0xe1   :  { %3406 = vmatpush3.bf16.msra.mxu1 %v3689_v21 }
  0xe3   :  { %2628 = vmatmul.mubr.bf16.vlgmr.msra.gmra.mrb[48].mxu0 %v3686_v23 }
  0xe4   :  { %2635 = vmatprep.mubr.bf16.mxu0 %v2786_v24  ;;  %3408 = vmatmul.mubr.bf16.vlgmr.msra.gmra.mrb[48].mxu1 %v3691_v25 }
  0xeb   :  { %2636 = vmatmul.mubr.bf16.gmra.mrb[52].mxu0 %v2785_v32 }
  0xf6   :  { %v3033_v26 = vpop.f32.mrb[0].mxu0 }
  0xf7   :  { %v3061_v27 = vpop.f32.mrb[0].mxu1  ;;  %v3034_v28 = vpop.f32.mrb[1].mxu0 }
  0xf8   :  { %v3035_v29 = vadd.f32 %v3034_v28, %v3033_v26  ;;  %v3062_v30 = vpop.f32.mrb[1].mxu1  ;;  %v3036_v31 = vpop.f32.mrb[2].mxu0 }
  0xf9   :  { %v3063_v33 = vadd.f32 %v3062_v30, %v3061_v27  ;;  %v3064_v34 = vpop.f32.mrb[2].mxu1  ;;  %v3037_v35 = vpop.f32.mrb[3].mxu0 }
  0xfa   :  { %v3038_v36 = vadd.f32 %v3037_v35, %v3036_v31  ;;  %v3065_v37 = vpop.f32.mrb[3].mxu1 }
  0xfb   :  { %v2102_v38 = vadd.f32 %v3063_v33, %v3035_v29  ;;  %v3066_v39 = vadd.f32 %v3065_v37, %v3064_v34 }
  0xfd   :  { %v2105_v40 = vadd.f32 %v3066_v39, %v3038_v36 }
  0xfe   :  { %v3039_v41 = vpop.f32.mrb[4].mxu0 }
  0xff   :  { %v3040_v42 = vpop.f32.mrb[5].mxu0  ;;  %v3067_v45 = vpop.f32.mrb[4].mxu1 }
 0x100   :  { %v3041_v43 = vadd.f32 %v3040_v42, %v3039_v41  ;;  %v3042_v44 = vpop.f32.mrb[6].mxu0  ;;  %v3068_v47 = vpop.f32.mrb[5].mxu1 }
 0x101   :  { %v3043_v46 = vpop.f32.mrb[7].mxu0  ;;  %v3069_v48 = vadd.f32 %v3068_v47, %v3067_v45  ;;  %v3070_v49 = vpop.f32.mrb[6].mxu1 }
 0x102   :  { %v3071_v50 = vpop.f32.mrb[7].mxu1 }
 0x103   :  { %v2110_v51 = vadd.f32 %v3069_v48, %v3041_v43 }
 0x116   :  { %v3089_v52 = vpop.f32.mrb[8].mxu0 }
 0x117   :  { %v3090_v53 = vpop.f32.mrb[9].mxu0  ;;  %v3117_v56 = vpop.f32.mrb[8].mxu1 }
 0x118   :  { %v3091_v54 = vadd.f32 %v3090_v53, %v3089_v52  ;;  %v3092_v55 = vpop.f32.mrb[10].mxu0  ;;  %v3118_v60 = vpop.f32.mrb[9].mxu1 }
 0x119   :  { %v3093_v57 = vpop.f32.mrb[11].mxu0  ;;  %v3119_v61 = vadd.f32 %v3118_v60, %v3117_v56  ;;  %v3120_v62 = vpop.f32.mrb[10].mxu1 }
 0x11a   :  { %v2150_v58 = vadd.f32 %v3091_v54, %v2102_v38  ;;  %v3094_v59 = vadd.f32 %v3093_v57, %v3092_v55  ;;  %v3121_v0 = vpop.f32.mrb[11].mxu1 }
 0x11b   :  { %v3122_v2 = vadd.f32 %v3121_v0, %v3120_v62 }
 0x11c   :  { %v2153_v63 = vadd.f32 %v3094_v59, %v2105_v40  ;;  %v2198_v1 = vadd.f32 %v3119_v61, %v2150_v58 }
 0x11e   :  { %v2201_v3 = vadd.f32 %v3122_v2, %v2153_v63  ;;  %v3095_v4 = vpop.f32.mrb[12].mxu0 }
 0x11f   :  { %v3096_v5 = vpop.f32.mrb[13].mxu0  ;;  %v3123_v7 = vpop.f32.mrb[12].mxu1 }
 0x120   :  { %v3097_v6 = vadd.f32 %v3096_v5, %v3095_v4  ;;  %v3098_v8 = vpop.f32.mrb[14].mxu0  ;;  %v3124_v9 = vpop.f32.mrb[13].mxu1 }
 0x121   :  { %v3099_v10 = vpop.f32.mrb[15].mxu0  ;;  %v3125_v12 = vadd.f32 %v3124_v9, %v3123_v7  ;;  %v3126_v13 = vpop.f32.mrb[14].mxu1 }
 0x122   :  { %v2158_v11 = vadd.f32 %v3097_v6, %v2110_v51  ;;  %v3127_v14 = vpop.f32.mrb[15].mxu1 }
 0x124   :  { %v2206_v15 = vadd.f32 %v3125_v12, %v2158_v11 }
 0x136   :  { %v3145_v16 = vpop.f32.mrb[16].mxu0 }
 0x137   :  { %v3146_v17 = vpop.f32.mrb[17].mxu0  ;;  %v3173_v22 = vpop.f32.mrb[16].mxu1 }
 0x138   :  { %v3147_v18 = vadd.f32 %v3146_v17, %v3145_v16  ;;  %v3148_v19 = vpop.f32.mrb[18].mxu0  ;;  %v3174_v24 = vpop.f32.mrb[17].mxu1 }
 0x139   :  { %v3149_v20 = vpop.f32.mrb[19].mxu0  ;;  %v3175_v26 = vadd.f32 %v3174_v24, %v3173_v22  ;;  %v3176_v27 = vpop.f32.mrb[18].mxu1 }
 0x13a   :  { %v2246_v21 = vadd.f32 %v3147_v18, %v2198_v1  ;;  %v3150_v23 = vadd.f32 %v3149_v20, %v3148_v19  ;;  %v3177_v28 = vpop.f32.mrb[19].mxu1 }
 0x13b   :  { %v3178_v30 = vadd.f32 %v3177_v28, %v3176_v27 }
 0x13c   :  { %v2249_v25 = vadd.f32 %v3150_v23, %v2201_v3  ;;  %v2294_v29 = vadd.f32 %v3175_v26, %v2246_v21 }
 0x13e   :  { %v2297_v31 = vadd.f32 %v3178_v30, %v2249_v25  ;;  %v3151_v32 = vpop.f32.mrb[20].mxu0 }
 0x13f   :  { %v3152_v33 = vpop.f32.mrb[21].mxu0  ;;  %v3179_v35 = vpop.f32.mrb[20].mxu1 }
 0x140   :  { %v3153_v34 = vadd.f32 %v3152_v33, %v3151_v32  ;;  %v3154_v36 = vpop.f32.mrb[22].mxu0  ;;  %v3180_v37 = vpop.f32.mrb[21].mxu1 }
 0x141   :  { %v3155_v38 = vpop.f32.mrb[23].mxu0  ;;  %v3181_v40 = vadd.f32 %v3180_v37, %v3179_v35  ;;  %v3182_v41 = vpop.f32.mrb[22].mxu1 }
 0x142   :  { %v2254_v39 = vadd.f32 %v3153_v34, %v2206_v15  ;;  %v3183_v42 = vpop.f32.mrb[23].mxu1 }
 0x144   :  { %v2302_v43 = vadd.f32 %v3181_v40, %v2254_v39 }
 0x156   :  { %v3201_v44 = vpop.f32.mrb[24].mxu0 }
 0x157   :  { %v3202_v45 = vpop.f32.mrb[25].mxu0  ;;  %v3229_v48 = vpop.f32.mrb[24].mxu1 }
 0x158   :  { %v3203_v46 = vadd.f32 %v3202_v45, %v3201_v44  ;;  %v3204_v47 = vpop.f32.mrb[26].mxu0  ;;  %v3230_v52 = vpop.f32.mrb[25].mxu1 }
 0x159   :  { %v3205_v49 = vpop.f32.mrb[27].mxu0  ;;  %v3231_v53 = vadd.f32 %v3230_v52, %v3229_v48  ;;  %v3232_v54 = vpop.f32.mrb[26].mxu1 }
 0x15a   :  { %v2342_v50 = vadd.f32 %v3203_v46, %v2294_v29  ;;  %v3206_v51 = vadd.f32 %v3205_v49, %v3204_v47  ;;  %v3233_v56 = vpop.f32.mrb[27].mxu1 }
 0x15b   :  { %v3234_v58 = vadd.f32 %v3233_v56, %v3232_v54 }
 0x15c   :  { %v2345_v55 = vadd.f32 %v3206_v51, %v2297_v31  ;;  %v2390_v57 = vadd.f32 %v3231_v53, %v2342_v50 }
 0x15e   :  { %v2393_v59 = vadd.f32 %v3234_v58, %v2345_v55  ;;  %v3207_v60 = vpop.f32.mrb[28].mxu0 }
 0x15f   :  { %v3208_v61 = vpop.f32.mrb[29].mxu0  ;;  %v3235_v0 = vpop.f32.mrb[28].mxu1 }
 0x160   :  { %v3209_v62 = vadd.f32 %v3208_v61, %v3207_v60  ;;  %v3210_v63 = vpop.f32.mrb[30].mxu0  ;;  %v3236_v3 = vpop.f32.mrb[29].mxu1 }
 0x161   :  { %v3211_v1 = vpop.f32.mrb[31].mxu0  ;;  %v3237_v4 = vadd.f32 %v3236_v3, %v3235_v0  ;;  %v3238_v5 = vpop.f32.mrb[30].mxu1 }
 0x162   :  { %v2350_v2 = vadd.f32 %v3209_v62, %v2302_v43  ;;  %v3239_v6 = vpop.f32.mrb[31].mxu1 }
 0x164   :  { %v2398_v7 = vadd.f32 %v3237_v4, %v2350_v2 }
 0x176   :  { %v3257_v8 = vpop.f32.mrb[32].mxu0 }
 0x177   :  { %v3258_v9 = vpop.f32.mrb[33].mxu0  ;;  %v3285_v12 = vpop.f32.mrb[32].mxu1 }
 0x178   :  { %v3259_v10 = vadd.f32 %v3258_v9, %v3257_v8  ;;  %v3260_v11 = vpop.f32.mrb[34].mxu0  ;;  %v3286_v16 = vpop.f32.mrb[33].mxu1  ;;  %v3004_v9 = vld [vmem:[%s4504_s2] ss:$0 sm:$0xff] }
 0x179   :  { %v3261_v13 = vpop.f32.mrb[35].mxu0  ;;  %v3287_v17 = vadd.f32 %v3286_v16, %v3285_v12  ;;  %v3288_v18 = vpop.f32.mrb[34].mxu1 }
 0x17a   :  { %v2438_v14 = vadd.f32 %v3259_v10, %v2390_v57  ;;  %v3262_v15 = vadd.f32 %v3261_v13, %v3260_v11  ;;  %v3289_v20 = vpop.f32.mrb[35].mxu1 }
 0x17b   :  { %v3290_v22 = vadd.f32 %v3289_v20, %v3288_v18 }
 0x17c   :  { %v2441_v19 = vadd.f32 %v3262_v15, %v2393_v59  ;;  %v2486_v21 = vadd.f32 %v3287_v17, %v2438_v14  ;;  %v3005_v14 = vld [vmem:[%s4505_s3] ss:$0 sm:$0xff] }
 0x17e   :  { %v2489_v23 = vadd.f32 %v3290_v22, %v2441_v19  ;;  %v3263_v24 = vpop.f32.mrb[36].mxu0 }
 0x17f   :  { %v3264_v25 = vpop.f32.mrb[37].mxu0  ;;  %v3291_v27 = vpop.f32.mrb[36].mxu1 }
 0x180   :  { %v3265_v26 = vadd.f32 %v3264_v25, %v3263_v24  ;;  %v3266_v28 = vpop.f32.mrb[38].mxu0  ;;  %v3292_v29 = vpop.f32.mrb[37].mxu1 }
 0x181   :  { %v3267_v30 = vpop.f32.mrb[39].mxu0  ;;  %v3293_v32 = vadd.f32 %v3292_v29, %v3291_v27  ;;  %v3294_v33 = vpop.f32.mrb[38].mxu1 }
 0x182   :  { %v2446_v31 = vadd.f32 %v3265_v26, %v2398_v7  ;;  %v3295_v34 = vpop.f32.mrb[39].mxu1 }
 0x184   :  { %v2494_v35 = vadd.f32 %v3293_v32, %v2446_v31 }
 0x196   :  { %v3313_v36 = vpop.f32.mrb[40].mxu0 }
 0x197   :  { %v3314_v37 = vpop.f32.mrb[41].mxu0  ;;  %v3341_v42 = vpop.f32.mrb[40].mxu1 }
 0x198   :  { %v3315_v38 = vadd.f32 %v3314_v37, %v3313_v36  ;;  %v3316_v39 = vpop.f32.mrb[42].mxu0  ;;  %v3342_v44 = vpop.f32.mrb[41].mxu1 }
 0x199   :  { %v3317_v40 = vpop.f32.mrb[43].mxu0  ;;  %v3343_v46 = vadd.f32 %v3342_v44, %v3341_v42  ;;  %v3344_v47 = vpop.f32.mrb[42].mxu1 }
 0x19a   :  { %v2534_v41 = vadd.f32 %v3315_v38, %v2486_v21  ;;  %v3318_v43 = vadd.f32 %v3317_v40, %v3316_v39  ;;  %v3345_v48 = vpop.f32.mrb[43].mxu1 }
 0x19b   :  { %v3346_v50 = vadd.f32 %v3345_v48, %v3344_v47 }
 0x19c   :  { %v2537_v45 = vadd.f32 %v3318_v43, %v2489_v23  ;;  %v2582_v49 = vadd.f32 %v3343_v46, %v2534_v41 }
 0x19e   :  { %v3319_v51 = vpop.f32.mrb[44].mxu0  ;;  %v2585_v52 = vadd.f32 %v3346_v50, %v2537_v45 }
 0x19f   :  { %v3320_v53 = vpop.f32.mrb[45].mxu0  ;;  %v3347_v56 = vpop.f32.mrb[44].mxu1 }
 0x1a0   :  { %v3321_v54 = vadd.f32 %v3320_v53, %v3319_v51  ;;  %v3322_v55 = vpop.f32.mrb[46].mxu0  ;;  %v3348_v59 = vpop.f32.mrb[45].mxu1 }
 0x1a1   :  { %v3323_v57 = vpop.f32.mrb[47].mxu0  ;;  %v3349_v60 = vadd.f32 %v3348_v59, %v3347_v56  ;;  %v3350_v61 = vpop.f32.mrb[46].mxu1 }
 0x1a2   :  { %v2542_v58 = vadd.f32 %v3321_v54, %v2494_v35  ;;  %v3351_v62 = vpop.f32.mrb[47].mxu1 }
 0x1a4   :  { %v2590_v63 = vadd.f32 %v3349_v60, %v2542_v58 }
 0x1b6   :  { %v3369_v0 = vpop.f32.mrb[48].mxu0 }
 0x1b7   :  { %v3370_v1 = vpop.f32.mrb[49].mxu0  ;;  %v3409_v5 = vpop.f32.mrb[48].mxu1 }
 0x1b8   :  { %v3371_v2 = vadd.f32 %v3370_v1, %v3369_v0  ;;  %v3372_v3 = vpop.f32.mrb[50].mxu0  ;;  %v2677_v8 = vpop.f32.mrb[49].mxu1 }
 0x1b9   :  { %v3373_v4 = vpop.f32.mrb[51].mxu0  ;;  %v3410_v10 = vpop.f32.mrb[50].mxu1 }
 0x1ba   :  { %v3374_v6 = vadd.f32 %v3373_v4, %v3372_v3  ;;  %v2630_v7 = vadd.f32 %v3371_v2, %v2582_v49  ;;  %v2680_v13 = vpop.f32.mrb[51].mxu1 }
 0x1bc   :  { %v2678_v11 = vadd.f32 %v2677_v8, %v2630_v7  ;;  %v2633_v12 = vadd.f32 %v3374_v6, %v2585_v52 }
 0x1be   :  { %v2698_v15 = vmul.f32 %v3004_v9, %v2678_v11  ;;  %v2681_v16 = vadd.f32 %v2680_v13, %v2633_v12  ;;  %v3375_v17 = vpop.f32.mrb[52].mxu0 }
 0x1bf   :  { %v3376_v18 = vpop.f32.mrb[53].mxu0 }
 0x1c0   :  { %v2708_v19 = vadd.f32 %v3005_v14, %v2698_v15  ;;  %v2699_v20 = vmul.f32 %v3004_v9, %v2681_v16  ;;  %v3377_v21 = vadd.f32 %v3376_v18, %v3375_v17  ;;  %v3378_v22 = vpop.f32.mrb[54].mxu0 }
 0x1c1   :  { %v3379_v23 = vpop.f32.mrb[55].mxu0 }
 0x1c2   :  { %v2709_v24 = vadd.f32 %v3005_v14, %v2699_v20  ;;  %v2638_v25 = vadd.f32 %v3377_v21, %v2590_v63  ;;  %v2711_v26 = vmax.f32 %v2708_v19, 0.0 }
 0x1c4   :  { %v2712_v27 = vmax.f32 %v2709_v24, 0.0  ;;  %v2686_v28 = vadd.f32 %v3409_v5, %v2638_v25 }
 0x1c6   :  { %v3015_v29 = vpack.c.bf16 %v2712_v27, %v2711_v26  ;;  %v2700_v30 = vmul.f32 %v3004_v9, %v2686_v28 }
 0x1c8   :  { %3016 = vst [vmem:[%s4506_s4] sm:$0xff] %v3015_v29   ;;  %v2710_v31 = vadd.f32 %v3005_v14, %v2700_v30 }
 0x1ca   :  { %v2713_v32 = vmax.f32 %v2710_v31, 0.0 }
 0x1cc   :  { %v3011_v33 = vpack.c.bf16 %v2713_v32, %v2713_v32 }
 0x1ce   :  { %2729 = vst [vmem:[%s4506_s4 + $0x8] sm:$0x1] %v3011_v33 }

// kernel: alexnet_map_forward.15
= control target key start
LH: loop header
LB: loop body
LE: loop exit
PB: predicated region body
PF: predicated region fallthrough
CT: control target
= control target key end

     0   :  { %s1604_s1 = inlined_call_operand.vmem [shape: bf16[1152,128], index: 1, kind: input, shape index: {}]   ;;  %s1605_s0 = inlined_call_operand.vmem [shape: bf16[18,1152], index: 0, kind: input, shape index: {}]   ;;  %s1606_s2 = inlined_call_operand.vmem [shape: f32[1,128], index: 2, kind: input, shape index: {}]   ;;  %s1607_s3 = inlined_call_operand.vmem [shape: f32[1,128], index: 3, kind: input, shape index: {}]   ;;  %s1608_s4 = inlined_call_operand.vmem [shape: bf16[18,128], index: 4, kind: output, shape index: {}]  }
   0x1   :  { %v1215_v0 = vld [vmem:[%s1604_s1 + $0x40] sm:$0xff]   ;;  %v1219_v4 = vld [vmem:[%s1604_s1 + $0x48] sm:$0xff]   ;;  %v1223_v8 = vld [vmem:[%s1604_s1 + $0x50] sm:$0xff]  }
   0x2   :  { %v1216_v1 = vld [vmem:[%s1604_s1 + $0xc0] sm:$0xff]   ;;  %1073 = vmatprep.subr.bf16.mxu0 %v1215_v0  ;;  %v1220_v5 = vld [vmem:[%s1604_s1 + $0xc8] sm:$0xff]   ;;  %v1224_v9 = vld [vmem:[%s1604_s1 + $0xd0] sm:$0xff]  }
   0x3   :  { %v1217_v2 = vld [vmem:[%s1604_s1] sm:$0xff]   ;;  %1101 = vmatprep.subr.bf16.mxu1 %v1216_v1  ;;  %v1221_v6 = vld [vmem:[%s1604_s1 + $0x8] sm:$0xff]   ;;  %v1225_v10 = vld [vmem:[%s1604_s1 + $0x10] sm:$0xff]  }
   0x4   :  { %v1218_v3 = vld [vmem:[%s1604_s1 + $0x80] sm:$0xff]   ;;  %1074 = vmatpush3.bf16.msra.mxu0 %v1217_v2  ;;  %v1222_v7 = vld [vmem:[%s1604_s1 + $0x88] sm:$0xff]   ;;  %v1226_v11 = vld [vmem:[%s1604_s1 + $0x90] sm:$0xff]  }
   0x5   :  { %1102 = vmatpush3.bf16.msra.mxu1 %v1218_v3  ;;  %1075 = vmatprep.subr.bf16.mxu0 %v1219_v4  ;;  %v1227_v12 = vld [vmem:[%s1604_s1 + $0x58] sm:$0xff]   ;;  %v1231_v16 = vld [vmem:[%s1604_s1 + $0x60] sm:$0xff]   ;;  %v1235_v20 = vld [vmem:[%s1604_s1 + $0x68] sm:$0xff]  }
   0x6   :  { %1103 = vmatprep.subr.bf16.mxu1 %v1220_v5  ;;  %v1228_v13 = vld [vmem:[%s1604_s1 + $0xd8] sm:$0xff]   ;;  %v1232_v17 = vld [vmem:[%s1604_s1 + $0xe0] sm:$0xff]   ;;  %v1236_v21 = vld [vmem:[%s1604_s1 + $0xe8] sm:$0xff]  }
   0x7   :  { %v1229_v14 = vld [vmem:[%s1604_s1 + $0x18] sm:$0xff]   ;;  %v1233_v18 = vld [vmem:[%s1604_s1 + $0x20] sm:$0xff]   ;;  %v1237_v22 = vld [vmem:[%s1604_s1 + $0x28] sm:$0xff]  }
   0x8   :  { %1076 = vmatpush3.bf16.msra.mxu0 %v1221_v6  ;;  %v1230_v15 = vld [vmem:[%s1604_s1 + $0x98] sm:$0xff]   ;;  %v1234_v19 = vld [vmem:[%s1604_s1 + $0xa0] sm:$0xff]   ;;  %v1238_v23 = vld [vmem:[%s1604_s1 + $0xa8] sm:$0xff]  }
   0x9   :  { %1104 = vmatpush3.bf16.msra.mxu1 %v1222_v7  ;;  %1077 = vmatprep.subr.bf16.mxu0 %v1223_v8  ;;  %v1239_v24 = vld [vmem:[%s1604_s1 + $0x70] sm:$0xff]   ;;  %v1243_v28 = vld [vmem:[%s1604_s1 + $0x78] sm:$0xff]   ;;  %v1247_v32 = vld [vmem:[%s1605_s0] ss:$36 sps:$4 sm:$0xff]  }
   0xa   :  { %1105 = vmatprep.subr.bf16.mxu1 %v1224_v9  ;;  %v1240_v25 = vld [vmem:[%s1604_s1 + $0xf0] sm:$0xff]   ;;  %v1244_v29 = vld [vmem:[%s1604_s1 + $0xf8] sm:$0xff]   ;;  %v1249_v33 = vld [vmem:[%s1605_s0 + $0x4] ss:$36 sps:$4 sm:$0xff]  }
   0xb   :  { %v1241_v26 = vld [vmem:[%s1604_s1 + $0x30] sm:$0xff]   ;;  %v1245_v30 = vld [vmem:[%s1604_s1 + $0x38] sm:$0xff]   ;;  %v1250_v34 = vld [vmem:[%s1605_s0 + $0x8] ss:$36 sps:$4 sm:$0xff]   ;;  %719 = vmatprep.mubr.bf16.mxu0 %v1249_v33 }
   0xc   :  { %1078 = vmatpush3.bf16.msra.mxu0 %v1225_v10  ;;  %v1242_v27 = vld [vmem:[%s1604_s1 + $0xb0] sm:$0xff]   ;;  %v1246_v31 = vld [vmem:[%s1604_s1 + $0xb8] sm:$0xff]   ;;  %v1253_v36 = vld [vmem:[%s1604_s1 + $0x140] sm:$0xff]  }
   0xd   :  { %1106 = vmatpush3.bf16.msra.mxu1 %v1226_v11  ;;  %1079 = vmatprep.subr.bf16.mxu0 %v1227_v12  ;;  %v1252_v35 = vld [vmem:[%s1605_s0 + $0xc] ss:$36 sps:$4 sm:$0xff]   ;;  %v1254_v37 = vld [vmem:[%s1604_s1 + $0x100] sm:$0xff]   ;;  %v1265_v48 = vld [vmem:[%s1604_s1 + $0x158] sm:$0xff]  }
   0xe   :  { %1107 = vmatprep.subr.bf16.mxu1 %v1228_v13  ;;  %767 = vmatprep.mubr.bf16.mxu1 %v1252_v35  ;;  %v1255_v38 = vld [vmem:[%s1604_s1 + $0x1c0] sm:$0xff]   ;;  %v1257_v40 = vld [vmem:[%s1604_s1 + $0x148] sm:$0xff]   ;;  %v1261_v44 = vld [vmem:[%s1604_s1 + $0x150] sm:$0xff]  }
   0xf   :  { %v1256_v39 = vld [vmem:[%s1604_s1 + $0x180] sm:$0xff]   ;;  %v1258_v41 = vld [vmem:[%s1604_s1 + $0x108] sm:$0xff]   ;;  %v1262_v45 = vld [vmem:[%s1604_s1 + $0x110] sm:$0xff]  }
  0x10   :  { %1080 = vmatpush3.bf16.msra.mxu0 %v1229_v14  ;;  %v1259_v42 = vld [vmem:[%s1604_s1 + $0x1c8] sm:$0xff]   ;;  %v1263_v46 = vld [vmem:[%s1604_s1 + $0x1d0] sm:$0xff]   ;;  %v1266_v49 = vld [vmem:[%s1604_s1 + $0x118] sm:$0xff]  }
  0x11   :  { %1108 = vmatpush3.bf16.msra.mxu1 %v1230_v15  ;;  %1081 = vmatprep.subr.bf16.mxu0 %v1231_v16  ;;  %v1260_v43 = vld [vmem:[%s1604_s1 + $0x188] sm:$0xff]   ;;  %v1264_v47 = vld [vmem:[%s1604_s1 + $0x190] sm:$0xff]   ;;  %v1267_v50 = vld [vmem:[%s1604_s1 + $0x1d8] sm:$0xff]  }
  0x12   :  { %1109 = vmatprep.subr.bf16.mxu1 %v1232_v17  ;;  %v1268_v51 = vld [vmem:[%s1604_s1 + $0x198] sm:$0xff]   ;;  %v1269_v52 = vld [vmem:[%s1604_s1 + $0x160] sm:$0xff]   ;;  %v1273_v56 = vld [vmem:[%s1604_s1 + $0x168] sm:$0xff]  }
  0x13   :  { %v1270_v53 = vld [vmem:[%s1604_s1 + $0x120] sm:$0xff]   ;;  %v28_v57 = vld [vmem:[%s1605_s0 + $0x48] sm:$0x11]  ;;  %v29_v62 = vld [vmem:[%s1605_s0 + $0x50] sm:$0x11] }
  0x14   :  { %1082 = vmatpush3.bf16.msra.mxu0 %v1233_v18  ;;  %v1271_v54 = vld [vmem:[%s1604_s1 + $0x1e0] sm:$0xff]   ;;  %v980_v58 = vcombine.high %v28_v57, %v28_v57  ;;  %v1275_v59 = vld [vmem:[%s1604_s1 + $0x128] sm:$0xff]   ;;  %v979_v60 = vcombine.low %v28_v57, %v28_v57  ;;  %v982_v63 = vcombine.high %v29_v62, %v29_v62  ;;  %v981_v1 = vcombine.low %v29_v62, %v29_v62  ;;  %v1281_v2 = vld [vmem:[%s1604_s1 + $0x170] sm:$0xff]  }
  0x15   :  { %1110 = vmatpush3.bf16.msra.mxu1 %v1234_v19  ;;  %1083 = vmatprep.subr.bf16.mxu0 %v1235_v20  ;;  %v1272_v55 = vld [vmem:[%s1604_s1 + $0x1a0] sm:$0xff]   ;;  %v1277_v61 = vld [vmem:[%s1604_s1 + $0x1e8] sm:$0xff]   ;;  %v1282_v3 = vld [vmem:[%s1604_s1 + $0x130] sm:$0xff]  }
  0x16   :  { %1111 = vmatprep.subr.bf16.mxu1 %v1236_v21  ;;  %v1279_v0 = vld [vmem:[%s1604_s1 + $0x1a8] sm:$0xff]   ;;  %v1283_v4 = vld [vmem:[%s1604_s1 + $0x1f0] sm:$0xff]   ;;  %v1285_v6 = vld [vmem:[%s1604_s1 + $0x178] sm:$0xff]  }
  0x17   :  { %v1284_v5 = vld [vmem:[%s1604_s1 + $0x1b0] sm:$0xff]   ;;  %v1286_v7 = vld [vmem:[%s1604_s1 + $0x138] sm:$0xff]   ;;  %v1292_v12 = vld [vmem:[%s1604_s1 + $0x200] sm:$0xff]  }
  0x18   :  { %1084 = vmatpush3.bf16.msra.mxu0 %v1237_v22  ;;  %v1287_v8 = vld [vmem:[%s1604_s1 + $0x1f8] sm:$0xff]   ;;  %v1288_v9 = vld [vmem:[%s1605_s0 + $0x10] ss:$36 sps:$4 sm:$0xff]   ;;  %v1296_v15 = vld [vmem:[%s1604_s1 + $0x208] sm:$0xff]  }
  0x19   :  { %1112 = vmatpush3.bf16.msra.mxu1 %v1238_v23  ;;  %1085 = vmatprep.subr.bf16.mxu0 %v1239_v24  ;;  %v1290_v10 = vld [vmem:[%s1605_s0 + $0x14] ss:$36 sps:$4 sm:$0xff]   ;;  %v1295_v14 = vld [vmem:[%s1605_s0 + $0x1c] ss:$36 sps:$4 sm:$0xff]  }
  0x1a   :  { %1113 = vmatprep.subr.bf16.mxu1 %v1240_v25  ;;  %v1291_v11 = vld [vmem:[%s1604_s1 + $0x1b8] sm:$0xff]   ;;  %v1299_v18 = vld [vmem:[%s1604_s1 + $0x210] sm:$0xff]   ;;  %v31_v19 = vld [vmem:[%s1605_s0 + $0x60] sm:$0x11] }
  0x1b   :  { %v1293_v13 = vld [vmem:[%s1605_s0 + $0x18] ss:$36 sps:$4 sm:$0xff]   ;;  %v986_v21 = vcombine.high %v31_v19, %v31_v19  ;;  %v985_v22 = vcombine.low %v31_v19, %v31_v19  ;;  %v1307_v24 = vld [vmem:[%s1605_s0 + $0x20] ss:$36 sps:$4 sm:$0xff]  }
  0x1c   :  { %1086 = vmatpush3.bf16.msra.mxu0 %v1241_v26  ;;  %v30_v16 = vld [vmem:[%s1605_s0 + $0x58] sm:$0x11]  ;;  %v1303_v25 = vld [vmem:[%s1604_s1 + $0x220] sm:$0xff]   ;;  %v1304_v26 = vld [vmem:[%s1604_s1 + $0x228] sm:$0xff]  }
  0x1d   :  { %1114 = vmatpush3.bf16.msra.mxu1 %v1242_v27  ;;  %1087 = vmatprep.subr.bf16.mxu0 %v1243_v28  ;;  %v984_v17 = vcombine.high %v30_v16, %v30_v16  ;;  %v983_v20 = vcombine.low %v30_v16, %v30_v16  ;;  %v1302_v23 = vld [vmem:[%s1604_s1 + $0x218] sm:$0xff]   ;;  %v1305_v27 = vld [vmem:[%s1604_s1 + $0x230] sm:$0xff]  }
  0x1e   :  { %1115 = vmatprep.subr.bf16.mxu1 %v1244_v29  ;;  %v1306_v28 = vld [vmem:[%s1604_s1 + $0x238] sm:$0xff]   ;;  %v1308_v29 = vld [vmem:[%s1605_s0 + $0x68] ss:$0 sps:$4 sm:$0x11]  }
  0x20   :  { %1088 = vmatpush3.bf16.msra.mxu0 %v1245_v30 }
  0x21   :  { %1116 = vmatpush3.bf16.msra.mxu1 %v1246_v31  ;;  %1129 = vmatprep.subr.bf16.mxu0 %v1253_v36 }
  0x22   :  { %1157 = vmatprep.subr.bf16.mxu1 %v1255_v38 }
  0x23   :  { %720 = vmatmul.mubr.bf16.vlgmr.msra.gmra.mrb[0].mxu0 %v1247_v32 }
  0x24   :  { %768 = vmatmul.mubr.bf16.vlgmr.msra.gmra.mrb[0].mxu1 %v1250_v34  ;;  %1130 = vmatpush3.bf16.msra.mxu0 %v1254_v37 }
  0x25   :  { %1158 = vmatpush3.bf16.msra.mxu1 %v1256_v39  ;;  %1131 = vmatprep.subr.bf16.mxu0 %v1257_v40 }
  0x26   :  { %1159 = vmatprep.subr.bf16.mxu1 %v1259_v42  ;;  %727 = vmatprep.mubr.bf16.mxu0 %v980_v58 }
  0x27   :  { %775 = vmatprep.mubr.bf16.mxu1 %v982_v63 }
  0x28   :  { %1132 = vmatpush3.bf16.msra.mxu0 %v1258_v41 }
  0x29   :  { %1160 = vmatpush3.bf16.msra.mxu1 %v1260_v43  ;;  %1133 = vmatprep.subr.bf16.mxu0 %v1261_v44 }
  0x2a   :  { %1161 = vmatprep.subr.bf16.mxu1 %v1263_v46 }
  0x2b   :  { %728 = vmatmul.mubr.bf16.gmra.mrb[4].mxu0 %v979_v60 }
  0x2c   :  { %1134 = vmatpush3.bf16.msra.mxu0 %v1262_v45  ;;  %776 = vmatmul.mubr.bf16.gmra.mrb[4].mxu1 %v981_v1 }
  0x2d   :  { %1162 = vmatpush3.bf16.msra.mxu1 %v1264_v47  ;;  %1135 = vmatprep.subr.bf16.mxu0 %v1265_v48 }
  0x2e   :  { %1163 = vmatprep.subr.bf16.mxu1 %v1267_v50  ;;  %815 = vmatprep.mubr.bf16.mxu0 %v1290_v10 }
  0x2f   :  { %863 = vmatprep.mubr.bf16.mxu1 %v1295_v14 }
  0x30   :  { %1136 = vmatpush3.bf16.msra.mxu0 %v1266_v49 }
  0x31   :  { %1164 = vmatpush3.bf16.msra.mxu1 %v1268_v51  ;;  %1137 = vmatprep.subr.bf16.mxu0 %v1269_v52 }
  0x32   :  { %1165 = vmatprep.subr.bf16.mxu1 %v1271_v54 }
  0x34   :  { %1138 = vmatpush3.bf16.msra.mxu0 %v1270_v53 }
  0x35   :  { %1166 = vmatpush3.bf16.msra.mxu1 %v1272_v55  ;;  %1139 = vmatprep.subr.bf16.mxu0 %v1273_v56 }
  0x36   :  { %1167 = vmatprep.subr.bf16.mxu1 %v1277_v61 }
  0x38   :  { %1140 = vmatpush3.bf16.msra.mxu0 %v1275_v59 }
  0x39   :  { %1168 = vmatpush3.bf16.msra.mxu1 %v1279_v0  ;;  %1141 = vmatprep.subr.bf16.mxu0 %v1281_v2 }
  0x3a   :  { %1169 = vmatprep.subr.bf16.mxu1 %v1283_v4 }
  0x3c   :  { %1142 = vmatpush3.bf16.msra.mxu0 %v1282_v3 }
  0x3d   :  { %1170 = vmatpush3.bf16.msra.mxu1 %v1284_v5  ;;  %1143 = vmatprep.subr.bf16.mxu0 %v1285_v6 }
  0x3e   :  { %1171 = vmatprep.subr.bf16.mxu1 %v1287_v8 }
  0x40   :  { %1144 = vmatpush3.bf16.msra.mxu0 %v1286_v7 }
  0x41   :  { %1172 = vmatpush3.bf16.msra.mxu1 %v1291_v11  ;;  %1195 = vmatprep.subr.bf16.mxu0 %v1292_v12 }
  0x43   :  { %816 = vmatmul.mubr.bf16.vlgmr.msra.gmra.mrb[8].mxu0 %v1288_v9 }
  0x44   :  { %1196 = vmatpush3.bf16.msra.mxu0 %v1292_v12  ;;  %864 = vmatmul.mubr.bf16.vlgmr.msra.gmra.mrb[8].mxu1 %v1293_v13 }
  0x45   :  { %1197 = vmatprep.subr.bf16.mxu0 %v1296_v15  ;;  %823 = vmatprep.mubr.bf16.mxu0 %v984_v17 }
  0x46   :  { %871 = vmatprep.mubr.bf16.mxu1 %v986_v21 }
  0x48   :  { %1198 = vmatpush3.bf16.msra.mxu0 %v1296_v15 }
  0x49   :  { %1199 = vmatprep.subr.bf16.mxu0 %v1299_v18 }
  0x4b   :  { %824 = vmatmul.mubr.bf16.gmra.mrb[12].mxu0 %v983_v20  ;;  %v1060_v20 = vld [vmem:[%s1606_s2] ss:$0 sm:$0xff] }
  0x4c   :  { %1200 = vmatpush3.bf16.msra.mxu0 %v1299_v18  ;;  %872 = vmatmul.mubr.bf16.gmra.mrb[12].mxu1 %v985_v22 }
  0x4d   :  { %1201 = vmatprep.subr.bf16.mxu0 %v1302_v23  ;;  %1211 = vmatprep.mubr.bf16.mxu0 %v1307_v24 }
  0x50   :  { %1202 = vmatpush3.bf16.msra.mxu0 %v1302_v23  ;;  %v1061_v23 = vld [vmem:[%s1607_s3] ss:$0 sm:$0xff] }
  0x51   :  { %1203 = vmatprep.subr.bf16.mxu0 %v1303_v25 }
  0x54   :  { %1204 = vmatpush3.bf16.msra.mxu0 %v1303_v25 }
  0x55   :  { %1205 = vmatprep.subr.bf16.mxu0 %v1304_v26 }
  0x58   :  { %1206 = vmatpush3.bf16.msra.mxu0 %v1304_v26 }
  0x59   :  { %1207 = vmatprep.subr.bf16.mxu0 %v1305_v27 }
  0x5c   :  { %1208 = vmatpush3.bf16.msra.mxu0 %v1305_v27 }
  0x5d   :  { %1209 = vmatprep.subr.bf16.mxu0 %v1306_v28 }
  0x60   :  { %1210 = vmatpush3.bf16.msra.mxu0 %v1306_v28 }
  0x63   :  { %1212 = vmatmul.mubr.bf16.vlgmr.msra.gmra.mrb[16].mxu0 %v1308_v29 }
  0xf6   :  { %v1089_v30 = vpop.f32.mrb[0].mxu0 }
  0xf7   :  { %v1117_v31 = vpop.f32.mrb[0].mxu1  ;;  %v1090_v32 = vpop.f32.mrb[1].mxu0 }
  0xf8   :  { %v1091_v33 = vadd.f32 %v1090_v32, %v1089_v30  ;;  %v1118_v34 = vpop.f32.mrb[1].mxu1  ;;  %v1092_v35 = vpop.f32.mrb[2].mxu0 }
  0xf9   :  { %v1119_v36 = vadd.f32 %v1118_v34, %v1117_v31  ;;  %v1120_v37 = vpop.f32.mrb[2].mxu1  ;;  %v1093_v38 = vpop.f32.mrb[3].mxu0 }
  0xfa   :  { %v1094_v39 = vadd.f32 %v1093_v38, %v1092_v35  ;;  %v1121_v40 = vpop.f32.mrb[3].mxu1 }
  0xfb   :  { %v770_v41 = vadd.f32 %v1119_v36, %v1091_v33  ;;  %v1122_v42 = vadd.f32 %v1121_v40, %v1120_v37 }
  0xfd   :  { %v773_v43 = vadd.f32 %v1122_v42, %v1094_v39 }
  0xfe   :  { %v1095_v44 = vpop.f32.mrb[4].mxu0 }
  0xff   :  { %v1096_v45 = vpop.f32.mrb[5].mxu0  ;;  %v1123_v48 = vpop.f32.mrb[4].mxu1 }
 0x100   :  { %v1097_v46 = vadd.f32 %v1096_v45, %v1095_v44  ;;  %v1098_v47 = vpop.f32.mrb[6].mxu0  ;;  %v1124_v50 = vpop.f32.mrb[5].mxu1 }
 0x101   :  { %v1099_v49 = vpop.f32.mrb[7].mxu0  ;;  %v1125_v51 = vadd.f32 %v1124_v50, %v1123_v48  ;;  %v1126_v52 = vpop.f32.mrb[6].mxu1 }
 0x102   :  { %v1127_v53 = vpop.f32.mrb[7].mxu1 }
 0x103   :  { %v778_v54 = vadd.f32 %v1125_v51, %v1097_v46 }
 0x116   :  { %v1145_v55 = vpop.f32.mrb[8].mxu0 }
 0x117   :  { %v1146_v56 = vpop.f32.mrb[9].mxu0  ;;  %v1173_v59 = vpop.f32.mrb[8].mxu1 }
 0x118   :  { %v1147_v57 = vadd.f32 %v1146_v56, %v1145_v55  ;;  %v1148_v58 = vpop.f32.mrb[10].mxu0  ;;  %v1174_v63 = vpop.f32.mrb[9].mxu1 }
 0x119   :  { %v1149_v60 = vpop.f32.mrb[11].mxu0  ;;  %v1175_v0 = vadd.f32 %v1174_v63, %v1173_v59  ;;  %v1176_v1 = vpop.f32.mrb[10].mxu1 }
 0x11a   :  { %v818_v61 = vadd.f32 %v1147_v57, %v770_v41  ;;  %v1150_v62 = vadd.f32 %v1149_v60, %v1148_v58  ;;  %v1177_v3 = vpop.f32.mrb[11].mxu1 }
 0x11b   :  { %v1178_v4 = vadd.f32 %v1177_v3, %v1176_v1 }
 0x11c   :  { %v821_v2 = vadd.f32 %v1150_v62, %v773_v43  ;;  %v866_v5 = vadd.f32 %v1175_v0, %v818_v61 }
 0x11e   :  { %v1151_v6 = vpop.f32.mrb[12].mxu0  ;;  %v869_v8 = vadd.f32 %v1178_v4, %v821_v2 }
 0x11f   :  { %v1152_v7 = vpop.f32.mrb[13].mxu0  ;;  %v1179_v11 = vpop.f32.mrb[12].mxu1 }
 0x120   :  { %v1153_v9 = vadd.f32 %v1152_v7, %v1151_v6  ;;  %v1154_v10 = vpop.f32.mrb[14].mxu0  ;;  %v1180_v14 = vpop.f32.mrb[13].mxu1 }
 0x121   :  { %v1155_v12 = vpop.f32.mrb[15].mxu0  ;;  %v1181_v15 = vadd.f32 %v1180_v14, %v1179_v11  ;;  %v1182_v16 = vpop.f32.mrb[14].mxu1 }
 0x122   :  { %v826_v13 = vadd.f32 %v1153_v9, %v778_v54  ;;  %v1183_v17 = vpop.f32.mrb[15].mxu1 }
 0x124   :  { %v874_v18 = vadd.f32 %v1181_v15, %v826_v13 }
 0x136   :  { %v1213_v19 = vpop.f32.mrb[16].mxu0 }
 0x137   :  { %v922_v21 = vadd.f32 %v1213_v19, %v874_v18  ;;  %v913_v22 = vpop.f32.mrb[17].mxu0 }
 0x138   :  { %v914_v24 = vadd.f32 %v913_v22, %v866_v5  ;;  %v1214_v25 = vpop.f32.mrb[18].mxu0 }
 0x139   :  { %v936_v26 = vmul.f32 %v1060_v20, %v922_v21  ;;  %v916_v27 = vpop.f32.mrb[19].mxu0 }
 0x13a   :  { %v934_v28 = vmul.f32 %v1060_v20, %v914_v24  ;;  %v917_v29 = vadd.f32 %v916_v27, %v869_v8 }
 0x13b   :  { %v946_v30 = vadd.f32 %v1061_v23, %v936_v26 }
 0x13c   :  { %v944_v31 = vadd.f32 %v1061_v23, %v934_v28  ;;  %v935_v32 = vmul.f32 %v1060_v20, %v917_v29 }
 0x13d   :  { %v949_v33 = vmax.f32 %v946_v30, 0.0 }
 0x13e   :  { %v945_v34 = vadd.f32 %v1061_v23, %v935_v32  ;;  %v947_v36 = vmax.f32 %v944_v31, 0.0 }
 0x13f   :  { %v1067_v35 = vpack.c.bf16 %v949_v33, %v949_v33 }
 0x140   :  { %v948_v37 = vmax.f32 %v945_v34, 0.0 }
 0x141   :  { %965 = vst [vmem:[%s1608_s4 + $0x8] sm:$0x1] %v1067_v35 }
 0x142   :  { %v1071_v38 = vpack.c.bf16 %v948_v37, %v947_v36 }
 0x144   :  { %1072 = vst [vmem:[%s1608_s4] sm:$0xff] %v1071_v38  }

// kernel: alexnet_map_forward.16
= control target key start
LH: loop header
LB: loop body
LE: loop exit
PB: predicated region body
PF: predicated region fallthrough
CT: control target
= control target key end

     0   :  { %s1090_s1 = inlined_call_operand.vmem [shape: bf16[512,256], index: 1, kind: input, shape index: {}]   ;;  %s1091_s0 = inlined_call_operand.vmem [shape: bf16[32,512], index: 0, kind: input, shape index: {}]   ;;  %s1092_s2 = inlined_call_operand.vmem [shape: f32[1,256], index: 2, kind: input, shape index: {}]   ;;  %s1093_s3 = inlined_call_operand.vmem [shape: f32[1,256], index: 3, kind: input, shape index: {}]   ;;  %s1094_s4 = inlined_call_operand.vmem [shape: bf16[32,256], index: 4, kind: output, shape index: {}]  }
   0x1   :  { %v723_v0 = vld [vmem:[%s1090_s1 + $0x4] ss:$8 sps:$4 sm:$0xff]   ;;  %v727_v2 = vld [vmem:[%s1090_s1] ss:$8 sps:$4 sm:$0xff]   ;;  %v729_v4 = vld [vmem:[%s1090_s1 + $0x14] ss:$8 sps:$4 sm:$0xff]  }
   0x2   :  { %v725_v1 = vld [vmem:[%s1090_s1 + $0x104] ss:$8 sps:$4 sm:$0xff]   ;;  %449 = vmatprep.subr.bf16.mxu1 %v723_v0  ;;  %v728_v3 = vld [vmem:[%s1090_s1 + $0x100] ss:$8 sps:$4 sm:$0xff]   ;;  %v731_v5 = vld [vmem:[%s1090_s1 + $0x114] ss:$8 sps:$4 sm:$0xff]  }
   0x3   :  { %502 = vmatprep.subr.bf16.mxu0 %v725_v1  ;;  %450 = vmatpush1.bf16.msra.mxu1 %v727_v2  ;;  %v733_v6 = vld [vmem:[%s1090_s1 + $0x10] ss:$8 sps:$4 sm:$0xff]   ;;  %v735_v8 = vld [vmem:[%s1090_s1 + $0x24] ss:$8 sps:$4 sm:$0xff]   ;;  %v739_v10 = vld [vmem:[%s1090_s1 + $0x20] ss:$8 sps:$4 sm:$0xff]  }
   0x4   :  { %503 = vmatpush1.bf16.msra.mxu0 %v728_v3  ;;  %451 = vmatprep.subr.bf16.mxu1 %v729_v4  ;;  %v734_v7 = vld [vmem:[%s1090_s1 + $0x110] ss:$8 sps:$4 sm:$0xff]   ;;  %v737_v9 = vld [vmem:[%s1090_s1 + $0x124] ss:$8 sps:$4 sm:$0xff]   ;;  %v740_v11 = vld [vmem:[%s1090_s1 + $0x120] ss:$8 sps:$4 sm:$0xff]  }
   0x5   :  { %504 = vmatprep.subr.bf16.mxu0 %v731_v5  ;;  %v741_v12 = vld [vmem:[%s1090_s1 + $0x34] ss:$8 sps:$4 sm:$0xff]   ;;  %v745_v14 = vld [vmem:[%s1090_s1 + $0x30] ss:$8 sps:$4 sm:$0xff]   ;;  %v747_v16 = vld [vmem:[%s1090_s1 + $0x44] ss:$8 sps:$4 sm:$0xff]  }
   0x6   :  { %v743_v13 = vld [vmem:[%s1090_s1 + $0x134] ss:$8 sps:$4 sm:$0xff]   ;;  %v746_v15 = vld [vmem:[%s1090_s1 + $0x130] ss:$8 sps:$4 sm:$0xff]   ;;  %v749_v17 = vld [vmem:[%s1090_s1 + $0x144] ss:$8 sps:$4 sm:$0xff]  }
   0x7   :  { %452 = vmatpush1.bf16.msra.mxu1 %v733_v6  ;;  %v751_v18 = vld [vmem:[%s1090_s1 + $0x40] ss:$8 sps:$4 sm:$0xff]   ;;  %v753_v20 = vld [vmem:[%s1090_s1 + $0x54] ss:$8 sps:$4 sm:$0xff]   ;;  %v757_v22 = vld [vmem:[%s1090_s1 + $0x50] ss:$8 sps:$4 sm:$0xff]  }
   0x8   :  { %505 = vmatpush1.bf16.msra.mxu0 %v734_v7  ;;  %453 = vmatprep.subr.bf16.mxu1 %v735_v8  ;;  %v752_v19 = vld [vmem:[%s1090_s1 + $0x140] ss:$8 sps:$4 sm:$0xff]   ;;  %v755_v21 = vld [vmem:[%s1090_s1 + $0x154] ss:$8 sps:$4 sm:$0xff]   ;;  %v758_v23 = vld [vmem:[%s1090_s1 + $0x150] ss:$8 sps:$4 sm:$0xff]   ;;  %v557_v8 = vlaneseq }
   0x9   :  { %506 = vmatprep.subr.bf16.mxu0 %v737_v9  ;;  %v759_v24 = vld [vmem:[%s1090_s1 + $0x64] ss:$8 sps:$4 sm:$0xff]   ;;  %v763_v26 = vld [vmem:[%s1090_s1 + $0x60] ss:$8 sps:$4 sm:$0xff]   ;;  %v765_v28 = vld [vmem:[%s1090_s1 + $0x74] ss:$8 sps:$4 sm:$0xff]  }
   0xa   :  { %v761_v25 = vld [vmem:[%s1090_s1 + $0x164] ss:$8 sps:$4 sm:$0xff]   ;;  %v764_v27 = vld [vmem:[%s1090_s1 + $0x160] ss:$8 sps:$4 sm:$0xff]   ;;  %v767_v29 = vld [vmem:[%s1090_s1 + $0x174] ss:$8 sps:$4 sm:$0xff]  }
   0xb   :  { %454 = vmatpush1.bf16.msra.mxu1 %v739_v10  ;;  %v769_v30 = vld [vmem:[%s1090_s1 + $0x70] ss:$8 sps:$4 sm:$0xff]   ;;  %v771_v32 = vld [vmem:[%s1090_s1 + $0x84] ss:$8 sps:$4 sm:$0xff]   ;;  %v775_v34 = vld [vmem:[%s1090_s1 + $0x80] ss:$8 sps:$4 sm:$0xff]  }
   0xc   :  { %507 = vmatpush1.bf16.msra.mxu0 %v740_v11  ;;  %455 = vmatprep.subr.bf16.mxu1 %v741_v12  ;;  %v770_v31 = vld [vmem:[%s1090_s1 + $0x170] ss:$8 sps:$4 sm:$0xff]   ;;  %v773_v33 = vld [vmem:[%s1090_s1 + $0x184] ss:$8 sps:$4 sm:$0xff]   ;;  %v776_v35 = vld [vmem:[%s1090_s1 + $0x180] ss:$8 sps:$4 sm:$0xff]  }
   0xd   :  { %508 = vmatprep.subr.bf16.mxu0 %v743_v13  ;;  %v777_v36 = vld [vmem:[%s1090_s1 + $0x94] ss:$8 sps:$4 sm:$0xff]   ;;  %v781_v38 = vld [vmem:[%s1090_s1 + $0x90] ss:$8 sps:$4 sm:$0xff]   ;;  %v783_v40 = vld [vmem:[%s1090_s1 + $0xa4] ss:$8 sps:$4 sm:$0xff]  }
   0xe   :  { %v779_v37 = vld [vmem:[%s1090_s1 + $0x194] ss:$8 sps:$4 sm:$0xff]   ;;  %v782_v39 = vld [vmem:[%s1090_s1 + $0x190] ss:$8 sps:$4 sm:$0xff]   ;;  %v785_v41 = vld [vmem:[%s1090_s1 + $0x1a4] ss:$8 sps:$4 sm:$0xff]  }
   0xf   :  { %456 = vmatpush1.bf16.msra.mxu1 %v745_v14  ;;  %v787_v42 = vld [vmem:[%s1090_s1 + $0xa0] ss:$8 sps:$4 sm:$0xff]   ;;  %v789_v44 = vld [vmem:[%s1090_s1 + $0xb4] ss:$8 sps:$4 sm:$0xff]   ;;  %v793_v46 = vld [vmem:[%s1090_s1 + $0xb0] ss:$8 sps:$4 sm:$0xff]  }
  0x10   :  { %509 = vmatpush1.bf16.msra.mxu0 %v746_v15  ;;  %457 = vmatprep.subr.bf16.mxu1 %v747_v16  ;;  %v788_v43 = vld [vmem:[%s1090_s1 + $0x1a0] ss:$8 sps:$4 sm:$0xff]   ;;  %v791_v45 = vld [vmem:[%s1090_s1 + $0x1b4] ss:$8 sps:$4 sm:$0xff]   ;;  %v794_v47 = vld [vmem:[%s1090_s1 + $0x1b0] ss:$8 sps:$4 sm:$0xff]  }
  0x11   :  { %510 = vmatprep.subr.bf16.mxu0 %v749_v17  ;;  %v795_v48 = vld [vmem:[%s1090_s1 + $0xc4] ss:$8 sps:$4 sm:$0xff]   ;;  %v799_v52 = vld [vmem:[%s1090_s1 + $0xc0] ss:$8 sps:$4 sm:$0xff]   ;;  %v801_v54 = vld [vmem:[%s1090_s1 + $0xd4] ss:$8 sps:$4 sm:$0xff]  }
  0x12   :  { %v821_v49 = vld [vmem:[%s1091_s0 + $0x4] ss:$16 sps:$4 sm:$0xff]   ;;  %v824_v51 = vld [vmem:[%s1091_s0 + $0xc] ss:$16 sps:$4 sm:$0xff]   ;;  %v800_v53 = vld [vmem:[%s1090_s1 + $0x1c0] ss:$8 sps:$4 sm:$0xff]  }
  0x13   :  { %458 = vmatpush1.bf16.msra.mxu1 %v751_v18  ;;  %v797_v50 = vld [vmem:[%s1090_s1 + $0x1c4] ss:$8 sps:$4 sm:$0xff]   ;;  %481 = vmatprep.mubr.bf16.mxu1 %v821_v49  ;;  %v803_v55 = vld [vmem:[%s1090_s1 + $0x1d4] ss:$8 sps:$4 sm:$0xff]   ;;  %v805_v56 = vld [vmem:[%s1090_s1 + $0xd0] ss:$8 sps:$4 sm:$0xff]  }
  0x14   :  { %511 = vmatpush1.bf16.msra.mxu0 %v752_v19  ;;  %459 = vmatprep.subr.bf16.mxu1 %v753_v20  ;;  %v806_v57 = vld [vmem:[%s1090_s1 + $0x1d0] ss:$8 sps:$4 sm:$0xff]   ;;  %v807_v58 = vld [vmem:[%s1090_s1 + $0xe4] ss:$8 sps:$4 sm:$0xff]   ;;  %v811_v60 = vld [vmem:[%s1090_s1 + $0xe0] ss:$8 sps:$4 sm:$0xff]  }
  0x15   :  { %512 = vmatprep.subr.bf16.mxu0 %v755_v21  ;;  %534 = vmatprep.mubr.bf16.mxu0 %v824_v51  ;;  %v809_v59 = vld [vmem:[%s1090_s1 + $0x1e4] ss:$8 sps:$4 sm:$0xff]   ;;  %v812_v61 = vld [vmem:[%s1090_s1 + $0x1e0] ss:$8 sps:$4 sm:$0xff]   ;;  %v813_v62 = vld [vmem:[%s1090_s1 + $0xf4] ss:$8 sps:$4 sm:$0xff]  }
  0x16   :  { %v815_v63 = vld [vmem:[%s1090_s1 + $0x1f4] ss:$8 sps:$4 sm:$0xff]   ;;  %v817_v0 = vld [vmem:[%s1090_s1 + $0xf0] ss:$8 sps:$4 sm:$0xff]   ;;  %v558_v9 = vshrl.u32 %v557_v8, 7 }
  0x17   :  { %460 = vmatpush1.bf16.msra.mxu1 %v757_v22  ;;  %v818_v1 = vld [vmem:[%s1090_s1 + $0x1f0] ss:$8 sps:$4 sm:$0xff]   ;;  %v825_v4 = vld [vmem:[%s1091_s0 + $0x24] ss:$16 sps:$4 sm:$0xff]   ;;  %v827_v5 = vld [vmem:[%s1091_s0 + $0x2c] ss:$16 sps:$4 sm:$0xff]  }
  0x18   :  { %513 = vmatpush1.bf16.msra.mxu0 %v758_v23  ;;  %461 = vmatprep.subr.bf16.mxu1 %v759_v24  ;;  %v819_v2 = vld [vmem:[%s1091_s0] ss:$16 sps:$4 sm:$0xff]   ;;  %v822_v3 = vld [vmem:[%s1091_s0 + $0x8] ss:$16 sps:$4 sm:$0xff]   ;;  %v559_v10 = vsub.s32 0, %v558_v9  ;;  %v563_v12 = vsub.s32 1, %v558_v9 }
  0x19   :  { %514 = vmatprep.subr.bf16.mxu0 %v761_v25  ;;  %v829_v6 = vld [vmem:[%s1091_s0 + $0x20] ss:$16 sps:$4 sm:$0xff]   ;;  %v830_v7 = vld [vmem:[%s1091_s0 + $0x28] ss:$16 sps:$4 sm:$0xff]  }
  0x1a   :  { %v555_v11 = vld [vmem:[%s1092_s2] sm:$0x3] }
  0x1b   :  { %462 = vmatpush1.bf16.msra.mxu1 %v763_v26  ;;  %v575_v13 = vld [vmem:[%s1093_s3] sm:$0x3]  ;;  %v560_v14 = vrot.slane %v555_v11, %v559_v10  ;;  %v564_v17 = vrot.slane %v555_v11, %v563_v12 }
  0x1c   :  { %515 = vmatpush1.bf16.msra.mxu0 %v764_v27  ;;  %463 = vmatprep.subr.bf16.mxu1 %v765_v28  ;;  %v580_v19 = vrot.slane %v575_v13, %v559_v10  ;;  %v584_v23 = vrot.slane %v575_v13, %v563_v12 }
  0x1d   :  { %516 = vmatprep.subr.bf16.mxu0 %v767_v29 }
  0x1f   :  { %464 = vmatpush1.bf16.msra.mxu1 %v769_v30 }
  0x20   :  { %517 = vmatpush1.bf16.msra.mxu0 %v770_v31  ;;  %465 = vmatprep.subr.bf16.mxu1 %v771_v32 }
  0x21   :  { %518 = vmatprep.subr.bf16.mxu0 %v773_v33 }
  0x23   :  { %466 = vmatpush1.bf16.msra.mxu1 %v775_v34 }
  0x24   :  { %519 = vmatpush1.bf16.msra.mxu0 %v776_v35  ;;  %467 = vmatprep.subr.bf16.mxu1 %v777_v36 }
  0x25   :  { %520 = vmatprep.subr.bf16.mxu0 %v779_v37 }
  0x27   :  { %468 = vmatpush1.bf16.msra.mxu1 %v781_v38 }
  0x28   :  { %521 = vmatpush1.bf16.msra.mxu0 %v782_v39  ;;  %469 = vmatprep.subr.bf16.mxu1 %v783_v40 }
  0x29   :  { %522 = vmatprep.subr.bf16.mxu0 %v785_v41 }
  0x2b   :  { %470 = vmatpush1.bf16.msra.mxu1 %v787_v42 }
  0x2c   :  { %523 = vmatpush1.bf16.msra.mxu0 %v788_v43  ;;  %471 = vmatprep.subr.bf16.mxu1 %v789_v44 }
  0x2d   :  { %524 = vmatprep.subr.bf16.mxu0 %v791_v45 }
  0x2f   :  { %472 = vmatpush1.bf16.msra.mxu1 %v793_v46 }
  0x30   :  { %525 = vmatpush1.bf16.msra.mxu0 %v794_v47  ;;  %473 = vmatprep.subr.bf16.mxu1 %v795_v48 }
  0x31   :  { %526 = vmatprep.subr.bf16.mxu0 %v797_v50 }
  0x33   :  { %474 = vmatpush1.bf16.msra.mxu1 %v799_v52 }
  0x34   :  { %527 = vmatpush1.bf16.msra.mxu0 %v800_v53  ;;  %475 = vmatprep.subr.bf16.mxu1 %v801_v54 }
  0x35   :  { %528 = vmatprep.subr.bf16.mxu0 %v803_v55 }
  0x37   :  { %476 = vmatpush1.bf16.msra.mxu1 %v805_v56 }
  0x38   :  { %529 = vmatpush1.bf16.msra.mxu0 %v806_v57  ;;  %477 = vmatprep.subr.bf16.mxu1 %v807_v58 }
  0x39   :  { %530 = vmatprep.subr.bf16.mxu0 %v809_v59 }
  0x3b   :  { %478 = vmatpush1.bf16.msra.mxu1 %v811_v60 }
  0x3c   :  { %531 = vmatpush1.bf16.msra.mxu0 %v812_v61  ;;  %479 = vmatprep.subr.bf16.mxu1 %v813_v62 }
  0x3d   :  { %532 = vmatprep.subr.bf16.mxu0 %v815_v63 }
  0x3f   :  { %480 = vmatpush1.bf16.msra.mxu1 %v817_v0 }
  0x40   :  { %533 = vmatpush1.bf16.msra.mxu0 %v818_v1 }
  0x42   :  { %482 = vmatmul.mubr.bf16.vlgmr.msra.gmra.mrb[0].mxu1 %v819_v2 }
  0x43   :  { %535 = vmatmul.mubr.bf16.vlgmr.msra.gmra.mrb[0].mxu0 %v822_v3  ;;  %491 = vmatprep.mubr.bf16.mxu1 %v825_v4 }
  0x44   :  { %544 = vmatprep.mubr.bf16.mxu0 %v827_v5 }
  0x4a   :  { %492 = vmatmul.mubr.bf16.gmra.mrb[4].mxu1 %v829_v6 }
  0x4b   :  { %545 = vmatmul.mubr.bf16.gmra.mrb[4].mxu0 %v830_v7 }
 0x115   :  { %v483_v15 = vpop.f32.mrb[0].mxu1 }
 0x116   :  { %v536_v16 = vpop.f32.mrb[0].mxu0  ;;  %v485_v20 = vpop.f32.mrb[1].mxu1 }
 0x117   :  { %v537_v18 = vadd.f32 %v536_v16, %v483_v15  ;;  %v538_v21 = vpop.f32.mrb[1].mxu0  ;;  %v487_v24 = vpop.f32.mrb[2].mxu1 }
 0x118   :  { %v539_v22 = vadd.f32 %v538_v21, %v485_v20  ;;  %v540_v25 = vpop.f32.mrb[2].mxu0  ;;  %v489_v28 = vpop.f32.mrb[3].mxu1 }
 0x119   :  { %v567_v26 = vmul.f32 %v560_v14, %v537_v18  ;;  %v541_v27 = vadd.f32 %v540_v25, %v487_v24  ;;  %v542_v29 = vpop.f32.mrb[3].mxu0 }
 0x11a   :  { %v568_v30 = vmul.f32 %v564_v17, %v539_v22  ;;  %v543_v31 = vadd.f32 %v542_v29, %v489_v28 }
 0x11b   :  { %v587_v32 = vadd.f32 %v580_v19, %v567_v26  ;;  %v569_v33 = vmul.f32 %v560_v14, %v541_v27 }
 0x11c   :  { %v588_v34 = vadd.f32 %v584_v23, %v568_v30  ;;  %v570_v35 = vmul.f32 %v564_v17, %v543_v31 }
 0x11d   :  { %v595_v36 = vmax.f32 %v587_v32, 0.0  ;;  %v589_v37 = vadd.f32 %v580_v19, %v569_v33  ;;  %v493_v40 = vpop.f32.mrb[4].mxu1 }
 0x11e   :  { %v596_v38 = vmax.f32 %v588_v34, 0.0  ;;  %v590_v39 = vadd.f32 %v584_v23, %v570_v35  ;;  %v546_v41 = vpop.f32.mrb[4].mxu0  ;;  %v495_v44 = vpop.f32.mrb[5].mxu1 }
 0x11f   :  { %v597_v42 = vmax.f32 %v589_v37, 0.0  ;;  %v547_v43 = vadd.f32 %v546_v41, %v493_v40  ;;  %v548_v45 = vpop.f32.mrb[5].mxu0  ;;  %v497_v49 = vpop.f32.mrb[6].mxu1 }
 0x120   :  { %v711_v46 = vpack.c.bf16 %v596_v38, %v595_v36  ;;  %v598_v47 = vmax.f32 %v590_v39, 0.0  ;;  %v549_v48 = vadd.f32 %v548_v45, %v495_v44  ;;  %v550_v50 = vpop.f32.mrb[6].mxu0  ;;  %v499_v53 = vpop.f32.mrb[7].mxu1 }
 0x121   :  { %v571_v51 = vmul.f32 %v560_v14, %v547_v43  ;;  %v551_v52 = vadd.f32 %v550_v50, %v497_v49  ;;  %v552_v54 = vpop.f32.mrb[7].mxu0 }
 0x122   :  { %627 = vst [vmem:[%s1094_s4] sm:$0xff] %v711_v46  ;;  %v712_v55 = vpack.c.bf16 %v598_v47, %v597_v42  ;;  %v572_v56 = vmul.f32 %v564_v17, %v549_v48  ;;  %v553_v57 = vadd.f32 %v552_v54, %v499_v53 }
 0x123   :  { %v591_v58 = vadd.f32 %v580_v19, %v571_v51  ;;  %v573_v59 = vmul.f32 %v560_v14, %v551_v52 }
 0x124   :  { %628 = vst [vmem:[%s1094_s4 + $0x8] sm:$0xff] %v712_v55  ;;  %v592_v60 = vadd.f32 %v584_v23, %v572_v56  ;;  %v574_v61 = vmul.f32 %v564_v17, %v553_v57 }
 0x125   :  { %v599_v62 = vmax.f32 %v591_v58, 0.0  ;;  %v593_v63 = vadd.f32 %v580_v19, %v573_v59 }
 0x126   :  { %v600_v0 = vmax.f32 %v592_v60, 0.0  ;;  %v594_v1 = vadd.f32 %v584_v23, %v574_v61 }
 0x127   :  { %v601_v2 = vmax.f32 %v593_v63, 0.0 }
 0x128   :  { %v713_v3 = vpack.c.bf16 %v600_v0, %v599_v62  ;;  %v602_v4 = vmax.f32 %v594_v1, 0.0 }
 0x12a   :  { %629 = vst [vmem:[%s1094_s4 + $0x10] sm:$0xff] %v713_v3  ;;  %v714_v5 = vpack.c.bf16 %v602_v4, %v601_v2 }
 0x12c   :  { %630 = vst [vmem:[%s1094_s4 + $0x18] sm:$0xff] %v714_v5 }

// kernel: alexnet_map_forward.17
= control target key start
LH: loop header
LB: loop body
LE: loop exit
PB: predicated region body
PF: predicated region fallthrough
CT: control target
= control target key end

     0   :  { %vm2974_vm0 = vmmov 0   ;;  %vm1344_vm1 = vcmask 523264   ;;  %vm2088_vm2 = vcmask 519168   ;;  %vm2101_vm3 = vcmask 516096   ;;  %s3760_s1 = inlined_call_operand.vmem [shape: bf16[1600,64], index: 1, kind: input, shape index: {}]   ;;  %s3761_s0 = inlined_call_operand.vmem [shape: bf16[98,1600], index: 0, kind: input, shape index: {}]   ;;  %s3762_s2 = inlined_call_operand.vmem [shape: f32[1,64], index: 2, kind: input, shape index: {}]   ;;  %s3763_s3 = inlined_call_operand.vmem [shape: f32[1,64], index: 3, kind: input, shape index: {}]   ;;  %s3764_s4 = inlined_call_operand.vmem [shape: bf16[98,64], index: 4, kind: output, shape index: {}]  }
   0x1   :  { %v2746_v0 = vld [vmem:[%s3760_s1 + $0x40] sm:$0xff]   ;;  %v2748_v2 = vld [vmem:[%s3760_s1 + $0x48] sm:$0xff]   ;;  %v2750_v4 = vld [vmem:[%s3760_s1 + $0x50] sm:$0xff]  }
   0x2   :  { %v2747_v1 = vld [vmem:[%s3760_s1] sm:$0xff]   ;;  %2728 = vmatprep.subr.bf16.mxu1 %v2746_v0  ;;  %2333 = vmatprep.subr.bf16.mxu0 %v2746_v0  ;;  %v2749_v3 = vld [vmem:[%s3760_s1 + $0x8] sm:$0xff]   ;;  %v2751_v5 = vld [vmem:[%s3760_s1 + $0x10] sm:$0xff]  }
   0x3   :  { %2736 = vmatpush3.bf16.msra.mxu1 %v2747_v1  ;;  %2334 = vmatpush3.bf16.msra.mxu0 %v2747_v1  ;;  %v2752_v6 = vld [vmem:[%s3760_s1 + $0x58] sm:$0xff]   ;;  %v2754_v8 = vld [vmem:[%s3760_s1 + $0x60] sm:$0xff]   ;;  %v2756_v10 = vld [vmem:[%s3760_s1 + $0x68] sm:$0xff]  }
   0x4   :  { %2729 = vmatprep.subr.bf16.mxu1 %v2748_v2  ;;  %2335 = vmatprep.subr.bf16.mxu0 %v2748_v2  ;;  %v2753_v7 = vld [vmem:[%s3760_s1 + $0x18] sm:$0xff]   ;;  %v2755_v9 = vld [vmem:[%s3760_s1 + $0x20] sm:$0xff]   ;;  %v2757_v12 = vld [vmem:[%s3760_s1 + $0x28] sm:$0xff]  }
   0x5   :  { %v2764_v11 = vld [vmem:[%s3761_s0 + $0x1a4] ss:$52 sps:$4 sm:$0xff]   ;;  %v2758_v14 = vld [vmem:[%s3760_s1 + $0x70] sm:$0xff]   ;;  %v2772_v24 = vld [vmem:[%s3760_s1 + $0xc8] sm:$0xff]  }
   0x6   :  { %v2768_v13 = vld [vmem:[%s3761_s0 + $0x4] ss:$52 sps:$4 sm:$0xff]   ;;  %1430 = vmatprep.mubr.bf16.mxu1 %v2764_v11  ;;  %v2759_v15 = vld [vmem:[%s3760_s1 + $0x30] sm:$0xff]   ;;  %v2774_v25 = vld [vmem:[%s3760_s1 + $0x148] sm:$0xff]  }
   0x7   :  { %2737 = vmatpush3.bf16.msra.mxu1 %v2749_v3  ;;  %2336 = vmatpush3.bf16.msra.mxu0 %v2749_v3  ;;  %v2760_v16 = vld [vmem:[%s3760_s1 + $0x78] sm:$0xff]   ;;  %v2765_v18 = vld [vmem:[%s3760_s1 + $0xc0] sm:$0xff]   ;;  %v2773_v27 = vld [vmem:[%s3760_s1 + $0x88] sm:$0xff]  }
   0x8   :  { %2730 = vmatprep.subr.bf16.mxu1 %v2750_v4  ;;  %2337 = vmatprep.subr.bf16.mxu0 %v2750_v4  ;;  %v2761_v17 = vld [vmem:[%s3760_s1 + $0x38] sm:$0xff]   ;;  %v2762_v19 = vld [vmem:[%s3761_s0 + $0x1a0] ss:$52 sps:$4 sm:$0xff]   ;;  %v2775_v29 = vld [vmem:[%s3760_s1 + $0x108] sm:$0xff]  }
   0x9   :  { %1398 = vmatprep.mubr.bf16.mxu0 %v2768_v13  ;;  %v2766_v20 = vld [vmem:[%s3761_s0] ss:$52 sps:$4 sm:$0xff]   ;;  %v2780_v33 = vld [vmem:[%s3761_s0 + $0x68] ss:$52 sps:$4 sm:$0xff]   ;;  %v2794_v46 = vld [vmem:[%s3761_s0 + $0xd0] ss:$52 sps:$4 sm:$0xff]  }
   0xa   :  { %v2770_v21 = vld [vmem:[%s3760_s1 + $0x140] sm:$0xff]   ;;  %v2776_v30 = vld [vmem:[%s3760_s1 + $0xd0] sm:$0xff]   ;;  %v2787_v34 = vld [vmem:[%s3761_s0 + $0x208] ss:$52 sps:$4 sm:$0xff]  }
   0xb   :  { %2738 = vmatpush3.bf16.msra.mxu1 %v2751_v5  ;;  %2338 = vmatpush3.bf16.msra.mxu0 %v2751_v5  ;;  %v2769_v22 = vld [vmem:[%s3760_s1 + $0x80] sm:$0xff]   ;;  %v2781_v31 = vld [vmem:[%s3760_s1 + $0x150] sm:$0xff]   ;;  %v2783_v36 = vld [vmem:[%s3760_s1 + $0xd8] sm:$0xff]  }
   0xc   :  { %2731 = vmatprep.subr.bf16.mxu1 %v2752_v6  ;;  %2339 = vmatprep.subr.bf16.mxu0 %v2752_v6  ;;  %v2771_v23 = vld [vmem:[%s3760_s1 + $0x100] sm:$0xff]   ;;  %v2779_v32 = vld [vmem:[%s3760_s1 + $0x90] sm:$0xff]   ;;  %v2788_v37 = vld [vmem:[%s3760_s1 + $0x158] sm:$0xff]  }
   0xd   :  { %v2777_v26 = vld [vmem:[%s3761_s0 + $0x6c] ss:$52 sps:$4 sm:$0xff]   ;;  %v2782_v35 = vld [vmem:[%s3760_s1 + $0x110] sm:$0xff]   ;;  %v2786_v38 = vld [vmem:[%s3760_s1 + $0x98] sm:$0xff]  }
   0xe   :  { %v2784_v28 = vld [vmem:[%s3761_s0 + $0x20c] ss:$52 sps:$4 sm:$0xff]   ;;  %v2791_v39 = vld [vmem:[%s3761_s0 + $0xd4] ss:$52 sps:$4 sm:$0xff]   ;;  %v2789_v40 = vld [vmem:[%s3760_s1 + $0x118] sm:$0xff]  }
   0xf   :  { %2739 = vmatpush3.bf16.msra.mxu1 %v2753_v7  ;;  %2340 = vmatpush3.bf16.msra.mxu0 %v2753_v7  ;;  %v2790_v41 = vld [vmem:[%s3760_s1 + $0xe0] sm:$0xff]   ;;  %v102_v42 = vld [vmem:[%s3761_s0 + $0x270] sm:$0x11]  ;;  %v2797_v49 = vld [vmem:[%s3760_s1 + $0xe8] sm:$0xff]  }
  0x10   :  { %2732 = vmatprep.subr.bf16.mxu1 %v2754_v8  ;;  %2341 = vmatprep.subr.bf16.mxu0 %v2754_v8  ;;  %v2795_v43 = vld [vmem:[%s3760_s1 + $0x160] sm:$0xff]   ;;  %v2186_v44 = vcombine.high %v102_v42, %v102_v42  ;;  %v2185_v48 = vcombine.low %v102_v42, %v102_v42  ;;  %v2801_v50 = vld [vmem:[%s3760_s1 + $0x168] sm:$0xff]   ;;  %v2804_v52 = vld [vmem:[%s3761_s0 + $0x13c] ss:$52 sps:$4 sm:$0xff]  }
  0x11   :  { %v2793_v45 = vld [vmem:[%s3760_s1 + $0xa0] sm:$0xff]   ;;  %v2799_v51 = vld [vmem:[%s3760_s1 + $0xa8] sm:$0xff]   ;;  %v2803_v54 = vld [vmem:[%s3760_s1 + $0xf0] sm:$0xff]  }
  0x12   :  { %v2796_v47 = vld [vmem:[%s3760_s1 + $0x120] sm:$0xff]   ;;  %v2802_v53 = vld [vmem:[%s3760_s1 + $0x128] sm:$0xff]   ;;  %v2808_v55 = vld [vmem:[%s3760_s1 + $0x170] sm:$0xff]  }
  0x13   :  { %2740 = vmatpush3.bf16.msra.mxu1 %v2755_v9  ;;  %2342 = vmatpush3.bf16.msra.mxu0 %v2755_v9  ;;  %v2806_v56 = vld [vmem:[%s3760_s1 + $0xb0] sm:$0xff]   ;;  %v2807_v57 = vld [vmem:[%s3761_s0 + $0x138] ss:$52 sps:$4 sm:$0xff]   ;;  %v2817_v0 = vld [vmem:[%s3760_s1 + $0x1c0] sm:$0xff]  }
  0x14   :  { %2733 = vmatprep.subr.bf16.mxu1 %v2756_v10  ;;  %2343 = vmatprep.subr.bf16.mxu0 %v2756_v10  ;;  %v2809_v58 = vld [vmem:[%s3760_s1 + $0x130] sm:$0xff]   ;;  %v2810_v59 = vld [vmem:[%s3760_s1 + $0xf8] sm:$0xff]   ;;  %v2815_v61 = vld [vmem:[%s3761_s0 + $0xc] ss:$52 sps:$4 sm:$0xff]  }
  0x15   :  { %v2812_v60 = vld [vmem:[%s3760_s1 + $0x178] sm:$0xff]   ;;  %v2820_v1 = vld [vmem:[%s3761_s0 + $0x14] ss:$52 sps:$4 sm:$0xff]   ;;  %v2818_v3 = vld [vmem:[%s3761_s0 + $0x10] ss:$52 sps:$4 sm:$0xff]  }
  0x16   :  { %v2811_v62 = vld [vmem:[%s3760_s1 + $0xb8] sm:$0xff]   ;;  %v2821_v4 = vld [vmem:[%s3760_s1 + $0x180] sm:$0xff]   ;;  %v2824_v7 = vld [vmem:[%s3761_s0 + $0x74] ss:$52 sps:$4 sm:$0xff]  }
  0x17   :  { %2741 = vmatpush3.bf16.msra.mxu1 %v2757_v12  ;;  %2344 = vmatpush3.bf16.msra.mxu0 %v2757_v12  ;;  %v2816_v63 = vld [vmem:[%s3760_s1 + $0x138] sm:$0xff]   ;;  %v2822_v5 = vld [vmem:[%s3760_s1 + $0x240] sm:$0xff]   ;;  %v2826_v8 = vld [vmem:[%s3760_s1 + $0x1c8] sm:$0xff]  }
  0x18   :  { %2734 = vmatprep.subr.bf16.mxu1 %v2758_v14  ;;  %2345 = vmatprep.subr.bf16.mxu0 %v2758_v14  ;;  %v2813_v2 = vld [vmem:[%s3761_s0 + $0x8] ss:$52 sps:$4 sm:$0xff]   ;;  %v2823_v6 = vld [vmem:[%s3760_s1 + $0x200] sm:$0xff]   ;;  %v2831_v12 = vld [vmem:[%s3761_s0 + $0x78] ss:$52 sps:$4 sm:$0xff]  }
  0x19   :  { %v2828_v9 = vld [vmem:[%s3760_s1 + $0x188] sm:$0xff]   ;;  %v2829_v10 = vld [vmem:[%s3761_s0 + $0x7c] ss:$52 sps:$4 sm:$0xff]  }
  0x1a   :  { %v2827_v11 = vld [vmem:[%s3761_s0 + $0x70] ss:$52 sps:$4 sm:$0xff]   ;;  %v2832_v13 = vld [vmem:[%s3760_s1 + $0x248] sm:$0xff]  }
  0x1b   :  { %2742 = vmatpush3.bf16.msra.mxu1 %v2759_v15  ;;  %2346 = vmatpush3.bf16.msra.mxu0 %v2759_v15  ;;  %v2833_v14 = vld [vmem:[%s3760_s1 + $0x208] sm:$0xff]   ;;  %v2834_v15 = vld [vmem:[%s3760_s1 + $0x1d0] sm:$0xff]  }
  0x1c   :  { %2735 = vmatprep.subr.bf16.mxu1 %v2760_v16  ;;  %2347 = vmatprep.subr.bf16.mxu0 %v2760_v16  ;;  %v2835_v16 = vld [vmem:[%s3761_s0 + $0xdc] ss:$52 sps:$4 sm:$0xff]   ;;  %v2869_v42 = vld [vmem:[%s3760_s1 + $0x268] sm:$0xff]  }
  0x1f   :  { %2743 = vmatpush3.bf16.msra.mxu1 %v2761_v17  ;;  %2348 = vmatpush3.bf16.msra.mxu0 %v2761_v17  ;;  %v2837_v17 = vld [vmem:[%s3760_s1 + $0x190] sm:$0xff]  }
  0x20   :  { %2391 = vmatprep.subr.bf16.mxu1 %v2765_v18  ;;  %2449 = vmatprep.subr.bf16.mxu0 %v2770_v21  ;;  %v2839_v18 = vld [vmem:[%s3761_s0 + $0xe4] ss:$52 sps:$4 sm:$0xff]   ;;  %v2841_v21 = vld [vmem:[%s3761_s0 + $0xe0] ss:$52 sps:$4 sm:$0xff]  }
  0x22   :  { %1431 = vmatmul.mubr.bf16.vlgmr.msra.gmra.mrb[0].mxu1 %v2762_v19  ;;  %1399 = vmatmul.mubr.bf16.vlgmr.msra.gmra.mrb[0].mxu0 %v2766_v20  ;;  %v2842_v19 = vld [vmem:[%s3760_s1 + $0x250] sm:$0xff]   ;;  %v2838_v20 = vld [vmem:[%s3761_s0 + $0xd8] ss:$52 sps:$4 sm:$0xff]  }
  0x23   :  { %2392 = vmatpush3.bf16.msra.mxu1 %v2769_v22  ;;  %2450 = vmatpush3.bf16.msra.mxu0 %v2771_v23  ;;  %v2843_v22 = vld [vmem:[%s3760_s1 + $0x210] sm:$0xff]   ;;  %v2844_v23 = vld [vmem:[%s3760_s1 + $0x1d8] sm:$0xff]  }
  0x24   :  { %2393 = vmatprep.subr.bf16.mxu1 %v2772_v24  ;;  %2451 = vmatprep.subr.bf16.mxu0 %v2774_v25  ;;  %v2845_v24 = vld [vmem:[%s3760_s1 + $0x198] sm:$0xff]  }
  0x25   :  { %1406 = vmatprep.mubr.bf16.mxu0 %v2777_v26  ;;  %1438 = vmatprep.mubr.bf16.mxu1 %v2784_v28  ;;  %v2846_v25 = vld [vmem:[%s3761_s0 + $0x144] ss:$52 sps:$4 sm:$0xff]   ;;  %v2849_v26 = vld [vmem:[%s3761_s0 + $0x14c] ss:$52 sps:$4 sm:$0xff]  }
  0x26   :  { %v2853_v28 = vld [vmem:[%s3760_s1 + $0x218] sm:$0xff]  }
  0x27   :  { %2394 = vmatpush3.bf16.msra.mxu1 %v2773_v27  ;;  %2452 = vmatpush3.bf16.msra.mxu0 %v2775_v29  ;;  %v2852_v27 = vld [vmem:[%s3760_s1 + $0x258] sm:$0xff]   ;;  %v2854_v29 = vld [vmem:[%s3760_s1 + $0x1e0] sm:$0xff]  }
  0x28   :  { %2395 = vmatprep.subr.bf16.mxu1 %v2776_v30  ;;  %2453 = vmatprep.subr.bf16.mxu0 %v2781_v31  ;;  %v2848_v30 = vld [vmem:[%s3761_s0 + $0x140] ss:$52 sps:$4 sm:$0xff]  }
  0x29   :  { %v2855_v31 = vld [vmem:[%s3760_s1 + $0x1a0] sm:$0xff]  }
  0x2a   :  { %1407 = vmatmul.mubr.bf16.gmra.mrb[4].mxu0 %v2780_v33  ;;  %1439 = vmatmul.mubr.bf16.gmra.mrb[4].mxu1 %v2787_v34  ;;  %v2856_v33 = vld [vmem:[%s3761_s0 + $0x1ac] ss:$52 sps:$4 sm:$0xff]   ;;  %v2859_v34 = vld [vmem:[%s3761_s0 + $0x1b4] ss:$52 sps:$4 sm:$0xff]  }
  0x2b   :  { %2396 = vmatpush3.bf16.msra.mxu1 %v2779_v32  ;;  %2454 = vmatpush3.bf16.msra.mxu0 %v2782_v35  ;;  %v2851_v32 = vld [vmem:[%s3761_s0 + $0x148] ss:$52 sps:$4 sm:$0xff]   ;;  %v2861_v35 = vld [vmem:[%s3760_s1 + $0x260] sm:$0xff]  }
  0x2c   :  { %2397 = vmatprep.subr.bf16.mxu1 %v2783_v36  ;;  %2455 = vmatprep.subr.bf16.mxu0 %v2788_v37  ;;  %v2863_v36 = vld [vmem:[%s3760_s1 + $0x220] sm:$0xff]   ;;  %v2864_v37 = vld [vmem:[%s3760_s1 + $0x1e8] sm:$0xff]  }
  0x2d   :  { %1414 = vmatprep.mubr.bf16.mxu0 %v2791_v39  ;;  %1446 = vmatprep.mubr.bf16.mxu1 %v2186_v44  ;;  %v2858_v39 = vld [vmem:[%s3761_s0 + $0x1a8] ss:$52 sps:$4 sm:$0xff]  }
  0x2e   :  { %v2872_v44 = vld [vmem:[%s3760_s1 + $0x228] sm:$0xff]  }
  0x2f   :  { %2398 = vmatpush3.bf16.msra.mxu1 %v2786_v38  ;;  %2456 = vmatpush3.bf16.msra.mxu0 %v2789_v40  ;;  %v2865_v38 = vld [vmem:[%s3760_s1 + $0x1a8] sm:$0xff]   ;;  %v2862_v40 = vld [vmem:[%s3761_s0 + $0x1b0] ss:$52 sps:$4 sm:$0xff]  }
  0x30   :  { %2399 = vmatprep.subr.bf16.mxu1 %v2790_v41  ;;  %2457 = vmatprep.subr.bf16.mxu0 %v2795_v43  ;;  %v2866_v41 = vld [vmem:[%s3761_s0 + $0x214] ss:$52 sps:$4 sm:$0xff]   ;;  %v2870_v43 = vld [vmem:[%s3761_s0 + $0x21c] ss:$52 sps:$4 sm:$0xff]  }
  0x32   :  { %1415 = vmatmul.mubr.bf16.gmra.mrb[8].mxu0 %v2794_v46  ;;  %1447 = vmatmul.mubr.bf16.gmra.mrb[8].mxu1 %v2185_v48  ;;  %v2875_v46 = vld [vmem:[%s3760_s1 + $0x1b0] sm:$0xff]  }
  0x33   :  { %2400 = vmatpush3.bf16.msra.mxu1 %v2793_v45  ;;  %2458 = vmatpush3.bf16.msra.mxu0 %v2796_v47  ;;  %v2874_v45 = vld [vmem:[%s3760_s1 + $0x1f0] sm:$0xff]   ;;  %v103_v47 = vld [vmem:[%s3761_s0 + $0x278] sm:$0x11] }
  0x34   :  { %2401 = vmatprep.subr.bf16.mxu1 %v2797_v49  ;;  %2459 = vmatprep.subr.bf16.mxu0 %v2801_v50  ;;  %v2877_v48 = vld [vmem:[%s3760_s1 + $0x270] sm:$0xff]   ;;  %v2873_v50 = vld [vmem:[%s3761_s0 + $0x218] ss:$52 sps:$4 sm:$0xff]  }
  0x35   :  { %1422 = vmatprep.mubr.bf16.mxu0 %v2804_v52  ;;  %1486 = vmatprep.mubr.bf16.mxu1 %v2815_v61  ;;  %v2868_v49 = vld [vmem:[%s3761_s0 + $0x210] ss:$52 sps:$4 sm:$0xff]   ;;  %v2187_v61 = vcombine.low %v103_v47, %v103_v47 }
  0x36   :  { %v104_v52 = vld [vmem:[%s3761_s0 + $0x280] sm:$0x11] }
  0x37   :  { %2402 = vmatpush3.bf16.msra.mxu1 %v2799_v51  ;;  %2460 = vmatpush3.bf16.msra.mxu0 %v2802_v53  ;;  %v2879_v51 = vld [vmem:[%s3760_s1 + $0x230] sm:$0xff]   ;;  %v2881_v53 = vld [vmem:[%s3760_s1 + $0x1f8] sm:$0xff]  }
  0x38   :  { %2403 = vmatprep.subr.bf16.mxu1 %v2803_v54  ;;  %2461 = vmatprep.subr.bf16.mxu0 %v2808_v55  ;;  %v2883_v54 = vld [vmem:[%s3760_s1 + $0x1b8] sm:$0xff]   ;;  %v2188_v55 = vcombine.high %v103_v47, %v103_v47 }
  0x3a   :  { %1423 = vmatmul.mubr.bf16.gmra.mrb[12].mxu0 %v2807_v57  ;;  %v2884_v57 = vld [vmem:[%s3760_s1 + $0x278] sm:$0xff]  }
  0x3b   :  { %2404 = vmatpush3.bf16.msra.mxu1 %v2806_v56  ;;  %2462 = vmatpush3.bf16.msra.mxu0 %v2809_v58  ;;  %v2190_v56 = vcombine.high %v104_v52, %v104_v52  ;;  %v2888_v58 = vld [vmem:[%s3760_s1 + $0x238] sm:$0xff]  }
  0x3c   :  { %2405 = vmatprep.subr.bf16.mxu1 %v2810_v59  ;;  %2463 = vmatprep.subr.bf16.mxu0 %v2812_v60  ;;  %v2889_v59 = vld [vmem:[%s3760_s1 + $0x2c0] sm:$0xff]   ;;  %v2973_v60 = vmov 0.0  }
  0x3d   :  { %1574 = vmatprep.mubr.bf16.mxu0 %v2820_v1  ;;  %v2885_v1 = vld [vmem:[%s3761_s0 + $0x18] ss:$52 sps:$4 sm:$0xff]  }
  0x3f   :  { %2406 = vmatpush3.bf16.msra.mxu1 %v2811_v62  ;;  %2464 = vmatpush3.bf16.msra.mxu0 %v2816_v63  ;;  %v2189_v62 = vcombine.low %v104_v52, %v104_v52  ;;  %v2887_v63 = vld [vmem:[%s3761_s0 + $0x1c] ss:$52 sps:$4 sm:$0xff]  }
  0x40   :  { %2507 = vmatprep.subr.bf16.mxu1 %v2817_v0  ;;  %2565 = vmatprep.subr.bf16.mxu0 %v2822_v5  ;;  %v2892_v0 = vld [vmem:[%s3761_s0 + $0x24] ss:$52 sps:$4 sm:$0xff]  }
  0x41   :  { %v2895_v5 = vld [vmem:[%s3761_s0 + $0x84] ss:$52 sps:$4 sm:$0xff]  }
  0x42   :  { %1487 = vmatmul.mubr.bf16.vlgmr.msra.gmra.mrb[12].mxu1 %v2813_v2  ;;  %1575 = vmatmul.mubr.bf16.vlgmr.msra.gmra.mrb[16].mxu0 %v2818_v3  ;;  %v2890_v2 = vld [vmem:[%s3761_s0 + $0x20] ss:$52 sps:$4 sm:$0xff]   ;;  %v2952_v52 = vld [vmem:[%s3761_s0 + $0x90] ss:$52 sps:$4 sm:$0xff]  }
  0x43   :  { %2508 = vmatpush3.bf16.msra.mxu1 %v2821_v4  ;;  %2566 = vmatpush3.bf16.msra.mxu0 %v2823_v6  ;;  %v2893_v3 = vld [vmem:[%s3760_s1 + $0x280] sm:$0xff]   ;;  %v2897_v6 = vld [vmem:[%s3760_s1 + $0x2c8] sm:$0xff]  }
  0x44   :  { %1494 = vmatprep.mubr.bf16.mxu1 %v2824_v7  ;;  %2509 = vmatprep.subr.bf16.mxu1 %v2826_v8  ;;  %v2894_v4 = vld [vmem:[%s3760_s1 + $0x300] sm:$0xff]   ;;  %v2899_v8 = vld [vmem:[%s3760_s1 + $0x288] sm:$0xff]  }
  0x45   :  { %1582 = vmatprep.mubr.bf16.mxu0 %v2829_v10  ;;  %2567 = vmatprep.subr.bf16.mxu0 %v2832_v13  ;;  %v2900_v7 = vld [vmem:[%s3761_s0 + $0x8c] ss:$52 sps:$4 sm:$0xff]   ;;  %v2903_v10 = vld [vmem:[%s3760_s1 + $0x2d0] sm:$0xff]  }
  0x46   :  { %v2904_v13 = vld [vmem:[%s3761_s0 + $0xec] ss:$52 sps:$4 sm:$0xff]  }
  0x47   :  { %2510 = vmatpush3.bf16.msra.mxu1 %v2828_v9  ;;  %2568 = vmatpush3.bf16.msra.mxu0 %v2833_v14  ;;  %v2911_v9 = vld [vmem:[%s3760_s1 + $0x308] sm:$0xff]   ;;  %v2906_v14 = vld [vmem:[%s3760_s1 + $0x290] sm:$0xff]  }
  0x48   :  { %2511 = vmatprep.subr.bf16.mxu1 %v2834_v15  ;;  %2569 = vmatprep.subr.bf16.mxu0 %v2842_v19  ;;  %v2908_v15 = vld [vmem:[%s3761_s0 + $0xf4] ss:$52 sps:$4 sm:$0xff]   ;;  %v2920_v19 = vld [vmem:[%s3760_s1 + $0x2e0] sm:$0xff]  }
  0x4a   :  { %1495 = vmatmul.mubr.bf16.gmra.mrb[16].mxu1 %v2827_v11  ;;  %1583 = vmatmul.mubr.bf16.gmra.mrb[20].mxu0 %v2831_v12  ;;  %v2898_v11 = vld [vmem:[%s3761_s0 + $0x80] ss:$52 sps:$4 sm:$0xff]   ;;  %v2902_v12 = vld [vmem:[%s3761_s0 + $0x88] ss:$52 sps:$4 sm:$0xff]  }
  0x4b   :  { %1502 = vmatprep.mubr.bf16.mxu1 %v2835_v16  ;;  %2512 = vmatpush3.bf16.msra.mxu1 %v2837_v17  ;;  %v2912_v16 = vld [vmem:[%s3760_s1 + $0x2d8] sm:$0xff]  }
  0x4c   :  { %1590 = vmatprep.mubr.bf16.mxu0 %v2839_v18  ;;  %2570 = vmatpush3.bf16.msra.mxu0 %v2843_v22  ;;  %v2913_v17 = vld [vmem:[%s3760_s1 + $0x298] sm:$0xff]   ;;  %v2928_v18 = vld [vmem:[%s3760_s1 + $0x310] sm:$0xff]  }
  0x4d   :  { %2513 = vmatprep.subr.bf16.mxu1 %v2844_v23  ;;  %2571 = vmatprep.subr.bf16.mxu0 %v2852_v27  ;;  %v2914_v22 = vld [vmem:[%s3761_s0 + $0x154] ss:$52 sps:$4 sm:$0xff]   ;;  %v2917_v23 = vld [vmem:[%s3761_s0 + $0x15c] ss:$52 sps:$4 sm:$0xff]  }
  0x4e   :  { %v2916_v27 = vld [vmem:[%s3761_s0 + $0x150] ss:$52 sps:$4 sm:$0xff]  }
  0x4f   :  { %2514 = vmatpush3.bf16.msra.mxu1 %v2845_v24  ;;  %v2921_v24 = vld [vmem:[%s3760_s1 + $0x2a0] sm:$0xff]  }
  0x50   :  { %2572 = vmatpush3.bf16.msra.mxu0 %v2853_v28  ;;  %2515 = vmatprep.subr.bf16.mxu1 %v2854_v29  ;;  %v2930_v28 = vld [vmem:[%s3760_s1 + $0x2a8] sm:$0xff]   ;;  %v2937_v29 = vld [vmem:[%s3760_s1 + $0x2f0] sm:$0xff]  }
  0x51   :  { %2573 = vmatprep.subr.bf16.mxu0 %v2861_v35  ;;  %v2945_v35 = vld [vmem:[%s3760_s1 + $0x2b8] sm:$0xff]  }
  0x52   :  { %1503 = vmatmul.mubr.bf16.gmra.mrb[20].mxu1 %v2838_v20  ;;  %1591 = vmatmul.mubr.bf16.gmra.mrb[24].mxu0 %v2841_v21  ;;  %v2907_v20 = vld [vmem:[%s3761_s0 + $0xe8] ss:$52 sps:$4 sm:$0xff]   ;;  %v2910_v21 = vld [vmem:[%s3761_s0 + $0xf0] ss:$52 sps:$4 sm:$0xff]  }
  0x53   :  { %1510 = vmatprep.mubr.bf16.mxu1 %v2846_v25  ;;  %1598 = vmatprep.mubr.bf16.mxu0 %v2849_v26  ;;  %v2929_v25 = vld [vmem:[%s3760_s1 + $0x2e8] sm:$0xff]   ;;  %v2941_v26 = vld [vmem:[%s3760_s1 + $0x318] sm:$0xff]  }
  0x54   :  { %2516 = vmatpush3.bf16.msra.mxu1 %v2855_v31  ;;  %2574 = vmatpush3.bf16.msra.mxu0 %v2863_v36  ;;  %v2922_v31 = vld [vmem:[%s3761_s0 + $0x1bc] ss:$52 sps:$4 sm:$0xff]   ;;  %v2924_v36 = vld [vmem:[%s3761_s0 + $0x1b8] ss:$52 sps:$4 sm:$0xff]  }
  0x55   :  { %2517 = vmatprep.subr.bf16.mxu1 %v2864_v37  ;;  %2575 = vmatprep.subr.bf16.mxu0 %v2869_v42  ;;  %v2927_v37 = vld [vmem:[%s3761_s0 + $0x1c0] ss:$52 sps:$4 sm:$0xff]  }
  0x56   :  { %v2933_v42 = vld [vmem:[%s3761_s0 + $0x220] ss:$52 sps:$4 sm:$0xff]  }
  0x58   :  { %2518 = vmatpush3.bf16.msra.mxu1 %v2865_v38  ;;  %2576 = vmatpush3.bf16.msra.mxu0 %v2872_v44  ;;  %v2931_v38 = vld [vmem:[%s3761_s0 + $0x224] ss:$52 sps:$4 sm:$0xff]  }
  0x59   :  { %2519 = vmatprep.subr.bf16.mxu1 %v2874_v45  ;;  %2577 = vmatprep.subr.bf16.mxu0 %v2877_v48  ;;  %v2948_v48 = vld [vmem:[%s3761_s0 + $0x2c] ss:$52 sps:$4 sm:$0xff]  }
  0x5a   :  { %1511 = vmatmul.mubr.bf16.gmra.mrb[24].mxu1 %v2848_v30  ;;  %1599 = vmatmul.mubr.bf16.gmra.mrb[28].mxu0 %v2851_v32  ;;  %v2919_v30 = vld [vmem:[%s3761_s0 + $0x158] ss:$52 sps:$4 sm:$0xff]  }
  0x5b   :  { %1518 = vmatprep.mubr.bf16.mxu1 %v2856_v33  ;;  %1606 = vmatprep.mubr.bf16.mxu0 %v2859_v34  ;;  %v2925_v32 = vld [vmem:[%s3761_s0 + $0x1c4] ss:$52 sps:$4 sm:$0xff]   ;;  %v2938_v33 = vld [vmem:[%s3760_s1 + $0x2b0] sm:$0xff]  }
  0x5c   :  { %2520 = vmatpush3.bf16.msra.mxu1 %v2875_v46  ;;  %2578 = vmatpush3.bf16.msra.mxu0 %v2879_v51  ;;  %v2943_v34 = vld [vmem:[%s3760_s1 + $0x2f8] sm:$0xff]   ;;  %v2950_v51 = vld [vmem:[%s3761_s0 + $0x94] ss:$52 sps:$4 sm:$0xff]  }
  0x5d   :  { %2521 = vmatprep.subr.bf16.mxu1 %v2881_v53  ;;  %2579 = vmatprep.subr.bf16.mxu0 %v2884_v57  ;;  %v2953_v53 = vld [vmem:[%s3761_s0 + $0x98] ss:$52 sps:$4 sm:$0xff]  }
  0x5e   :  { %v2958_v57 = vld [vmem:[%s3761_s0 + $0x164] ss:$52 sps:$4 sm:$0xff]  }
  0x60   :  { %2522 = vmatpush3.bf16.msra.mxu1 %v2883_v54  ;;  %2580 = vmatpush3.bf16.msra.mxu0 %v2888_v58  ;;  %v2954_v54 = vld [vmem:[%s3761_s0 + $0xfc] ss:$52 sps:$4 sm:$0xff]   ;;  %v2960_v58 = vld [vmem:[%s3761_s0 + $0x160] ss:$52 sps:$4 sm:$0xff]  }
  0x61   :  { %2623 = vmatprep.subr.bf16.mxu1 %v2889_v59  ;;  %2692 = vmatprep.subr.bf16.mxu0 %v2973_v60  ;;  %v2961_v59 = vld [vmem:[%s3761_s0 + $0x168] ss:$52 sps:$4 sm:$0xff]  }
  0x62   :  { %1519 = vmatmul.mubr.bf16.gmra.mrb[28].mxu1 %v2858_v39  ;;  %1607 = vmatmul.mubr.bf16.gmra.mrb[32].mxu0 %v2862_v40  ;;  %v2934_v39 = vld [vmem:[%s3761_s0 + $0x22c] ss:$52 sps:$4 sm:$0xff]  }
  0x63   :  { %1526 = vmatprep.mubr.bf16.mxu1 %v2866_v41  ;;  %1614 = vmatprep.mubr.bf16.mxu0 %v2870_v43  ;;  %v105_v40 = vld [vmem:[%s3761_s0 + $0x288] sm:$0x11]  ;;  %v106_v41 = vld [vmem:[%s3761_s0 + $0x290] sm:$0x11] }
  0x64   :  { %v2936_v43 = vld [vmem:[%s3761_s0 + $0x228] ss:$52 sps:$4 sm:$0xff]   ;;  %v2192_v44 = vcombine.high %v105_v40, %v105_v40  ;;  %v2194_v45 = vcombine.high %v106_v41, %v106_v41  ;;  %v2191_v46 = vcombine.low %v105_v40, %v105_v40  ;;  %v2193_v47 = vcombine.low %v106_v41, %v106_v41 }
  0x6a   :  { %1527 = vmatmul.mubr.bf16.gmra.mrb[32].mxu1 %v2868_v49  ;;  %1615 = vmatmul.mubr.bf16.gmra.mrb[36].mxu0 %v2873_v50  ;;  %v2946_v49 = vld [vmem:[%s3761_s0 + $0x28] ss:$52 sps:$4 sm:$0xff]   ;;  %v2949_v50 = vld [vmem:[%s3761_s0 + $0x30] ss:$52 sps:$4 sm:$0xff]  }
  0x6b   :  { %1534 = vmatprep.mubr.bf16.mxu1 %v2188_v55  ;;  %1622 = vmatprep.mubr.bf16.mxu0 %v2190_v56  ;;  %v2956_v55 = vld [vmem:[%s3761_s0 + $0xf8] ss:$52 sps:$4 sm:$0xff]   ;;  %v2957_v56 = vld [vmem:[%s3761_s0 + $0x100] ss:$52 sps:$4 sm:$0xff]  }
  0x72   :  { %1535 = vmatmul.mubr.bf16.gmra.mrb[36].mxu1 %v2187_v61  ;;  %1623 = vmatmul.mubr.bf16.gmra.mrb[40].mxu0 %v2189_v62  ;;  %v2962_v61 = vld [vmem:[%s3761_s0 + $0x1cc] ss:$52 sps:$4 sm:$0xff]   ;;  %v2964_v62 = vld [vmem:[%s3761_s0 + $0x1c8] ss:$52 sps:$4 sm:$0xff]  }
  0x73   :  { %1662 = vmatprep.mubr.bf16.mxu1 %v2887_v63  ;;  %1750 = vmatprep.mubr.bf16.mxu0 %v2892_v0  ;;  %v2965_v63 = vld [vmem:[%s3761_s0 + $0x1d0] ss:$52 sps:$4 sm:$0xff]   ;;  %v2966_v0 = vld [vmem:[%s3761_s0 + $0x234] ss:$52 sps:$4 sm:$0xff]  }
  0x7a   :  { %1663 = vmatmul.mubr.bf16.vlgmr.msra.gmra.mrb[40].mxu1 %v2885_v1  ;;  %1751 = vmatmul.mubr.bf16.vlgmr.msra.gmra.mrb[44].mxu0 %v2890_v2  ;;  %v107_v1 = vld [vmem:[%s3761_s0 + $0x298] sm:$0x11]  ;;  %v2968_v2 = vld [vmem:[%s3761_s0 + $0x230] ss:$52 sps:$4 sm:$0xff]  }
  0x7b   :  { %2624 = vmatpush3.bf16.msra.mxu1 %v2893_v3  ;;  %2693 = vmatpush3.bf16.msra.mxu0 %v2894_v4  ;;  %v2969_v3 = vld [vmem:[%s3761_s0 + $0x238] ss:$52 sps:$4 sm:$0xff]   ;;  %v2196_v4 = vcombine.high %v107_v1, %v107_v1 }
  0x7c   :  { %1670 = vmatprep.mubr.bf16.mxu1 %v2895_v5  ;;  %2625 = vmatprep.subr.bf16.mxu1 %v2897_v6  ;;  %v2195_v5 = vcombine.low %v107_v1, %v107_v1  ;;  %v2972_v6 = vld [vmem:[%s3761_s0 + $0x2a0] ss:$0 sps:$4 sm:$0x11]  }
  0x7d   :  { %1758 = vmatprep.mubr.bf16.mxu0 %v2900_v7  ;;  %2694 = vmatprep.subr.bf16.mxu0 %v2973_v60 }
  0x7f   :  { %2626 = vmatpush3.bf16.msra.mxu1 %v2899_v8  ;;  %2695 = vmatpush3.bf16.msra.mxu0 %v2911_v9 }
  0x80   :  { %2627 = vmatprep.subr.bf16.mxu1 %v2903_v10  ;;  %2696 = vmatprep.subr.bf16.mxu0 %v2973_v60 }
  0x82   :  { %1671 = vmatmul.mubr.bf16.gmra.mrb[44].mxu1 %v2898_v11  ;;  %1759 = vmatmul.mubr.bf16.gmra.mrb[48].mxu0 %v2902_v12 }
  0x83   :  { %1678 = vmatprep.mubr.bf16.mxu1 %v2904_v13  ;;  %2628 = vmatpush3.bf16.msra.mxu1 %v2906_v14 }
  0x84   :  { %1766 = vmatprep.mubr.bf16.mxu0 %v2908_v15  ;;  %2629 = vmatprep.subr.bf16.mxu1 %v2912_v16 }
  0x85   :  { %2697 = vmatpush3.bf16.msra.mxu0 %v2928_v18 }
  0x86   :  { %2698 = vmatprep.subr.bf16.mxu0 %v2973_v60 }
  0x87   :  { %2630 = vmatpush3.bf16.msra.mxu1 %v2913_v17 }
  0x88   :  { %2631 = vmatprep.subr.bf16.mxu1 %v2920_v19 }
  0x89   :  { %2699 = vmatpush3.bf16.msra.mxu0 %v2941_v26 }
  0x8a   :  { %1679 = vmatmul.mubr.bf16.gmra.mrb[48].mxu1 %v2907_v20  ;;  %1767 = vmatmul.mubr.bf16.gmra.mrb[52].mxu0 %v2910_v21 }
  0x8b   :  { %1686 = vmatprep.mubr.bf16.mxu1 %v2914_v22  ;;  %1774 = vmatprep.mubr.bf16.mxu0 %v2917_v23 }
  0x8c   :  { %2632 = vmatpush3.bf16.msra.mxu1 %v2921_v24 }
  0x8d   :  { %2633 = vmatprep.subr.bf16.mxu1 %v2929_v25 }
  0x90   :  { %2634 = vmatpush3.bf16.msra.mxu1 %v2930_v28 }
  0x91   :  { %2635 = vmatprep.subr.bf16.mxu1 %v2937_v29 }
  0x92   :  { %1687 = vmatmul.mubr.bf16.gmra.mrb[52].mxu1 %v2916_v27  ;;  %1775 = vmatmul.mubr.bf16.gmra.mrb[56].mxu0 %v2919_v30 }
  0x93   :  { %1694 = vmatprep.mubr.bf16.mxu1 %v2922_v31  ;;  %1782 = vmatprep.mubr.bf16.mxu0 %v2925_v32 }
  0x94   :  { %2636 = vmatpush3.bf16.msra.mxu1 %v2938_v33 }
  0x95   :  { %2637 = vmatprep.subr.bf16.mxu1 %v2943_v34 }
  0x98   :  { %2638 = vmatpush3.bf16.msra.mxu1 %v2945_v35 }
  0x9a   :  { %1695 = vmatmul.mubr.bf16.gmra.mrb[56].mxu1 %v2924_v36  ;;  %1783 = vmatmul.mubr.bf16.gmra.mrb[60].mxu0 %v2927_v37 }
  0x9b   :  { %1702 = vmatprep.mubr.bf16.mxu1 %v2931_v38  ;;  %1790 = vmatprep.mubr.bf16.mxu0 %v2934_v39 }
  0xa2   :  { %1703 = vmatmul.mubr.bf16.gmra.mrb[60].mxu1 %v2933_v42  ;;  %1791 = vmatmul.mubr.bf16.gmra.mrb[64].mxu0 %v2936_v43 }
  0xa3   :  { %1710 = vmatprep.mubr.bf16.mxu1 %v2192_v44  ;;  %1798 = vmatprep.mubr.bf16.mxu0 %v2194_v45 }
  0xaa   :  { %1711 = vmatmul.mubr.bf16.gmra.mrb[64].mxu1 %v2191_v46  ;;  %1799 = vmatmul.mubr.bf16.gmra.mrb[68].mxu0 %v2193_v47 }
  0xab   :  { %1838 = vmatprep.mubr.bf16.mxu1 %v2948_v48  ;;  %2700 = vmatprep.mubr.msk.bf16.mxu0 %vm2974_vm0, %v2973_v60 }
  0xb2   :  { %1839 = vmatmul.mubr.bf16.vlgmr.msra.gmra.mrb[68].mxu1 %v2946_v49  ;;  %2701 = vmatmul.mubr.msk.bf16.vlgmr.msra.gmra.mrb[72].mxu0 %vm1344_vm1, %v2949_v50 }
  0xb3   :  { %1846 = vmatprep.mubr.bf16.mxu1 %v2950_v51  ;;  %2704 = vmatprep.mubr.msk.bf16.mxu0 %vm2974_vm0, %v2973_v60 }
  0xba   :  { %1847 = vmatmul.mubr.bf16.gmra.mrb[72].mxu1 %v2952_v52  ;;  %2705 = vmatmul.mubr.msk.bf16.gmra.mrb[76].mxu0 %vm1344_vm1, %v2953_v53 }
  0xbb   :  { %1854 = vmatprep.mubr.bf16.mxu1 %v2954_v54  ;;  %2708 = vmatprep.mubr.msk.bf16.mxu0 %vm2974_vm0, %v2973_v60 }
  0xc2   :  { %1855 = vmatmul.mubr.bf16.gmra.mrb[76].mxu1 %v2956_v55  ;;  %2709 = vmatmul.mubr.msk.bf16.gmra.mrb[80].mxu0 %vm1344_vm1, %v2957_v56 }
  0xc3   :  { %1862 = vmatprep.mubr.bf16.mxu1 %v2958_v57  ;;  %2712 = vmatprep.mubr.msk.bf16.mxu0 %vm2974_vm0, %v2973_v60 }
  0xca   :  { %1863 = vmatmul.mubr.bf16.gmra.mrb[80].mxu1 %v2960_v58  ;;  %2713 = vmatmul.mubr.msk.bf16.gmra.mrb[84].mxu0 %vm1344_vm1, %v2961_v59 }
  0xcb   :  { %1870 = vmatprep.mubr.bf16.mxu1 %v2962_v61  ;;  %2716 = vmatprep.mubr.msk.bf16.mxu0 %vm2974_vm0, %v2973_v60 }
  0xd2   :  { %1871 = vmatmul.mubr.bf16.gmra.mrb[84].mxu1 %v2964_v62  ;;  %2717 = vmatmul.mubr.msk.bf16.gmra.mrb[88].mxu0 %vm1344_vm1, %v2965_v63 }
  0xd3   :  { %1878 = vmatprep.mubr.bf16.mxu1 %v2966_v0  ;;  %2720 = vmatprep.mubr.msk.bf16.mxu0 %vm2974_vm0, %v2973_v60 }
  0xda   :  { %1879 = vmatmul.mubr.bf16.gmra.mrb[88].mxu1 %v2968_v2  ;;  %2721 = vmatmul.mubr.msk.bf16.gmra.mrb[92].mxu0 %vm1344_vm1, %v2969_v3 }
  0xdb   :  { %1886 = vmatprep.mubr.bf16.mxu1 %v2196_v4  ;;  %2724 = vmatprep.mubr.msk.bf16.mxu0 %vm2974_vm0, %v2973_v60 }
  0xe2   :  { %1887 = vmatmul.mubr.bf16.gmra.mrb[92].mxu1 %v2195_v5  ;;  %2725 = vmatmul.mubr.msk.bf16.gmra.mrb[96].mxu0 %vm1344_vm1, %v2972_v6 }
  0xf5   :  { %v2373_v7 = vpop.f32.mrb[0].mxu1  ;;  %v2349_v8 = vpop.f32.mrb[0].mxu0 }
  0xf6   :  { %v2374_v9 = vpop.f32.mrb[1].mxu1  ;;  %v2350_v10 = vpop.f32.mrb[1].mxu0 }
  0xf7   :  { %v3580_v11 = vadd.f32 %v2374_v9, %v2373_v7  ;;  %v2376_v12 = vpop.f32.mrb[2].mxu1  ;;  %v2351_v13 = vadd.f32 %v2350_v10, %v2349_v8  ;;  %v2352_v14 = vpop.f32.mrb[2].mxu0 }
  0xf8   :  { %v2377_v15 = vpop.f32.mrb[3].mxu1  ;;  %v2353_v16 = vpop.f32.mrb[3].mxu0 }
  0xf9   :  { %v3582_v60 = vadd.f32 %v2377_v15, %v2376_v12  ;;  %v2354_v17 = vadd.f32 %v2353_v16, %v2352_v14 }
  0xfd   :  { %v2355_v18 = vpop.f32.mrb[4].mxu0  ;;  %v2379_v19 = vpop.f32.mrb[4].mxu1 }
  0xfe   :  { %v2356_v20 = vpop.f32.mrb[5].mxu0  ;;  %v2380_v21 = vpop.f32.mrb[5].mxu1 }
  0xff   :  { %v2357_v22 = vadd.f32 %v2356_v20, %v2355_v18  ;;  %v2358_v23 = vpop.f32.mrb[6].mxu0  ;;  %v3584_v24 = vadd.f32 %v2380_v21, %v2379_v19  ;;  %v2382_v25 = vpop.f32.mrb[6].mxu1 }
 0x100   :  { %v2359_v26 = vpop.f32.mrb[7].mxu0  ;;  %v2383_v27 = vpop.f32.mrb[7].mxu1 }
 0x101   :  { %v2360_v28 = vadd.f32 %v2359_v26, %v2358_v23  ;;  %v3586_v29 = vadd.f32 %v2383_v27, %v2382_v25 }
 0x105   :  { %v2361_v30 = vpop.f32.mrb[8].mxu0  ;;  %v2385_v31 = vpop.f32.mrb[8].mxu1 }
 0x106   :  { %v2362_v32 = vpop.f32.mrb[9].mxu0  ;;  %v2386_v33 = vpop.f32.mrb[9].mxu1 }
 0x107   :  { %v2363_v34 = vadd.f32 %v2362_v32, %v2361_v30  ;;  %v2364_v35 = vpop.f32.mrb[10].mxu0  ;;  %v3588_v36 = vadd.f32 %v2386_v33, %v2385_v31  ;;  %v2388_v37 = vpop.f32.mrb[10].mxu1 }
 0x108   :  { %v2365_v38 = vpop.f32.mrb[11].mxu0  ;;  %v2389_v39 = vpop.f32.mrb[11].mxu1 }
 0x109   :  { %v2366_v40 = vadd.f32 %v2365_v38, %v2364_v35 }
 0x10d   :  { %v2367_v41 = vpop.f32.mrb[12].mxu0 }
 0x10e   :  { %v2368_v42 = vpop.f32.mrb[13].mxu0 }
 0x10f   :  { %v2369_v43 = vadd.f32 %v2368_v42, %v2367_v41  ;;  %v2370_v44 = vpop.f32.mrb[14].mxu0 }
 0x110   :  { %v2371_v45 = vpop.f32.mrb[15].mxu0 }
 0x111   :  { %v2372_v46 = vadd.f32 %v2371_v45, %v2370_v44 }
 0x115   :  { %v2407_v47 = vpop.f32.mrb[12].mxu1  ;;  %v2465_v48 = vpop.f32.mrb[16].mxu0 }
 0x116   :  { %v2408_v49 = vpop.f32.mrb[13].mxu1  ;;  %v2466_v50 = vpop.f32.mrb[17].mxu0 }
 0x117   :  { %v2409_v51 = vadd.f32 %v2408_v49, %v2407_v47  ;;  %v2410_v52 = vpop.f32.mrb[14].mxu1  ;;  %v2467_v53 = vadd.f32 %v2466_v50, %v2465_v48  ;;  %v2468_v54 = vpop.f32.mrb[18].mxu0 }
 0x118   :  { %v2411_v55 = vpop.f32.mrb[15].mxu1  ;;  %v2469_v56 = vpop.f32.mrb[19].mxu0 }
 0x119   :  { %v1489_v57 = vadd.f32 %v2409_v51, %v2351_v13  ;;  %v2412_v58 = vadd.f32 %v2411_v55, %v2410_v52  ;;  %v2470_v59 = vadd.f32 %v2469_v56, %v2468_v54 }
 0x11b   :  { %v1492_v61 = vadd.f32 %v2412_v58, %v2354_v17  ;;  %v3590_v62 = vadd.f32 %v2467_v53, %v1489_v57 }
 0x11d   :  { %v3592_v63 = vadd.f32 %v2470_v59, %v1492_v61  ;;  %v2413_v0 = vpop.f32.mrb[16].mxu1  ;;  %v2471_v1 = vpop.f32.mrb[20].mxu0 }
 0x11e   :  { %v2414_v2 = vpop.f32.mrb[17].mxu1  ;;  %v2472_v3 = vpop.f32.mrb[21].mxu0 }
 0x11f   :  { %v2415_v4 = vadd.f32 %v2414_v2, %v2413_v0  ;;  %v2416_v5 = vpop.f32.mrb[18].mxu1  ;;  %v2473_v6 = vadd.f32 %v2472_v3, %v2471_v1  ;;  %v2474_v7 = vpop.f32.mrb[22].mxu0 }
 0x120   :  { %v2417_v8 = vpop.f32.mrb[19].mxu1  ;;  %v2475_v9 = vpop.f32.mrb[23].mxu0 }
 0x121   :  { %v1497_v10 = vadd.f32 %v2415_v4, %v2357_v22  ;;  %v2418_v12 = vadd.f32 %v2417_v8, %v2416_v5  ;;  %v2476_v13 = vadd.f32 %v2475_v9, %v2474_v7 }
 0x123   :  { %v1500_v14 = vadd.f32 %v2418_v12, %v2360_v28  ;;  %v3594_v15 = vadd.f32 %v2473_v6, %v1497_v10 }
 0x125   :  { %v3596_v16 = vadd.f32 %v2476_v13, %v1500_v14  ;;  %v2419_v17 = vpop.f32.mrb[20].mxu1  ;;  %v2477_v18 = vpop.f32.mrb[24].mxu0 }
 0x126   :  { %v2420_v19 = vpop.f32.mrb[21].mxu1  ;;  %v2478_v20 = vpop.f32.mrb[25].mxu0 }
 0x127   :  { %v2421_v21 = vadd.f32 %v2420_v19, %v2419_v17  ;;  %v2422_v23 = vpop.f32.mrb[22].mxu1  ;;  %v2479_v25 = vadd.f32 %v2478_v20, %v2477_v18  ;;  %v2480_v26 = vpop.f32.mrb[26].mxu0 }
 0x128   :  { %v2423_v27 = vpop.f32.mrb[23].mxu1  ;;  %v2481_v30 = vpop.f32.mrb[27].mxu0 }
 0x129   :  { %v1505_v31 = vadd.f32 %v2421_v21, %v2363_v34  ;;  %v2424_v32 = vadd.f32 %v2423_v27, %v2422_v23  ;;  %v2482_v22 = vadd.f32 %v2481_v30, %v2480_v26 }
 0x12b   :  { %v1508_v33 = vadd.f32 %v2424_v32, %v2366_v40  ;;  %v3598_v35 = vadd.f32 %v2479_v25, %v1505_v31 }
 0x12d   :  { %v3600_v28 = vadd.f32 %v2482_v22, %v1508_v33  ;;  %v2425_v37 = vpop.f32.mrb[24].mxu1  ;;  %v2483_v38 = vpop.f32.mrb[28].mxu0 }
 0x12e   :  { %v2426_v39 = vpop.f32.mrb[25].mxu1  ;;  %v2484_v41 = vpop.f32.mrb[29].mxu0 }
 0x12f   :  { %v2427_v42 = vadd.f32 %v2426_v39, %v2425_v37  ;;  %v2428_v44 = vpop.f32.mrb[26].mxu1  ;;  %v2485_v45 = vadd.f32 %v2484_v41, %v2483_v38  ;;  %v2486_v47 = vpop.f32.mrb[30].mxu0 }
 0x130   :  { %v2429_v48 = vpop.f32.mrb[27].mxu1  ;;  %v2487_v49 = vpop.f32.mrb[31].mxu0 }
 0x131   :  { %v1513_v50 = vadd.f32 %v2427_v42, %v2369_v43  ;;  %v2430_v51 = vadd.f32 %v2429_v48, %v2428_v44  ;;  %v2488_v34 = vadd.f32 %v2487_v49, %v2486_v47 }
 0x133   :  { %v1516_v52 = vadd.f32 %v2430_v51, %v2372_v46  ;;  %v3602_v53 = vadd.f32 %v2485_v45, %v1513_v50 }
 0x135   :  { %v3604_v40 = vadd.f32 %v2488_v34, %v1516_v52  ;;  %v2431_v54 = vpop.f32.mrb[28].mxu1  ;;  %v2489_v55 = vpop.f32.mrb[32].mxu0 }
 0x136   :  { %v2432_v56 = vpop.f32.mrb[29].mxu1  ;;  %v2490_v57 = vpop.f32.mrb[33].mxu0 }
 0x137   :  { %v2433_v58 = vadd.f32 %v2432_v56, %v2431_v54  ;;  %v2434_v59 = vpop.f32.mrb[30].mxu1  ;;  %v2491_v61 = vadd.f32 %v2490_v57, %v2489_v55  ;;  %v2492_v0 = vpop.f32.mrb[34].mxu0 }
 0x138   :  { %v2435_v1 = vpop.f32.mrb[31].mxu1  ;;  %v2493_v2 = vpop.f32.mrb[35].mxu0 }
 0x139   :  { %v1521_v3 = vadd.f32 %v2433_v58, %v3580_v11  ;;  %v2436_v43 = vadd.f32 %v2435_v1, %v2434_v59  ;;  %v2494_v4 = vadd.f32 %v2493_v2, %v2492_v0 }
 0x13b   :  { %v1524_v46 = vadd.f32 %v2436_v43, %v3582_v60  ;;  %v3608_v5 = vadd.f32 %v2491_v61, %v1521_v3 }
 0x13d   :  { %v3610_v6 = vadd.f32 %v2494_v4, %v1524_v46  ;;  %v2437_v7 = vpop.f32.mrb[32].mxu1  ;;  %v2495_v8 = vpop.f32.mrb[36].mxu0 }
 0x13e   :  { %v2438_v9 = vpop.f32.mrb[33].mxu1  ;;  %v2496_v10 = vpop.f32.mrb[37].mxu0 }
 0x13f   :  { %v2439_v12 = vadd.f32 %v2438_v9, %v2437_v7  ;;  %v2440_v13 = vpop.f32.mrb[34].mxu1  ;;  %v2497_v14 = vadd.f32 %v2496_v10, %v2495_v8  ;;  %v2498_v17 = vpop.f32.mrb[38].mxu0 }
 0x140   :  { %v2441_v18 = vpop.f32.mrb[35].mxu1  ;;  %v2499_v19 = vpop.f32.mrb[39].mxu0 }
 0x141   :  { %v1529_v11 = vadd.f32 %v2439_v12, %v3584_v24  ;;  %v2442_v20 = vadd.f32 %v2441_v18, %v2440_v13  ;;  %v2500_v21 = vadd.f32 %v2499_v19, %v2498_v17 }
 0x143   :  { %v1532_v60 = vadd.f32 %v2442_v20, %v3586_v29  ;;  %v3614_v23 = vadd.f32 %v2497_v14, %v1529_v11 }
 0x145   :  { %v3616_v25 = vadd.f32 %v2500_v21, %v1532_v60  ;;  %v2443_v26 = vpop.f32.mrb[36].mxu1  ;;  %v2501_v27 = vpop.f32.mrb[40].mxu0 }
 0x146   :  { %v2444_v30 = vpop.f32.mrb[37].mxu1  ;;  %v2502_v31 = vpop.f32.mrb[41].mxu0 }
 0x147   :  { %v2445_v32 = vadd.f32 %v2444_v30, %v2443_v26  ;;  %v2446_v22 = vpop.f32.mrb[38].mxu1  ;;  %v2503_v33 = vadd.f32 %v2502_v31, %v2501_v27  ;;  %v2504_v37 = vpop.f32.mrb[42].mxu0 }
 0x148   :  { %v2447_v38 = vpop.f32.mrb[39].mxu1  ;;  %v2505_v39 = vpop.f32.mrb[43].mxu0 }
 0x149   :  { %v1537_v24 = vadd.f32 %v2445_v32, %v3588_v36 }
 0x14b   :  { %v3619_v41 = vadd.f32 %v2503_v33, %v1537_v24 }
 0x14d   :  { %v2523_v42 = vpop.f32.mrb[40].mxu1  ;;  %v2581_v29 = vpop.f32.mrb[44].mxu0 }
 0x14e   :  { %v2524_v44 = vpop.f32.mrb[41].mxu1  ;;  %v2582_v45 = vpop.f32.mrb[45].mxu0 }
 0x14f   :  { %v2525_v47 = vadd.f32 %v2524_v44, %v2523_v42  ;;  %v2526_v48 = vpop.f32.mrb[42].mxu1  ;;  %v2583_v49 = vadd.f32 %v2582_v45, %v2581_v29  ;;  %v2584_v50 = vpop.f32.mrb[46].mxu0 }
 0x150   :  { %v2527_v51 = vpop.f32.mrb[43].mxu1  ;;  %v2585_v34 = vpop.f32.mrb[47].mxu0 }
 0x151   :  { %v1665_v52 = vadd.f32 %v2525_v47, %v3590_v62  ;;  %v2528_v54 = vadd.f32 %v2527_v51, %v2526_v48  ;;  %v2586_v55 = vadd.f32 %v2585_v34, %v2584_v50 }
 0x153   :  { %v1668_v56 = vadd.f32 %v2528_v54, %v3592_v63  ;;  %v3623_v57 = vadd.f32 %v2583_v49, %v1665_v52 }
 0x155   :  { %v3625_v36 = vadd.f32 %v2586_v55, %v1668_v56  ;;  %v2529_v58 = vpop.f32.mrb[44].mxu1  ;;  %v2587_v59 = vpop.f32.mrb[48].mxu0 }
 0x156   :  { %v2530_v61 = vpop.f32.mrb[45].mxu1  ;;  %v2588_v0 = vpop.f32.mrb[49].mxu0 }
 0x157   :  { %v2531_v1 = vadd.f32 %v2530_v61, %v2529_v58  ;;  %v2532_v2 = vpop.f32.mrb[46].mxu1  ;;  %v2589_v3 = vadd.f32 %v2588_v0, %v2587_v59  ;;  %v2590_v43 = vpop.f32.mrb[50].mxu0 }
 0x158   :  { %v2533_v4 = vpop.f32.mrb[47].mxu1  ;;  %v2591_v46 = vpop.f32.mrb[51].mxu0 }
 0x159   :  { %v1673_v62 = vadd.f32 %v2531_v1, %v3594_v15  ;;  %v2534_v7 = vadd.f32 %v2533_v4, %v2532_v2  ;;  %v2592_v8 = vadd.f32 %v2591_v46, %v2590_v43 }
 0x15b   :  { %v1676_v63 = vadd.f32 %v2534_v7, %v3596_v16  ;;  %v3629_v9 = vadd.f32 %v2589_v3, %v1673_v62 }
 0x15d   :  { %v3631_v10 = vadd.f32 %v2592_v8, %v1676_v63  ;;  %v2535_v12 = vpop.f32.mrb[48].mxu1  ;;  %v2593_v13 = vpop.f32.mrb[52].mxu0 }
 0x15e   :  { %v2536_v14 = vpop.f32.mrb[49].mxu1  ;;  %v2594_v17 = vpop.f32.mrb[53].mxu0 }
 0x15f   :  { %v2537_v18 = vadd.f32 %v2536_v14, %v2535_v12  ;;  %v2538_v19 = vpop.f32.mrb[50].mxu1  ;;  %v2595_v11 = vadd.f32 %v2594_v17, %v2593_v13  ;;  %v2596_v20 = vpop.f32.mrb[54].mxu0 }
 0x160   :  { %v2539_v21 = vpop.f32.mrb[51].mxu1  ;;  %v2597_v60 = vpop.f32.mrb[55].mxu0 }
 0x161   :  { %v1681_v15 = vadd.f32 %v2537_v18, %v3598_v35  ;;  %v2540_v26 = vadd.f32 %v2539_v21, %v2538_v19  ;;  %v2598_v27 = vadd.f32 %v2597_v60, %v2596_v20 }
 0x163   :  { %v1684_v16 = vadd.f32 %v2540_v26, %v3600_v28  ;;  %v3635_v30 = vadd.f32 %v2595_v11, %v1681_v15 }
 0x165   :  { %v3637_v31 = vadd.f32 %v2598_v27, %v1684_v16  ;;  %v2541_v32 = vpop.f32.mrb[52].mxu1  ;;  %v2599_v22 = vpop.f32.mrb[56].mxu0 }
 0x166   :  { %v2542_v33 = vpop.f32.mrb[53].mxu1  ;;  %v2600_v37 = vpop.f32.mrb[57].mxu0 }
 0x167   :  { %v2543_v38 = vadd.f32 %v2542_v33, %v2541_v32  ;;  %v2544_v39 = vpop.f32.mrb[54].mxu1  ;;  %v2601_v24 = vadd.f32 %v2600_v37, %v2599_v22  ;;  %v2602_v42 = vpop.f32.mrb[58].mxu0 }
 0x168   :  { %v2545_v29 = vpop.f32.mrb[55].mxu1  ;;  %v2603_v44 = vpop.f32.mrb[59].mxu0 }
 0x169   :  { %v1689_v35 = vadd.f32 %v2543_v38, %v3602_v53  ;;  %v2546_v45 = vadd.f32 %v2545_v29, %v2544_v39  ;;  %v2604_v47 = vadd.f32 %v2603_v44, %v2602_v42 }
 0x16b   :  { %v1692_v28 = vadd.f32 %v2546_v45, %v3604_v40  ;;  %v3641_v48 = vadd.f32 %v2601_v24, %v1689_v35 }
 0x16d   :  { %v3643_v49 = vadd.f32 %v2604_v47, %v1692_v28  ;;  %v2547_v50 = vpop.f32.mrb[56].mxu1  ;;  %v2605_v51 = vpop.f32.mrb[60].mxu0 }
 0x16e   :  { %v2548_v34 = vpop.f32.mrb[57].mxu1  ;;  %v2606_v52 = vpop.f32.mrb[61].mxu0 }
 0x16f   :  { %v2549_v54 = vadd.f32 %v2548_v34, %v2547_v50  ;;  %v2550_v55 = vpop.f32.mrb[58].mxu1  ;;  %v2607_v56 = vadd.f32 %v2606_v52, %v2605_v51  ;;  %v2608_v58 = vpop.f32.mrb[62].mxu0  ;;  %v3664_v50 = vld [vmem:[%s3762_s2] ss:$0 sm:$0xff] }
 0x170   :  { %v2551_v59 = vpop.f32.mrb[59].mxu1  ;;  %v2609_v61 = vpop.f32.mrb[63].mxu0  ;;  %v3670_v34 = vld [vmem:[%s3763_s3] ss:$0 sm:$0xff] }
 0x171   :  { %v1697_v53 = vadd.f32 %v2549_v54, %v3608_v5  ;;  %v2552_v0 = vadd.f32 %v2551_v59, %v2550_v55  ;;  %v2610_v1 = vadd.f32 %v2609_v61, %v2608_v58 }
 0x173   :  { %v1700_v40 = vadd.f32 %v2552_v0, %v3610_v6  ;;  %v3647_v2 = vadd.f32 %v2607_v56, %v1697_v53 }
 0x175   :  { %v3649_v3 = vadd.f32 %v2610_v1, %v1700_v40  ;;  %v2553_v43 = vpop.f32.mrb[60].mxu1  ;;  %v2611_v4 = vpop.f32.mrb[64].mxu0 }
 0x176   :  { %v2554_v46 = vpop.f32.mrb[61].mxu1  ;;  %v2612_v62 = vpop.f32.mrb[65].mxu0 }
 0x177   :  { %v2555_v7 = vadd.f32 %v2554_v46, %v2553_v43  ;;  %v2556_v8 = vpop.f32.mrb[62].mxu1  ;;  %v2613_v63 = vadd.f32 %v2612_v62, %v2611_v4  ;;  %v2614_v12 = vpop.f32.mrb[66].mxu0 }
 0x178   :  { %v2557_v13 = vpop.f32.mrb[63].mxu1  ;;  %v2615_v14 = vpop.f32.mrb[67].mxu0 }
 0x179   :  { %v1705_v5 = vadd.f32 %v2555_v7, %v3614_v23  ;;  %v2558_v17 = vadd.f32 %v2557_v13, %v2556_v8  ;;  %v2616_v18 = vadd.f32 %v2615_v14, %v2614_v12 }
 0x17b   :  { %v1708_v6 = vadd.f32 %v2558_v17, %v3616_v25  ;;  %v3653_v19 = vadd.f32 %v2613_v63, %v1705_v5 }
 0x17d   :  { %v3655_v11 = vadd.f32 %v2616_v18, %v1708_v6  ;;  %v2559_v20 = vpop.f32.mrb[64].mxu1  ;;  %v2617_v21 = vpop.f32.mrb[68].mxu0 }
 0x17e   :  { %v2560_v60 = vpop.f32.mrb[65].mxu1  ;;  %v2618_v15 = vpop.f32.mrb[69].mxu0 }
 0x17f   :  { %v2561_v26 = vadd.f32 %v2560_v60, %v2559_v20  ;;  %v2562_v27 = vpop.f32.mrb[66].mxu1  ;;  %v2619_v16 = vadd.f32 %v2618_v15, %v2617_v21  ;;  %v2620_v32 = vpop.f32.mrb[70].mxu0 }
 0x180   :  { %v2563_v22 = vpop.f32.mrb[67].mxu1  ;;  %v2621_v33 = vpop.f32.mrb[71].mxu0 }
 0x181   :  { %v1713_v23 = vadd.f32 %v2561_v26, %v3619_v41 }
 0x183   :  { %v3658_v37 = vadd.f32 %v2619_v16, %v1713_v23 }
 0x185   :  { %v2639_v38 = vpop.f32.mrb[68].mxu1  ;;  %v1928_v25 = vpop.f32.mrb[72].mxu0 }
 0x186   :  { %v2640_v39 = vpop.f32.mrb[69].mxu1  ;;  %v2702_v24 = vpop.f32.mrb[73].mxu0 }
 0x187   :  { %v2641_v42 = vadd.f32 %v2640_v39, %v2639_v38  ;;  %v2642_v29 = vpop.f32.mrb[70].mxu1  ;;  %v1931_v44 = vpop.f32.mrb[74].mxu0 }
 0x188   :  { %v2643_v35 = vpop.f32.mrb[71].mxu1  ;;  %v2703_v45 = vpop.f32.mrb[75].mxu0 }
 0x189   :  { %v2644_v47 = vadd.f32 %v2643_v35, %v2642_v29  ;;  %v1841_v28 = vadd.f32 %v2641_v42, %v3623_v57 }
 0x18b   :  { %v1929_v41 = vadd.f32 %v1928_v25, %v1841_v28  ;;  %v1844_v51 = vadd.f32 %v2644_v47, %v3625_v36 }
 0x18d   :  { %v1989_v52 = vmul.f32 %v3664_v50, %v1929_v41  ;;  %v1932_v54 = vadd.f32 %v1931_v44, %v1844_v51  ;;  %v2645_v55 = vpop.f32.mrb[72].mxu1  ;;  %v1936_v56 = vpop.f32.mrb[76].mxu0 }
 0x18e   :  { %v2646_v58 = vpop.f32.mrb[73].mxu1  ;;  %v2706_v57 = vpop.f32.mrb[77].mxu0 }
 0x18f   :  { %v2009_v59 = vadd.f32 %v3670_v34, %v1989_v52  ;;  %v1990_v61 = vmul.f32 %v3664_v50, %v1932_v54  ;;  %v2647_v53 = vadd.f32 %v2646_v58, %v2645_v55  ;;  %v2648_v0 = vpop.f32.mrb[74].mxu1  ;;  %v1939_v1 = vpop.f32.mrb[78].mxu0 }
 0x190   :  { %v2649_v36 = vpop.f32.mrb[75].mxu1  ;;  %v2707_v40 = vpop.f32.mrb[79].mxu0 }
 0x191   :  { %v2022_v43 = vmax.f32 %v2009_v59, 0.0  ;;  %v2010_v4 = vadd.f32 %v3670_v34, %v1990_v61  ;;  %v2650_v46 = vadd.f32 %v2649_v36, %v2648_v0  ;;  %v1849_v62 = vadd.f32 %v2647_v53, %v3629_v9 }
 0x193   :  { %v2320_v7 = vpack.c.bf16 %v2022_v43, %v2022_v43  ;;  %v2023_v8 = vmax.f32 %v2010_v4, 0.0  ;;  %v1937_v63 = vadd.f32 %v1936_v56, %v1849_v62  ;;  %v1852_v12 = vadd.f32 %v2650_v46, %v3631_v10 }
 0x195   :  { %2089 = vst.msk [vmem:[%s3764_s4] sm:$0xf] %vm2088_vm2, %v2320_v7  ;;  %v2321_v13 = vpack.c.bf16 %v2023_v8, %v2023_v8  ;;  %v1991_v14 = vmul.f32 %v3664_v50, %v1937_v63  ;;  %v1940_v5 = vadd.f32 %v1939_v1, %v1852_v12  ;;  %v2651_v17 = vpop.f32.mrb[76].mxu1  ;;  %v1944_v18 = vpop.f32.mrb[80].mxu0 }
 0x196   :  { %v2652_v6 = vpop.f32.mrb[77].mxu1  ;;  %v2710_v20 = vpop.f32.mrb[81].mxu0 }
 0x197   :  { %2090 = vst.msk [vmem:[%s3764_s4 + $0x4] sm:$0xf] %vm2088_vm2, %v2321_v13  ;;  %v2011_v9 = vadd.f32 %v3670_v34, %v1991_v14  ;;  %v1992_v10 = vmul.f32 %v3664_v50, %v1940_v5  ;;  %v2653_v21 = vadd.f32 %v2652_v6, %v2651_v17  ;;  %v2654_v60 = vpop.f32.mrb[78].mxu1  ;;  %v1947_v15 = vpop.f32.mrb[82].mxu0 }
 0x198   :  { %v2655_v26 = vpop.f32.mrb[79].mxu1  ;;  %v2711_v27 = vpop.f32.mrb[83].mxu0 }
 0x199   :  { %v2024_v16 = vmax.f32 %v2011_v9, 0.0  ;;  %v2012_v32 = vadd.f32 %v3670_v34, %v1992_v10  ;;  %v2656_v22 = vadd.f32 %v2655_v26, %v2654_v60  ;;  %v1857_v33 = vadd.f32 %v2653_v21, %v3635_v30 }
 0x19b   :  { %v2322_v23 = vpack.c.bf16 %v2024_v16, %v2024_v16  ;;  %v2025_v38 = vmax.f32 %v2012_v32, 0.0  ;;  %v1945_v25 = vadd.f32 %v1944_v18, %v1857_v33  ;;  %v1860_v39 = vadd.f32 %v2656_v22, %v3637_v31 }
 0x19d   :  { %2091 = vst.msk [vmem:[%s3764_s4 + $0x8] sm:$0xf] %vm2088_vm2, %v2322_v23  ;;  %v2323_v24 = vpack.c.bf16 %v2025_v38, %v2025_v38  ;;  %v1993_v42 = vmul.f32 %v3664_v50, %v1945_v25  ;;  %v1948_v29 = vadd.f32 %v1947_v15, %v1860_v39  ;;  %v2657_v44 = vpop.f32.mrb[80].mxu1  ;;  %v1952_v35 = vpop.f32.mrb[84].mxu0 }
 0x19e   :  { %v2658_v45 = vpop.f32.mrb[81].mxu1  ;;  %v2714_v47 = vpop.f32.mrb[85].mxu0 }
 0x19f   :  { %2092 = vst.msk [vmem:[%s3764_s4 + $0xc] sm:$0xf] %vm2088_vm2, %v2323_v24  ;;  %v2013_v30 = vadd.f32 %v3670_v34, %v1993_v42  ;;  %v1994_v31 = vmul.f32 %v3664_v50, %v1948_v29  ;;  %v2659_v28 = vadd.f32 %v2658_v45, %v2657_v44  ;;  %v2660_v41 = vpop.f32.mrb[82].mxu1  ;;  %v1955_v51 = vpop.f32.mrb[86].mxu0 }
 0x1a0   :  { %v2661_v52 = vpop.f32.mrb[83].mxu1  ;;  %v2715_v54 = vpop.f32.mrb[87].mxu0 }
 0x1a1   :  { %v2026_v55 = vmax.f32 %v2013_v30, 0.0  ;;  %v2014_v56 = vadd.f32 %v3670_v34, %v1994_v31  ;;  %v2662_v58 = vadd.f32 %v2661_v52, %v2660_v41  ;;  %v1865_v57 = vadd.f32 %v2659_v28, %v3641_v48 }
 0x1a3   :  { %v2324_v59 = vpack.c.bf16 %v2026_v55, %v2026_v55  ;;  %v2027_v61 = vmax.f32 %v2014_v56, 0.0  ;;  %v1953_v53 = vadd.f32 %v1952_v35, %v1865_v57  ;;  %v1868_v0 = vadd.f32 %v2662_v58, %v3643_v49 }
 0x1a5   :  { %2093 = vst.msk [vmem:[%s3764_s4 + $0x10] sm:$0xf] %vm2088_vm2, %v2324_v59  ;;  %v2325_v1 = vpack.c.bf16 %v2027_v61, %v2027_v61  ;;  %v1995_v36 = vmul.f32 %v3664_v50, %v1953_v53  ;;  %v1956_v40 = vadd.f32 %v1955_v51, %v1868_v0  ;;  %v2663_v43 = vpop.f32.mrb[84].mxu1  ;;  %v1960_v4 = vpop.f32.mrb[88].mxu0 }
 0x1a6   :  { %v2664_v46 = vpop.f32.mrb[85].mxu1  ;;  %v2718_v62 = vpop.f32.mrb[89].mxu0 }
 0x1a7   :  { %2094 = vst.msk [vmem:[%s3764_s4 + $0x14] sm:$0xf] %vm2088_vm2, %v2325_v1  ;;  %v2015_v48 = vadd.f32 %v3670_v34, %v1995_v36  ;;  %v1996_v49 = vmul.f32 %v3664_v50, %v1956_v40  ;;  %v2665_v7 = vadd.f32 %v2664_v46, %v2663_v43  ;;  %v2666_v8 = vpop.f32.mrb[86].mxu1  ;;  %v1963_v63 = vpop.f32.mrb[90].mxu0 }
 0x1a8   :  { %v2667_v12 = vpop.f32.mrb[87].mxu1  ;;  %v2719_v13 = vpop.f32.mrb[91].mxu0 }
 0x1a9   :  { %v2028_v14 = vmax.f32 %v2015_v48, 0.0  ;;  %v2016_v5 = vadd.f32 %v3670_v34, %v1996_v49  ;;  %v2668_v17 = vadd.f32 %v2667_v12, %v2666_v8  ;;  %v1873_v18 = vadd.f32 %v2665_v7, %v3647_v2 }
 0x1ab   :  { %v2326_v6 = vpack.c.bf16 %v2028_v14, %v2028_v14  ;;  %v2029_v20 = vmax.f32 %v2016_v5, 0.0  ;;  %v1961_v9 = vadd.f32 %v1960_v4, %v1873_v18  ;;  %v1876_v10 = vadd.f32 %v2668_v17, %v3649_v3 }
 0x1ad   :  { %2095 = vst.msk [vmem:[%s3764_s4 + $0x18] sm:$0xf] %vm2088_vm2, %v2326_v6  ;;  %v2327_v21 = vpack.c.bf16 %v2029_v20, %v2029_v20  ;;  %v1997_v60 = vmul.f32 %v3664_v50, %v1961_v9  ;;  %v1964_v15 = vadd.f32 %v1963_v63, %v1876_v10  ;;  %v2669_v26 = vpop.f32.mrb[88].mxu1  ;;  %v1968_v27 = vpop.f32.mrb[92].mxu0 }
 0x1ae   :  { %v2670_v16 = vpop.f32.mrb[89].mxu1  ;;  %v2722_v32 = vpop.f32.mrb[93].mxu0 }
 0x1af   :  { %2096 = vst.msk [vmem:[%s3764_s4 + $0x1c] sm:$0xf] %vm2088_vm2, %v2327_v21  ;;  %v2017_v2 = vadd.f32 %v3670_v34, %v1997_v60  ;;  %v1998_v3 = vmul.f32 %v3664_v50, %v1964_v15  ;;  %v2671_v22 = vadd.f32 %v2670_v16, %v2669_v26  ;;  %v2672_v33 = vpop.f32.mrb[90].mxu1  ;;  %v1971_v23 = vpop.f32.mrb[94].mxu0 }
 0x1b0   :  { %v2673_v38 = vpop.f32.mrb[91].mxu1  ;;  %v2723_v25 = vpop.f32.mrb[95].mxu0 }
 0x1b1   :  { %v2030_v39 = vmax.f32 %v2017_v2, 0.0  ;;  %v2018_v24 = vadd.f32 %v3670_v34, %v1998_v3  ;;  %v2674_v42 = vadd.f32 %v2673_v38, %v2672_v33  ;;  %v1881_v29 = vadd.f32 %v2671_v22, %v3653_v19 }
 0x1b3   :  { %v2328_v44 = vpack.c.bf16 %v2030_v39, %v2030_v39  ;;  %v2031_v35 = vmax.f32 %v2018_v24, 0.0  ;;  %v1969_v45 = vadd.f32 %v1968_v27, %v1881_v29  ;;  %v1884_v47 = vadd.f32 %v2674_v42, %v3655_v11 }
 0x1b5   :  { %2097 = vst.msk [vmem:[%s3764_s4 + $0x20] sm:$0xf] %vm2088_vm2, %v2328_v44  ;;  %v2329_v30 = vpack.c.bf16 %v2031_v35, %v2031_v35  ;;  %v1999_v31 = vmul.f32 %v3664_v50, %v1969_v45  ;;  %v1972_v28 = vadd.f32 %v1971_v23, %v1884_v47  ;;  %v2675_v41 = vpop.f32.mrb[92].mxu1  ;;  %v1976_v51 = vpop.f32.mrb[96].mxu0 }
 0x1b6   :  { %v2676_v52 = vpop.f32.mrb[93].mxu1  ;;  %v2726_v54 = vpop.f32.mrb[97].mxu0 }
 0x1b7   :  { %2098 = vst.msk [vmem:[%s3764_s4 + $0x24] sm:$0xf] %vm2088_vm2, %v2329_v30  ;;  %v2019_v19 = vadd.f32 %v3670_v34, %v1999_v31  ;;  %v2000_v11 = vmul.f32 %v3664_v50, %v1972_v28  ;;  %v2677_v55 = vadd.f32 %v2676_v52, %v2675_v41  ;;  %v2678_v56 = vpop.f32.mrb[94].mxu1  ;;  %v1979_v58 = vpop.f32.mrb[98].mxu0 }
 0x1b8   :  { %v2679_v57 = vpop.f32.mrb[95].mxu1  ;;  %v2727_v59 = vpop.f32.mrb[99].mxu0 }
 0x1b9   :  { %v2032_v61 = vmax.f32 %v2019_v19, 0.0  ;;  %v2020_v53 = vadd.f32 %v3670_v34, %v2000_v11  ;;  %v1889_v0 = vadd.f32 %v2677_v55, %v3658_v37 }
 0x1bb   :  { %v2330_v1 = vpack.c.bf16 %v2032_v61, %v2032_v61  ;;  %v2033_v36 = vmax.f32 %v2020_v53, 0.0  ;;  %v1977_v40 = vadd.f32 %v1976_v51, %v1889_v0 }
 0x1bd   :  { %2099 = vst.msk [vmem:[%s3764_s4 + $0x28] sm:$0xf] %vm2088_vm2, %v2330_v1  ;;  %v2331_v43 = vpack.c.bf16 %v2033_v36, %v2033_v36  ;;  %v2001_v4 = vmul.f32 %v3664_v50, %v1977_v40 }
 0x1bf   :  { %2100 = vst.msk [vmem:[%s3764_s4 + $0x2c] sm:$0xf] %vm2088_vm2, %v2331_v43  ;;  %v2021_v46 = vadd.f32 %v3670_v34, %v2001_v4 }
 0x1c1   :  { %v2034_v62 = vmax.f32 %v2021_v46, 0.0 }
 0x1c3   :  { %v2332_v37 = vpack.c.bf16 %v2034_v62, %v2034_v62 }
 0x1c5   :  { %2102 = vst.msk [vmem:[%s3764_s4 + $0x30] sm:$0x1] %vm2101_vm3, %v2332_v37 }

// kernel: alexnet_map_forward.18
= control target key start
LH: loop header
LB: loop body
LE: loop exit
PB: predicated region body
PF: predicated region fallthrough
CT: control target
= control target key end

     0   :  { %s809_s1 = inlined_call_operand.vmem [shape: bf16[256,128], index: 1, kind: input, shape index: {}]   ;;  %s810_s0 = inlined_call_operand.vmem [shape: bf16[98,256], index: 0, kind: input, shape index: {}]   ;;  %s811_s2 = inlined_call_operand.vmem [shape: f32[1,128], index: 2, kind: input, shape index: {}]   ;;  %s812_s3 = inlined_call_operand.vmem [shape: f32[1,128], index: 3, kind: input, shape index: {}]   ;;  %s813_s4 = inlined_call_operand.vmem [shape: bf16[98,128], index: 4, kind: output, shape index: {}]  }
   0x1   :  { %v604_v0 = vld [vmem:[%s809_s1 + $0x40] sm:$0xff]   ;;  %v606_v2 = vld [vmem:[%s809_s1 + $0x48] sm:$0xff]   ;;  %v608_v4 = vld [vmem:[%s809_s1 + $0x50] sm:$0xff]  }
   0x2   :  { %v605_v1 = vld [vmem:[%s809_s1] sm:$0xff]   ;;  %530 = vmatprep.subr.bf16.mxu0 %v604_v0  ;;  %588 = vmatprep.subr.bf16.mxu1 %v604_v0  ;;  %v607_v3 = vld [vmem:[%s809_s1 + $0x8] sm:$0xff]   ;;  %v609_v5 = vld [vmem:[%s809_s1 + $0x10] sm:$0xff]  }
   0x3   :  { %531 = vmatpush3.bf16.msra.mxu0 %v605_v1  ;;  %596 = vmatpush3.bf16.msra.mxu1 %v605_v1  ;;  %v610_v6 = vld [vmem:[%s809_s1 + $0x58] sm:$0xff]   ;;  %v612_v8 = vld [vmem:[%s809_s1 + $0x60] sm:$0xff]   ;;  %v614_v10 = vld [vmem:[%s809_s1 + $0x68] sm:$0xff]  }
   0x4   :  { %532 = vmatprep.subr.bf16.mxu0 %v606_v2  ;;  %589 = vmatprep.subr.bf16.mxu1 %v606_v2  ;;  %v611_v7 = vld [vmem:[%s809_s1 + $0x18] sm:$0xff]   ;;  %v613_v9 = vld [vmem:[%s809_s1 + $0x20] sm:$0xff]   ;;  %v615_v13 = vld [vmem:[%s809_s1 + $0x28] sm:$0xff]  }
   0x5   :  { %v622_v11 = vld [vmem:[%s810_s0 + $0x4] ss:$8 sps:$4 sm:$0xff]   ;;  %v616_v14 = vld [vmem:[%s809_s1 + $0x70] sm:$0xff]   ;;  %v618_v16 = vld [vmem:[%s809_s1 + $0x78] sm:$0xff]  }
   0x6   :  { %v625_v12 = vld [vmem:[%s810_s0 + $0x44] ss:$8 sps:$4 sm:$0xff]   ;;  %258 = vmatprep.mubr.bf16.mxu0 %v622_v11  ;;  %v617_v15 = vld [vmem:[%s809_s1 + $0x30] sm:$0xff]   ;;  %v619_v17 = vld [vmem:[%s809_s1 + $0x38] sm:$0xff]  }
   0x7   :  { %533 = vmatpush3.bf16.msra.mxu0 %v607_v3  ;;  %597 = vmatpush3.bf16.msra.mxu1 %v607_v3  ;;  %v620_v18 = vld [vmem:[%s810_s0] ss:$8 sps:$4 sm:$0xff]   ;;  %v626_v20 = vld [vmem:[%s810_s0 + $0x14] ss:$8 sps:$4 sm:$0xff]   ;;  %v628_v23 = vld [vmem:[%s810_s0 + $0x10] ss:$8 sps:$4 sm:$0xff]  }
   0x8   :  { %534 = vmatprep.subr.bf16.mxu0 %v608_v4  ;;  %590 = vmatprep.subr.bf16.mxu1 %v608_v4  ;;  %v623_v19 = vld [vmem:[%s810_s0 + $0x40] ss:$8 sps:$4 sm:$0xff]   ;;  %v629_v21 = vld [vmem:[%s810_s0 + $0x54] ss:$8 sps:$4 sm:$0xff]   ;;  %v633_v24 = vld [vmem:[%s810_s0 + $0x50] ss:$8 sps:$4 sm:$0xff]  }
   0x9   :  { %290 = vmatprep.mubr.bf16.mxu1 %v625_v12  ;;  %v30_v22 = vld [vmem:[%s810_s0 + $0x60] sm:$0x11]  ;;  %v636_v29 = vld [vmem:[%s810_s0 + $0x34] ss:$8 sps:$4 sm:$0xff]   ;;  %v639_v30 = vld [vmem:[%s810_s0 + $0x30] ss:$8 sps:$4 sm:$0xff]  }
   0xa   :  { %v631_v25 = vld [vmem:[%s810_s0 + $0x24] ss:$8 sps:$4 sm:$0xff]   ;;  %v450_v26 = vcombine.high %v30_v22, %v30_v22  ;;  %v634_v27 = vld [vmem:[%s810_s0 + $0x20] ss:$8 sps:$4 sm:$0xff]   ;;  %v449_v28 = vcombine.low %v30_v22, %v30_v22 }
   0xb   :  { %535 = vmatpush3.bf16.msra.mxu0 %v609_v5  ;;  %598 = vmatpush3.bf16.msra.mxu1 %v609_v5  ;;  %v755_v34 = vld [vmem:[%s811_s2] ss:$0 sm:$0xff] }
   0xc   :  { %536 = vmatprep.subr.bf16.mxu0 %v610_v6  ;;  %591 = vmatprep.subr.bf16.mxu1 %v610_v6  ;;  %v760_v40 = vld [vmem:[%s812_s3] ss:$0 sm:$0xff] }
   0xf   :  { %537 = vmatpush3.bf16.msra.mxu0 %v611_v7  ;;  %599 = vmatpush3.bf16.msra.mxu1 %v611_v7 }
  0x10   :  { %538 = vmatprep.subr.bf16.mxu0 %v612_v8  ;;  %592 = vmatprep.subr.bf16.mxu1 %v612_v8 }
  0x13   :  { %539 = vmatpush3.bf16.msra.mxu0 %v613_v9  ;;  %600 = vmatpush3.bf16.msra.mxu1 %v613_v9 }
  0x14   :  { %540 = vmatprep.subr.bf16.mxu0 %v614_v10  ;;  %593 = vmatprep.subr.bf16.mxu1 %v614_v10 }
  0x17   :  { %541 = vmatpush3.bf16.msra.mxu0 %v615_v13  ;;  %601 = vmatpush3.bf16.msra.mxu1 %v615_v13 }
  0x18   :  { %542 = vmatprep.subr.bf16.mxu0 %v616_v14  ;;  %594 = vmatprep.subr.bf16.mxu1 %v616_v14 }
  0x1b   :  { %543 = vmatpush3.bf16.msra.mxu0 %v617_v15  ;;  %602 = vmatpush3.bf16.msra.mxu1 %v617_v15 }
  0x1c   :  { %544 = vmatprep.subr.bf16.mxu0 %v618_v16  ;;  %595 = vmatprep.subr.bf16.mxu1 %v618_v16 }
  0x1f   :  { %545 = vmatpush3.bf16.msra.mxu0 %v619_v17  ;;  %603 = vmatpush3.bf16.msra.mxu1 %v619_v17 }
  0x22   :  { %259 = vmatmul.mubr.bf16.vlgmr.msra.gmra.mrb[0].mxu0 %v620_v18  ;;  %291 = vmatmul.mubr.bf16.vlgmr.msra.gmra.mrb[0].mxu1 %v623_v19 }
  0x23   :  { %266 = vmatprep.mubr.bf16.mxu0 %v626_v20  ;;  %298 = vmatprep.mubr.bf16.mxu1 %v629_v21 }
  0x2a   :  { %267 = vmatmul.mubr.bf16.gmra.mrb[4].mxu0 %v628_v23  ;;  %299 = vmatmul.mubr.bf16.gmra.mrb[4].mxu1 %v633_v24 }
  0x2b   :  { %274 = vmatprep.mubr.bf16.mxu0 %v631_v25  ;;  %306 = vmatprep.mubr.bf16.mxu1 %v450_v26 }
  0x32   :  { %275 = vmatmul.mubr.bf16.gmra.mrb[8].mxu0 %v634_v27  ;;  %307 = vmatmul.mubr.bf16.gmra.mrb[8].mxu1 %v449_v28 }
  0x33   :  { %282 = vmatprep.mubr.bf16.mxu0 %v636_v29 }
  0x3a   :  { %283 = vmatmul.mubr.bf16.gmra.mrb[12].mxu0 %v639_v30 }
  0xf5   :  { %v546_v31 = vpop.f32.mrb[0].mxu0  ;;  %v570_v32 = vpop.f32.mrb[0].mxu1 }
  0xf6   :  { %v547_v33 = vpop.f32.mrb[1].mxu0  ;;  %v571_v35 = vpop.f32.mrb[1].mxu1 }
  0xf7   :  { %v548_v36 = vadd.f32 %v547_v33, %v546_v31  ;;  %v549_v37 = vpop.f32.mrb[2].mxu0  ;;  %v572_v38 = vadd.f32 %v571_v35, %v570_v32  ;;  %v573_v39 = vpop.f32.mrb[2].mxu1 }
  0xf8   :  { %v550_v41 = vpop.f32.mrb[3].mxu0  ;;  %v574_v42 = vpop.f32.mrb[3].mxu1 }
  0xf9   :  { %v321_v43 = vmul.f32 %v548_v36, %v755_v34  ;;  %v551_v44 = vadd.f32 %v550_v41, %v549_v37  ;;  %v329_v45 = vmul.f32 %v572_v38, %v755_v34  ;;  %v575_v46 = vadd.f32 %v574_v42, %v573_v39 }
  0xfb   :  { %v341_v47 = vadd.f32 %v760_v40, %v321_v43  ;;  %v322_v48 = vmul.f32 %v551_v44, %v755_v34  ;;  %v349_v49 = vadd.f32 %v760_v40, %v329_v45  ;;  %v330_v50 = vmul.f32 %v575_v46, %v755_v34 }
  0xfd   :  { %v342_v51 = vadd.f32 %v760_v40, %v322_v48  ;;  %v552_v52 = vpop.f32.mrb[4].mxu0  ;;  %v362_v53 = vmax.f32 %v349_v49, 0.0  ;;  %v350_v54 = vadd.f32 %v760_v40, %v330_v50  ;;  %v576_v55 = vpop.f32.mrb[4].mxu1  ;;  %v354_v56 = vmax.f32 %v341_v47, 0.0 }
  0xfe   :  { %v553_v57 = vpop.f32.mrb[5].mxu0  ;;  %v577_v58 = vpop.f32.mrb[5].mxu1 }
  0xff   :  { %v355_v59 = vmax.f32 %v342_v51, 0.0  ;;  %v554_v60 = vadd.f32 %v553_v57, %v552_v52  ;;  %v555_v61 = vpop.f32.mrb[6].mxu0  ;;  %v363_v62 = vmax.f32 %v350_v54, 0.0  ;;  %v578_v63 = vadd.f32 %v577_v58, %v576_v55  ;;  %v579_v0 = vpop.f32.mrb[6].mxu1 }
 0x100   :  { %v556_v1 = vpop.f32.mrb[7].mxu0  ;;  %v580_v2 = vpop.f32.mrb[7].mxu1 }
 0x101   :  { %v498_v3 = vpack.c.bf16 %v355_v59, %v354_v56  ;;  %v323_v4 = vmul.f32 %v554_v60, %v755_v34  ;;  %v518_v5 = vpack.c.bf16 %v363_v62, %v362_v53  ;;  %v557_v6 = vadd.f32 %v556_v1, %v555_v61 }
 0x102   :  { %v331_v7 = vmul.f32 %v578_v63, %v755_v34  ;;  %v581_v8 = vadd.f32 %v580_v2, %v579_v0 }
 0x103   :  { %499 = vst [vmem:[%s813_s4] sm:$0xff] %v498_v3   ;;  %v343_v9 = vadd.f32 %v760_v40, %v323_v4  ;;  %528 = vst [vmem:[%s813_s4 + $0x20] sm:$0xff] %v518_v5   ;;  %v324_v10 = vmul.f32 %v557_v6, %v755_v34 }
 0x104   :  { %v351_v11 = vadd.f32 %v760_v40, %v331_v7  ;;  %v332_v12 = vmul.f32 %v581_v8, %v755_v34 }
 0x105   :  { %v344_v13 = vadd.f32 %v760_v40, %v324_v10  ;;  %v558_v14 = vpop.f32.mrb[8].mxu0  ;;  %v582_v15 = vpop.f32.mrb[8].mxu1  ;;  %v356_v20 = vmax.f32 %v343_v9, 0.0 }
 0x106   :  { %v364_v16 = vmax.f32 %v351_v11, 0.0  ;;  %v559_v17 = vpop.f32.mrb[9].mxu0  ;;  %v352_v18 = vadd.f32 %v760_v40, %v332_v12  ;;  %v583_v19 = vpop.f32.mrb[9].mxu1 }
 0x107   :  { %v357_v21 = vmax.f32 %v344_v13, 0.0  ;;  %v560_v22 = vadd.f32 %v559_v17, %v558_v14  ;;  %v561_v23 = vpop.f32.mrb[10].mxu0  ;;  %v584_v24 = vadd.f32 %v583_v19, %v582_v15  ;;  %v585_v25 = vpop.f32.mrb[10].mxu1 }
 0x108   :  { %v365_v26 = vmax.f32 %v352_v18, 0.0  ;;  %v562_v27 = vpop.f32.mrb[11].mxu0  ;;  %v586_v28 = vpop.f32.mrb[11].mxu1 }
 0x109   :  { %v503_v29 = vpack.c.bf16 %v357_v21, %v356_v20  ;;  %v325_v30 = vmul.f32 %v560_v22, %v755_v34  ;;  %v563_v31 = vadd.f32 %v562_v27, %v561_v23  ;;  %v333_v32 = vmul.f32 %v584_v24, %v755_v34 }
 0x10a   :  { %v523_v33 = vpack.c.bf16 %v365_v26, %v364_v16 }
 0x10b   :  { %525 = vst [vmem:[%s813_s4 + $0x8] sm:$0xff] %v503_v29   ;;  %v345_v35 = vadd.f32 %v760_v40, %v325_v30  ;;  %v326_v36 = vmul.f32 %v563_v31, %v755_v34  ;;  %v353_v37 = vadd.f32 %v760_v40, %v333_v32 }
 0x10c   :  { %529 = vst [vmem:[%s813_s4 + $0x28] sm:$0xff] %v523_v33  }
 0x10d   :  { %v346_v38 = vadd.f32 %v760_v40, %v326_v36  ;;  %v564_v39 = vpop.f32.mrb[12].mxu0  ;;  %v366_v41 = vmax.f32 %v353_v37, 0.0  ;;  %v358_v43 = vmax.f32 %v345_v35, 0.0 }
 0x10e   :  { %v565_v42 = vpop.f32.mrb[13].mxu0 }
 0x10f   :  { %v359_v44 = vmax.f32 %v346_v38, 0.0  ;;  %v494_v45 = vpack.c.bf16 %v366_v41, %v366_v41  ;;  %v566_v46 = vadd.f32 %v565_v42, %v564_v39  ;;  %v567_v47 = vpop.f32.mrb[14].mxu0 }
 0x110   :  { %v568_v48 = vpop.f32.mrb[15].mxu0 }
 0x111   :  { %v508_v49 = vpack.c.bf16 %v359_v44, %v358_v43  ;;  %432 = vst [vmem:[%s813_s4 + $0x30] sm:$0x1] %v494_v45  ;;  %v327_v50 = vmul.f32 %v566_v46, %v755_v34  ;;  %v569_v51 = vadd.f32 %v568_v48, %v567_v47 }
 0x113   :  { %526 = vst [vmem:[%s813_s4 + $0x10] sm:$0xff] %v508_v49   ;;  %v347_v52 = vadd.f32 %v760_v40, %v327_v50  ;;  %v328_v53 = vmul.f32 %v569_v51, %v755_v34 }
 0x115   :  { %v348_v54 = vadd.f32 %v760_v40, %v328_v53  ;;  %v360_v55 = vmax.f32 %v347_v52, 0.0 }
 0x117   :  { %v361_v56 = vmax.f32 %v348_v54, 0.0 }
 0x119   :  { %v513_v57 = vpack.c.bf16 %v361_v56, %v360_v55 }
 0x11b   :  { %527 = vst [vmem:[%s813_s4 + $0x18] sm:$0xff] %v513_v57  }

// kernel: alexnet_map_forward.19
= control target key start
LH: loop header
LB: loop body
LE: loop exit
PB: predicated region body
PF: predicated region fallthrough
CT: control target
= control target key end

     0   :  { %s1890_s18 = smov 0   ;;  %s2359_s0 = inlined_call_operand.vmem [shape: bf16[512,288], index: 0, kind: input, shape index: {}]   ;;  %s2360_s1 = inlined_call_operand.vmem [shape: bf16[288,96], index: 1, kind: input, shape index: {}]   ;;  %s2361_s2 = inlined_call_operand.vmem [shape: f32[1,96], index: 2, kind: input, shape index: {}]   ;;  %s2362_s3 = inlined_call_operand.vmem [shape: f32[1,96], index: 3, kind: input, shape index: {}]   ;;  %s2363_s4 = inlined_call_operand.vmem [shape: f32[1,96], index: 4, kind: input, shape index: {}]   ;;  %s2364_s5 = inlined_call_operand.vmem [shape: f32[512,96], index: 5, kind: output, shape index: {}]  }
   0x1 LB: > { %s1418_s19 = sadd.s32 4294967295, %s1857_s18   ;;  %p1422_p0 = scmp.ge.s32.totalorder %s1857_s18, 1  ;;  %s1857_s18 = sphi %s1890_s18, %s15_s18  }
   0x2   : > { %p189_p1 = scmp.lt.s32.totalorder %s1857_s18, 3 }
   0x4   : > { %p190_p2 = pnand %p1422_p0, %p189_p1 }
   0x5   : > { %v1705_v0 = vld [vmem:[%s2360_s1 + $0x40] sm:$0xff] (!%p190_p2)   ;;  %s1423_s22 = sshll.u32 (!%p190_p2), %s1418_s19, 5  ;;  %v1707_v2 = vld [vmem:[%s2360_s1 + $0x48] sm:$0xff] (!%p190_p2)   ;;  %v1709_v4 = vld [vmem:[%s2360_s1 + $0x50] sm:$0xff] (!%p190_p2)   ;;  %vm680_vm0 = vcmask (!%p190_p2), 261120   ;;  %vm1329_vm3 = vcmask (!%p190_p2), 785408  }
   0x6   : > { %193 = sbr.rel (%p190_p2) target bundleno = 380 (0x17c), region = 40  ;;  %v1706_v1 = vld [vmem:[%s2360_s1] sm:$0xff] (!%p190_p2)   ;;  %1513 = vmatprep.subr.bf16.mxu0 (!%p190_p2), %v1705_v0  ;;  %1679 = vmatprep.subr.bf16.mxu1 (!%p190_p2), %v1705_v0  ;;  %p219_p3 = scmp.lt.s32.totalorder (!%p190_p2), %s1423_s22, 63  ;;  %v1708_v3 = vld [vmem:[%s2360_s1 + $0x8] sm:$0xff] (!%p190_p2)   ;;  %v1710_v5 = vld [vmem:[%s2360_s1 + $0x10] sm:$0xff] (!%p190_p2)  }
   0x7   : > { %1514 = vmatpush3.bf16.msra.mxu0 (!%p190_p2), %v1706_v1  ;;  %1687 = vmatpush3.bf16.msra.mxu1 (!%p190_p2), %v1706_v1  ;;  %v1711_v6 = vld [vmem:[%s2360_s1 + $0x58] sm:$0xff] (!%p190_p2)   ;;  %v1713_v8 = vld [vmem:[%s2360_s1 + $0x60] sm:$0xff] (!%p190_p2)   ;;  %v1715_v10 = vld [vmem:[%s2360_s1 + $0x68] sm:$0xff] (!%p190_p2)  }
   0x8   : > { %1515 = vmatprep.subr.bf16.mxu0 (!%p190_p2), %v1707_v2  ;;  %1680 = vmatprep.subr.bf16.mxu1 (!%p190_p2), %v1707_v2  ;;  %v1712_v7 = vld [vmem:[%s2360_s1 + $0x18] sm:$0xff] (!%p190_p2)   ;;  %v1714_v9 = vld [vmem:[%s2360_s1 + $0x20] sm:$0xff] (!%p190_p2)   ;;  %v1716_v13 = vld [vmem:[%s2360_s1 + $0x28] sm:$0xff] (!%p190_p2)  }
   0x9   : > { %v1717_v14 = vld [vmem:[%s2360_s1 + $0x70] sm:$0xff] (!%p190_p2)   ;;  %v1719_v16 = vld [vmem:[%s2360_s1 + $0x78] sm:$0xff] (!%p190_p2)   ;;  %v1727_v18 = vld [vmem:[%s2360_s1 + $0x80] sm:$0xff] (!%p190_p2)  }
   0xa   : > { %v1718_v15 = vld [vmem:[%s2360_s1 + $0x30] sm:$0xff] (!%p190_p2)   ;;  %v1720_v17 = vld [vmem:[%s2360_s1 + $0x38] sm:$0xff] (!%p190_p2)   ;;  %v1740_v23 = vld [vmem:[%s2360_s1 + $0x88] sm:$0xff] (!%p190_p2)  }
   0xb   : > { %1516 = vmatpush3.bf16.msra.mxu0 (!%p190_p2), %v1708_v3  ;;  %1688 = vmatpush3.bf16.msra.mxu1 (!%p190_p2), %v1708_v3 }
   0xc   : > { %1517 = vmatprep.subr.bf16.mxu0 (!%p190_p2), %v1709_v4  ;;  %1681 = vmatprep.subr.bf16.mxu1 (!%p190_p2), %v1709_v4 }
   0xd   : > { %s2366_s22 = smov (!%p219_p3, %s1423_s22), 63 }
   0xe   : > { %s1695_s10 = smul.u32 12, %s2366_s22  ;;  %s1426_s20 = sshll.u32 %s2366_s22, 3 }
   0xf   : > { %1518 = vmatpush3.bf16.msra.mxu0 %v1710_v5  ;;  %1689 = vmatpush3.bf16.msra.mxu1 %v1710_v5  ;;  %s2111_s23 = scalar_lea.vmem %s2364_s5, %s1426_s20 }
  0x10   : > { %1519 = vmatprep.subr.bf16.mxu0 %v1711_v6  ;;  %1682 = vmatprep.subr.bf16.mxu1 %v1711_v6  ;;  %s1931_s17 = scalar_lea.vmem %s2359_s0, %s1695_s10 }
  0x11   : > { %v1723_v11 = vld [vmem:[%s1931_s17 + $0x4] ss:$12 sps:$4 sm:$0xff]   ;;  %v1721_v19 = vld [vmem:[%s1931_s17] ss:$12 sps:$4 sm:$0xff]   ;;  %v1728_v21 = vld [vmem:[%s1931_s17 + $0x1c] ss:$12 sps:$4 sm:$0xff]  }
  0x12   : > { %v1726_v12 = vld [vmem:[%s1931_s17 + $0x124] ss:$12 sps:$4 sm:$0xff]   ;;  %761 = vmatprep.mubr.bf16.mxu0 %v1723_v11  ;;  %v1724_v20 = vld [vmem:[%s1931_s17 + $0x120] ss:$12 sps:$4 sm:$0xff]   ;;  %v1730_v22 = vld [vmem:[%s1931_s17 + $0x13c] ss:$12 sps:$4 sm:$0xff]  }
  0x13   : > { %1520 = vmatpush3.bf16.msra.mxu0 %v1712_v7  ;;  %1690 = vmatpush3.bf16.msra.mxu1 %v1712_v7  ;;  %v1732_v24 = vld [vmem:[%s1931_s17 + $0x18] ss:$12 sps:$4 sm:$0xff]   ;;  %v1734_v26 = vld [vmem:[%s1931_s17 + $0x34] ss:$12 sps:$4 sm:$0xff]   ;;  %v1738_v28 = vld [vmem:[%s1931_s17 + $0x30] ss:$12 sps:$4 sm:$0xff]  }
  0x14   : > { %1521 = vmatprep.subr.bf16.mxu0 %v1713_v8  ;;  %1683 = vmatprep.subr.bf16.mxu1 %v1713_v8  ;;  %v1733_v25 = vld [vmem:[%s1931_s17 + $0x138] ss:$12 sps:$4 sm:$0xff]   ;;  %v1736_v27 = vld [vmem:[%s1931_s17 + $0x154] ss:$12 sps:$4 sm:$0xff]   ;;  %v1739_v29 = vld [vmem:[%s1931_s17 + $0x150] ss:$12 sps:$4 sm:$0xff]  }
  0x15   : > { %857 = vmatprep.mubr.bf16.mxu1 %v1726_v12  ;;  %v1741_v30 = vld [vmem:[%s1931_s17 + $0x4c] ss:$12 sps:$4 sm:$0xff]   ;;  %v1745_v32 = vld [vmem:[%s1931_s17 + $0x48] ss:$12 sps:$4 sm:$0xff]   ;;  %v1747_v34 = vld [vmem:[%s1931_s17 + $0x64] ss:$12 sps:$4 sm:$0xff]  }
  0x16   : > { %v1743_v31 = vld [vmem:[%s1931_s17 + $0x16c] ss:$12 sps:$4 sm:$0xff]   ;;  %v1746_v33 = vld [vmem:[%s1931_s17 + $0x168] ss:$12 sps:$4 sm:$0xff]   ;;  %v1756_v41 = vld [vmem:[%s1931_s17 + $0x50] ss:$12 sps:$4 sm:$0xff]  }
  0x17   : > { %1522 = vmatpush3.bf16.msra.mxu0 %v1714_v9  ;;  %1691 = vmatpush3.bf16.msra.mxu1 %v1714_v9  ;;  %v1749_v35 = vld [vmem:[%s1931_s17 + $0x8] ss:$12 sps:$4 sm:$0xff]   ;;  %v1750_v36 = vld [vmem:[%s1931_s17 + $0x60] ss:$12 sps:$4 sm:$0xff]   ;;  %v1754_v39 = vld [vmem:[%s1931_s17 + $0x38] ss:$12 sps:$4 sm:$0xff]  }
  0x18   : > { %1523 = vmatprep.subr.bf16.mxu0 %v1715_v10  ;;  %1684 = vmatprep.subr.bf16.mxu1 %v1715_v10  ;;  %v1751_v37 = vld [vmem:[%s1931_s17 + $0x20] ss:$12 sps:$4 sm:$0xff]   ;;  %v1752_v38 = vld [vmem:[%s1931_s17 + $0x7c] ss:$12 sps:$4 sm:$0xff]   ;;  %v1755_v40 = vld [vmem:[%s1931_s17 + $0x78] ss:$12 sps:$4 sm:$0xff]  }
  0x19   : > { %v1757_v42 = vld [vmem:[%s1931_s17 + $0x94] ss:$12 sps:$4 sm:$0xff]   ;;  %v1760_v44 = vld [vmem:[%s1931_s17 + $0x90] ss:$12 sps:$4 sm:$0xff]   ;;  %v1762_v46 = vld [vmem:[%s1931_s17 + $0xac] ss:$12 sps:$4 sm:$0xff]  }
  0x1a   : > { %v1759_v43 = vld [vmem:[%s1931_s17 + $0x68] ss:$12 sps:$4 sm:$0xff]   ;;  %v1761_v45 = vld [vmem:[%s1931_s17 + $0x80] ss:$12 sps:$4 sm:$0xff]   ;;  %v1764_v47 = vld [vmem:[%s1931_s17 + $0x98] ss:$12 sps:$4 sm:$0xff]  }
  0x1b   : > { %1524 = vmatpush3.bf16.msra.mxu0 %v1716_v13  ;;  %1692 = vmatpush3.bf16.msra.mxu1 %v1716_v13  ;;  %v1765_v48 = vld [vmem:[%s1931_s17 + $0xa8] ss:$12 sps:$4 sm:$0xff]   ;;  %v1766_v49 = vld [vmem:[%s1931_s17 + $0xb0] ss:$12 sps:$4 sm:$0xff]   ;;  %v1770_v52 = vld [vmem:[%s1931_s17 + $0xc0] ss:$12 sps:$4 sm:$0xff]  }
  0x1c   : > { %1525 = vmatprep.subr.bf16.mxu0 %v1717_v14  ;;  %1685 = vmatprep.subr.bf16.mxu1 %v1717_v14  ;;  %v1767_v50 = vld [vmem:[%s1931_s17 + $0xc4] ss:$12 sps:$4 sm:$0xff]   ;;  %v1769_v51 = vld [vmem:[%s1931_s17 + $0xc8] ss:$12 sps:$4 sm:$0xff]   ;;  %v1771_v53 = vld [vmem:[%s1931_s17 + $0xe0] ss:$12 sps:$4 sm:$0xff]  }
  0x1d   : > { %v1772_v54 = vld [vmem:[%s1931_s17 + $0xdc] ss:$12 sps:$4 sm:$0xff]   ;;  %v1774_v55 = vld [vmem:[%s1931_s17 + $0xf8] ss:$12 sps:$4 sm:$0xff]   ;;  %v1777_v58 = vld [vmem:[%s1931_s17 + $0xf4] ss:$12 sps:$4 sm:$0xff]  }
  0x1e   : > { %v1775_v56 = vld [vmem:[%s1931_s17 + $0xd8] ss:$12 sps:$4 sm:$0xff]   ;;  %v1776_v57 = vld [vmem:[%s1931_s17 + $0x110] ss:$12 sps:$4 sm:$0xff]   ;;  %v1779_v59 = vld [vmem:[%s1931_s17 + $0x128] ss:$12 sps:$4 sm:$0xff]  }
  0x1f   : > { %1526 = vmatpush3.bf16.msra.mxu0 %v1718_v15  ;;  %1693 = vmatpush3.bf16.msra.mxu1 %v1718_v15  ;;  %v1780_v60 = vld [vmem:[%s1931_s17 + $0xf0] ss:$12 sps:$4 sm:$0xff]   ;;  %v1781_v61 = vld [vmem:[%s1931_s17 + $0x140] ss:$12 sps:$4 sm:$0xff]   ;;  %v1784_v63 = vld [vmem:[%s1931_s17 + $0x158] ss:$12 sps:$4 sm:$0xff]  }
  0x20   : > { %1527 = vmatprep.subr.bf16.mxu0 %v1719_v16  ;;  %1686 = vmatprep.subr.bf16.mxu1 %v1719_v16  ;;  %v1782_v62 = vld [vmem:[%s1931_s17 + $0x10c] ss:$12 sps:$4 sm:$0xff]   ;;  %v1785_v0 = vld [vmem:[%s1931_s17 + $0x108] ss:$12 sps:$4 sm:$0xff]   ;;  %v1786_v1 = vld [vmem:[%s1931_s17 + $0x170] ss:$12 sps:$4 sm:$0xff]  }
  0x23   : > { %1528 = vmatpush3.bf16.msra.mxu0 %v1720_v17  ;;  %1694 = vmatpush3.bf16.msra.mxu1 %v1720_v17 }
  0x24   : > { %1643 = vmatprep.subr.bf16.mxu1 %v1727_v18 }
  0x26   : > { %762 = vmatmul.mubr.bf16.vlgmr.msra.gmra.mrb[0].mxu0 %v1721_v19  ;;  %858 = vmatmul.mubr.bf16.vlgmr.msra.gmra.mrb[0].mxu1 %v1724_v20 }
  0x27   : > { %1644 = vmatpush3.bf16.msra.mxu1 %v1727_v18  ;;  %769 = vmatprep.mubr.bf16.mxu0 %v1728_v21 }
  0x28   : > { %865 = vmatprep.mubr.bf16.mxu1 %v1730_v22  ;;  %1645 = vmatprep.subr.bf16.mxu1 %v1740_v23 }
  0x2b   : > { %1646 = vmatpush3.bf16.msra.mxu1 %v1740_v23 }
  0x2e   : > { %770 = vmatmul.mubr.bf16.gmra.mrb[4].mxu0 %v1732_v24  ;;  %866 = vmatmul.mubr.bf16.gmra.mrb[4].mxu1 %v1733_v25 }
  0x2f   : > { %777 = vmatprep.mubr.bf16.mxu0 %v1734_v26  ;;  %873 = vmatprep.mubr.bf16.mxu1 %v1736_v27 }
  0x36   : > { %778 = vmatmul.mubr.bf16.gmra.mrb[8].mxu0 %v1738_v28  ;;  %874 = vmatmul.mubr.bf16.gmra.mrb[8].mxu1 %v1739_v29 }
  0x37   : > { %785 = vmatprep.mubr.bf16.mxu0 %v1741_v30  ;;  %881 = vmatprep.mubr.bf16.mxu1 %v1743_v31 }
  0x3e   : > { %786 = vmatmul.mubr.bf16.gmra.mrb[12].mxu0 %v1745_v32  ;;  %882 = vmatmul.mubr.bf16.gmra.mrb[12].mxu1 %v1746_v33 }
  0x3f   : > { %793 = vmatprep.mubr.bf16.mxu0 %v1747_v34  ;;  %1647 = vmatprep.mubr.msk.bf16.mxu1 %vm680_vm0, %v1749_v35 }
  0x46   : > { %794 = vmatmul.mubr.bf16.gmra.mrb[16].mxu0 %v1750_v36  ;;  %1648 = vmatmul.mubr.msk.bf16.vlgmr.msra.gmra.mrb[16].mxu1 %vm680_vm0, %v1751_v37 }
  0x47   : > { %801 = vmatprep.mubr.bf16.mxu0 %v1752_v38  ;;  %1651 = vmatprep.mubr.msk.bf16.mxu1 %vm680_vm0, %v1754_v39  ;;  %v1164_v38 = vlaneseq }
  0x4e   : > { %802 = vmatmul.mubr.bf16.gmra.mrb[20].mxu0 %v1755_v40  ;;  %1652 = vmatmul.mubr.msk.bf16.gmra.mrb[20].mxu1 %vm680_vm0, %v1756_v41 }
  0x4f   : > { %809 = vmatprep.mubr.bf16.mxu0 %v1757_v42  ;;  %1655 = vmatprep.mubr.msk.bf16.mxu1 %vm680_vm0, %v1759_v43  ;;  %v1129_v43 = vld [vmem:[%s2363_s4] sm:$0x1] }
  0x50   : > { %vm1130_vm1 = vcmp.gt.f32.partialorder %v1129_v43, 0.5 }
  0x56   : > { %810 = vmatmul.mubr.bf16.gmra.mrb[24].mxu0 %v1760_v44  ;;  %1656 = vmatmul.mubr.msk.bf16.gmra.mrb[24].mxu1 %vm680_vm0, %v1761_v45 }
  0x57   : > { %817 = vmatprep.mubr.bf16.mxu0 %v1762_v46  ;;  %1659 = vmatprep.mubr.msk.bf16.mxu1 %vm680_vm0, %v1764_v47 }
  0x5e   : > { %818 = vmatmul.mubr.bf16.gmra.mrb[28].mxu0 %v1765_v48  ;;  %1660 = vmatmul.mubr.msk.bf16.gmra.mrb[28].mxu1 %vm680_vm0, %v1766_v49  ;;  %v1165_v48 = vshrl.u32 %v1164_v38, 7 }
  0x5f   : > { %825 = vmatprep.mubr.bf16.mxu0 %v1767_v50  ;;  %1663 = vmatprep.mubr.msk.bf16.mxu1 %vm680_vm0, %v1769_v51 }
  0x66   : > { %826 = vmatmul.mubr.bf16.gmra.mrb[32].mxu0 %v1770_v52  ;;  %1664 = vmatmul.mubr.msk.bf16.gmra.mrb[32].mxu1 %vm680_vm0, %v1771_v53  ;;  %v1166_v53 = vsub.s32 0, %v1165_v48 }
  0x67   : > { %833 = vmatprep.mubr.bf16.mxu0 %v1772_v54  ;;  %1667 = vmatprep.mubr.msk.bf16.mxu1 %vm680_vm0, %v1774_v55  ;;  %v1859_v54 = vmov 0  }
  0x68   : > { %v1163_v55 = vsel %vm1130_vm1, 1, %v1859_v54 }
  0x6e   : > { %834 = vmatmul.mubr.bf16.gmra.mrb[36].mxu0 %v1775_v56  ;;  %1668 = vmatmul.mubr.msk.bf16.gmra.mrb[36].mxu1 %vm680_vm0, %v1776_v57 }
  0x6f   : > { %841 = vmatprep.mubr.bf16.mxu0 %v1777_v58  ;;  %1671 = vmatprep.mubr.msk.bf16.mxu1 %vm680_vm0, %v1779_v59  ;;  %v2052_v58 = vld [vmem:[%s2361_s2] ss:$0 sm:$0xff] }
  0x76   : > { %842 = vmatmul.mubr.bf16.gmra.mrb[40].mxu0 %v1780_v60  ;;  %1672 = vmatmul.mubr.msk.bf16.gmra.mrb[40].mxu1 %vm680_vm0, %v1781_v61 }
  0x77   : > { %849 = vmatprep.mubr.bf16.mxu0 %v1782_v62  ;;  %1675 = vmatprep.mubr.msk.bf16.mxu1 %vm680_vm0, %v1784_v63  ;;  %v2057_v62 = vld [vmem:[%s2362_s3] ss:$0 sm:$0xff]  ;;  %v2059_v63 = vrot.slane %v1163_v55, %v1166_v53 }
  0x79   : > { %vm1168_vm2 = vcmp.eq.s32.totalorder %v2059_v63, 1 }
  0x7e   : > { %850 = vmatmul.mubr.bf16.gmra.mrb[44].mxu0 %v1785_v0  ;;  %1676 = vmatmul.mubr.msk.bf16.gmra.mrb[44].mxu1 %vm680_vm0, %v1786_v1 }
  0xf9   : > { %v1529_v2 = vpop.f32.mrb[0].mxu0  ;;  %v1601_v3 = vpop.f32.mrb[0].mxu1 }
  0xfa   : > { %v1530_v4 = vpop.f32.mrb[1].mxu0  ;;  %v1602_v5 = vpop.f32.mrb[1].mxu1 }
  0xfb   : > { %v1531_v6 = vadd.f32 %v1530_v4, %v1529_v2  ;;  %v2024_v7 = vadd.f32 %v1602_v5, %v1601_v3  ;;  %v1532_v8 = vpop.f32.mrb[2].mxu0  ;;  %v1604_v9 = vpop.f32.mrb[2].mxu1 }
  0xfc   : > { %v1533_v10 = vpop.f32.mrb[3].mxu0  ;;  %v1605_v11 = vpop.f32.mrb[3].mxu1 }
  0xfd   : > { %v2026_v12 = vadd.f32 %v1533_v10, %v1532_v8  ;;  %v2028_v13 = vadd.f32 %v1605_v11, %v1604_v9 }
 0x101   : > { %v1535_v14 = vpop.f32.mrb[4].mxu0  ;;  %v1607_v15 = vpop.f32.mrb[4].mxu1 }
 0x102   : > { %v1536_v16 = vpop.f32.mrb[5].mxu0  ;;  %v1608_v17 = vpop.f32.mrb[5].mxu1 }
 0x103   : > { %v1537_v18 = vadd.f32 %v1536_v16, %v1535_v14  ;;  %v2030_v19 = vadd.f32 %v1608_v17, %v1607_v15  ;;  %v1538_v20 = vpop.f32.mrb[6].mxu0  ;;  %v1610_v21 = vpop.f32.mrb[6].mxu1 }
 0x104   : > { %v1539_v22 = vpop.f32.mrb[7].mxu0  ;;  %v1611_v23 = vpop.f32.mrb[7].mxu1 }
 0x105   : > { %v1540_v24 = vadd.f32 %v1539_v22, %v1538_v20  ;;  %v2032_v25 = vadd.f32 %v1611_v23, %v1610_v21 }
 0x109   : > { %v1541_v26 = vpop.f32.mrb[8].mxu0  ;;  %v1613_v27 = vpop.f32.mrb[8].mxu1 }
 0x10a   : > { %v1542_v28 = vpop.f32.mrb[9].mxu0  ;;  %v1614_v29 = vpop.f32.mrb[9].mxu1 }
 0x10b   : > { %v2034_v30 = vadd.f32 %v1542_v28, %v1541_v26  ;;  %v2036_v31 = vadd.f32 %v1614_v29, %v1613_v27  ;;  %v1544_v32 = vpop.f32.mrb[10].mxu0  ;;  %v1616_v33 = vpop.f32.mrb[10].mxu1 }
 0x10c   : > { %v1545_v34 = vpop.f32.mrb[11].mxu0  ;;  %v1617_v35 = vpop.f32.mrb[11].mxu1 }
 0x10d   : > { %v2038_v36 = vadd.f32 %v1545_v34, %v1544_v32  ;;  %v2040_v37 = vadd.f32 %v1617_v35, %v1616_v33 }
 0x111   : > { %v1547_v39 = vpop.f32.mrb[12].mxu0  ;;  %v1619_v40 = vpop.f32.mrb[12].mxu1 }
 0x112   : > { %v1548_v41 = vpop.f32.mrb[13].mxu0  ;;  %v1620_v42 = vpop.f32.mrb[13].mxu1 }
 0x113   : > { %v1549_v44 = vadd.f32 %v1548_v41, %v1547_v39  ;;  %v2045_v45 = vadd.f32 %v1620_v42, %v1619_v40  ;;  %v1550_v46 = vpop.f32.mrb[14].mxu0  ;;  %v1622_v47 = vpop.f32.mrb[14].mxu1 }
 0x114   : > { %v1551_v49 = vpop.f32.mrb[15].mxu0  ;;  %v1623_v50 = vpop.f32.mrb[15].mxu1 }
 0x115   : > { %v1552_v51 = vadd.f32 %v1551_v49, %v1550_v46  ;;  %v2047_v52 = vadd.f32 %v1623_v50, %v1622_v47 }
 0x119   : > { %v1553_v56 = vpop.f32.mrb[16].mxu0  ;;  %v1649_v57 = vpop.f32.mrb[16].mxu1 }
 0x11a   : > { %v933_v59 = vadd.f32 %v1649_v57, %v1537_v18  ;;  %v1554_v60 = vpop.f32.mrb[17].mxu0  ;;  %v924_v61 = vpop.f32.mrb[17].mxu1 }
 0x11b   : > { %v2061_v0 = vadd.f32 %v1554_v60, %v1553_v56  ;;  %v925_v1 = vadd.f32 %v1531_v6, %v924_v61  ;;  %v1556_v2 = vpop.f32.mrb[18].mxu0  ;;  %v1650_v3 = vpop.f32.mrb[18].mxu1 }
 0x11c   : > { %v1060_v4 = vmul.f32 %v2052_v58, %v933_v59  ;;  %v936_v5 = vadd.f32 %v1650_v3, %v1540_v24  ;;  %v1557_v8 = vpop.f32.mrb[19].mxu0  ;;  %v927_v9 = vpop.f32.mrb[19].mxu1 }
 0x11d   : > { %v1058_v10 = vmul.f32 %v2052_v58, %v925_v1  ;;  %v2065_v11 = vadd.f32 %v1557_v8, %v1556_v2  ;;  %v928_v14 = vadd.f32 %v2026_v12, %v927_v9 }
 0x11e   : > { %v1099_v15 = vadd.f32 %v2057_v62, %v1060_v4  ;;  %v1061_v16 = vmul.f32 %v2052_v58, %v936_v5 }
 0x11f   : > { %v1097_v6 = vadd.f32 %v2057_v62, %v1058_v10  ;;  %v1059_v17 = vmul.f32 %v2052_v58, %v928_v14 }
 0x120   : > { %v1133_v18 = vmul.f32 0.5, %v1099_v15  ;;  %v1100_v20 = vadd.f32 %v2057_v62, %v1061_v16 }
 0x121   : > { %v1131_v21 = vmul.f32 0.5, %v1097_v6  ;;  %v1098_v22 = vadd.f32 %v2057_v62, %v1059_v17  ;;  %v1559_v23 = vpop.f32.mrb[20].mxu0  ;;  %v1653_v24 = vpop.f32.mrb[20].mxu1 }
 0x122   : > { %v1171_v12 = vsel %vm1168_vm2, %v1099_v15, %v1133_v18  ;;  %v1134_v26 = vmul.f32 0.5, %v1100_v20  ;;  %v949_v27 = vadd.f32 %v1653_v24, %v1549_v44  ;;  %v1560_v28 = vpop.f32.mrb[21].mxu0  ;;  %v940_v29 = vpop.f32.mrb[21].mxu1 }
 0x123   : > { %1787 = vtanh.f32 %v1171_v12  ;;  %v1169_v32 = vsel %vm1168_vm2, %v1097_v6, %v1131_v21  ;;  %v1132_v33 = vmul.f32 0.5, %v1098_v22  ;;  %v1561_v34 = vadd.f32 %v1560_v28, %v1559_v23  ;;  %v1562_v35 = vpop.f32.mrb[22].mxu0  ;;  %v1654_v38 = vpop.f32.mrb[22].mxu1 }
 0x124   : > { %1789 = vtanh.f32 %v1169_v32  ;;  %v1172_v39 = vsel %vm1168_vm2, %v1100_v20, %v1134_v26  ;;  %v1064_v40 = vmul.f32 %v2052_v58, %v949_v27  ;;  %v941_v41 = vadd.f32 %v2034_v30, %v940_v29  ;;  %v1563_v42 = vpop.f32.mrb[23].mxu0  ;;  %v943_v43 = vpop.f32.mrb[23].mxu1 }
 0x125   : > { %1791 = vtanh.f32 %v1172_v39  ;;  %v1170_v44 = vsel %vm1168_vm2, %v1098_v22, %v1132_v33  ;;  %v952_v46 = vadd.f32 %v1654_v38, %v1552_v51  ;;  %v1564_v47 = vadd.f32 %v1563_v42, %v1562_v35 }
 0x126   : > { %1793 = vtanh.f32 %v1170_v44  ;;  %v1103_v48 = vadd.f32 %v2057_v62, %v1064_v40  ;;  %v1062_v49 = vmul.f32 %v2052_v58, %v941_v41  ;;  %v944_v50 = vadd.f32 %v2038_v36, %v943_v43 }
 0x127   : > { %v1065_v53 = vmul.f32 %v2052_v58, %v952_v46 }
 0x128   : > { %v1137_v54 = vmul.f32 0.5, %v1103_v48  ;;  %v1101_v30 = vadd.f32 %v2057_v62, %v1062_v49  ;;  %v1063_v55 = vmul.f32 %v2052_v58, %v944_v50 }
 0x129   : > { %v1104_v56 = vadd.f32 %v2057_v62, %v1065_v53  ;;  %v1565_v57 = vpop.f32.mrb[24].mxu0  ;;  %v1657_v51 = vpop.f32.mrb[24].mxu1 }
 0x12a   : > { %v1175_v59 = vsel %vm1168_vm2, %v1103_v48, %v1137_v54  ;;  %v1135_v60 = vmul.f32 0.5, %v1101_v30  ;;  %v1102_v61 = vadd.f32 %v2057_v62, %v1063_v55  ;;  %v965_v1 = vadd.f32 %v1657_v51, %v1561_v34  ;;  %v1566_v36 = vpop.f32.mrb[25].mxu0  ;;  %v956_v2 = vpop.f32.mrb[25].mxu1 }
 0x12b   : > { %1795 = vtanh.f32 %v1175_v59  ;;  %v1138_v3 = vmul.f32 0.5, %v1104_v56  ;;  %v1567_v4 = vadd.f32 %v1566_v36, %v1565_v57  ;;  %v957_v5 = vadd.f32 %v2061_v0, %v956_v2  ;;  %v1568_v8 = vpop.f32.mrb[26].mxu0  ;;  %v1658_v9 = vpop.f32.mrb[26].mxu1 }
 0x12c   : > { %v1173_v10 = vsel %vm1168_vm2, %v1101_v30, %v1135_v60  ;;  %v1136_v14 = vmul.f32 0.5, %v1102_v61  ;;  %v1068_v15 = vmul.f32 %v2052_v58, %v965_v1  ;;  %v968_v16 = vadd.f32 %v1658_v9, %v1564_v47  ;;  %v1569_v6 = vpop.f32.mrb[27].mxu0  ;;  %v959_v17 = vpop.f32.mrb[27].mxu1 }
 0x12d   : > { %v1788_v18 = vpop.eup %1787  ;;  %1797 = vtanh.f32 %v1173_v10  ;;  %v1176_v20 = vsel %vm1168_vm2, %v1104_v56, %v1138_v3  ;;  %v1066_v21 = vmul.f32 %v2052_v58, %v957_v5  ;;  %v1570_v0 = vadd.f32 %v1569_v6, %v1568_v8 }
 0x12e   : > { %v1790_v22 = vpop.eup %1789  ;;  %v1235_v23 = vadd.f32 1.0, %v1788_v18  ;;  %1799 = vtanh.f32 %v1176_v20  ;;  %v1174_v24 = vsel %vm1168_vm2, %v1102_v61, %v1136_v14  ;;  %v1107_v12 = vadd.f32 %v2057_v62, %v1068_v15 }
 0x12f   : > { %v1792_v26 = vpop.eup %1791  ;;  %v1233_v27 = vadd.f32 1.0, %v1790_v22  ;;  %1801 = vtanh.f32 %v1174_v24  ;;  %v1105_v28 = vadd.f32 %v2057_v62, %v1066_v21  ;;  %v1069_v29 = vmul.f32 %v2052_v58, %v968_v16 }
 0x130   : > { %v1794_v32 = vpop.eup %1793  ;;  %v1267_v33 = vmul.f32 0.5, %v1235_v23  ;;  %v1236_v34 = vadd.f32 1.0, %v1792_v26  ;;  %v1141_v35 = vmul.f32 0.5, %v1107_v12  ;;  %v960_v38 = vadd.f32 %v2065_v11, %v959_v17 }
 0x131   : > { %v1265_v39 = vmul.f32 0.5, %v1233_v27  ;;  %v1234_v40 = vadd.f32 1.0, %v1794_v32  ;;  %v1139_v41 = vmul.f32 0.5, %v1105_v28  ;;  %v1108_v42 = vadd.f32 %v2057_v62, %v1069_v29  ;;  %v1571_v43 = vpop.f32.mrb[28].mxu0  ;;  %v1661_v44 = vpop.f32.mrb[28].mxu1 }
 0x132   : > { %v1299_v46 = vsel %vm1168_vm2, %v1788_v18, %v1267_v33  ;;  %v1268_v47 = vmul.f32 0.5, %v1236_v34  ;;  %v1179_v48 = vsel %vm1168_vm2, %v1107_v12, %v1141_v35  ;;  %v1067_v49 = vmul.f32 %v2052_v58, %v960_v38  ;;  %v1572_v50 = vpop.f32.mrb[29].mxu0  ;;  %v972_v53 = vpop.f32.mrb[29].mxu1 }
 0x133   : > { %1332 = vst.msk [vmem:[%s2111_s23 + $0x10] sm:$0xff] %vm1329_vm3, %v1299_v46  ;;  %v1297_v11 = vsel %vm1168_vm2, %v1790_v22, %v1265_v39  ;;  %v1266_v54 = vmul.f32 0.5, %v1234_v40  ;;  %1803 = vtanh.f32 %v1179_v48  ;;  %v1177_v30 = vsel %vm1168_vm2, %v1105_v28, %v1139_v41  ;;  %v1574_v55 = vpop.f32.mrb[30].mxu0  ;;  %v1662_v56 = vpop.f32.mrb[30].mxu1 }
 0x134   : > { %1330 = vst.msk [vmem:[%s2111_s23] sm:$0xff] %vm1329_vm3, %v1297_v11  ;;  %v1300_v57 = vsel %vm1168_vm2, %v1792_v26, %v1268_v47  ;;  %1805 = vtanh.f32 %v1177_v30  ;;  %v1142_v51 = vmul.f32 0.5, %v1108_v42  ;;  %v1106_v59 = vadd.f32 %v2057_v62, %v1067_v49  ;;  %v1575_v60 = vpop.f32.mrb[31].mxu0  ;;  %v975_v61 = vpop.f32.mrb[31].mxu1 }
 0x135   : > { %v1796_v1 = vpop.eup %1795  ;;  %1333 = vst.msk [vmem:[%s2111_s23 + $0x18] sm:$0xff] %vm1329_vm3, %v1300_v57  ;;  %v1298_v36 = vsel %vm1168_vm2, %v1794_v32, %v1266_v54  ;;  %v1573_v2 = vadd.f32 %v1572_v50, %v1571_v43  ;;  %v973_v3 = vadd.f32 %v1567_v4, %v972_v53  ;;  %v1576_v5 = vadd.f32 %v1575_v60, %v1574_v55 }
 0x136   : > { %1331 = vst.msk [vmem:[%s2111_s23 + $0x8] sm:$0xff] %vm1329_vm3, %v1298_v36  ;;  %v1239_v8 = vadd.f32 1.0, %v1796_v1  ;;  %v1180_v9 = vsel %vm1168_vm2, %v1108_v42, %v1142_v51  ;;  %v1140_v10 = vmul.f32 0.5, %v1106_v59  ;;  %v976_v14 = vadd.f32 %v1570_v0, %v975_v61 }
 0x137   : > { %v1798_v15 = vpop.eup %1797  ;;  %1807 = vtanh.f32 %v1180_v9  ;;  %v981_v16 = vadd.f32 %v1661_v44, %v1573_v2  ;;  %v1070_v6 = vmul.f32 %v2052_v58, %v973_v3  ;;  %v984_v17 = vadd.f32 %v1662_v56, %v1576_v5 }
 0x138   : > { %v1800_v18 = vpop.eup %1799  ;;  %v1271_v20 = vmul.f32 0.5, %v1239_v8  ;;  %v1237_v21 = vadd.f32 1.0, %v1798_v15  ;;  %v1178_v4 = vsel %vm1168_vm2, %v1106_v59, %v1140_v10  ;;  %v1071_v22 = vmul.f32 %v2052_v58, %v976_v14 }
 0x139   : > { %v1802_v23 = vpop.eup %1801  ;;  %v1240_v24 = vadd.f32 1.0, %v1800_v18  ;;  %1809 = vtanh.f32 %v1178_v4  ;;  %v1072_v0 = vmul.f32 %v2052_v58, %v981_v16  ;;  %v1109_v12 = vadd.f32 %v2057_v62, %v1070_v6  ;;  %v1577_v26 = vpop.f32.mrb[32].mxu0 }
 0x13a   : > { %v2145_v27 = vpop.f32.mrb[32].mxu1  ;;  %v1303_v28 = vsel %vm1168_vm2, %v1796_v1, %v1271_v20  ;;  %v1269_v29 = vmul.f32 0.5, %v1237_v21  ;;  %v1238_v32 = vadd.f32 1.0, %v1802_v23  ;;  %v1073_v33 = vmul.f32 %v2052_v58, %v984_v17  ;;  %v1578_v34 = vpop.f32.mrb[33].mxu0 }
 0x13b   : > { %v988_v35 = vpop.f32.mrb[33].mxu1  ;;  %1336 = vst.msk [vmem:[%s2111_s23 + $0x30] sm:$0xff] %vm1329_vm3, %v1303_v28  ;;  %v1272_v38 = vmul.f32 0.5, %v1240_v24  ;;  %v1111_v39 = vadd.f32 %v2057_v62, %v1072_v0  ;;  %v1143_v40 = vmul.f32 0.5, %v1109_v12  ;;  %v1110_v41 = vadd.f32 %v2057_v62, %v1071_v22  ;;  %v1580_v42 = vpop.f32.mrb[34].mxu0 }
 0x13c   : > { %v1666_v43 = vpop.f32.mrb[34].mxu1  ;;  %v1301_v44 = vsel %vm1168_vm2, %v1798_v15, %v1269_v29  ;;  %v1270_v46 = vmul.f32 0.5, %v1238_v32  ;;  %v1112_v47 = vadd.f32 %v2057_v62, %v1073_v33  ;;  %v1579_v48 = vadd.f32 %v1578_v34, %v1577_v26  ;;  %v1581_v49 = vpop.f32.mrb[35].mxu0 }
 0x13d   : > { %v991_v50 = vpop.f32.mrb[35].mxu1  ;;  %v1804_v53 = vpop.eup %1803  ;;  %1334 = vst.msk [vmem:[%s2111_s23 + $0x20] sm:$0xff] %vm1329_vm3, %v1301_v44  ;;  %v1304_v11 = vsel %vm1168_vm2, %v1800_v18, %v1272_v38  ;;  %v1145_v54 = vmul.f32 0.5, %v1111_v39  ;;  %v1181_v30 = vsel %vm1168_vm2, %v1109_v12, %v1143_v40  ;;  %v1144_v55 = vmul.f32 0.5, %v1110_v41 }
 0x13e   : > { %v1806_v56 = vpop.eup %1805  ;;  %1337 = vst.msk [vmem:[%s2111_s23 + $0x38] sm:$0xff] %vm1329_vm3, %v1304_v11  ;;  %v1302_v57 = vsel %vm1168_vm2, %v1802_v23, %v1270_v46  ;;  %v1243_v51 = vadd.f32 1.0, %v1804_v53  ;;  %1811 = vtanh.f32 %v1181_v30  ;;  %v1146_v59 = vmul.f32 0.5, %v1112_v47 }
 0x13f   : > { %1335 = vst.msk [vmem:[%s2111_s23 + $0x28] sm:$0xff] %vm1329_vm3, %v1302_v57  ;;  %v1241_v60 = vadd.f32 1.0, %v1806_v56  ;;  %v1183_v61 = vsel %vm1168_vm2, %v1111_v39, %v1145_v54  ;;  %v1182_v1 = vsel %vm1168_vm2, %v1110_v41, %v1144_v55  ;;  %v989_v36 = vadd.f32 %v1579_v48, %v988_v35 }
 0x140   : > { %v1275_v2 = vmul.f32 0.5, %v1243_v51  ;;  %1813 = vtanh.f32 %v1183_v61  ;;  %v1184_v3 = vsel %vm1168_vm2, %v1112_v47, %v1146_v59  ;;  %v1582_v5 = vadd.f32 %v1581_v49, %v1580_v42 }
 0x141   : > { %v1808_v8 = vpop.eup %1807  ;;  %v1273_v9 = vmul.f32 0.5, %v1241_v60  ;;  %1815 = vtanh.f32 %v1184_v3  ;;  %v1074_v10 = vmul.f32 %v2052_v58, %v989_v36  ;;  %v1583_v14 = vpop.f32.mrb[36].mxu0 }
 0x142   : > { %v2176_v15 = vpop.f32.mrb[36].mxu1  ;;  %v1307_v16 = vsel %vm1168_vm2, %v1804_v53, %v1275_v2  ;;  %v1244_v6 = vadd.f32 1.0, %v1808_v8  ;;  %1817 = vtanh.f32 %v1182_v1  ;;  %v992_v17 = vadd.f32 %v1582_v5, %v991_v50  ;;  %v1584_v18 = vpop.f32.mrb[37].mxu0 }
 0x143   : > { %v2180_v20 = vpop.f32.mrb[37].mxu1  ;;  %v1810_v21 = vpop.eup %1809  ;;  %1340 = vst.msk [vmem:[%s2111_s23 + $0x50] sm:$0xff] %vm1329_vm3, %v1307_v16  ;;  %v1305_v4 = vsel %vm1168_vm2, %v1806_v56, %v1273_v9  ;;  %v1113_v22 = vadd.f32 %v2057_v62, %v1074_v10  ;;  %v1585_v23 = vadd.f32 %v1584_v18, %v1583_v14 }
 0x144   : > { %v1586_v24 = vpop.f32.mrb[38].mxu0  ;;  %v2187_v0 = vpop.f32.mrb[38].mxu1  ;;  %1338 = vst.msk [vmem:[%s2111_s23 + $0x40] sm:$0xff] %vm1329_vm3, %v1305_v4  ;;  %v1276_v12 = vmul.f32 0.5, %v1244_v6  ;;  %v1242_v26 = vadd.f32 1.0, %v1810_v21  ;;  %v1075_v28 = vmul.f32 %v2052_v58, %v992_v17 }
 0x145   : > { %v1587_v29 = vpop.f32.mrb[39].mxu0  ;;  %v2192_v32 = vpop.f32.mrb[39].mxu1  ;;  %v1147_v33 = vmul.f32 0.5, %v1113_v22  ;;  %v997_v34 = vadd.f32 %v2145_v27, %v1585_v23 }
 0x146   : > { %v1588_v35 = vadd.f32 %v1587_v29, %v1586_v24  ;;  %v1308_v38 = vsel %vm1168_vm2, %v1808_v8, %v1276_v12  ;;  %v1274_v39 = vmul.f32 0.5, %v1242_v26  ;;  %v1114_v40 = vadd.f32 %v2057_v62, %v1075_v28 }
 0x147   : > { %1341 = vst.msk [vmem:[%s2111_s23 + $0x58] sm:$0xff] %vm1329_vm3, %v1308_v38  ;;  %v1185_v41 = vsel %vm1168_vm2, %v1113_v22, %v1147_v33  ;;  %v1076_v42 = vmul.f32 %v2052_v58, %v997_v34 }
 0x148   : > { %v1000_v44 = vadd.f32 %v1666_v43, %v1588_v35  ;;  %v1812_v46 = vpop.eup %1811  ;;  %v1306_v47 = vsel %vm1168_vm2, %v1810_v21, %v1274_v39  ;;  %1819 = vtanh.f32 %v1185_v41  ;;  %v1148_v27 = vmul.f32 0.5, %v1114_v40 }
 0x149   : > { %1339 = vst.msk [vmem:[%s2111_s23 + $0x48] sm:$0xff] %vm1329_vm3, %v1306_v47  ;;  %v1245_v48 = vadd.f32 1.0, %v1812_v46  ;;  %v1115_v49 = vadd.f32 %v2057_v62, %v1076_v42  ;;  %v1589_v53 = vpop.f32.mrb[40].mxu0  ;;  %v1673_v11 = vpop.f32.mrb[40].mxu1 }
 0x14a   : > { %v1077_v50 = vmul.f32 %v2052_v58, %v1000_v44  ;;  %v1814_v54 = vpop.eup %1813  ;;  %v1186_v30 = vsel %vm1168_vm2, %v1114_v40, %v1148_v27  ;;  %v1029_v43 = vadd.f32 %v1673_v11, %v2030_v19  ;;  %v1590_v55 = vpop.f32.mrb[41].mxu0 }
 0x14b   : > { %v1020_v56 = vpop.f32.mrb[41].mxu1  ;;  %v1816_v57 = vpop.eup %1815  ;;  %v1247_v51 = vadd.f32 1.0, %v1814_v54  ;;  %v1277_v59 = vmul.f32 0.5, %v1245_v48  ;;  %1821 = vtanh.f32 %v1186_v30  ;;  %v1149_v60 = vmul.f32 0.5, %v1115_v49 }
 0x14c   : > { %v1592_v61 = vpop.f32.mrb[42].mxu0  ;;  %v1674_v1 = vpop.f32.mrb[42].mxu1  ;;  %v1248_v2 = vadd.f32 1.0, %v1816_v57  ;;  %v1116_v3 = vadd.f32 %v2057_v62, %v1077_v50  ;;  %v1084_v5 = vmul.f32 %v2052_v58, %v1029_v43  ;;  %v1591_v8 = vadd.f32 %v1590_v55, %v1589_v53 }
 0x14d   : > { %v1818_v36 = vpop.eup %1817  ;;  %v1593_v9 = vpop.f32.mrb[43].mxu0  ;;  %v1279_v10 = vmul.f32 0.5, %v1247_v51  ;;  %v1309_v14 = vsel %vm1168_vm2, %v1812_v46, %v1277_v59  ;;  %v1187_v6 = vsel %vm1168_vm2, %v1115_v49, %v1149_v60  ;;  %v1021_v24 = vadd.f32 %v2024_v7, %v1020_v56 }
 0x14e   : > { %v1023_v19 = vpop.f32.mrb[43].mxu1  ;;  %v1246_v16 = vadd.f32 1.0, %v1818_v36  ;;  %1342 = vst.msk [vmem:[%s2111_s23 + $0x60] sm:$0xff] %vm1329_vm3, %v1309_v14  ;;  %v1280_v17 = vmul.f32 0.5, %v1248_v2  ;;  %1823 = vtanh.f32 %v1187_v6  ;;  %v1150_v18 = vmul.f32 0.5, %v1116_v3 }
 0x14f   : > { %v1123_v21 = vadd.f32 %v2057_v62, %v1084_v5  ;;  %v1311_v4 = vsel %vm1168_vm2, %v1814_v54, %v1279_v10  ;;  %v1005_v23 = vadd.f32 %v1591_v8, %v2180_v20  ;;  %v1032_v29 = vadd.f32 %v1674_v1, %v2032_v25 }
 0x150   : > { %v1278_v22 = vmul.f32 0.5, %v1246_v16  ;;  %1344 = vst.msk [vmem:[%s2111_s23 + $0x70] sm:$0xff] %vm1329_vm3, %v1311_v4  ;;  %v1312_v12 = vsel %vm1168_vm2, %v1816_v57, %v1280_v17  ;;  %v1188_v26 = vsel %vm1168_vm2, %v1116_v3, %v1150_v18  ;;  %v1082_v7 = vmul.f32 %v2052_v58, %v1021_v24 }
 0x151   : > { %v1157_v28 = vmul.f32 0.5, %v1123_v21  ;;  %1345 = vst.msk [vmem:[%s2111_s23 + $0x78] sm:$0xff] %vm1329_vm3, %v1312_v12  ;;  %1825 = vtanh.f32 %v1188_v26  ;;  %v1078_v20 = vmul.f32 %v2052_v58, %v1005_v23  ;;  %v1595_v34 = vpop.f32.mrb[44].mxu0  ;;  %v1677_v35 = vpop.f32.mrb[44].mxu1  ;;  %v1085_v25 = vmul.f32 %v2052_v58, %v1032_v29 }
 0x152   : > { %v1310_v33 = vsel %vm1168_vm2, %v1818_v36, %v1278_v22  ;;  %v1820_v38 = vpop.eup %1819  ;;  %v1594_v40 = vadd.f32 %v1593_v9, %v1592_v61  ;;  %v1024_v41 = vadd.f32 %v2028_v13, %v1023_v19  ;;  %v1596_v42 = vpop.f32.mrb[45].mxu0  ;;  %v1121_v27 = vadd.f32 %v2057_v62, %v1082_v7 }
 0x153   : > { %1343 = vst.msk [vmem:[%s2111_s23 + $0x68] sm:$0xff] %vm1329_vm3, %v1310_v33  ;;  %v1195_v39 = vsel %vm1168_vm2, %v1123_v21, %v1157_v28  ;;  %v1036_v44 = vpop.f32.mrb[45].mxu1  ;;  %v1249_v46 = vadd.f32 1.0, %v1820_v38  ;;  %v1117_v47 = vadd.f32 %v2057_v62, %v1078_v20  ;;  %v1598_v48 = vpop.f32.mrb[46].mxu0  ;;  %v1124_v50 = vadd.f32 %v2057_v62, %v1085_v25 }
 0x154   : > { %1827 = vtanh.f32 %v1195_v39  ;;  %v1678_v49 = vpop.f32.mrb[46].mxu1  ;;  %v1008_v53 = vadd.f32 %v1594_v40, %v2192_v32  ;;  %v1083_v11 = vmul.f32 %v2052_v58, %v1024_v41  ;;  %v1045_v54 = vadd.f32 %v1677_v35, %v2045_v45  ;;  %v1599_v30 = vpop.f32.mrb[47].mxu0 }
 0x155   : > { %v1039_v13 = vpop.f32.mrb[47].mxu1  ;;  %v1822_v43 = vpop.eup %1821  ;;  %v1281_v55 = vmul.f32 0.5, %v1249_v46  ;;  %v1151_v56 = vmul.f32 0.5, %v1117_v47  ;;  %v1155_v57 = vmul.f32 0.5, %v1121_v27  ;;  %v1597_v51 = vadd.f32 %v1596_v42, %v1595_v34 }
 0x156   : > { %v1250_v59 = vadd.f32 1.0, %v1822_v43  ;;  %v1158_v60 = vmul.f32 0.5, %v1124_v50  ;;  %v1079_v61 = vmul.f32 %v2052_v58, %v1008_v53  ;;  %v1122_v1 = vadd.f32 %v2057_v62, %v1083_v11 }
 0x157   : > { %v1313_v32 = vsel %vm1168_vm2, %v1820_v38, %v1281_v55  ;;  %v1189_v45 = vsel %vm1168_vm2, %v1117_v47, %v1151_v56  ;;  %v1193_v36 = vsel %vm1168_vm2, %v1121_v27, %v1155_v57  ;;  %v1088_v2 = vmul.f32 %v2052_v58, %v1045_v54 }
 0x158   : > { %v1824_v3 = vpop.eup %1823  ;;  %1346 = vst.msk [vmem:[%s2111_s23 + $0x80] sm:$0xff] %vm1329_vm3, %v1313_v32  ;;  %v1282_v5 = vmul.f32 0.5, %v1250_v59  ;;  %1829 = vtanh.f32 %v1189_v45  ;;  %v1196_v8 = vsel %vm1168_vm2, %v1124_v50, %v1158_v60  ;;  %v1118_v9 = vadd.f32 %v2057_v62, %v1079_v61 }
 0x159   : > { %v1251_v19 = vadd.f32 1.0, %v1824_v3  ;;  %1831 = vtanh.f32 %v1193_v36  ;;  %v1156_v10 = vmul.f32 0.5, %v1122_v1  ;;  %v1127_v14 = vadd.f32 %v2057_v62, %v1088_v2 }
 0x15a   : > { %v1314_v16 = vsel %vm1168_vm2, %v1822_v43, %v1282_v5  ;;  %1833 = vtanh.f32 %v1196_v8  ;;  %v1152_v6 = vmul.f32 0.5, %v1118_v9  ;;  %v1013_v17 = vadd.f32 %v2176_v15, %v1597_v51 }
 0x15b   : > { %v1826_v18 = vpop.eup %1825  ;;  %1347 = vst.msk [vmem:[%s2111_s23 + $0x88] sm:$0xff] %vm1329_vm3, %v1314_v16  ;;  %v1283_v21 = vmul.f32 0.5, %v1251_v19  ;;  %v1194_v4 = vsel %vm1168_vm2, %v1122_v1, %v1156_v10  ;;  %v1161_v22 = vmul.f32 0.5, %v1127_v14  ;;  %v1037_v23 = vadd.f32 %v2036_v31, %v1036_v44 }
 0x15c   : > { %v1252_v24 = vadd.f32 1.0, %v1826_v18  ;;  %v1190_v12 = vsel %vm1168_vm2, %v1118_v9, %v1152_v6  ;;  %1835 = vtanh.f32 %v1194_v4  ;;  %v1080_v26 = vmul.f32 %v2052_v58, %v1013_v17 }
 0x15d   : > { %v1315_v15 = vsel %vm1168_vm2, %v1824_v3, %v1283_v21  ;;  %1837 = vtanh.f32 %v1190_v12  ;;  %v1199_v29 = vsel %vm1168_vm2, %v1127_v14, %v1161_v22  ;;  %v1086_v33 = vmul.f32 %v2052_v58, %v1037_v23 }
 0x15e   : > { %v1828_v28 = vpop.eup %1827  ;;  %1348 = vst.msk [vmem:[%s2111_s23 + $0x90] sm:$0xff] %vm1329_vm3, %v1315_v15  ;;  %v1284_v31 = vmul.f32 0.5, %v1252_v24  ;;  %1839 = vtanh.f32 %v1199_v29  ;;  %v1119_v7 = vadd.f32 %v2057_v62, %v1080_v26  ;;  %v1048_v35 = vadd.f32 %v1678_v49, %v2047_v52 }
 0x15f   : > { %v1259_v20 = vadd.f32 1.0, %v1828_v28  ;;  %v1125_v34 = vadd.f32 %v2057_v62, %v1086_v33  ;;  %v1600_v38 = vadd.f32 %v1599_v30, %v1598_v48  ;;  %v1040_v39 = vadd.f32 %v2040_v37, %v1039_v13 }
 0x160   : > { %v1316_v25 = vsel %vm1168_vm2, %v1826_v18, %v1284_v31  ;;  %v1153_v41 = vmul.f32 0.5, %v1119_v7  ;;  %v1089_v44 = vmul.f32 %v2052_v58, %v1048_v35 }
 0x161   : > { %v1291_v40 = vmul.f32 0.5, %v1259_v20  ;;  %1349 = vst.msk [vmem:[%s2111_s23 + $0x98] sm:$0xff] %vm1329_vm3, %v1316_v25  ;;  %v1159_v42 = vmul.f32 0.5, %v1125_v34  ;;  %v1016_v46 = vadd.f32 %v2187_v0, %v1600_v38  ;;  %v1087_v47 = vmul.f32 %v2052_v58, %v1040_v39 }
 0x162   : > { %v1830_v27 = vpop.eup %1829  ;;  %v1191_v37 = vsel %vm1168_vm2, %v1119_v7, %v1153_v41  ;;  %v1128_v53 = vadd.f32 %v2057_v62, %v1089_v44 }
 0x163   : > { %v1323_v52 = vsel %vm1168_vm2, %v1828_v28, %v1291_v40  ;;  %v1832_v48 = vpop.eup %1831  ;;  %v1253_v49 = vadd.f32 1.0, %v1830_v27  ;;  %1841 = vtanh.f32 %v1191_v37  ;;  %v1197_v50 = vsel %vm1168_vm2, %v1125_v34, %v1159_v42 }
 0x164   : > { %1356 = vst.msk [vmem:[%s2111_s23 + $0xd0] sm:$0xff] %vm1329_vm3, %v1323_v52  ;;  %v1834_v0 = vpop.eup %1833  ;;  %v1257_v11 = vadd.f32 1.0, %v1832_v48  ;;  %1843 = vtanh.f32 %v1197_v50  ;;  %v1081_v54 = vmul.f32 %v2052_v58, %v1016_v46  ;;  %v1126_v30 = vadd.f32 %v2057_v62, %v1087_v47 }
 0x165   : > { %v1285_v13 = vmul.f32 0.5, %v1253_v49  ;;  %v1260_v43 = vadd.f32 1.0, %v1834_v0  ;;  %v1162_v55 = vmul.f32 0.5, %v1128_v53 }
 0x166   : > { %v1836_v56 = vpop.eup %1835  ;;  %v1289_v57 = vmul.f32 0.5, %v1257_v11  ;;  %v1120_v51 = vadd.f32 %v2057_v62, %v1081_v54  ;;  %v1160_v59 = vmul.f32 0.5, %v1126_v30 }
 0x167   : > { %v1838_v60 = vpop.eup %1837  ;;  %v1317_v61 = vsel %vm1168_vm2, %v1830_v27, %v1285_v13  ;;  %v1292_v1 = vmul.f32 0.5, %v1260_v43  ;;  %v1258_v32 = vadd.f32 1.0, %v1836_v56  ;;  %v1200_v58 = vsel %vm1168_vm2, %v1128_v53, %v1162_v55 }
 0x168   : > { %v1840_v45 = vpop.eup %1839  ;;  %1350 = vst.msk [vmem:[%s2111_s23 + $0xa0] sm:$0xff] %vm1329_vm3, %v1317_v61  ;;  %v1321_v36 = vsel %vm1168_vm2, %v1832_v48, %v1289_v57  ;;  %v1254_v2 = vadd.f32 1.0, %v1838_v60  ;;  %1845 = vtanh.f32 %v1200_v58  ;;  %v1154_v62 = vmul.f32 0.5, %v1120_v51 }
 0x169   : > { %1354 = vst.msk [vmem:[%s2111_s23 + $0xc0] sm:$0xff] %vm1329_vm3, %v1321_v36  ;;  %v1324_v3 = vsel %vm1168_vm2, %v1834_v0, %v1292_v1  ;;  %v1290_v5 = vmul.f32 0.5, %v1258_v32  ;;  %v1263_v8 = vadd.f32 1.0, %v1840_v45  ;;  %v1198_v9 = vsel %vm1168_vm2, %v1126_v30, %v1160_v59 }
 0x16a   : > { %1357 = vst.msk [vmem:[%s2111_s23 + $0xd8] sm:$0xff] %vm1329_vm3, %v1324_v3  ;;  %v1286_v19 = vmul.f32 0.5, %v1254_v2  ;;  %v1192_v10 = vsel %vm1168_vm2, %v1120_v51, %v1154_v62  ;;  %1847 = vtanh.f32 %v1198_v9 }
 0x16b   : > { %v1322_v14 = vsel %vm1168_vm2, %v1836_v56, %v1290_v5  ;;  %v1295_v16 = vmul.f32 0.5, %v1263_v8  ;;  %1849 = vtanh.f32 %v1192_v10 }
 0x16c   : > { %v1318_v6 = vsel %vm1168_vm2, %v1838_v60, %v1286_v19  ;;  %1355 = vst.msk [vmem:[%s2111_s23 + $0xc8] sm:$0xff] %vm1329_vm3, %v1322_v14 }
 0x16d   : > { %v1842_v17 = vpop.eup %1841  ;;  %1351 = vst.msk [vmem:[%s2111_s23 + $0xa8] sm:$0xff] %vm1329_vm3, %v1318_v6  ;;  %v1327_v18 = vsel %vm1168_vm2, %v1840_v45, %v1295_v16 }
 0x16e   : > { %v1844_v21 = vpop.eup %1843  ;;  %1360 = vst.msk [vmem:[%s2111_s23 + $0xf0] sm:$0xff] %vm1329_vm3, %v1327_v18  ;;  %v1255_v4 = vadd.f32 1.0, %v1842_v17 }
 0x16f   : > { %v1261_v22 = vadd.f32 1.0, %v1844_v21 }
 0x170   : > { %v1287_v23 = vmul.f32 0.5, %v1255_v4 }
 0x171   : > { %v1293_v24 = vmul.f32 0.5, %v1261_v22 }
 0x172   : > { %v1846_v12 = vpop.eup %1845  ;;  %v1319_v26 = vsel %vm1168_vm2, %v1842_v17, %v1287_v23 }
 0x173   : > { %1352 = vst.msk [vmem:[%s2111_s23 + $0xb0] sm:$0xff] %vm1329_vm3, %v1319_v26  ;;  %v1325_v28 = vsel %vm1168_vm2, %v1844_v21, %v1293_v24  ;;  %v1264_v15 = vadd.f32 1.0, %v1846_v12 }
 0x174   : > { %v1848_v29 = vpop.eup %1847  ;;  %1358 = vst.msk [vmem:[%s2111_s23 + $0xe0] sm:$0xff] %vm1329_vm3, %v1325_v28 }
 0x175   : > { %v1850_v33 = vpop.eup %1849  ;;  %v1296_v31 = vmul.f32 0.5, %v1264_v15  ;;  %v1262_v20 = vadd.f32 1.0, %v1848_v29 }
 0x176   : > { %v1256_v7 = vadd.f32 1.0, %v1850_v33 }
 0x177   : > { %v1328_v34 = vsel %vm1168_vm2, %v1846_v12, %v1296_v31  ;;  %v1294_v35 = vmul.f32 0.5, %v1262_v20 }
 0x178   : > { %1361 = vst.msk [vmem:[%s2111_s23 + $0xf8] sm:$0xff] %vm1329_vm3, %v1328_v34  ;;  %v1288_v38 = vmul.f32 0.5, %v1256_v7 }
 0x179   : > { %v1326_v39 = vsel %vm1168_vm2, %v1848_v29, %v1294_v35 }
 0x17a   : > { %v1320_v25 = vsel %vm1168_vm2, %v1850_v33, %v1288_v38  ;;  %1359 = vst.msk [vmem:[%s2111_s23 + $0xe8] sm:$0xff] %vm1329_vm3, %v1326_v39 }
 0x17b   : > { %1353 = vst.msk [vmem:[%s2111_s23 + $0xb8] sm:$0xff] %vm1329_vm3, %v1320_v25 }
 0x17c PF: > { %s15_s18 = sadd.s32 1, %s1857_s18  }
 0x17d   : > { %p12_p4 = scmp.ge.s32.totalorder %s15_s18, 4  }
 0x17f   :  { %14 = sbr.rel (!%p12_p4) target bundleno = 1 (0x1), region = 70 }

</bundles_post_ra>
